<compile_context>
chip_gen: v7x
topology: tpu7x:2x2x1
jax: 0.10.0
libtpu: 0.0.40
codegen_flags: <defaults>
</compile_context>

<pallas_src>
import jax
import jax.numpy as jnp
import numpy as np
from jax.experimental import pallas as pl
from jax.experimental.pallas import tpu as pltpu

# torchvision VGG16 features cfg is [64,64,'M',128,128,'M',256,256,256,'M',
# 512,512,512,'M',512,512,512,'M']; scaled down /8 for a small runnable test.
VGG_CFG = (8, 8, 'M', 16, 16, 'M', 32, 32, 32, 'M', 64, 64, 64, 'M', 64, 64, 64, 'M')
HIDDEN = 128  # stands in for the 4096-wide fc6/fc7 layers


# ---------------- Pallas kernels ----------------

def _conv3x3_relu_kernel(p_ref, w_ref, b_ref, o_ref):
    # (TM, 9*Cin) @ (9*Cin, Cout) in bf16, f32 accumulate, f32 epilogue, cast to bf16.
    y = jnp.dot(p_ref[...], w_ref[...], preferred_element_type=jnp.float32)
    y = y + b_ref[...]
    o_ref[...] = jnp.maximum(y, 0.0).astype(o_ref.dtype)


def _maxpool2x2_kernel(x_ref, o_ref):
    # x_ref: (R, 2, Wo, 2*C); vertical max over the size-2 row axis, then horizontal max
    # over the two C-wide lane halves.
    x = x_ref[...]
    v = jnp.maximum(x[:, 0], x[:, 1])          # (R, Wo, 2*C)
    c = o_ref.shape[-1]
    o_ref[...] = jnp.maximum(v[:, :, :c], v[:, :, c:])


def _linear_relu_kernel(x_ref, w_ref, b_ref, o_ref):
    # x: (B, Din) bf16, w: (Dout, Din) bf16 (PyTorch layout, contracted on axis 1).
    y = jax.lax.dot_general(x_ref[...], w_ref[...],
                            dimension_numbers=(((1,), (1,)), ((), ())),
                            preferred_element_type=jnp.float32)
    o_ref[...] = jnp.maximum(y + b_ref[...], 0.0).astype(o_ref.dtype)


# ---------------- wrappers ----------------

def _pick_tile_m(m):
    for t in (512, 256, 128, 64, 32, 16, 8):
        if m % t == 0:
            return t
    return m


def conv3x3_relu(x, w, b):
    """x: (N,H,W,Cin); w: (3,3,Cin,Cout) f32; b: (Cout,) f32 -> (N,H,W,Cout) bf16.
    stride=1, pad=1 (PyTorch Conv2d cross-correlation semantics) + ReLU."""
    N, H, W, Cin = x.shape
    Cout = w.shape[-1]
    M = N * H * W
    K = 9 * Cin

    xp = jnp.pad(x, ((0, 0), (1, 1), (1, 1), (0, 0)))
    # Fused im2col: single (M, 9*Cin) matrix; tap order (kh, kw, ci) matches
    # w.reshape(9*Cin, Cout).
    patches = jnp.concatenate(
        [xp[:, kh:kh + H, kw:kw + W, :] for kh in range(3) for kw in range(3)],
        axis=-1).reshape(M, K).astype(jnp.bfloat16)
    wf = w.reshape(K, Cout).astype(jnp.bfloat16)
    bf = b.reshape(1, Cout).astype(jnp.float32)

    TM = _pick_tile_m(M)
    grid = (M // TM,)
    cost = pl.CostEstimate(
        flops=2 * M * K * Cout,
        transcendentals=0,
        bytes_accessed=M * K * 2 + K * Cout * 2 + M * Cout * 2 + Cout * 4)

    out = pl.pallas_call(
        _conv3x3_relu_kernel,
        out_shape=jax.ShapeDtypeStruct((M, Cout), jnp.bfloat16),
        grid=grid,
        in_specs=[pl.BlockSpec((TM, K), lambda i: (i, 0)),
                  pl.BlockSpec((K, Cout), lambda i: (0, 0)),
                  pl.BlockSpec((1, Cout), lambda i: (0, 0))],
        out_specs=pl.BlockSpec((TM, Cout), lambda i: (i, 0)),
        compiler_params=pltpu.CompilerParams(dimension_semantics=("parallel",)),
        cost_estimate=cost,
    )(patches, wf, bf)
    return out.reshape(N, H, W, Cout)


def maxpool2x2(x):
    """x: (N,H,W,C) -> (N,H//2,W//2,C), kernel=2, stride=2."""
    N, H, W, C = x.shape
    assert H % 2 == 0 and W % 2 == 0, "maxpool2x2 requires even spatial dims"
    Ho, Wo = H // 2, W // 2
    # Pure view of contiguous NHWC: (N*Ho, 2, Wo, 2*C); no strided HBM gathers.
    xr = x.reshape(N * Ho, 2, Wo, 2 * C)
    out = pl.pallas_call(
        _maxpool2x2_kernel,
        out_shape=jax.ShapeDtypeStruct((N * Ho, Wo, C), x.dtype),
    )(xr)
    return out.reshape(N, Ho, Wo, C)


def linear_relu(x, w, b):
    """x: (B, Din); w: (Dout, Din) (PyTorch Linear layout); b: (Dout,) -> (B, Dout) f32."""
    B, Din = x.shape
    Dout = w.shape[0]
    cost = pl.CostEstimate(
        flops=2 * B * Din * Dout,
        transcendentals=0,
        bytes_accessed=B * Din * 2 + Dout * Din * 2 + B * Dout * 4 + Dout * 4)
    return pl.pallas_call(
        _linear_relu_kernel,
        out_shape=jax.ShapeDtypeStruct((B, Dout), jnp.float32),
        cost_estimate=cost,
    )(x.astype(jnp.bfloat16), w.astype(jnp.bfloat16),
      b.reshape(1, Dout).astype(jnp.float32))


# ---------------- parameters & forward ----------------

def init_params(key, in_ch, flat_dim, hidden=HIDDEN):
    convs = []
    c = in_ch
    for v in VGG_CFG:
        if v == 'M':
            continue
        key, kw, kb = jax.random.split(key, 3)
        w = jax.random.normal(kw, (3, 3, c, v), jnp.float32) * np.sqrt(2.0 / (9 * c))
        bb = jax.random.normal(kb, (v,), jnp.float32) * 0.01
        convs.append((w, bb))
        c = v
    key, k1, k2, k3, k4 = jax.random.split(key, 5)
    fc1_w = jax.random.normal(k1, (hidden, flat_dim), jnp.float32) * np.sqrt(2.0 / flat_dim)
    fc1_b = jax.random.normal(k2, (hidden,), jnp.float32) * 0.01
    fc2_w = jax.random.normal(k3, (hidden, hidden), jnp.float32) * np.sqrt(2.0 / hidden)
    fc2_b = jax.random.normal(k4, (hidden,), jnp.float32) * 0.01
    return {"conv": convs, "fc": [(fc1_w, fc1_b), (fc2_w, fc2_b)]}


def vgg16_relu7(params, x_nchw):
    # PyTorch-style NCHW input -> NHWC for the TPU kernels; bf16 activations.
    x = jnp.transpose(x_nchw, (0, 2, 3, 1)).astype(jnp.bfloat16)
    ci = 0
    for v in VGG_CFG:
        if v == 'M':
            x = maxpool2x2(x)
        else:
            w, b = params["conv"][ci]
            ci += 1
            x = conv3x3_relu(x, w, b)          # Conv2d(3x3, pad=1) + ReLU(inplace)
    # x.view(x.size(0), -1) on NCHW  => flatten in (C, H, W) order
    n = x.shape[0]
    x = jnp.transpose(x, (0, 3, 1, 2)).reshape(n, -1)
    (w1, b1), (w2, b2) = params["fc"]
    x = linear_relu(x, w1, b1)                 # fc6 + relu6
    # classifier Dropout is identity in eval mode
    # TODO(synk): training-mode Dropout RNG masking not implemented (eval semantics only).
    x = linear_relu(x, w2, b2)                 # fc7 + relu7  (classifier[:-2] output)
    return x


if __name__ == "__main__":
    key = jax.random.PRNGKey(0)
    kx, kp = jax.random.split(key)
    N, Cin, H, W = 2, 3, 32, 32                # small NCHW input, like PyTorch
    x = jax.random.normal(kx, (N, Cin, H, W), jnp.float32)
    last_c = [v for v in VGG_CFG if v != 'M'][-1]
    flat_dim = last_c * (H // 32) * (W // 32)  # 5 maxpools -> spatial /32
    params = init_params(kp, Cin, flat_dim)

    out = jax.jit(vgg16_relu7)(params, x)
    out = jax.block_until_ready(out)
    assert out.shape == (N, HIDDEN), out.shape
    assert bool(jnp.all(jnp.isfinite(out)))
    print("KERNEL_OK")
</pallas_src>

<mosaic_0001>
module attributes {stable_mosaic.version = 11 : i64} {
  func.func @_conv3x3_relu_kernel(%arg0: i32, %arg1: memref<512x27xbf16, #tpu.memory_space<vmem>>, %arg2: memref<27x8xbf16, #tpu.memory_space<vmem>>, %arg3: memref<1x8xf32, #tpu.memory_space<vmem>>, %arg4: memref<512x8xbf16, #tpu.memory_space<vmem>>) attributes {dimension_semantics = [#tpu.dimension_semantics<parallel>], iteration_bounds = array<i64: 4>, scalar_prefetch = 0 : i64, scratch_operands = 0 : i64, tpu.core_type = #tpu.core_type<tc>, window_params = [{transform_indices = @transform_0, window_bounds = array<i64: 512, 27>}, {pipeline_mode = #tpu.pipeline_mode<synchronous>, transform_indices = @transform_1, window_bounds = array<i64: 27, 8>}, {pipeline_mode = #tpu.pipeline_mode<synchronous>, transform_indices = @transform_2, window_bounds = array<i64: 1, 8>}, {transform_indices = @transform_3, window_bounds = array<i64: 512, 8>}]} {
    %c0 = arith.constant 0 : index
    %c0_0 = arith.constant 0 : index
    %0 = vector.load %arg1[%c0, %c0_0] : memref<512x27xbf16, #tpu.memory_space<vmem>>, vector<512x27xbf16>
    %c0_1 = arith.constant 0 : index
    %c0_2 = arith.constant 0 : index
    %1 = vector.load %arg2[%c0_1, %c0_2] : memref<27x8xbf16, #tpu.memory_space<vmem>>, vector<27x8xbf16>
    %cst = arith.constant dense<0.000000e+00> : vector<512x8xf32>
    %2 = tpu.matmul %0, %1, %cst {dimension_numbers = #tpu.dot_dimension_numbers<[1], [0], [0], [1], [0, 0, 1, 1], [], []>} : vector<512x27xbf16>, vector<27x8xbf16>, vector<512x8xf32> -> vector<512x8xf32>
    %c0_3 = arith.constant 0 : index
    %c0_4 = arith.constant 0 : index
    %3 = vector.load %arg3[%c0_3, %c0_4] : memref<1x8xf32, #tpu.memory_space<vmem>>, vector<1x8xf32>
    %4 = vector.broadcast %3 : vector<1x8xf32> to vector<512x8xf32>
    %5 = arith.addf %2, %4 : vector<512x8xf32>
    %cst_5 = arith.constant 0.000000e+00 : f32
    %6 = vector.broadcast %cst_5 : f32 to vector<512x8xf32>
    %7 = arith.maximumf %5, %6 : vector<512x8xf32>
    %8 = arith.truncf %7 : vector<512x8xf32> to vector<512x8xbf16>
    %c0_6 = arith.constant 0 : index
    %c0_7 = arith.constant 0 : index
    %9 = vector.load %arg4[%c0_6, %c0_7] : memref<512x8xbf16, #tpu.memory_space<vmem>>, vector<512x8xbf16>
    tpu.vector_store %arg4[%c0_6, %c0_7], %8 {strides = array<i32>} : memref<512x8xbf16, #tpu.memory_space<vmem>>, vector<512x8xbf16>,
    return
  }
  func.func @transform_0(%arg0: i32) -> (i32, i32) {
    %c0_i32 = arith.constant 0 : i32
    %c0_i32_0 = arith.constant 0 : i32
    return %arg0, %c0_i32 : i32, i32
  }
  func.func @transform_1(%arg0: i32) -> (i32, i32) {
    %c0_i32 = arith.constant 0 : i32
    %c0_i32_0 = arith.constant 0 : i32
    %c0_i32_1 = arith.constant 0 : i32
    return %c0_i32, %c0_i32_0 : i32, i32
  }
  func.func @transform_2(%arg0: i32) -> (i32, i32) {
    %c0_i32 = arith.constant 0 : i32
    %c0_i32_0 = arith.constant 0 : i32
    %c0_i32_1 = arith.constant 0 : i32
    return %c0_i32, %c0_i32_0 : i32, i32
  }
  func.func @transform_3(%arg0: i32) -> (i32, i32) {
    %c0_i32 = arith.constant 0 : i32
    %c0_i32_0 = arith.constant 0 : i32
    return %arg0, %c0_i32 : i32, i32
  }
}

module attributes {stable_mosaic.version = 11 : i64} {
  func.func @_conv3x3_relu_kernel(%arg0: i32, %arg1: memref<512x72xbf16, #tpu.memory_space<vmem>>, %arg2: memref<72x8xbf16, #tpu.memory_space<vmem>>, %arg3: memref<1x8xf32, #tpu.memory_space<vmem>>, %arg4: memref<512x8xbf16, #tpu.memory_space<vmem>>) attributes {dimension_semantics = [#tpu.dimension_semantics<parallel>], iteration_bounds = array<i64: 4>, scalar_prefetch = 0 : i64, scratch_operands = 0 : i64, tpu.core_type = #tpu.core_type<tc>, window_params = [{transform_indices = @transform_0, window_bounds = array<i64: 512, 72>}, {pipeline_mode = #tpu.pipeline_mode<synchronous>, transform_indices = @transform_1, window_bounds = array<i64: 72, 8>}, {pipeline_mode = #tpu.pipeline_mode<synchronous>, transform_indices = @transform_2, window_bounds = array<i64: 1, 8>}, {transform_indices = @transform_3, window_bounds = array<i64: 512, 8>}]} {
    %c0 = arith.constant 0 : index
    %c0_0 = arith.constant 0 : index
    %0 = vector.load %arg1[%c0, %c0_0] : memref<512x72xbf16, #tpu.memory_space<vmem>>, vector<512x72xbf16>
    %c0_1 = arith.constant 0 : index
    %c0_2 = arith.constant 0 : index
    %1 = vector.load %arg2[%c0_1, %c0_2] : memref<72x8xbf16, #tpu.memory_space<vmem>>, vector<72x8xbf16>
    %cst = arith.constant dense<0.000000e+00> : vector<512x8xf32>
    %2 = tpu.matmul %0, %1, %cst {dimension_numbers = #tpu.dot_dimension_numbers<[1], [0], [0], [1], [0, 0, 1, 1], [], []>} : vector<512x72xbf16>, vector<72x8xbf16>, vector<512x8xf32> -> vector<512x8xf32>
    %c0_3 = arith.constant 0 : index
    %c0_4 = arith.constant 0 : index
    %3 = vector.load %arg3[%c0_3, %c0_4] : memref<1x8xf32, #tpu.memory_space<vmem>>, vector<1x8xf32>
    %4 = vector.broadcast %3 : vector<1x8xf32> to vector<512x8xf32>
    %5 = arith.addf %2, %4 : vector<512x8xf32>
    %cst_5 = arith.constant 0.000000e+00 : f32
    %6 = vector.broadcast %cst_5 : f32 to vector<512x8xf32>
    %7 = arith.maximumf %5, %6 : vector<512x8xf32>
    %8 = arith.truncf %7 : vector<512x8xf32> to vector<512x8xbf16>
    %c0_6 = arith.constant 0 : index
    %c0_7 = arith.constant 0 : index
    %9 = vector.load %arg4[%c0_6, %c0_7] : memref<512x8xbf16, #tpu.memory_space<vmem>>, vector<512x8xbf16>
    tpu.vector_store %arg4[%c0_6, %c0_7], %8 {strides = array<i32>} : memref<512x8xbf16, #tpu.memory_space<vmem>>, vector<512x8xbf16>,
    return
  }
  func.func @transform_0(%arg0: i32) -> (i32, i32) {
    %c0_i32 = arith.constant 0 : i32
    %c0_i32_0 = arith.constant 0 : i32
    return %arg0, %c0_i32 : i32, i32
  }
  func.func @transform_1(%arg0: i32) -> (i32, i32) {
    %c0_i32 = arith.constant 0 : i32
    %c0_i32_0 = arith.constant 0 : i32
    %c0_i32_1 = arith.constant 0 : i32
    return %c0_i32, %c0_i32_0 : i32, i32
  }
  func.func @transform_2(%arg0: i32) -> (i32, i32) {
    %c0_i32 = arith.constant 0 : i32
    %c0_i32_0 = arith.constant 0 : i32
    %c0_i32_1 = arith.constant 0 : i32
    return %c0_i32, %c0_i32_0 : i32, i32
  }
  func.func @transform_3(%arg0: i32) -> (i32, i32) {
    %c0_i32 = arith.constant 0 : i32
    %c0_i32_0 = arith.constant 0 : i32
    return %arg0, %c0_i32 : i32, i32
  }
}

module attributes {stable_mosaic.version = 11 : i64} {
  func.func @_maxpool2x2_kernel(%arg0: memref<32x2x16x16xbf16, #tpu.memory_space<vmem>>, %arg1: memref<32x16x8xbf16, #tpu.memory_space<vmem>>) attributes {dimension_semantics = [], scalar_prefetch = 0 : i64, scratch_operands = 0 : i64, tpu.core_type = #tpu.core_type<tc>} {
    %c0 = arith.constant 0 : index
    %c0_0 = arith.constant 0 : index
    %c0_1 = arith.constant 0 : index
    %c0_2 = arith.constant 0 : index
    %0 = vector.load %arg0[%c0, %c0_0, %c0_1, %c0_2] : memref<32x2x16x16xbf16, #tpu.memory_space<vmem>>, vector<32x2x16x16xbf16>
    %1 = vector.extract_strided_slice %0 {offsets = [0, 0, 0, 0], sizes = [32, 1, 16, 16], strides = [1, 1, 1, 1]} : vector<32x2x16x16xbf16> to vector<32x1x16x16xbf16>
    %2 = vector.shape_cast %1 : vector<32x1x16x16xbf16> to vector<32x16x16xbf16>
    %3 = vector.extract_strided_slice %0 {offsets = [0, 1, 0, 0], sizes = [32, 1, 16, 16], strides = [1, 1, 1, 1]} : vector<32x2x16x16xbf16> to vector<32x1x16x16xbf16>
    %4 = vector.shape_cast %3 : vector<32x1x16x16xbf16> to vector<32x16x16xbf16>
    %5 = arith.maximumf %2, %4 : vector<32x16x16xbf16>
    %6 = vector.extract_strided_slice %5 {offsets = [0, 0, 0], sizes = [32, 16, 8], strides = [1, 1, 1]} : vector<32x16x16xbf16> to vector<32x16x8xbf16>
    %7 = vector.extract_strided_slice %5 {offsets = [0, 0, 8], sizes = [32, 16, 8], strides = [1, 1, 1]} : vector<32x16x16xbf16> to vector<32x16x8xbf16>
    %8 = arith.maximumf %6, %7 : vector<32x16x8xbf16>
    %c0_3 = arith.constant 0 : index
    %c0_4 = arith.constant 0 : index
    %c0_5 = arith.constant 0 : index
    %9 = vector.load %arg1[%c0_3, %c0_4, %c0_5] : memref<32x16x8xbf16, #tpu.memory_space<vmem>>, vector<32x16x8xbf16>
    tpu.vector_store %arg1[%c0_3, %c0_4, %c0_5], %8 {strides = array<i32>} : memref<32x16x8xbf16, #tpu.memory_space<vmem>>, vector<32x16x8xbf16>,
    return
  }
}

module attributes {stable_mosaic.version = 11 : i64} {
  func.func @_conv3x3_relu_kernel(%arg0: i32, %arg1: memref<512x72xbf16, #tpu.memory_space<vmem>>, %arg2: memref<72x16xbf16, #tpu.memory_space<vmem>>, %arg3: memref<1x16xf32, #tpu.memory_space<vmem>>, %arg4: memref<512x16xbf16, #tpu.memory_space<vmem>>) attributes {dimension_semantics = [#tpu.dimension_semantics<parallel>], iteration_bounds = array<i64: 1>, scalar_prefetch = 0 : i64, scratch_operands = 0 : i64, tpu.core_type = #tpu.core_type<tc>, window_params = [{transform_indices = @transform_0, window_bounds = array<i64: 512, 72>}, {pipeline_mode = #tpu.pipeline_mode<synchronous>, transform_indices = @transform_1, window_bounds = array<i64: 72, 16>}, {pipeline_mode = #tpu.pipeline_mode<synchronous>, transform_indices = @transform_2, window_bounds = array<i64: 1, 16>}, {transform_indices = @transform_3, window_bounds = array<i64: 512, 16>}]} {
    %c0 = arith.constant 0 : index
    %c0_0 = arith.constant 0 : index
    %0 = vector.load %arg1[%c0, %c0_0] : memref<512x72xbf16, #tpu.memory_space<vmem>>, vector<512x72xbf16>
    %c0_1 = arith.constant 0 : index
    %c0_2 = arith.constant 0 : index
    %1 = vector.load %arg2[%c0_1, %c0_2] : memref<72x16xbf16, #tpu.memory_space<vmem>>, vector<72x16xbf16>
    %cst = arith.constant dense<0.000000e+00> : vector<512x16xf32>
    %2 = tpu.matmul %0, %1, %cst {dimension_numbers = #tpu.dot_dimension_numbers<[1], [0], [0], [1], [0, 0, 1, 1], [], []>} : vector<512x72xbf16>, vector<72x16xbf16>, vector<512x16xf32> -> vector<512x16xf32>
    %c0_3 = arith.constant 0 : index
    %c0_4 = arith.constant 0 : index
    %3 = vector.load %arg3[%c0_3, %c0_4] : memref<1x16xf32, #tpu.memory_space<vmem>>, vector<1x16xf32>
    %4 = vector.broadcast %3 : vector<1x16xf32> to vector<512x16xf32>
    %5 = arith.addf %2, %4 : vector<512x16xf32>
    %cst_5 = arith.constant 0.000000e+00 : f32
    %6 = vector.broadcast %cst_5 : f32 to vector<512x16xf32>
    %7 = arith.maximumf %5, %6 : vector<512x16xf32>
    %8 = arith.truncf %7 : vector<512x16xf32> to vector<512x16xbf16>
    %c0_6 = arith.constant 0 : index
    %c0_7 = arith.constant 0 : index
    %9 = vector.load %arg4[%c0_6, %c0_7] : memref<512x16xbf16, #tpu.memory_space<vmem>>, vector<512x16xbf16>
    tpu.vector_store %arg4[%c0_6, %c0_7], %8 {strides = array<i32>} : memref<512x16xbf16, #tpu.memory_space<vmem>>, vector<512x16xbf16>,
    return
  }
  func.func @transform_0(%arg0: i32) -> (i32, i32) {
    %c0_i32 = arith.constant 0 : i32
    %c0_i32_0 = arith.constant 0 : i32
    return %arg0, %c0_i32 : i32, i32
  }
  func.func @transform_1(%arg0: i32) -> (i32, i32) {
    %c0_i32 = arith.constant 0 : i32
    %c0_i32_0 = arith.constant 0 : i32
    %c0_i32_1 = arith.constant 0 : i32
    return %c0_i32, %c0_i32_0 : i32, i32
  }
  func.func @transform_2(%arg0: i32) -> (i32, i32) {
    %c0_i32 = arith.constant 0 : i32
    %c0_i32_0 = arith.constant 0 : i32
    %c0_i32_1 = arith.constant 0 : i32
    return %c0_i32, %c0_i32_0 : i32, i32
  }
  func.func @transform_3(%arg0: i32) -> (i32, i32) {
    %c0_i32 = arith.constant 0 : i32
    %c0_i32_0 = arith.constant 0 : i32
    return %arg0, %c0_i32 : i32, i32
  }
}

module attributes {stable_mosaic.version = 11 : i64} {
  func.func @_conv3x3_relu_kernel(%arg0: i32, %arg1: memref<512x144xbf16, #tpu.memory_space<vmem>>, %arg2: memref<144x16xbf16, #tpu.memory_space<vmem>>, %arg3: memref<1x16xf32, #tpu.memory_space<vmem>>, %arg4: memref<512x16xbf16, #tpu.memory_space<vmem>>) attributes {dimension_semantics = [#tpu.dimension_semantics<parallel>], iteration_bounds = array<i64: 1>, scalar_prefetch = 0 : i64, scratch_operands = 0 : i64, tpu.core_type = #tpu.core_type<tc>, window_params = [{transform_indices = @transform_0, window_bounds = array<i64: 512, 144>}, {pipeline_mode = #tpu.pipeline_mode<synchronous>, transform_indices = @transform_1, window_bounds = array<i64: 144, 16>}, {pipeline_mode = #tpu.pipeline_mode<synchronous>, transform_indices = @transform_2, window_bounds = array<i64: 1, 16>}, {transform_indices = @transform_3, window_bounds = array<i64: 512, 16>}]} {
    %c0 = arith.constant 0 : index
    %c0_0 = arith.constant 0 : index
    %0 = vector.load %arg1[%c0, %c0_0] : memref<512x144xbf16, #tpu.memory_space<vmem>>, vector<512x144xbf16>
    %c0_1 = arith.constant 0 : index
    %c0_2 = arith.constant 0 : index
    %1 = vector.load %arg2[%c0_1, %c0_2] : memref<144x16xbf16, #tpu.memory_space<vmem>>, vector<144x16xbf16>
    %cst = arith.constant dense<0.000000e+00> : vector<512x16xf32>
    %2 = tpu.matmul %0, %1, %cst {dimension_numbers = #tpu.dot_dimension_numbers<[1], [0], [0], [1], [0, 0, 1, 1], [], []>} : vector<512x144xbf16>, vector<144x16xbf16>, vector<512x16xf32> -> vector<512x16xf32>
    %c0_3 = arith.constant 0 : index
    %c0_4 = arith.constant 0 : index
    %3 = vector.load %arg3[%c0_3, %c0_4] : memref<1x16xf32, #tpu.memory_space<vmem>>, vector<1x16xf32>
    %4 = vector.broadcast %3 : vector<1x16xf32> to vector<512x16xf32>
    %5 = arith.addf %2, %4 : vector<512x16xf32>
    %cst_5 = arith.constant 0.000000e+00 : f32
    %6 = vector.broadcast %cst_5 : f32 to vector<512x16xf32>
    %7 = arith.maximumf %5, %6 : vector<512x16xf32>
    %8 = arith.truncf %7 : vector<512x16xf32> to vector<512x16xbf16>
    %c0_6 = arith.constant 0 : index
    %c0_7 = arith.constant 0 : index
    %9 = vector.load %arg4[%c0_6, %c0_7] : memref<512x16xbf16, #tpu.memory_space<vmem>>, vector<512x16xbf16>
    tpu.vector_store %arg4[%c0_6, %c0_7], %8 {strides = array<i32>} : memref<512x16xbf16, #tpu.memory_space<vmem>>, vector<512x16xbf16>,
    return
  }
  func.func @transform_0(%arg0: i32) -> (i32, i32) {
    %c0_i32 = arith.constant 0 : i32
    %c0_i32_0 = arith.constant 0 : i32
    return %arg0, %c0_i32 : i32, i32
  }
  func.func @transform_1(%arg0: i32) -> (i32, i32) {
    %c0_i32 = arith.constant 0 : i32
    %c0_i32_0 = arith.constant 0 : i32
    %c0_i32_1 = arith.constant 0 : i32
    return %c0_i32, %c0_i32_0 : i32, i32
  }
  func.func @transform_2(%arg0: i32) -> (i32, i32) {
    %c0_i32 = arith.constant 0 : i32
    %c0_i32_0 = arith.constant 0 : i32
    %c0_i32_1 = arith.constant 0 : i32
    return %c0_i32, %c0_i32_0 : i32, i32
  }
  func.func @transform_3(%arg0: i32) -> (i32, i32) {
    %c0_i32 = arith.constant 0 : i32
    %c0_i32_0 = arith.constant 0 : i32
    return %arg0, %c0_i32 : i32, i32
  }
}

module attributes {stable_mosaic.version = 11 : i64} {
  func.func @_maxpool2x2_kernel(%arg0: memref<16x2x8x32xbf16, #tpu.memory_space<vmem>>, %arg1: memref<16x8x16xbf16, #tpu.memory_space<vmem>>) attributes {dimension_semantics = [], scalar_prefetch = 0 : i64, scratch_operands = 0 : i64, tpu.core_type = #tpu.core_type<tc>} {
    %c0 = arith.constant 0 : index
    %c0_0 = arith.constant 0 : index
    %c0_1 = arith.constant 0 : index
    %c0_2 = arith.constant 0 : index
    %0 = vector.load %arg0[%c0, %c0_0, %c0_1, %c0_2] : memref<16x2x8x32xbf16, #tpu.memory_space<vmem>>, vector<16x2x8x32xbf16>
    %1 = vector.extract_strided_slice %0 {offsets = [0, 0, 0, 0], sizes = [16, 1, 8, 32], strides = [1, 1, 1, 1]} : vector<16x2x8x32xbf16> to vector<16x1x8x32xbf16>
    %2 = vector.shape_cast %1 : vector<16x1x8x32xbf16> to vector<16x8x32xbf16>
    %3 = vector.extract_strided_slice %0 {offsets = [0, 1, 0, 0], sizes = [16, 1, 8, 32], strides = [1, 1, 1, 1]} : vector<16x2x8x32xbf16> to vector<16x1x8x32xbf16>
    %4 = vector.shape_cast %3 : vector<16x1x8x32xbf16> to vector<16x8x32xbf16>
    %5 = arith.maximumf %2, %4 : vector<16x8x32xbf16>
    %6 = vector.extract_strided_slice %5 {offsets = [0, 0, 0], sizes = [16, 8, 16], strides = [1, 1, 1]} : vector<16x8x32xbf16> to vector<16x8x16xbf16>
    %7 = vector.extract_strided_slice %5 {offsets = [0, 0, 16], sizes = [16, 8, 16], strides = [1, 1, 1]} : vector<16x8x32xbf16> to vector<16x8x16xbf16>
    %8 = arith.maximumf %6, %7 : vector<16x8x16xbf16>
    %c0_3 = arith.constant 0 : index
    %c0_4 = arith.constant 0 : index
    %c0_5 = arith.constant 0 : index
    %9 = vector.load %arg1[%c0_3, %c0_4, %c0_5] : memref<16x8x16xbf16, #tpu.memory_space<vmem>>, vector<16x8x16xbf16>
    tpu.vector_store %arg1[%c0_3, %c0_4, %c0_5], %8 {strides = array<i32>} : memref<16x8x16xbf16, #tpu.memory_space<vmem>>, vector<16x8x16xbf16>,
    return
  }
}

module attributes {stable_mosaic.version = 11 : i64} {
  func.func @_conv3x3_relu_kernel(%arg0: i32, %arg1: memref<128x144xbf16, #tpu.memory_space<vmem>>, %arg2: memref<144x32xbf16, #tpu.memory_space<vmem>>, %arg3: memref<1x32xf32, #tpu.memory_space<vmem>>, %arg4: memref<128x32xbf16, #tpu.memory_space<vmem>>) attributes {dimension_semantics = [#tpu.dimension_semantics<parallel>], iteration_bounds = array<i64: 1>, scalar_prefetch = 0 : i64, scratch_operands = 0 : i64, tpu.core_type = #tpu.core_type<tc>, window_params = [{transform_indices = @transform_0, window_bounds = array<i64: 128, 144>}, {pipeline_mode = #tpu.pipeline_mode<synchronous>, transform_indices = @transform_1, window_bounds = array<i64: 144, 32>}, {pipeline_mode = #tpu.pipeline_mode<synchronous>, transform_indices = @transform_2, window_bounds = array<i64: 1, 32>}, {transform_indices = @transform_3, window_bounds = array<i64: 128, 32>}]} {
    %c0 = arith.constant 0 : index
    %c0_0 = arith.constant 0 : index
    %0 = vector.load %arg1[%c0, %c0_0] : memref<128x144xbf16, #tpu.memory_space<vmem>>, vector<128x144xbf16>
    %c0_1 = arith.constant 0 : index
    %c0_2 = arith.constant 0 : index
    %1 = vector.load %arg2[%c0_1, %c0_2] : memref<144x32xbf16, #tpu.memory_space<vmem>>, vector<144x32xbf16>
    %cst = arith.constant dense<0.000000e+00> : vector<128x32xf32>
    %2 = tpu.matmul %0, %1, %cst {dimension_numbers = #tpu.dot_dimension_numbers<[1], [0], [0], [1], [0, 0, 1, 1], [], []>} : vector<128x144xbf16>, vector<144x32xbf16>, vector<128x32xf32> -> vector<128x32xf32>
    %c0_3 = arith.constant 0 : index
    %c0_4 = arith.constant 0 : index
    %3 = vector.load %arg3[%c0_3, %c0_4] : memref<1x32xf32, #tpu.memory_space<vmem>>, vector<1x32xf32>
    %4 = vector.broadcast %3 : vector<1x32xf32> to vector<128x32xf32>
    %5 = arith.addf %2, %4 : vector<128x32xf32>
    %cst_5 = arith.constant 0.000000e+00 : f32
    %6 = vector.broadcast %cst_5 : f32 to vector<128x32xf32>
    %7 = arith.maximumf %5, %6 : vector<128x32xf32>
    %8 = arith.truncf %7 : vector<128x32xf32> to vector<128x32xbf16>
    %c0_6 = arith.constant 0 : index
    %c0_7 = arith.constant 0 : index
    %9 = vector.load %arg4[%c0_6, %c0_7] : memref<128x32xbf16, #tpu.memory_space<vmem>>, vector<128x32xbf16>
    tpu.vector_store %arg4[%c0_6, %c0_7], %8 {strides = array<i32>} : memref<128x32xbf16, #tpu.memory_space<vmem>>, vector<128x32xbf16>,
    return
  }
  func.func @transform_0(%arg0: i32) -> (i32, i32) {
    %c0_i32 = arith.constant 0 : i32
    %c0_i32_0 = arith.constant 0 : i32
    return %arg0, %c0_i32 : i32, i32
  }
  func.func @transform_1(%arg0: i32) -> (i32, i32) {
    %c0_i32 = arith.constant 0 : i32
    %c0_i32_0 = arith.constant 0 : i32
    %c0_i32_1 = arith.constant 0 : i32
    return %c0_i32, %c0_i32_0 : i32, i32
  }
  func.func @transform_2(%arg0: i32) -> (i32, i32) {
    %c0_i32 = arith.constant 0 : i32
    %c0_i32_0 = arith.constant 0 : i32
    %c0_i32_1 = arith.constant 0 : i32
    return %c0_i32, %c0_i32_0 : i32, i32
  }
  func.func @transform_3(%arg0: i32) -> (i32, i32) {
    %c0_i32 = arith.constant 0 : i32
    %c0_i32_0 = arith.constant 0 : i32
    return %arg0, %c0_i32 : i32, i32
  }
}

module attributes {stable_mosaic.version = 11 : i64} {
  func.func @_conv3x3_relu_kernel(%arg0: i32, %arg1: memref<128x288xbf16, #tpu.memory_space<vmem>>, %arg2: memref<288x32xbf16, #tpu.memory_space<vmem>>, %arg3: memref<1x32xf32, #tpu.memory_space<vmem>>, %arg4: memref<128x32xbf16, #tpu.memory_space<vmem>>) attributes {dimension_semantics = [#tpu.dimension_semantics<parallel>], iteration_bounds = array<i64: 1>, scalar_prefetch = 0 : i64, scratch_operands = 0 : i64, tpu.core_type = #tpu.core_type<tc>, window_params = [{transform_indices = @transform_0, window_bounds = array<i64: 128, 288>}, {pipeline_mode = #tpu.pipeline_mode<synchronous>, transform_indices = @transform_1, window_bounds = array<i64: 288, 32>}, {pipeline_mode = #tpu.pipeline_mode<synchronous>, transform_indices = @transform_2, window_bounds = array<i64: 1, 32>}, {transform_indices = @transform_3, window_bounds = array<i64: 128, 32>}]} {
    %c0 = arith.constant 0 : index
    %c0_0 = arith.constant 0 : index
    %0 = vector.load %arg1[%c0, %c0_0] : memref<128x288xbf16, #tpu.memory_space<vmem>>, vector<128x288xbf16>
    %c0_1 = arith.constant 0 : index
    %c0_2 = arith.constant 0 : index
    %1 = vector.load %arg2[%c0_1, %c0_2] : memref<288x32xbf16, #tpu.memory_space<vmem>>, vector<288x32xbf16>
    %cst = arith.constant dense<0.000000e+00> : vector<128x32xf32>
    %2 = tpu.matmul %0, %1, %cst {dimension_numbers = #tpu.dot_dimension_numbers<[1], [0], [0], [1], [0, 0, 1, 1], [], []>} : vector<128x288xbf16>, vector<288x32xbf16>, vector<128x32xf32> -> vector<128x32xf32>
    %c0_3 = arith.constant 0 : index
    %c0_4 = arith.constant 0 : index
    %3 = vector.load %arg3[%c0_3, %c0_4] : memref<1x32xf32, #tpu.memory_space<vmem>>, vector<1x32xf32>
    %4 = vector.broadcast %3 : vector<1x32xf32> to vector<128x32xf32>
    %5 = arith.addf %2, %4 : vector<128x32xf32>
    %cst_5 = arith.constant 0.000000e+00 : f32
    %6 = vector.broadcast %cst_5 : f32 to vector<128x32xf32>
    %7 = arith.maximumf %5, %6 : vector<128x32xf32>
    %8 = arith.truncf %7 : vector<128x32xf32> to vector<128x32xbf16>
    %c0_6 = arith.constant 0 : index
    %c0_7 = arith.constant 0 : index
    %9 = vector.load %arg4[%c0_6, %c0_7] : memref<128x32xbf16, #tpu.memory_space<vmem>>, vector<128x32xbf16>
    tpu.vector_store %arg4[%c0_6, %c0_7], %8 {strides = array<i32>} : memref<128x32xbf16, #tpu.memory_space<vmem>>, vector<128x32xbf16>,
    return
  }
  func.func @transform_0(%arg0: i32) -> (i32, i32) {
    %c0_i32 = arith.constant 0 : i32
    %c0_i32_0 = arith.constant 0 : i32
    return %arg0, %c0_i32 : i32, i32
  }
  func.func @transform_1(%arg0: i32) -> (i32, i32) {
    %c0_i32 = arith.constant 0 : i32
    %c0_i32_0 = arith.constant 0 : i32
    %c0_i32_1 = arith.constant 0 : i32
    return %c0_i32, %c0_i32_0 : i32, i32
  }
  func.func @transform_2(%arg0: i32) -> (i32, i32) {
    %c0_i32 = arith.constant 0 : i32
    %c0_i32_0 = arith.constant 0 : i32
    %c0_i32_1 = arith.constant 0 : i32
    return %c0_i32, %c0_i32_0 : i32, i32
  }
  func.func @transform_3(%arg0: i32) -> (i32, i32) {
    %c0_i32 = arith.constant 0 : i32
    %c0_i32_0 = arith.constant 0 : i32
    return %arg0, %c0_i32 : i32, i32
  }
}

module attributes {stable_mosaic.version = 11 : i64} {
  func.func @_maxpool2x2_kernel(%arg0: memref<8x2x4x64xbf16, #tpu.memory_space<vmem>>, %arg1: memref<8x4x32xbf16, #tpu.memory_space<vmem>>) attributes {dimension_semantics = [], scalar_prefetch = 0 : i64, scratch_operands = 0 : i64, tpu.core_type = #tpu.core_type<tc>} {
    %c0 = arith.constant 0 : index
    %c0_0 = arith.constant 0 : index
    %c0_1 = arith.constant 0 : index
    %c0_2 = arith.constant 0 : index
    %0 = vector.load %arg0[%c0, %c0_0, %c0_1, %c0_2] : memref<8x2x4x64xbf16, #tpu.memory_space<vmem>>, vector<8x2x4x64xbf16>
    %1 = vector.extract_strided_slice %0 {offsets = [0, 0, 0, 0], sizes = [8, 1, 4, 64], strides = [1, 1, 1, 1]} : vector<8x2x4x64xbf16> to vector<8x1x4x64xbf16>
    %2 = vector.shape_cast %1 : vector<8x1x4x64xbf16> to vector<8x4x64xbf16>
    %3 = vector.extract_strided_slice %0 {offsets = [0, 1, 0, 0], sizes = [8, 1, 4, 64], strides = [1, 1, 1, 1]} : vector<8x2x4x64xbf16> to vector<8x1x4x64xbf16>
    %4 = vector.shape_cast %3 : vector<8x1x4x64xbf16> to vector<8x4x64xbf16>
    %5 = arith.maximumf %2, %4 : vector<8x4x64xbf16>
    %6 = vector.extract_strided_slice %5 {offsets = [0, 0, 0], sizes = [8, 4, 32], strides = [1, 1, 1]} : vector<8x4x64xbf16> to vector<8x4x32xbf16>
    %7 = vector.extract_strided_slice %5 {offsets = [0, 0, 32], sizes = [8, 4, 32], strides = [1, 1, 1]} : vector<8x4x64xbf16> to vector<8x4x32xbf16>
    %8 = arith.maximumf %6, %7 : vector<8x4x32xbf16>
    %c0_3 = arith.constant 0 : index
    %c0_4 = arith.constant 0 : index
    %c0_5 = arith.constant 0 : index
    %9 = vector.load %arg1[%c0_3, %c0_4, %c0_5] : memref<8x4x32xbf16, #tpu.memory_space<vmem>>, vector<8x4x32xbf16>
    tpu.vector_store %arg1[%c0_3, %c0_4, %c0_5], %8 {strides = array<i32>} : memref<8x4x32xbf16, #tpu.memory_space<vmem>>, vector<8x4x32xbf16>,
    return
  }
}

module attributes {stable_mosaic.version = 11 : i64} {
  func.func @_conv3x3_relu_kernel(%arg0: i32, %arg1: memref<32x288xbf16, #tpu.memory_space<vmem>>, %arg2: memref<288x64xbf16, #tpu.memory_space<vmem>>, %arg3: memref<1x64xf32, #tpu.memory_space<vmem>>, %arg4: memref<32x64xbf16, #tpu.memory_space<vmem>>) attributes {dimension_semantics = [#tpu.dimension_semantics<parallel>], iteration_bounds = array<i64: 1>, scalar_prefetch = 0 : i64, scratch_operands = 0 : i64, tpu.core_type = #tpu.core_type<tc>, window_params = [{transform_indices = @transform_0, window_bounds = array<i64: 32, 288>}, {pipeline_mode = #tpu.pipeline_mode<synchronous>, transform_indices = @transform_1, window_bounds = array<i64: 288, 64>}, {pipeline_mode = #tpu.pipeline_mode<synchronous>, transform_indices = @transform_2, window_bounds = array<i64: 1, 64>}, {transform_indices = @transform_3, window_bounds = array<i64: 32, 64>}]} {
    %c0 = arith.constant 0 : index
    %c0_0 = arith.constant 0 : index
    %0 = vector.load %arg1[%c0, %c0_0] : memref<32x288xbf16, #tpu.memory_space<vmem>>, vector<32x288xbf16>
    %c0_1 = arith.constant 0 : index
    %c0_2 = arith.constant 0 : index
    %1 = vector.load %arg2[%c0_1, %c0_2] : memref<288x64xbf16, #tpu.memory_space<vmem>>, vector<288x64xbf16>
    %cst = arith.constant dense<0.000000e+00> : vector<32x64xf32>
    %2 = tpu.matmul %0, %1, %cst {dimension_numbers = #tpu.dot_dimension_numbers<[1], [0], [0], [1], [0, 0, 1, 1], [], []>} : vector<32x288xbf16>, vector<288x64xbf16>, vector<32x64xf32> -> vector<32x64xf32>
    %c0_3 = arith.constant 0 : index
    %c0_4 = arith.constant 0 : index
    %3 = vector.load %arg3[%c0_3, %c0_4] : memref<1x64xf32, #tpu.memory_space<vmem>>, vector<1x64xf32>
    %4 = vector.broadcast %3 : vector<1x64xf32> to vector<32x64xf32>
    %5 = arith.addf %2, %4 : vector<32x64xf32>
    %cst_5 = arith.constant 0.000000e+00 : f32
    %6 = vector.broadcast %cst_5 : f32 to vector<32x64xf32>
    %7 = arith.maximumf %5, %6 : vector<32x64xf32>
    %8 = arith.truncf %7 : vector<32x64xf32> to vector<32x64xbf16>
    %c0_6 = arith.constant 0 : index
    %c0_7 = arith.constant 0 : index
    %9 = vector.load %arg4[%c0_6, %c0_7] : memref<32x64xbf16, #tpu.memory_space<vmem>>, vector<32x64xbf16>
    tpu.vector_store %arg4[%c0_6, %c0_7], %8 {strides = array<i32>} : memref<32x64xbf16, #tpu.memory_space<vmem>>, vector<32x64xbf16>,
    return
  }
  func.func @transform_0(%arg0: i32) -> (i32, i32) {
    %c0_i32 = arith.constant 0 : i32
    %c0_i32_0 = arith.constant 0 : i32
    return %arg0, %c0_i32 : i32, i32
  }
  func.func @transform_1(%arg0: i32) -> (i32, i32) {
    %c0_i32 = arith.constant 0 : i32
    %c0_i32_0 = arith.constant 0 : i32
    %c0_i32_1 = arith.constant 0 : i32
    return %c0_i32, %c0_i32_0 : i32, i32
  }
  func.func @transform_2(%arg0: i32) -> (i32, i32) {
    %c0_i32 = arith.constant 0 : i32
    %c0_i32_0 = arith.constant 0 : i32
    %c0_i32_1 = arith.constant 0 : i32
    return %c0_i32, %c0_i32_0 : i32, i32
  }
  func.func @transform_3(%arg0: i32) -> (i32, i32) {
    %c0_i32 = arith.constant 0 : i32
    %c0_i32_0 = arith.constant 0 : i32
    return %arg0, %c0_i32 : i32, i32
  }
}

module attributes {stable_mosaic.version = 11 : i64} {
  func.func @_conv3x3_relu_kernel(%arg0: i32, %arg1: memref<32x576xbf16, #tpu.memory_space<vmem>>, %arg2: memref<576x64xbf16, #tpu.memory_space<vmem>>, %arg3: memref<1x64xf32, #tpu.memory_space<vmem>>, %arg4: memref<32x64xbf16, #tpu.memory_space<vmem>>) attributes {dimension_semantics = [#tpu.dimension_semantics<parallel>], iteration_bounds = array<i64: 1>, scalar_prefetch = 0 : i64, scratch_operands = 0 : i64, tpu.core_type = #tpu.core_type<tc>, window_params = [{transform_indices = @transform_0, window_bounds = array<i64: 32, 576>}, {pipeline_mode = #tpu.pipeline_mode<synchronous>, transform_indices = @transform_1, window_bounds = array<i64: 576, 64>}, {pipeline_mode = #tpu.pipeline_mode<synchronous>, transform_indices = @transform_2, window_bounds = array<i64: 1, 64>}, {transform_indices = @transform_3, window_bounds = array<i64: 32, 64>}]} {
    %c0 = arith.constant 0 : index
    %c0_0 = arith.constant 0 : index
    %0 = vector.load %arg1[%c0, %c0_0] : memref<32x576xbf16, #tpu.memory_space<vmem>>, vector<32x576xbf16>
    %c0_1 = arith.constant 0 : index
    %c0_2 = arith.constant 0 : index
    %1 = vector.load %arg2[%c0_1, %c0_2] : memref<576x64xbf16, #tpu.memory_space<vmem>>, vector<576x64xbf16>
    %cst = arith.constant dense<0.000000e+00> : vector<32x64xf32>
    %2 = tpu.matmul %0, %1, %cst {dimension_numbers = #tpu.dot_dimension_numbers<[1], [0], [0], [1], [0, 0, 1, 1], [], []>} : vector<32x576xbf16>, vector<576x64xbf16>, vector<32x64xf32> -> vector<32x64xf32>
    %c0_3 = arith.constant 0 : index
    %c0_4 = arith.constant 0 : index
    %3 = vector.load %arg3[%c0_3, %c0_4] : memref<1x64xf32, #tpu.memory_space<vmem>>, vector<1x64xf32>
    %4 = vector.broadcast %3 : vector<1x64xf32> to vector<32x64xf32>
    %5 = arith.addf %2, %4 : vector<32x64xf32>
    %cst_5 = arith.constant 0.000000e+00 : f32
    %6 = vector.broadcast %cst_5 : f32 to vector<32x64xf32>
    %7 = arith.maximumf %5, %6 : vector<32x64xf32>
    %8 = arith.truncf %7 : vector<32x64xf32> to vector<32x64xbf16>
    %c0_6 = arith.constant 0 : index
    %c0_7 = arith.constant 0 : index
    %9 = vector.load %arg4[%c0_6, %c0_7] : memref<32x64xbf16, #tpu.memory_space<vmem>>, vector<32x64xbf16>
    tpu.vector_store %arg4[%c0_6, %c0_7], %8 {strides = array<i32>} : memref<32x64xbf16, #tpu.memory_space<vmem>>, vector<32x64xbf16>,
    return
  }
  func.func @transform_0(%arg0: i32) -> (i32, i32) {
    %c0_i32 = arith.constant 0 : i32
    %c0_i32_0 = arith.constant 0 : i32
    return %arg0, %c0_i32 : i32, i32
  }
  func.func @transform_1(%arg0: i32) -> (i32, i32) {
    %c0_i32 = arith.constant 0 : i32
    %c0_i32_0 = arith.constant 0 : i32
    %c0_i32_1 = arith.constant 0 : i32
    return %c0_i32, %c0_i32_0 : i32, i32
  }
  func.func @transform_2(%arg0: i32) -> (i32, i32) {
    %c0_i32 = arith.constant 0 : i32
    %c0_i32_0 = arith.constant 0 : i32
    %c0_i32_1 = arith.constant 0 : i32
    return %c0_i32, %c0_i32_0 : i32, i32
  }
  func.func @transform_3(%arg0: i32) -> (i32, i32) {
    %c0_i32 = arith.constant 0 : i32
    %c0_i32_0 = arith.constant 0 : i32
    return %arg0, %c0_i32 : i32, i32
  }
}

module attributes {stable_mosaic.version = 11 : i64} {
  func.func @_maxpool2x2_kernel(%arg0: memref<4x2x2x128xbf16, #tpu.memory_space<vmem>>, %arg1: memref<4x2x64xbf16, #tpu.memory_space<vmem>>) attributes {dimension_semantics = [], scalar_prefetch = 0 : i64, scratch_operands = 0 : i64, tpu.core_type = #tpu.core_type<tc>} {
    %c0 = arith.constant 0 : index
    %c0_0 = arith.constant 0 : index
    %c0_1 = arith.constant 0 : index
    %c0_2 = arith.constant 0 : index
    %0 = vector.load %arg0[%c0, %c0_0, %c0_1, %c0_2] : memref<4x2x2x128xbf16, #tpu.memory_space<vmem>>, vector<4x2x2x128xbf16>
    %1 = vector.extract_strided_slice %0 {offsets = [0, 0, 0, 0], sizes = [4, 1, 2, 128], strides = [1, 1, 1, 1]} : vector<4x2x2x128xbf16> to vector<4x1x2x128xbf16>
    %2 = vector.shape_cast %1 : vector<4x1x2x128xbf16> to vector<4x2x128xbf16>
    %3 = vector.extract_strided_slice %0 {offsets = [0, 1, 0, 0], sizes = [4, 1, 2, 128], strides = [1, 1, 1, 1]} : vector<4x2x2x128xbf16> to vector<4x1x2x128xbf16>
    %4 = vector.shape_cast %3 : vector<4x1x2x128xbf16> to vector<4x2x128xbf16>
    %5 = arith.maximumf %2, %4 : vector<4x2x128xbf16>
    %6 = vector.extract_strided_slice %5 {offsets = [0, 0, 0], sizes = [4, 2, 64], strides = [1, 1, 1]} : vector<4x2x128xbf16> to vector<4x2x64xbf16>
    %7 = vector.extract_strided_slice %5 {offsets = [0, 0, 64], sizes = [4, 2, 64], strides = [1, 1, 1]} : vector<4x2x128xbf16> to vector<4x2x64xbf16>
    %8 = arith.maximumf %6, %7 : vector<4x2x64xbf16>
    %c0_3 = arith.constant 0 : index
    %c0_4 = arith.constant 0 : index
    %c0_5 = arith.constant 0 : index
    %9 = vector.load %arg1[%c0_3, %c0_4, %c0_5] : memref<4x2x64xbf16, #tpu.memory_space<vmem>>, vector<4x2x64xbf16>
    tpu.vector_store %arg1[%c0_3, %c0_4, %c0_5], %8 {strides = array<i32>} : memref<4x2x64xbf16, #tpu.memory_space<vmem>>, vector<4x2x64xbf16>,
    return
  }
}

module attributes {stable_mosaic.version = 11 : i64} {
  func.func @_conv3x3_relu_kernel(%arg0: i32, %arg1: memref<8x576xbf16, #tpu.memory_space<vmem>>, %arg2: memref<576x64xbf16, #tpu.memory_space<vmem>>, %arg3: memref<1x64xf32, #tpu.memory_space<vmem>>, %arg4: memref<8x64xbf16, #tpu.memory_space<vmem>>) attributes {dimension_semantics = [#tpu.dimension_semantics<parallel>], iteration_bounds = array<i64: 1>, scalar_prefetch = 0 : i64, scratch_operands = 0 : i64, tpu.core_type = #tpu.core_type<tc>, window_params = [{transform_indices = @transform_0, window_bounds = array<i64: 8, 576>}, {pipeline_mode = #tpu.pipeline_mode<synchronous>, transform_indices = @transform_1, window_bounds = array<i64: 576, 64>}, {pipeline_mode = #tpu.pipeline_mode<synchronous>, transform_indices = @transform_2, window_bounds = array<i64: 1, 64>}, {transform_indices = @transform_3, window_bounds = array<i64: 8, 64>}]} {
    %c0 = arith.constant 0 : index
    %c0_0 = arith.constant 0 : index
    %0 = vector.load %arg1[%c0, %c0_0] : memref<8x576xbf16, #tpu.memory_space<vmem>>, vector<8x576xbf16>
    %c0_1 = arith.constant 0 : index
    %c0_2 = arith.constant 0 : index
    %1 = vector.load %arg2[%c0_1, %c0_2] : memref<576x64xbf16, #tpu.memory_space<vmem>>, vector<576x64xbf16>
    %cst = arith.constant dense<0.000000e+00> : vector<8x64xf32>
    %2 = tpu.matmul %0, %1, %cst {dimension_numbers = #tpu.dot_dimension_numbers<[1], [0], [0], [1], [0, 0, 1, 1], [], []>} : vector<8x576xbf16>, vector<576x64xbf16>, vector<8x64xf32> -> vector<8x64xf32>
    %c0_3 = arith.constant 0 : index
    %c0_4 = arith.constant 0 : index
    %3 = vector.load %arg3[%c0_3, %c0_4] : memref<1x64xf32, #tpu.memory_space<vmem>>, vector<1x64xf32>
    %4 = vector.broadcast %3 : vector<1x64xf32> to vector<8x64xf32>
    %5 = arith.addf %2, %4 : vector<8x64xf32>
    %cst_5 = arith.constant 0.000000e+00 : f32
    %6 = vector.broadcast %cst_5 : f32 to vector<8x64xf32>
    %7 = arith.maximumf %5, %6 : vector<8x64xf32>
    %8 = arith.truncf %7 : vector<8x64xf32> to vector<8x64xbf16>
    %c0_6 = arith.constant 0 : index
    %c0_7 = arith.constant 0 : index
    %9 = vector.load %arg4[%c0_6, %c0_7] : memref<8x64xbf16, #tpu.memory_space<vmem>>, vector<8x64xbf16>
    tpu.vector_store %arg4[%c0_6, %c0_7], %8 {strides = array<i32>} : memref<8x64xbf16, #tpu.memory_space<vmem>>, vector<8x64xbf16>,
    return
  }
  func.func @transform_0(%arg0: i32) -> (i32, i32) {
    %c0_i32 = arith.constant 0 : i32
    %c0_i32_0 = arith.constant 0 : i32
    return %arg0, %c0_i32 : i32, i32
  }
  func.func @transform_1(%arg0: i32) -> (i32, i32) {
    %c0_i32 = arith.constant 0 : i32
    %c0_i32_0 = arith.constant 0 : i32
    %c0_i32_1 = arith.constant 0 : i32
    return %c0_i32, %c0_i32_0 : i32, i32
  }
  func.func @transform_2(%arg0: i32) -> (i32, i32) {
    %c0_i32 = arith.constant 0 : i32
    %c0_i32_0 = arith.constant 0 : i32
    %c0_i32_1 = arith.constant 0 : i32
    return %c0_i32, %c0_i32_0 : i32, i32
  }
  func.func @transform_3(%arg0: i32) -> (i32, i32) {
    %c0_i32 = arith.constant 0 : i32
    %c0_i32_0 = arith.constant 0 : i32
    return %arg0, %c0_i32 : i32, i32
  }
}

module attributes {stable_mosaic.version = 11 : i64} {
  func.func @_maxpool2x2_kernel(%arg0: memref<2x2x1x128xbf16, #tpu.memory_space<vmem>>, %arg1: memref<2x1x64xbf16, #tpu.memory_space<vmem>>) attributes {dimension_semantics = [], scalar_prefetch = 0 : i64, scratch_operands = 0 : i64, tpu.core_type = #tpu.core_type<tc>} {
    %c0 = arith.constant 0 : index
    %c0_0 = arith.constant 0 : index
    %c0_1 = arith.constant 0 : index
    %c0_2 = arith.constant 0 : index
    %0 = vector.load %arg0[%c0, %c0_0, %c0_1, %c0_2] : memref<2x2x1x128xbf16, #tpu.memory_space<vmem>>, vector<2x2x1x128xbf16>
    %1 = vector.extract_strided_slice %0 {offsets = [0, 0, 0, 0], sizes = [2, 1, 1, 128], strides = [1, 1, 1, 1]} : vector<2x2x1x128xbf16> to vector<2x1x1x128xbf16>
    %2 = vector.shape_cast %1 : vector<2x1x1x128xbf16> to vector<2x1x128xbf16>
    %3 = vector.extract_strided_slice %0 {offsets = [0, 1, 0, 0], sizes = [2, 1, 1, 128], strides = [1, 1, 1, 1]} : vector<2x2x1x128xbf16> to vector<2x1x1x128xbf16>
    %4 = vector.shape_cast %3 : vector<2x1x1x128xbf16> to vector<2x1x128xbf16>
    %5 = arith.maximumf %2, %4 : vector<2x1x128xbf16>
    %6 = vector.extract_strided_slice %5 {offsets = [0, 0, 0], sizes = [2, 1, 64], strides = [1, 1, 1]} : vector<2x1x128xbf16> to vector<2x1x64xbf16>
    %7 = vector.extract_strided_slice %5 {offsets = [0, 0, 64], sizes = [2, 1, 64], strides = [1, 1, 1]} : vector<2x1x128xbf16> to vector<2x1x64xbf16>
    %8 = arith.maximumf %6, %7 : vector<2x1x64xbf16>
    %c0_3 = arith.constant 0 : index
    %c0_4 = arith.constant 0 : index
    %c0_5 = arith.constant 0 : index
    %9 = vector.load %arg1[%c0_3, %c0_4, %c0_5] : memref<2x1x64xbf16, #tpu.memory_space<vmem>>, vector<2x1x64xbf16>
    tpu.vector_store %arg1[%c0_3, %c0_4, %c0_5], %8 {strides = array<i32>} : memref<2x1x64xbf16, #tpu.memory_space<vmem>>, vector<2x1x64xbf16>,
    return
  }
}

module attributes {stable_mosaic.version = 11 : i64} {
  func.func @_linear_relu_kernel(%arg0: memref<2x64xbf16, #tpu.memory_space<vmem>>, %arg1: memref<128x64xbf16, #tpu.memory_space<vmem>>, %arg2: memref<1x128xf32, #tpu.memory_space<vmem>>, %arg3: memref<2x128xf32, #tpu.memory_space<vmem>>) attributes {dimension_semantics = [], scalar_prefetch = 0 : i64, scratch_operands = 0 : i64, tpu.core_type = #tpu.core_type<tc>} {
    %c0 = arith.constant 0 : index
    %c0_0 = arith.constant 0 : index
    %0 = vector.load %arg0[%c0, %c0_0] : memref<2x64xbf16, #tpu.memory_space<vmem>>, vector<2x64xbf16>
    %c0_1 = arith.constant 0 : index
    %c0_2 = arith.constant 0 : index
    %1 = vector.load %arg1[%c0_1, %c0_2] : memref<128x64xbf16, #tpu.memory_space<vmem>>, vector<128x64xbf16>
    %cst = arith.constant dense<0.000000e+00> : vector<2x128xf32>
    %2 = tpu.matmul %0, %1, %cst {dimension_numbers = #tpu.dot_dimension_numbers<[1], [1], [0], [0], [0, 0, 1, 0], [], []>} : vector<2x64xbf16>, vector<128x64xbf16>, vector<2x128xf32> -> vector<2x128xf32>
    %c0_3 = arith.constant 0 : index
    %c0_4 = arith.constant 0 : index
    %3 = vector.load %arg2[%c0_3, %c0_4] : memref<1x128xf32, #tpu.memory_space<vmem>>, vector<1x128xf32>
    %4 = vector.broadcast %3 : vector<1x128xf32> to vector<2x128xf32>
    %5 = arith.addf %2, %4 : vector<2x128xf32>
    %cst_5 = arith.constant 0.000000e+00 : f32
    %6 = vector.broadcast %cst_5 : f32 to vector<2x128xf32>
    %7 = arith.maximumf %5, %6 : vector<2x128xf32>
    %c0_6 = arith.constant 0 : index
    %c0_7 = arith.constant 0 : index
    %8 = vector.load %arg3[%c0_6, %c0_7] : memref<2x128xf32, #tpu.memory_space<vmem>>, vector<2x128xf32>
    tpu.vector_store %arg3[%c0_6, %c0_7], %7 {strides = array<i32>} : memref<2x128xf32, #tpu.memory_space<vmem>>, vector<2x128xf32>,
    return
  }
}

module attributes {stable_mosaic.version = 11 : i64} {
  func.func @_linear_relu_kernel(%arg0: memref<2x128xbf16, #tpu.memory_space<vmem>>, %arg1: memref<128x128xbf16, #tpu.memory_space<vmem>>, %arg2: memref<1x128xf32, #tpu.memory_space<vmem>>, %arg3: memref<2x128xf32, #tpu.memory_space<vmem>>) attributes {dimension_semantics = [], scalar_prefetch = 0 : i64, scratch_operands = 0 : i64, tpu.core_type = #tpu.core_type<tc>} {
    %c0 = arith.constant 0 : index
    %c0_0 = arith.constant 0 : index
    %0 = vector.load %arg0[%c0, %c0_0] : memref<2x128xbf16, #tpu.memory_space<vmem>>, vector<2x128xbf16>
    %c0_1 = arith.constant 0 : index
    %c0_2 = arith.constant 0 : index
    %1 = vector.load %arg1[%c0_1, %c0_2] : memref<128x128xbf16, #tpu.memory_space<vmem>>, vector<128x128xbf16>
    %cst = arith.constant dense<0.000000e+00> : vector<2x128xf32>
    %2 = tpu.matmul %0, %1, %cst {dimension_numbers = #tpu.dot_dimension_numbers<[1], [1], [0], [0], [0, 0, 1, 0], [], []>} : vector<2x128xbf16>, vector<128x128xbf16>, vector<2x128xf32> -> vector<2x128xf32>
    %c0_3 = arith.constant 0 : index
    %c0_4 = arith.constant 0 : index
    %3 = vector.load %arg2[%c0_3, %c0_4] : memref<1x128xf32, #tpu.memory_space<vmem>>, vector<1x128xf32>
    %4 = vector.broadcast %3 : vector<1x128xf32> to vector<2x128xf32>
    %5 = arith.addf %2, %4 : vector<2x128xf32>
    %cst_5 = arith.constant 0.000000e+00 : f32
    %6 = vector.broadcast %cst_5 : f32 to vector<2x128xf32>
    %7 = arith.maximumf %5, %6 : vector<2x128xf32>
    %c0_6 = arith.constant 0 : index
    %c0_7 = arith.constant 0 : index
    %8 = vector.load %arg3[%c0_6, %c0_7] : memref<2x128xf32, #tpu.memory_space<vmem>>, vector<2x128xf32>
    tpu.vector_store %arg3[%c0_6, %c0_7], %7 {strides = array<i32>} : memref<2x128xf32, #tpu.memory_space<vmem>>, vector<2x128xf32>,
    return
  }
}

</mosaic_0001>

<bundles_post_ra>
// kernel: vgg16_relu7.20
= control target key start
LH: loop header
LB: loop body
LE: loop exit
PB: predicated region body
PF: predicated region fallthrough
CT: control target
= control target key end

     0   :  { %s1639_s12 = smov 0   ;;  %s1934_s0 = inlined_call_operand.vmem [shape: bf16[2048,27], index: 0, kind: input, shape index: {}]   ;;  %s1935_s1 = inlined_call_operand.vmem [shape: bf16[27,8], index: 1, kind: input, shape index: {}]   ;;  %s1936_s2 = inlined_call_operand.vmem [shape: f32[1,8], index: 2, kind: input, shape index: {}]   ;;  %s1937_s3 = inlined_call_operand.vmem [shape: bf16[2048,8], index: 3, kind: output, shape index: {}]  }
   0x1 LB: > { %s1255_s13 = sadd.s32 4294967295, %s1616_s12   ;;  %p1259_p0 = scmp.ge.s32.totalorder %s1616_s12, 1  ;;  %s1616_s12 = sphi %s1639_s12, %s13_s12  }
   0x2   : > { %p138_p1 = scmp.lt.s32.totalorder %s1616_s12, 5 }
   0x4   : > { %p139_p2 = pnand %p1259_p0, %p138_p1 }
   0x5   : > { %v1576_v0 = vld [vmem:[%s1935_s1] sm:$0xff] (!%p139_p2)   ;;  %vm518_vm0 = vcmask (!%p139_p2), 1044480   ;;  %v1577_v1 = vld [vmem:[%s1935_s1 + $0x8] sm:$0x3f] (!%p139_p2)   ;;  %vm519_vm1 = vcmask (!%p139_p2), 1045504   ;;  %s1260_s18 = sshll.u32 (!%p139_p2), %s1255_s13, 6 }
   0x6   : > { %142 = sbr.rel (%p139_p2) target bundleno = 297 (0x129), region = 32  ;;  %1495 = vmatprep.subr.bf16.mxu0 (!%p139_p2), %v1576_v0  ;;  %1563 = vmatprep.subr.bf16.mxu1 (!%p139_p2), %v1576_v0  ;;  %v1618_v2 = vmov (!%p139_p2), 65535   ;;  %p163_p3 = scmp.lt.s32.totalorder (!%p139_p2), %s1260_s18, 255  ;;  %vm421_vm2 = vcmask (!%p139_p2), 220160   ;;  %v1730_v38 = vld [vmem:[%s1936_s2] ss:$0 sm:$0xff] (!%p139_p2) }
   0x7   : > { %1496 = vmatpush3.bf16.msra.mxu0 (!%p139_p2), %v1576_v0  ;;  %1565 = vmatpush3.bf16.msra.mxu1 (!%p139_p2), %v1576_v0  ;;  %v520_v3 = vsel (!%p139_p2), %vm518_vm0, 4294967295, %v1618_v2  ;;  %vm1134_vm3 = vcmask (!%p139_p2), 60416  }
   0x8   : > { %v521_v4 = vsel (!%p139_p2), %vm519_vm1, %v520_v3, 0 }
   0x9   : > { %v523_v5 = vand.u32 (!%p139_p2), %v1577_v1, %v521_v4 }
   0xb   : > { %1497 = vmatprep.subr.bf16.mxu0 (!%p139_p2), %v523_v5  ;;  %1564 = vmatprep.subr.bf16.mxu1 (!%p139_p2), %v523_v5 }
   0xc   : > { %1498 = vmatpush3.bf16.msra.mxu0 (!%p139_p2), %v523_v5  ;;  %1566 = vmatpush3.bf16.msra.mxu1 (!%p139_p2), %v523_v5 }
   0xd   : > { %s1939_s18 = smov (!%p163_p3, %s1260_s18), 255 }
   0xe   : > { %s1261_s19 = sshll.u32 %s1939_s18, 2 }
   0xf   : > { %s1661_s22 = scalar_lea.vmem %s1934_s0, %s1261_s19  ;;  %s1742_s27 = scalar_lea.vmem %s1937_s3, %s1261_s19 }
  0x10   : > { %v1578_v6 = vld [vmem:[%s1661_s22] sm:$0xff]   ;;  %v1580_v8 = vld [vmem:[%s1661_s22 + $0x8] sm:$0xff]   ;;  %v1582_v10 = vld [vmem:[%s1661_s22 + $0x10] sm:$0xff]  }
  0x11   : > { %v1579_v7 = vld [vmem:[%s1661_s22 + $0x80] sm:$0xff]   ;;  %1499 = vmatprep.mubr.msk.bf16.mxu0 %vm421_vm2, %v1578_v6  ;;  %v1581_v9 = vld [vmem:[%s1661_s22 + $0x88] sm:$0xff]   ;;  %v1583_v11 = vld [vmem:[%s1661_s22 + $0x90] sm:$0xff]  }
  0x12   : > { %1531 = vmatprep.mubr.msk.bf16.mxu1 %vm421_vm2, %v1579_v7  ;;  %1500 = vmatmul.mubr.msk.bf16.vlgmr.msra.gmra.mrb[0].mxu0 %vm421_vm2, %v1580_v8  ;;  %v1584_v12 = vld [vmem:[%s1661_s22 + $0x18] sm:$0xff]   ;;  %v1586_v14 = vld [vmem:[%s1661_s22 + $0x20] sm:$0xff]   ;;  %v1588_v16 = vld [vmem:[%s1661_s22 + $0x28] sm:$0xff]  }
  0x13   : > { %1532 = vmatmul.mubr.msk.bf16.vlgmr.msra.gmra.mrb[0].mxu1 %vm421_vm2, %v1581_v9  ;;  %1503 = vmatprep.mubr.msk.bf16.mxu0 %vm421_vm2, %v1582_v10  ;;  %v1585_v13 = vld [vmem:[%s1661_s22 + $0x98] sm:$0xff]   ;;  %v1587_v15 = vld [vmem:[%s1661_s22 + $0xa0] sm:$0xff]   ;;  %v1589_v17 = vld [vmem:[%s1661_s22 + $0xa8] sm:$0xff]  }
  0x14   : > { %1535 = vmatprep.mubr.msk.bf16.mxu1 %vm421_vm2, %v1583_v11  ;;  %v1590_v18 = vld [vmem:[%s1661_s22 + $0x30] sm:$0xff]   ;;  %v1592_v20 = vld [vmem:[%s1661_s22 + $0x38] sm:$0xff]   ;;  %v1594_v22 = vld [vmem:[%s1661_s22 + $0x40] sm:$0xff]  }
  0x15   : > { %v1591_v19 = vld [vmem:[%s1661_s22 + $0xb0] sm:$0xff]   ;;  %v1593_v21 = vld [vmem:[%s1661_s22 + $0xb8] sm:$0xff]   ;;  %v1595_v23 = vld [vmem:[%s1661_s22 + $0xc0] sm:$0xff]  }
  0x16   : > { %v1596_v24 = vld [vmem:[%s1661_s22 + $0x48] sm:$0xff]   ;;  %v1598_v26 = vld [vmem:[%s1661_s22 + $0x50] sm:$0xff]   ;;  %v1600_v28 = vld [vmem:[%s1661_s22 + $0x58] sm:$0xff]  }
  0x17   : > { %v1597_v25 = vld [vmem:[%s1661_s22 + $0xc8] sm:$0xff]   ;;  %v1599_v27 = vld [vmem:[%s1661_s22 + $0xd0] sm:$0xff]   ;;  %v1601_v29 = vld [vmem:[%s1661_s22 + $0xd8] sm:$0xff]  }
  0x18   : > { %v1602_v30 = vld [vmem:[%s1661_s22 + $0x60] sm:$0xff]   ;;  %v1604_v32 = vld [vmem:[%s1661_s22 + $0x68] sm:$0xff]   ;;  %v1606_v34 = vld [vmem:[%s1661_s22 + $0x70] sm:$0xff]  }
  0x19   : > { %v1603_v31 = vld [vmem:[%s1661_s22 + $0xe0] sm:$0xff]   ;;  %v1605_v33 = vld [vmem:[%s1661_s22 + $0xe8] sm:$0xff]   ;;  %v1607_v35 = vld [vmem:[%s1661_s22 + $0xf0] sm:$0xff]  }
  0x1a   : > { %1504 = vmatmul.mubr.msk.bf16.gmra.mrb[4].mxu0 %vm421_vm2, %v1584_v12  ;;  %v1608_v36 = vld [vmem:[%s1661_s22 + $0x78] sm:$0xff]  }
  0x1b   : > { %1536 = vmatmul.mubr.msk.bf16.gmra.mrb[4].mxu1 %vm421_vm2, %v1585_v13  ;;  %1507 = vmatprep.mubr.msk.bf16.mxu0 %vm421_vm2, %v1586_v14  ;;  %v1609_v37 = vld [vmem:[%s1661_s22 + $0xf8] sm:$0xff]  }
  0x1c   : > { %1539 = vmatprep.mubr.msk.bf16.mxu1 %vm421_vm2, %v1587_v15 }
  0x22   : > { %1508 = vmatmul.mubr.msk.bf16.gmra.mrb[8].mxu0 %vm421_vm2, %v1588_v16 }
  0x23   : > { %1540 = vmatmul.mubr.msk.bf16.gmra.mrb[8].mxu1 %vm421_vm2, %v1589_v17  ;;  %1511 = vmatprep.mubr.msk.bf16.mxu0 %vm421_vm2, %v1590_v18 }
  0x24   : > { %1543 = vmatprep.mubr.msk.bf16.mxu1 %vm421_vm2, %v1591_v19 }
  0x2a   : > { %1512 = vmatmul.mubr.msk.bf16.gmra.mrb[12].mxu0 %vm421_vm2, %v1592_v20 }
  0x2b   : > { %1544 = vmatmul.mubr.msk.bf16.gmra.mrb[12].mxu1 %vm421_vm2, %v1593_v21  ;;  %1515 = vmatprep.mubr.msk.bf16.mxu0 %vm421_vm2, %v1594_v22 }
  0x2c   : > { %1547 = vmatprep.mubr.msk.bf16.mxu1 %vm421_vm2, %v1595_v23 }
  0x32   : > { %1516 = vmatmul.mubr.msk.bf16.gmra.mrb[16].mxu0 %vm421_vm2, %v1596_v24 }
  0x33   : > { %1548 = vmatmul.mubr.msk.bf16.gmra.mrb[16].mxu1 %vm421_vm2, %v1597_v25  ;;  %1519 = vmatprep.mubr.msk.bf16.mxu0 %vm421_vm2, %v1598_v26 }
  0x34   : > { %1551 = vmatprep.mubr.msk.bf16.mxu1 %vm421_vm2, %v1599_v27 }
  0x3a   : > { %1520 = vmatmul.mubr.msk.bf16.gmra.mrb[20].mxu0 %vm421_vm2, %v1600_v28 }
  0x3b   : > { %1552 = vmatmul.mubr.msk.bf16.gmra.mrb[20].mxu1 %vm421_vm2, %v1601_v29  ;;  %1523 = vmatprep.mubr.msk.bf16.mxu0 %vm421_vm2, %v1602_v30 }
  0x3c   : > { %1555 = vmatprep.mubr.msk.bf16.mxu1 %vm421_vm2, %v1603_v31 }
  0x42   : > { %1524 = vmatmul.mubr.msk.bf16.gmra.mrb[24].mxu0 %vm421_vm2, %v1604_v32 }
  0x43   : > { %1556 = vmatmul.mubr.msk.bf16.gmra.mrb[24].mxu1 %vm421_vm2, %v1605_v33  ;;  %1527 = vmatprep.mubr.msk.bf16.mxu0 %vm421_vm2, %v1606_v34 }
  0x44   : > { %1559 = vmatprep.mubr.msk.bf16.mxu1 %vm421_vm2, %v1607_v35 }
  0x4a   : > { %1528 = vmatmul.mubr.msk.bf16.gmra.mrb[28].mxu0 %vm421_vm2, %v1608_v36 }
  0x4b   : > { %1560 = vmatmul.mubr.msk.bf16.gmra.mrb[28].mxu1 %vm421_vm2, %v1609_v37 }
  0xe5   : > { %v1501_v39 = vpop.f32.mrb[0].mxu0 }
  0xe6   : > { %v568_v40 = vadd.f32 %v1501_v39, %v1730_v38  ;;  %v1533_v41 = vpop.f32.mrb[0].mxu1  ;;  %v559_v42 = vpop.f32.mrb[1].mxu0 }
  0xe7   : > { %v696_v43 = vadd.f32 %v1533_v41, %v1730_v38  ;;  %v560_v44 = vadd.f32 %v1730_v38, %v559_v42  ;;  %v687_v45 = vpop.f32.mrb[1].mxu1  ;;  %v1502_v46 = vpop.f32.mrb[2].mxu0 }
  0xe8   : > { %v816_v47 = vmax.f32 %v568_v40, 0.0  ;;  %v688_v48 = vadd.f32 %v1730_v38, %v687_v45  ;;  %v571_v49 = vadd.f32 %v1502_v46, %v1730_v38  ;;  %v1534_v50 = vpop.f32.mrb[2].mxu1  ;;  %v562_v51 = vpop.f32.mrb[3].mxu0 }
  0xe9   : > { %v848_v52 = vmax.f32 %v696_v43, 0.0  ;;  %v814_v53 = vmax.f32 %v560_v44, 0.0  ;;  %v699_v54 = vadd.f32 %v1534_v50, %v1730_v38  ;;  %v563_v55 = vadd.f32 %v1730_v38, %v562_v51  ;;  %v690_v56 = vpop.f32.mrb[3].mxu1 }
  0xea   : > { %v1399_v57 = vpack.c.bf16 %v816_v47, %v816_v47  ;;  %v846_v58 = vmax.f32 %v688_v48, 0.0  ;;  %v817_v59 = vmax.f32 %v571_v49, 0.0  ;;  %v691_v60 = vadd.f32 %v1730_v38, %v690_v56 }
  0xeb   : > { %v1431_v61 = vpack.c.bf16 %v848_v52, %v848_v52  ;;  %v1397_v62 = vpack.c.bf16 %v814_v53, %v814_v53  ;;  %v849_v63 = vmax.f32 %v699_v54, 0.0  ;;  %v815_v0 = vmax.f32 %v563_v55, 0.0 }
  0xec   : > { %1137 = vst.msk [vmem:[%s1742_s27 + $0x8] sm:$0xf] %vm1134_vm3, %v1399_v57  ;;  %v1429_v1 = vpack.c.bf16 %v846_v58, %v846_v58  ;;  %v1400_v2 = vpack.c.bf16 %v817_v59, %v817_v59  ;;  %v847_v3 = vmax.f32 %v691_v60, 0.0 }
  0xed   : > { %1169 = vst.msk [vmem:[%s1742_s27 + $0x88] sm:$0xf] %vm1134_vm3, %v1431_v61  ;;  %1135 = vst.msk [vmem:[%s1742_s27] sm:$0xf] %vm1134_vm3, %v1397_v62  ;;  %v1432_v4 = vpack.c.bf16 %v849_v63, %v849_v63  ;;  %v1398_v5 = vpack.c.bf16 %v815_v0, %v815_v0  ;;  %v1505_v6 = vpop.f32.mrb[4].mxu0 }
  0xee   : > { %1167 = vst.msk [vmem:[%s1742_s27 + $0x80] sm:$0xf] %vm1134_vm3, %v1429_v1  ;;  %1138 = vst.msk [vmem:[%s1742_s27 + $0xc] sm:$0xf] %vm1134_vm3, %v1400_v2  ;;  %v1430_v7 = vpack.c.bf16 %v847_v3, %v847_v3  ;;  %v584_v8 = vadd.f32 %v1505_v6, %v1730_v38  ;;  %v1537_v9 = vpop.f32.mrb[4].mxu1  ;;  %v575_v10 = vpop.f32.mrb[5].mxu0 }
  0xef   : > { %1170 = vst.msk [vmem:[%s1742_s27 + $0x8c] sm:$0xf] %vm1134_vm3, %v1432_v4  ;;  %1136 = vst.msk [vmem:[%s1742_s27 + $0x4] sm:$0xf] %vm1134_vm3, %v1398_v5  ;;  %v712_v11 = vadd.f32 %v1537_v9, %v1730_v38  ;;  %v576_v12 = vadd.f32 %v1730_v38, %v575_v10  ;;  %v703_v13 = vpop.f32.mrb[5].mxu1  ;;  %v1506_v14 = vpop.f32.mrb[6].mxu0 }
  0xf0   : > { %1168 = vst.msk [vmem:[%s1742_s27 + $0x84] sm:$0xf] %vm1134_vm3, %v1430_v7  ;;  %v820_v15 = vmax.f32 %v584_v8, 0.0  ;;  %v704_v16 = vadd.f32 %v1730_v38, %v703_v13  ;;  %v587_v17 = vadd.f32 %v1506_v14, %v1730_v38  ;;  %v1538_v18 = vpop.f32.mrb[6].mxu1  ;;  %v578_v19 = vpop.f32.mrb[7].mxu0 }
  0xf1   : > { %v852_v20 = vmax.f32 %v712_v11, 0.0  ;;  %v818_v21 = vmax.f32 %v576_v12, 0.0  ;;  %v715_v22 = vadd.f32 %v1538_v18, %v1730_v38  ;;  %v579_v23 = vadd.f32 %v1730_v38, %v578_v19  ;;  %v706_v24 = vpop.f32.mrb[7].mxu1 }
  0xf2   : > { %v1403_v25 = vpack.c.bf16 %v820_v15, %v820_v15  ;;  %v850_v26 = vmax.f32 %v704_v16, 0.0  ;;  %v821_v27 = vmax.f32 %v587_v17, 0.0  ;;  %v707_v28 = vadd.f32 %v1730_v38, %v706_v24 }
  0xf3   : > { %v1435_v29 = vpack.c.bf16 %v852_v20, %v852_v20  ;;  %v1401_v30 = vpack.c.bf16 %v818_v21, %v818_v21  ;;  %v853_v31 = vmax.f32 %v715_v22, 0.0  ;;  %v819_v32 = vmax.f32 %v579_v23, 0.0 }
  0xf4   : > { %1141 = vst.msk [vmem:[%s1742_s27 + $0x18] sm:$0xf] %vm1134_vm3, %v1403_v25  ;;  %v1433_v33 = vpack.c.bf16 %v850_v26, %v850_v26  ;;  %v1404_v34 = vpack.c.bf16 %v821_v27, %v821_v27  ;;  %v851_v35 = vmax.f32 %v707_v28, 0.0 }
  0xf5   : > { %1173 = vst.msk [vmem:[%s1742_s27 + $0x98] sm:$0xf] %vm1134_vm3, %v1435_v29  ;;  %1139 = vst.msk [vmem:[%s1742_s27 + $0x10] sm:$0xf] %vm1134_vm3, %v1401_v30  ;;  %v1436_v36 = vpack.c.bf16 %v853_v31, %v853_v31  ;;  %v1402_v37 = vpack.c.bf16 %v819_v32, %v819_v32  ;;  %v1509_v39 = vpop.f32.mrb[8].mxu0 }
  0xf6   : > { %1171 = vst.msk [vmem:[%s1742_s27 + $0x90] sm:$0xf] %vm1134_vm3, %v1433_v33  ;;  %1142 = vst.msk [vmem:[%s1742_s27 + $0x1c] sm:$0xf] %vm1134_vm3, %v1404_v34  ;;  %v1434_v40 = vpack.c.bf16 %v851_v35, %v851_v35  ;;  %v600_v41 = vadd.f32 %v1509_v39, %v1730_v38  ;;  %v1541_v42 = vpop.f32.mrb[8].mxu1  ;;  %v591_v43 = vpop.f32.mrb[9].mxu0 }
  0xf7   : > { %1174 = vst.msk [vmem:[%s1742_s27 + $0x9c] sm:$0xf] %vm1134_vm3, %v1436_v36  ;;  %1140 = vst.msk [vmem:[%s1742_s27 + $0x14] sm:$0xf] %vm1134_vm3, %v1402_v37  ;;  %v728_v44 = vadd.f32 %v1541_v42, %v1730_v38  ;;  %v592_v45 = vadd.f32 %v1730_v38, %v591_v43  ;;  %v719_v46 = vpop.f32.mrb[9].mxu1  ;;  %v1510_v47 = vpop.f32.mrb[10].mxu0 }
  0xf8   : > { %1172 = vst.msk [vmem:[%s1742_s27 + $0x94] sm:$0xf] %vm1134_vm3, %v1434_v40  ;;  %v824_v48 = vmax.f32 %v600_v41, 0.0  ;;  %v720_v49 = vadd.f32 %v1730_v38, %v719_v46  ;;  %v603_v50 = vadd.f32 %v1510_v47, %v1730_v38  ;;  %v1542_v51 = vpop.f32.mrb[10].mxu1  ;;  %v594_v52 = vpop.f32.mrb[11].mxu0 }
  0xf9   : > { %v856_v53 = vmax.f32 %v728_v44, 0.0  ;;  %v822_v54 = vmax.f32 %v592_v45, 0.0  ;;  %v731_v55 = vadd.f32 %v1542_v51, %v1730_v38  ;;  %v595_v56 = vadd.f32 %v1730_v38, %v594_v52  ;;  %v722_v57 = vpop.f32.mrb[11].mxu1 }
  0xfa   : > { %v1407_v58 = vpack.c.bf16 %v824_v48, %v824_v48  ;;  %v854_v59 = vmax.f32 %v720_v49, 0.0  ;;  %v825_v60 = vmax.f32 %v603_v50, 0.0  ;;  %v723_v61 = vadd.f32 %v1730_v38, %v722_v57 }
  0xfb   : > { %v1439_v62 = vpack.c.bf16 %v856_v53, %v856_v53  ;;  %v1405_v63 = vpack.c.bf16 %v822_v54, %v822_v54  ;;  %v857_v0 = vmax.f32 %v731_v55, 0.0  ;;  %v823_v1 = vmax.f32 %v595_v56, 0.0 }
  0xfc   : > { %1145 = vst.msk [vmem:[%s1742_s27 + $0x28] sm:$0xf] %vm1134_vm3, %v1407_v58  ;;  %v1437_v2 = vpack.c.bf16 %v854_v59, %v854_v59  ;;  %v1408_v3 = vpack.c.bf16 %v825_v60, %v825_v60  ;;  %v855_v4 = vmax.f32 %v723_v61, 0.0 }
  0xfd   : > { %1177 = vst.msk [vmem:[%s1742_s27 + $0xa8] sm:$0xf] %vm1134_vm3, %v1439_v62  ;;  %1143 = vst.msk [vmem:[%s1742_s27 + $0x20] sm:$0xf] %vm1134_vm3, %v1405_v63  ;;  %v1440_v5 = vpack.c.bf16 %v857_v0, %v857_v0  ;;  %v1406_v6 = vpack.c.bf16 %v823_v1, %v823_v1  ;;  %v1513_v7 = vpop.f32.mrb[12].mxu0 }
  0xfe   : > { %1175 = vst.msk [vmem:[%s1742_s27 + $0xa0] sm:$0xf] %vm1134_vm3, %v1437_v2  ;;  %1146 = vst.msk [vmem:[%s1742_s27 + $0x2c] sm:$0xf] %vm1134_vm3, %v1408_v3  ;;  %v1438_v8 = vpack.c.bf16 %v855_v4, %v855_v4  ;;  %v616_v9 = vadd.f32 %v1513_v7, %v1730_v38  ;;  %v1545_v10 = vpop.f32.mrb[12].mxu1  ;;  %v607_v11 = vpop.f32.mrb[13].mxu0 }
  0xff   : > { %1178 = vst.msk [vmem:[%s1742_s27 + $0xac] sm:$0xf] %vm1134_vm3, %v1440_v5  ;;  %1144 = vst.msk [vmem:[%s1742_s27 + $0x24] sm:$0xf] %vm1134_vm3, %v1406_v6  ;;  %v744_v12 = vadd.f32 %v1545_v10, %v1730_v38  ;;  %v608_v13 = vadd.f32 %v1730_v38, %v607_v11  ;;  %v735_v14 = vpop.f32.mrb[13].mxu1  ;;  %v1514_v15 = vpop.f32.mrb[14].mxu0 }
 0x100   : > { %1176 = vst.msk [vmem:[%s1742_s27 + $0xa4] sm:$0xf] %vm1134_vm3, %v1438_v8  ;;  %v828_v16 = vmax.f32 %v616_v9, 0.0  ;;  %v736_v17 = vadd.f32 %v1730_v38, %v735_v14  ;;  %v619_v18 = vadd.f32 %v1514_v15, %v1730_v38  ;;  %v1546_v19 = vpop.f32.mrb[14].mxu1  ;;  %v610_v20 = vpop.f32.mrb[15].mxu0 }
 0x101   : > { %v860_v21 = vmax.f32 %v744_v12, 0.0  ;;  %v826_v22 = vmax.f32 %v608_v13, 0.0  ;;  %v747_v23 = vadd.f32 %v1546_v19, %v1730_v38  ;;  %v611_v24 = vadd.f32 %v1730_v38, %v610_v20  ;;  %v738_v25 = vpop.f32.mrb[15].mxu1 }
 0x102   : > { %v1411_v26 = vpack.c.bf16 %v828_v16, %v828_v16  ;;  %v858_v27 = vmax.f32 %v736_v17, 0.0  ;;  %v829_v28 = vmax.f32 %v619_v18, 0.0  ;;  %v739_v29 = vadd.f32 %v1730_v38, %v738_v25 }
 0x103   : > { %v1443_v30 = vpack.c.bf16 %v860_v21, %v860_v21  ;;  %v1409_v31 = vpack.c.bf16 %v826_v22, %v826_v22  ;;  %v861_v32 = vmax.f32 %v747_v23, 0.0  ;;  %v827_v33 = vmax.f32 %v611_v24, 0.0 }
 0x104   : > { %1149 = vst.msk [vmem:[%s1742_s27 + $0x38] sm:$0xf] %vm1134_vm3, %v1411_v26  ;;  %v1441_v34 = vpack.c.bf16 %v858_v27, %v858_v27  ;;  %v1412_v35 = vpack.c.bf16 %v829_v28, %v829_v28  ;;  %v859_v36 = vmax.f32 %v739_v29, 0.0 }
 0x105   : > { %1181 = vst.msk [vmem:[%s1742_s27 + $0xb8] sm:$0xf] %vm1134_vm3, %v1443_v30  ;;  %1147 = vst.msk [vmem:[%s1742_s27 + $0x30] sm:$0xf] %vm1134_vm3, %v1409_v31  ;;  %v1444_v37 = vpack.c.bf16 %v861_v32, %v861_v32  ;;  %v1410_v39 = vpack.c.bf16 %v827_v33, %v827_v33  ;;  %v1517_v40 = vpop.f32.mrb[16].mxu0 }
 0x106   : > { %1179 = vst.msk [vmem:[%s1742_s27 + $0xb0] sm:$0xf] %vm1134_vm3, %v1441_v34  ;;  %1150 = vst.msk [vmem:[%s1742_s27 + $0x3c] sm:$0xf] %vm1134_vm3, %v1412_v35  ;;  %v1442_v41 = vpack.c.bf16 %v859_v36, %v859_v36  ;;  %v632_v42 = vadd.f32 %v1517_v40, %v1730_v38  ;;  %v1549_v43 = vpop.f32.mrb[16].mxu1  ;;  %v623_v44 = vpop.f32.mrb[17].mxu0 }
 0x107   : > { %1182 = vst.msk [vmem:[%s1742_s27 + $0xbc] sm:$0xf] %vm1134_vm3, %v1444_v37  ;;  %1148 = vst.msk [vmem:[%s1742_s27 + $0x34] sm:$0xf] %vm1134_vm3, %v1410_v39  ;;  %v760_v45 = vadd.f32 %v1549_v43, %v1730_v38  ;;  %v624_v46 = vadd.f32 %v1730_v38, %v623_v44  ;;  %v751_v47 = vpop.f32.mrb[17].mxu1  ;;  %v1518_v48 = vpop.f32.mrb[18].mxu0 }
 0x108   : > { %1180 = vst.msk [vmem:[%s1742_s27 + $0xb4] sm:$0xf] %vm1134_vm3, %v1442_v41  ;;  %v832_v49 = vmax.f32 %v632_v42, 0.0  ;;  %v752_v50 = vadd.f32 %v1730_v38, %v751_v47  ;;  %v635_v51 = vadd.f32 %v1518_v48, %v1730_v38  ;;  %v1550_v52 = vpop.f32.mrb[18].mxu1  ;;  %v626_v53 = vpop.f32.mrb[19].mxu0 }
 0x109   : > { %v864_v54 = vmax.f32 %v760_v45, 0.0  ;;  %v830_v55 = vmax.f32 %v624_v46, 0.0  ;;  %v763_v56 = vadd.f32 %v1550_v52, %v1730_v38  ;;  %v627_v57 = vadd.f32 %v1730_v38, %v626_v53  ;;  %v754_v58 = vpop.f32.mrb[19].mxu1 }
 0x10a   : > { %v1415_v59 = vpack.c.bf16 %v832_v49, %v832_v49  ;;  %v862_v60 = vmax.f32 %v752_v50, 0.0  ;;  %v833_v61 = vmax.f32 %v635_v51, 0.0  ;;  %v755_v62 = vadd.f32 %v1730_v38, %v754_v58 }
 0x10b   : > { %v1447_v63 = vpack.c.bf16 %v864_v54, %v864_v54  ;;  %v1413_v0 = vpack.c.bf16 %v830_v55, %v830_v55  ;;  %v865_v1 = vmax.f32 %v763_v56, 0.0  ;;  %v831_v2 = vmax.f32 %v627_v57, 0.0 }
 0x10c   : > { %1153 = vst.msk [vmem:[%s1742_s27 + $0x48] sm:$0xf] %vm1134_vm3, %v1415_v59  ;;  %v1445_v3 = vpack.c.bf16 %v862_v60, %v862_v60  ;;  %v1416_v4 = vpack.c.bf16 %v833_v61, %v833_v61  ;;  %v863_v5 = vmax.f32 %v755_v62, 0.0 }
 0x10d   : > { %1185 = vst.msk [vmem:[%s1742_s27 + $0xc8] sm:$0xf] %vm1134_vm3, %v1447_v63  ;;  %1151 = vst.msk [vmem:[%s1742_s27 + $0x40] sm:$0xf] %vm1134_vm3, %v1413_v0  ;;  %v1448_v6 = vpack.c.bf16 %v865_v1, %v865_v1  ;;  %v1414_v7 = vpack.c.bf16 %v831_v2, %v831_v2  ;;  %v1521_v8 = vpop.f32.mrb[20].mxu0 }
 0x10e   : > { %1183 = vst.msk [vmem:[%s1742_s27 + $0xc0] sm:$0xf] %vm1134_vm3, %v1445_v3  ;;  %1154 = vst.msk [vmem:[%s1742_s27 + $0x4c] sm:$0xf] %vm1134_vm3, %v1416_v4  ;;  %v1446_v9 = vpack.c.bf16 %v863_v5, %v863_v5  ;;  %v648_v10 = vadd.f32 %v1521_v8, %v1730_v38  ;;  %v1553_v11 = vpop.f32.mrb[20].mxu1  ;;  %v639_v12 = vpop.f32.mrb[21].mxu0 }
 0x10f   : > { %1186 = vst.msk [vmem:[%s1742_s27 + $0xcc] sm:$0xf] %vm1134_vm3, %v1448_v6  ;;  %1152 = vst.msk [vmem:[%s1742_s27 + $0x44] sm:$0xf] %vm1134_vm3, %v1414_v7  ;;  %v776_v13 = vadd.f32 %v1553_v11, %v1730_v38  ;;  %v640_v14 = vadd.f32 %v1730_v38, %v639_v12  ;;  %v767_v15 = vpop.f32.mrb[21].mxu1  ;;  %v1522_v16 = vpop.f32.mrb[22].mxu0 }
 0x110   : > { %1184 = vst.msk [vmem:[%s1742_s27 + $0xc4] sm:$0xf] %vm1134_vm3, %v1446_v9  ;;  %v836_v17 = vmax.f32 %v648_v10, 0.0  ;;  %v768_v18 = vadd.f32 %v1730_v38, %v767_v15  ;;  %v651_v19 = vadd.f32 %v1522_v16, %v1730_v38  ;;  %v1554_v20 = vpop.f32.mrb[22].mxu1  ;;  %v642_v21 = vpop.f32.mrb[23].mxu0 }
 0x111   : > { %v868_v22 = vmax.f32 %v776_v13, 0.0  ;;  %v834_v23 = vmax.f32 %v640_v14, 0.0  ;;  %v779_v24 = vadd.f32 %v1554_v20, %v1730_v38  ;;  %v643_v25 = vadd.f32 %v1730_v38, %v642_v21  ;;  %v770_v26 = vpop.f32.mrb[23].mxu1 }
 0x112   : > { %v1419_v27 = vpack.c.bf16 %v836_v17, %v836_v17  ;;  %v866_v28 = vmax.f32 %v768_v18, 0.0  ;;  %v837_v29 = vmax.f32 %v651_v19, 0.0  ;;  %v771_v30 = vadd.f32 %v1730_v38, %v770_v26 }
 0x113   : > { %v1451_v31 = vpack.c.bf16 %v868_v22, %v868_v22  ;;  %v1417_v32 = vpack.c.bf16 %v834_v23, %v834_v23  ;;  %v869_v33 = vmax.f32 %v779_v24, 0.0  ;;  %v835_v34 = vmax.f32 %v643_v25, 0.0 }
 0x114   : > { %1157 = vst.msk [vmem:[%s1742_s27 + $0x58] sm:$0xf] %vm1134_vm3, %v1419_v27  ;;  %v1449_v35 = vpack.c.bf16 %v866_v28, %v866_v28  ;;  %v1420_v36 = vpack.c.bf16 %v837_v29, %v837_v29  ;;  %v867_v37 = vmax.f32 %v771_v30, 0.0 }
 0x115   : > { %1189 = vst.msk [vmem:[%s1742_s27 + $0xd8] sm:$0xf] %vm1134_vm3, %v1451_v31  ;;  %1155 = vst.msk [vmem:[%s1742_s27 + $0x50] sm:$0xf] %vm1134_vm3, %v1417_v32  ;;  %v1452_v39 = vpack.c.bf16 %v869_v33, %v869_v33  ;;  %v1418_v40 = vpack.c.bf16 %v835_v34, %v835_v34  ;;  %v1525_v41 = vpop.f32.mrb[24].mxu0 }
 0x116   : > { %1187 = vst.msk [vmem:[%s1742_s27 + $0xd0] sm:$0xf] %vm1134_vm3, %v1449_v35  ;;  %1158 = vst.msk [vmem:[%s1742_s27 + $0x5c] sm:$0xf] %vm1134_vm3, %v1420_v36  ;;  %v1450_v42 = vpack.c.bf16 %v867_v37, %v867_v37  ;;  %v664_v43 = vadd.f32 %v1525_v41, %v1730_v38  ;;  %v1557_v44 = vpop.f32.mrb[24].mxu1  ;;  %v655_v45 = vpop.f32.mrb[25].mxu0 }
 0x117   : > { %1190 = vst.msk [vmem:[%s1742_s27 + $0xdc] sm:$0xf] %vm1134_vm3, %v1452_v39  ;;  %1156 = vst.msk [vmem:[%s1742_s27 + $0x54] sm:$0xf] %vm1134_vm3, %v1418_v40  ;;  %v792_v46 = vadd.f32 %v1557_v44, %v1730_v38  ;;  %v656_v47 = vadd.f32 %v1730_v38, %v655_v45  ;;  %v783_v48 = vpop.f32.mrb[25].mxu1  ;;  %v1526_v49 = vpop.f32.mrb[26].mxu0 }
 0x118   : > { %1188 = vst.msk [vmem:[%s1742_s27 + $0xd4] sm:$0xf] %vm1134_vm3, %v1450_v42  ;;  %v840_v50 = vmax.f32 %v664_v43, 0.0  ;;  %v784_v51 = vadd.f32 %v1730_v38, %v783_v48  ;;  %v667_v52 = vadd.f32 %v1526_v49, %v1730_v38  ;;  %v1558_v53 = vpop.f32.mrb[26].mxu1  ;;  %v658_v54 = vpop.f32.mrb[27].mxu0 }
 0x119   : > { %v872_v55 = vmax.f32 %v792_v46, 0.0  ;;  %v838_v56 = vmax.f32 %v656_v47, 0.0  ;;  %v795_v57 = vadd.f32 %v1558_v53, %v1730_v38  ;;  %v659_v58 = vadd.f32 %v1730_v38, %v658_v54  ;;  %v786_v59 = vpop.f32.mrb[27].mxu1 }
 0x11a   : > { %v1423_v60 = vpack.c.bf16 %v840_v50, %v840_v50  ;;  %v870_v61 = vmax.f32 %v784_v51, 0.0  ;;  %v841_v62 = vmax.f32 %v667_v52, 0.0  ;;  %v787_v63 = vadd.f32 %v1730_v38, %v786_v59 }
 0x11b   : > { %v1455_v0 = vpack.c.bf16 %v872_v55, %v872_v55  ;;  %v1421_v1 = vpack.c.bf16 %v838_v56, %v838_v56  ;;  %v873_v2 = vmax.f32 %v795_v57, 0.0  ;;  %v839_v3 = vmax.f32 %v659_v58, 0.0 }
 0x11c   : > { %1161 = vst.msk [vmem:[%s1742_s27 + $0x68] sm:$0xf] %vm1134_vm3, %v1423_v60  ;;  %v1453_v4 = vpack.c.bf16 %v870_v61, %v870_v61  ;;  %v1424_v5 = vpack.c.bf16 %v841_v62, %v841_v62  ;;  %v871_v6 = vmax.f32 %v787_v63, 0.0 }
 0x11d   : > { %1193 = vst.msk [vmem:[%s1742_s27 + $0xe8] sm:$0xf] %vm1134_vm3, %v1455_v0  ;;  %1159 = vst.msk [vmem:[%s1742_s27 + $0x60] sm:$0xf] %vm1134_vm3, %v1421_v1  ;;  %v1456_v7 = vpack.c.bf16 %v873_v2, %v873_v2  ;;  %v1422_v8 = vpack.c.bf16 %v839_v3, %v839_v3  ;;  %v1529_v9 = vpop.f32.mrb[28].mxu0 }
 0x11e   : > { %1191 = vst.msk [vmem:[%s1742_s27 + $0xe0] sm:$0xf] %vm1134_vm3, %v1453_v4  ;;  %1162 = vst.msk [vmem:[%s1742_s27 + $0x6c] sm:$0xf] %vm1134_vm3, %v1424_v5  ;;  %v1454_v10 = vpack.c.bf16 %v871_v6, %v871_v6  ;;  %v680_v11 = vadd.f32 %v1529_v9, %v1730_v38  ;;  %v1561_v12 = vpop.f32.mrb[28].mxu1  ;;  %v671_v13 = vpop.f32.mrb[29].mxu0 }
 0x11f   : > { %1194 = vst.msk [vmem:[%s1742_s27 + $0xec] sm:$0xf] %vm1134_vm3, %v1456_v7  ;;  %1160 = vst.msk [vmem:[%s1742_s27 + $0x64] sm:$0xf] %vm1134_vm3, %v1422_v8  ;;  %v808_v14 = vadd.f32 %v1561_v12, %v1730_v38  ;;  %v672_v15 = vadd.f32 %v1730_v38, %v671_v13  ;;  %v799_v16 = vpop.f32.mrb[29].mxu1  ;;  %v1530_v17 = vpop.f32.mrb[30].mxu0 }
 0x120   : > { %1192 = vst.msk [vmem:[%s1742_s27 + $0xe4] sm:$0xf] %vm1134_vm3, %v1454_v10  ;;  %v844_v18 = vmax.f32 %v680_v11, 0.0  ;;  %v800_v19 = vadd.f32 %v1730_v38, %v799_v16  ;;  %v683_v20 = vadd.f32 %v1530_v17, %v1730_v38  ;;  %v1562_v21 = vpop.f32.mrb[30].mxu1  ;;  %v674_v22 = vpop.f32.mrb[31].mxu0 }
 0x121   : > { %v876_v23 = vmax.f32 %v808_v14, 0.0  ;;  %v842_v24 = vmax.f32 %v672_v15, 0.0  ;;  %v811_v25 = vadd.f32 %v1562_v21, %v1730_v38  ;;  %v675_v26 = vadd.f32 %v1730_v38, %v674_v22  ;;  %v802_v27 = vpop.f32.mrb[31].mxu1 }
 0x122   : > { %v1427_v28 = vpack.c.bf16 %v844_v18, %v844_v18  ;;  %v874_v29 = vmax.f32 %v800_v19, 0.0  ;;  %v845_v30 = vmax.f32 %v683_v20, 0.0  ;;  %v803_v31 = vadd.f32 %v1730_v38, %v802_v27 }
 0x123   : > { %v1459_v32 = vpack.c.bf16 %v876_v23, %v876_v23  ;;  %v1425_v33 = vpack.c.bf16 %v842_v24, %v842_v24  ;;  %v877_v34 = vmax.f32 %v811_v25, 0.0  ;;  %v843_v35 = vmax.f32 %v675_v26, 0.0 }
 0x124   : > { %1165 = vst.msk [vmem:[%s1742_s27 + $0x78] sm:$0xf] %vm1134_vm3, %v1427_v28  ;;  %v1457_v36 = vpack.c.bf16 %v874_v29, %v874_v29  ;;  %v1428_v37 = vpack.c.bf16 %v845_v30, %v845_v30  ;;  %v875_v39 = vmax.f32 %v803_v31, 0.0 }
 0x125   : > { %1197 = vst.msk [vmem:[%s1742_s27 + $0xf8] sm:$0xf] %vm1134_vm3, %v1459_v32  ;;  %1163 = vst.msk [vmem:[%s1742_s27 + $0x70] sm:$0xf] %vm1134_vm3, %v1425_v33  ;;  %v1460_v40 = vpack.c.bf16 %v877_v34, %v877_v34  ;;  %v1426_v41 = vpack.c.bf16 %v843_v35, %v843_v35 }
 0x126   : > { %1195 = vst.msk [vmem:[%s1742_s27 + $0xf0] sm:$0xf] %vm1134_vm3, %v1457_v36  ;;  %1166 = vst.msk [vmem:[%s1742_s27 + $0x7c] sm:$0xf] %vm1134_vm3, %v1428_v37  ;;  %v1458_v38 = vpack.c.bf16 %v875_v39, %v875_v39 }
 0x127   : > { %1198 = vst.msk [vmem:[%s1742_s27 + $0xfc] sm:$0xf] %vm1134_vm3, %v1460_v40  ;;  %1164 = vst.msk [vmem:[%s1742_s27 + $0x74] sm:$0xf] %vm1134_vm3, %v1426_v41 }
 0x128   : > { %1196 = vst.msk [vmem:[%s1742_s27 + $0xf4] sm:$0xf] %vm1134_vm3, %v1458_v38 }
 0x129 PF: > { %s13_s12 = sadd.s32 1, %s1616_s12  }
 0x12a   : > { %p10_p4 = scmp.ge.s32.totalorder %s13_s12, 6  }
 0x12c   :  { %12 = sbr.rel (!%p10_p4) target bundleno = 1 (0x1), region = 62 }

// kernel: vgg16_relu7.21
= control target key start
LH: loop header
LB: loop body
LE: loop exit
PB: predicated region body
PF: predicated region fallthrough
CT: control target
= control target key end

     0   :  { %s1678_s12 = smov 0   ;;  %s1982_s0 = inlined_call_operand.vmem [shape: bf16[2048,72], index: 0, kind: input, shape index: {}]   ;;  %s1983_s1 = inlined_call_operand.vmem [shape: bf16[72,8], index: 1, kind: input, shape index: {}]   ;;  %s1984_s2 = inlined_call_operand.vmem [shape: f32[1,8], index: 2, kind: input, shape index: {}]   ;;  %s1985_s3 = inlined_call_operand.vmem [shape: bf16[2048,8], index: 3, kind: output, shape index: {}]  }
   0x1 LB: > { %s1273_s13 = sadd.s32 4294967295, %s1656_s12   ;;  %p1277_p0 = scmp.ge.s32.totalorder %s1656_s12, 1  ;;  %s1656_s12 = sphi %s1678_s12, %s13_s12  }
   0x2   : > { %p138_p1 = scmp.lt.s32.totalorder %s1656_s12, 5 }
   0x4   : > { %p139_p2 = pnand %p1277_p0, %p138_p1 }
   0x5   : > { %v1613_v0 = vld [vmem:[%s1983_s1] sm:$0xff] (!%p139_p2)   ;;  %v1614_v1 = vld [vmem:[%s1983_s1 + $0x8] sm:$0xff] (!%p139_p2)   ;;  %s1278_s18 = sshll.u32 (!%p139_p2), %s1273_s13, 6  ;;  %v1615_v2 = vld [vmem:[%s1983_s1 + $0x10] sm:$0xff] (!%p139_p2)   ;;  %vm442_vm0 = vcmask (!%p139_p2), 588800   ;;  %vm539_vm1 = vcmask (!%p139_p2), 1043456  }
   0x6   : > { %142 = sbr.rel (%p139_p2) target bundleno = 304 (0x130), region = 32  ;;  %1519 = vmatprep.subr.bf16.mxu0 (!%p139_p2), %v1613_v0  ;;  %1593 = vmatprep.subr.bf16.mxu1 (!%p139_p2), %v1613_v0  ;;  %p163_p3 = scmp.lt.s32.totalorder (!%p139_p2), %s1278_s18, 255  ;;  %v1616_v3 = vld [vmem:[%s1983_s1 + $0x18] sm:$0xff] (!%p139_p2)   ;;  %v1617_v6 = vld [vmem:[%s1983_s1 + $0x20] ss:$0 sps:$4 sm:$0xff] (!%p139_p2)   ;;  %vm1152_vm2 = vcmask (!%p139_p2), 60416  }
   0x7   : > { %1520 = vmatpush3.bf16.msra.mxu0 (!%p139_p2), %v1613_v0  ;;  %1598 = vmatpush3.bf16.msra.mxu1 (!%p139_p2), %v1613_v0  ;;  %v541_v7 = vsel (!%p139_p2), %vm539_vm1, %v1617_v6, 0  ;;  %v1778_v38 = vld [vmem:[%s1984_s2] ss:$0 sm:$0xff] (!%p139_p2) }
   0x8   : > { %1521 = vmatprep.subr.bf16.mxu0 (!%p139_p2), %v1614_v1  ;;  %1594 = vmatprep.subr.bf16.mxu1 (!%p139_p2), %v1614_v1 }
   0xb   : > { %1522 = vmatpush3.bf16.msra.mxu0 (!%p139_p2), %v1614_v1  ;;  %1599 = vmatpush3.bf16.msra.mxu1 (!%p139_p2), %v1614_v1 }
   0xc   : > { %1523 = vmatprep.subr.bf16.mxu0 (!%p139_p2), %v1615_v2  ;;  %1595 = vmatprep.subr.bf16.mxu1 (!%p139_p2), %v1615_v2 }
   0xd   : > { %s1987_s18 = smov (!%p163_p3, %s1278_s18), 255 }
   0xe   : > { %s1279_s21 = sshll.u32 %s1987_s18, 2 }
   0xf   : > { %s1706_s26 = scalar_lea.vmem %s1982_s0, %s1279_s21  ;;  %1524 = vmatpush3.bf16.msra.mxu0 %v1615_v2  ;;  %1600 = vmatpush3.bf16.msra.mxu1 %v1615_v2  ;;  %s1791_s6 = scalar_lea.vmem %s1985_s3, %s1279_s21 }
  0x10   : > { %v1618_v4 = vld [vmem:[%s1706_s26] sm:$0xff]   ;;  %1525 = vmatprep.subr.bf16.mxu0 %v1616_v3  ;;  %1596 = vmatprep.subr.bf16.mxu1 %v1616_v3  ;;  %v1620_v8 = vld [vmem:[%s1706_s26 + $0x8] sm:$0xff]   ;;  %v1622_v10 = vld [vmem:[%s1706_s26 + $0x10] sm:$0xff]  }
  0x11   : > { %v1619_v5 = vld [vmem:[%s1706_s26 + $0x80] sm:$0xff]   ;;  %1529 = vmatprep.mubr.msk.bf16.mxu0 %vm442_vm0, %v1618_v4  ;;  %v1621_v9 = vld [vmem:[%s1706_s26 + $0x88] sm:$0xff]   ;;  %v1623_v11 = vld [vmem:[%s1706_s26 + $0x90] sm:$0xff]  }
  0x12   : > { %1561 = vmatprep.mubr.msk.bf16.mxu1 %vm442_vm0, %v1619_v5  ;;  %v1624_v12 = vld [vmem:[%s1706_s26 + $0x18] sm:$0xff]   ;;  %v1626_v14 = vld [vmem:[%s1706_s26 + $0x20] sm:$0xff]   ;;  %v1628_v16 = vld [vmem:[%s1706_s26 + $0x28] sm:$0xff]  }
  0x13   : > { %1526 = vmatpush3.bf16.msra.mxu0 %v1616_v3  ;;  %1601 = vmatpush3.bf16.msra.mxu1 %v1616_v3  ;;  %v1625_v13 = vld [vmem:[%s1706_s26 + $0x98] sm:$0xff]   ;;  %v1627_v15 = vld [vmem:[%s1706_s26 + $0xa0] sm:$0xff]   ;;  %v1629_v17 = vld [vmem:[%s1706_s26 + $0xa8] sm:$0xff]  }
  0x14   : > { %1603 = vmatprep.subr.msk.bf16.mxu0 %vm539_vm1, %v1617_v6  ;;  %1604 = vmatprep.subr.msk.bf16.mxu1 %vm539_vm1, %v1617_v6  ;;  %v1630_v18 = vld [vmem:[%s1706_s26 + $0x30] sm:$0xff]   ;;  %v1632_v20 = vld [vmem:[%s1706_s26 + $0x38] sm:$0xff]   ;;  %v1634_v22 = vld [vmem:[%s1706_s26 + $0x40] sm:$0xff]  }
  0x15   : > { %v1631_v19 = vld [vmem:[%s1706_s26 + $0xb0] sm:$0xff]   ;;  %v1633_v21 = vld [vmem:[%s1706_s26 + $0xb8] sm:$0xff]   ;;  %v1635_v23 = vld [vmem:[%s1706_s26 + $0xc0] sm:$0xff]  }
  0x16   : > { %v1636_v24 = vld [vmem:[%s1706_s26 + $0x48] sm:$0xff]   ;;  %v1638_v26 = vld [vmem:[%s1706_s26 + $0x50] sm:$0xff]   ;;  %v1640_v28 = vld [vmem:[%s1706_s26 + $0x58] sm:$0xff]  }
  0x17   : > { %1528 = vmatpush3.bf16.msra.mxu0 %v541_v7  ;;  %1602 = vmatpush3.bf16.msra.mxu1 %v541_v7  ;;  %v1637_v25 = vld [vmem:[%s1706_s26 + $0xc8] sm:$0xff]   ;;  %v1639_v27 = vld [vmem:[%s1706_s26 + $0xd0] sm:$0xff]   ;;  %v1641_v29 = vld [vmem:[%s1706_s26 + $0xd8] sm:$0xff]  }
  0x18   : > { %v1642_v30 = vld [vmem:[%s1706_s26 + $0x60] sm:$0xff]   ;;  %v1644_v32 = vld [vmem:[%s1706_s26 + $0x68] sm:$0xff]   ;;  %v1646_v34 = vld [vmem:[%s1706_s26 + $0x70] sm:$0xff]  }
  0x19   : > { %v1643_v31 = vld [vmem:[%s1706_s26 + $0xe0] sm:$0xff]   ;;  %v1645_v33 = vld [vmem:[%s1706_s26 + $0xe8] sm:$0xff]   ;;  %v1647_v35 = vld [vmem:[%s1706_s26 + $0xf0] sm:$0xff]  }
  0x1a   : > { %1530 = vmatmul.mubr.msk.bf16.vlgmr.msra.gmra.mrb[0].mxu0 %vm442_vm0, %v1620_v8  ;;  %1562 = vmatmul.mubr.msk.bf16.vlgmr.msra.gmra.mrb[0].mxu1 %vm442_vm0, %v1621_v9  ;;  %v1648_v36 = vld [vmem:[%s1706_s26 + $0x78] sm:$0xff]  }
  0x1b   : > { %1533 = vmatprep.mubr.msk.bf16.mxu0 %vm442_vm0, %v1622_v10  ;;  %1565 = vmatprep.mubr.msk.bf16.mxu1 %vm442_vm0, %v1623_v11  ;;  %v1649_v37 = vld [vmem:[%s1706_s26 + $0xf8] sm:$0xff]  }
  0x22   : > { %1534 = vmatmul.mubr.msk.bf16.gmra.mrb[4].mxu0 %vm442_vm0, %v1624_v12  ;;  %1566 = vmatmul.mubr.msk.bf16.gmra.mrb[4].mxu1 %vm442_vm0, %v1625_v13 }
  0x23   : > { %1537 = vmatprep.mubr.msk.bf16.mxu0 %vm442_vm0, %v1626_v14  ;;  %1569 = vmatprep.mubr.msk.bf16.mxu1 %vm442_vm0, %v1627_v15 }
  0x2a   : > { %1538 = vmatmul.mubr.msk.bf16.gmra.mrb[8].mxu0 %vm442_vm0, %v1628_v16  ;;  %1570 = vmatmul.mubr.msk.bf16.gmra.mrb[8].mxu1 %vm442_vm0, %v1629_v17 }
  0x2b   : > { %1541 = vmatprep.mubr.msk.bf16.mxu0 %vm442_vm0, %v1630_v18  ;;  %1573 = vmatprep.mubr.msk.bf16.mxu1 %vm442_vm0, %v1631_v19 }
  0x32   : > { %1542 = vmatmul.mubr.msk.bf16.gmra.mrb[12].mxu0 %vm442_vm0, %v1632_v20  ;;  %1574 = vmatmul.mubr.msk.bf16.gmra.mrb[12].mxu1 %vm442_vm0, %v1633_v21 }
  0x33   : > { %1545 = vmatprep.mubr.msk.bf16.mxu0 %vm442_vm0, %v1634_v22  ;;  %1577 = vmatprep.mubr.msk.bf16.mxu1 %vm442_vm0, %v1635_v23 }
  0x3a   : > { %1546 = vmatmul.mubr.msk.bf16.gmra.mrb[16].mxu0 %vm442_vm0, %v1636_v24  ;;  %1578 = vmatmul.mubr.msk.bf16.gmra.mrb[16].mxu1 %vm442_vm0, %v1637_v25 }
  0x3b   : > { %1549 = vmatprep.mubr.msk.bf16.mxu0 %vm442_vm0, %v1638_v26  ;;  %1581 = vmatprep.mubr.msk.bf16.mxu1 %vm442_vm0, %v1639_v27 }
  0x42   : > { %1550 = vmatmul.mubr.msk.bf16.gmra.mrb[20].mxu0 %vm442_vm0, %v1640_v28  ;;  %1582 = vmatmul.mubr.msk.bf16.gmra.mrb[20].mxu1 %vm442_vm0, %v1641_v29 }
  0x43   : > { %1553 = vmatprep.mubr.msk.bf16.mxu0 %vm442_vm0, %v1642_v30  ;;  %1585 = vmatprep.mubr.msk.bf16.mxu1 %vm442_vm0, %v1643_v31 }
  0x4a   : > { %1554 = vmatmul.mubr.msk.bf16.gmra.mrb[24].mxu0 %vm442_vm0, %v1644_v32  ;;  %1586 = vmatmul.mubr.msk.bf16.gmra.mrb[24].mxu1 %vm442_vm0, %v1645_v33 }
  0x4b   : > { %1557 = vmatprep.mubr.msk.bf16.mxu0 %vm442_vm0, %v1646_v34  ;;  %1589 = vmatprep.mubr.msk.bf16.mxu1 %vm442_vm0, %v1647_v35 }
  0x52   : > { %1558 = vmatmul.mubr.msk.bf16.gmra.mrb[28].mxu0 %vm442_vm0, %v1648_v36  ;;  %1590 = vmatmul.mubr.msk.bf16.gmra.mrb[28].mxu1 %vm442_vm0, %v1649_v37 }
  0xed   : > { %v1531_v39 = vpop.f32.mrb[0].mxu0  ;;  %v1563_v40 = vpop.f32.mrb[0].mxu1 }
  0xee   : > { %v586_v41 = vadd.f32 %v1531_v39, %v1778_v38  ;;  %v714_v42 = vadd.f32 %v1563_v40, %v1778_v38  ;;  %v577_v43 = vpop.f32.mrb[1].mxu0  ;;  %v705_v44 = vpop.f32.mrb[1].mxu1 }
  0xef   : > { %v578_v45 = vadd.f32 %v1778_v38, %v577_v43  ;;  %v706_v46 = vadd.f32 %v1778_v38, %v705_v44  ;;  %v1532_v47 = vpop.f32.mrb[2].mxu0  ;;  %v1564_v48 = vpop.f32.mrb[2].mxu1 }
  0xf0   : > { %v834_v49 = vmax.f32 %v586_v41, 0.0  ;;  %v866_v50 = vmax.f32 %v714_v42, 0.0  ;;  %v589_v51 = vadd.f32 %v1532_v47, %v1778_v38  ;;  %v717_v52 = vadd.f32 %v1564_v48, %v1778_v38  ;;  %v580_v53 = vpop.f32.mrb[3].mxu0  ;;  %v708_v54 = vpop.f32.mrb[3].mxu1 }
  0xf1   : > { %v832_v55 = vmax.f32 %v578_v45, 0.0  ;;  %v864_v56 = vmax.f32 %v706_v46, 0.0  ;;  %v581_v57 = vadd.f32 %v1778_v38, %v580_v53  ;;  %v709_v58 = vadd.f32 %v1778_v38, %v708_v54 }
  0xf2   : > { %v1420_v59 = vpack.c.bf16 %v834_v49, %v834_v49  ;;  %v1452_v60 = vpack.c.bf16 %v866_v50, %v866_v50  ;;  %v835_v61 = vmax.f32 %v589_v51, 0.0  ;;  %v867_v62 = vmax.f32 %v717_v52, 0.0 }
  0xf3   : > { %v1418_v63 = vpack.c.bf16 %v832_v55, %v832_v55  ;;  %v1450_v0 = vpack.c.bf16 %v864_v56, %v864_v56  ;;  %v833_v1 = vmax.f32 %v581_v57, 0.0  ;;  %v865_v2 = vmax.f32 %v709_v58, 0.0 }
  0xf4   : > { %1155 = vst.msk [vmem:[%s1791_s6 + $0x8] sm:$0xf] %vm1152_vm2, %v1420_v59  ;;  %1187 = vst.msk [vmem:[%s1791_s6 + $0x88] sm:$0xf] %vm1152_vm2, %v1452_v60  ;;  %v1421_v3 = vpack.c.bf16 %v835_v61, %v835_v61  ;;  %v1453_v4 = vpack.c.bf16 %v867_v62, %v867_v62 }
  0xf5   : > { %1153 = vst.msk [vmem:[%s1791_s6] sm:$0xf] %vm1152_vm2, %v1418_v63  ;;  %1185 = vst.msk [vmem:[%s1791_s6 + $0x80] sm:$0xf] %vm1152_vm2, %v1450_v0  ;;  %v1419_v5 = vpack.c.bf16 %v833_v1, %v833_v1  ;;  %v1451_v6 = vpack.c.bf16 %v865_v2, %v865_v2  ;;  %v1535_v7 = vpop.f32.mrb[4].mxu0  ;;  %v1567_v8 = vpop.f32.mrb[4].mxu1 }
  0xf6   : > { %1156 = vst.msk [vmem:[%s1791_s6 + $0xc] sm:$0xf] %vm1152_vm2, %v1421_v3  ;;  %1188 = vst.msk [vmem:[%s1791_s6 + $0x8c] sm:$0xf] %vm1152_vm2, %v1453_v4  ;;  %v602_v9 = vadd.f32 %v1535_v7, %v1778_v38  ;;  %v730_v10 = vadd.f32 %v1567_v8, %v1778_v38  ;;  %v593_v11 = vpop.f32.mrb[5].mxu0  ;;  %v721_v12 = vpop.f32.mrb[5].mxu1 }
  0xf7   : > { %1154 = vst.msk [vmem:[%s1791_s6 + $0x4] sm:$0xf] %vm1152_vm2, %v1419_v5  ;;  %1186 = vst.msk [vmem:[%s1791_s6 + $0x84] sm:$0xf] %vm1152_vm2, %v1451_v6  ;;  %v594_v13 = vadd.f32 %v1778_v38, %v593_v11  ;;  %v722_v14 = vadd.f32 %v1778_v38, %v721_v12  ;;  %v1536_v15 = vpop.f32.mrb[6].mxu0  ;;  %v1568_v16 = vpop.f32.mrb[6].mxu1 }
  0xf8   : > { %v838_v17 = vmax.f32 %v602_v9, 0.0  ;;  %v870_v18 = vmax.f32 %v730_v10, 0.0  ;;  %v605_v19 = vadd.f32 %v1536_v15, %v1778_v38  ;;  %v733_v20 = vadd.f32 %v1568_v16, %v1778_v38  ;;  %v596_v21 = vpop.f32.mrb[7].mxu0  ;;  %v724_v22 = vpop.f32.mrb[7].mxu1 }
  0xf9   : > { %v836_v23 = vmax.f32 %v594_v13, 0.0  ;;  %v868_v24 = vmax.f32 %v722_v14, 0.0  ;;  %v597_v25 = vadd.f32 %v1778_v38, %v596_v21  ;;  %v725_v26 = vadd.f32 %v1778_v38, %v724_v22 }
  0xfa   : > { %v1424_v27 = vpack.c.bf16 %v838_v17, %v838_v17  ;;  %v1456_v28 = vpack.c.bf16 %v870_v18, %v870_v18  ;;  %v839_v29 = vmax.f32 %v605_v19, 0.0  ;;  %v871_v30 = vmax.f32 %v733_v20, 0.0 }
  0xfb   : > { %v1422_v31 = vpack.c.bf16 %v836_v23, %v836_v23  ;;  %v1454_v32 = vpack.c.bf16 %v868_v24, %v868_v24  ;;  %v837_v33 = vmax.f32 %v597_v25, 0.0  ;;  %v869_v34 = vmax.f32 %v725_v26, 0.0 }
  0xfc   : > { %1159 = vst.msk [vmem:[%s1791_s6 + $0x18] sm:$0xf] %vm1152_vm2, %v1424_v27  ;;  %1191 = vst.msk [vmem:[%s1791_s6 + $0x98] sm:$0xf] %vm1152_vm2, %v1456_v28  ;;  %v1425_v35 = vpack.c.bf16 %v839_v29, %v839_v29  ;;  %v1457_v36 = vpack.c.bf16 %v871_v30, %v871_v30 }
  0xfd   : > { %1157 = vst.msk [vmem:[%s1791_s6 + $0x10] sm:$0xf] %vm1152_vm2, %v1422_v31  ;;  %1189 = vst.msk [vmem:[%s1791_s6 + $0x90] sm:$0xf] %vm1152_vm2, %v1454_v32  ;;  %v1423_v37 = vpack.c.bf16 %v837_v33, %v837_v33  ;;  %v1455_v39 = vpack.c.bf16 %v869_v34, %v869_v34  ;;  %v1539_v40 = vpop.f32.mrb[8].mxu0  ;;  %v1571_v41 = vpop.f32.mrb[8].mxu1 }
  0xfe   : > { %1160 = vst.msk [vmem:[%s1791_s6 + $0x1c] sm:$0xf] %vm1152_vm2, %v1425_v35  ;;  %1192 = vst.msk [vmem:[%s1791_s6 + $0x9c] sm:$0xf] %vm1152_vm2, %v1457_v36  ;;  %v618_v42 = vadd.f32 %v1539_v40, %v1778_v38  ;;  %v746_v43 = vadd.f32 %v1571_v41, %v1778_v38  ;;  %v609_v44 = vpop.f32.mrb[9].mxu0  ;;  %v737_v45 = vpop.f32.mrb[9].mxu1 }
  0xff   : > { %1158 = vst.msk [vmem:[%s1791_s6 + $0x14] sm:$0xf] %vm1152_vm2, %v1423_v37  ;;  %1190 = vst.msk [vmem:[%s1791_s6 + $0x94] sm:$0xf] %vm1152_vm2, %v1455_v39  ;;  %v610_v46 = vadd.f32 %v1778_v38, %v609_v44  ;;  %v738_v47 = vadd.f32 %v1778_v38, %v737_v45  ;;  %v1540_v48 = vpop.f32.mrb[10].mxu0  ;;  %v1572_v49 = vpop.f32.mrb[10].mxu1 }
 0x100   : > { %v842_v50 = vmax.f32 %v618_v42, 0.0  ;;  %v874_v51 = vmax.f32 %v746_v43, 0.0  ;;  %v621_v52 = vadd.f32 %v1540_v48, %v1778_v38  ;;  %v749_v53 = vadd.f32 %v1572_v49, %v1778_v38  ;;  %v612_v54 = vpop.f32.mrb[11].mxu0  ;;  %v740_v55 = vpop.f32.mrb[11].mxu1 }
 0x101   : > { %v840_v56 = vmax.f32 %v610_v46, 0.0  ;;  %v872_v57 = vmax.f32 %v738_v47, 0.0  ;;  %v613_v58 = vadd.f32 %v1778_v38, %v612_v54  ;;  %v741_v59 = vadd.f32 %v1778_v38, %v740_v55 }
 0x102   : > { %v1428_v60 = vpack.c.bf16 %v842_v50, %v842_v50  ;;  %v1460_v61 = vpack.c.bf16 %v874_v51, %v874_v51  ;;  %v843_v62 = vmax.f32 %v621_v52, 0.0  ;;  %v875_v63 = vmax.f32 %v749_v53, 0.0 }
 0x103   : > { %v1426_v0 = vpack.c.bf16 %v840_v56, %v840_v56  ;;  %v1458_v1 = vpack.c.bf16 %v872_v57, %v872_v57  ;;  %v841_v2 = vmax.f32 %v613_v58, 0.0  ;;  %v873_v3 = vmax.f32 %v741_v59, 0.0 }
 0x104   : > { %1163 = vst.msk [vmem:[%s1791_s6 + $0x28] sm:$0xf] %vm1152_vm2, %v1428_v60  ;;  %1195 = vst.msk [vmem:[%s1791_s6 + $0xa8] sm:$0xf] %vm1152_vm2, %v1460_v61  ;;  %v1429_v4 = vpack.c.bf16 %v843_v62, %v843_v62  ;;  %v1461_v5 = vpack.c.bf16 %v875_v63, %v875_v63 }
 0x105   : > { %1161 = vst.msk [vmem:[%s1791_s6 + $0x20] sm:$0xf] %vm1152_vm2, %v1426_v0  ;;  %1193 = vst.msk [vmem:[%s1791_s6 + $0xa0] sm:$0xf] %vm1152_vm2, %v1458_v1  ;;  %v1427_v6 = vpack.c.bf16 %v841_v2, %v841_v2  ;;  %v1459_v7 = vpack.c.bf16 %v873_v3, %v873_v3  ;;  %v1543_v8 = vpop.f32.mrb[12].mxu0  ;;  %v1575_v9 = vpop.f32.mrb[12].mxu1 }
 0x106   : > { %1164 = vst.msk [vmem:[%s1791_s6 + $0x2c] sm:$0xf] %vm1152_vm2, %v1429_v4  ;;  %1196 = vst.msk [vmem:[%s1791_s6 + $0xac] sm:$0xf] %vm1152_vm2, %v1461_v5  ;;  %v634_v10 = vadd.f32 %v1543_v8, %v1778_v38  ;;  %v762_v11 = vadd.f32 %v1575_v9, %v1778_v38  ;;  %v625_v12 = vpop.f32.mrb[13].mxu0  ;;  %v753_v13 = vpop.f32.mrb[13].mxu1 }
 0x107   : > { %1162 = vst.msk [vmem:[%s1791_s6 + $0x24] sm:$0xf] %vm1152_vm2, %v1427_v6  ;;  %1194 = vst.msk [vmem:[%s1791_s6 + $0xa4] sm:$0xf] %vm1152_vm2, %v1459_v7  ;;  %v626_v14 = vadd.f32 %v1778_v38, %v625_v12  ;;  %v754_v15 = vadd.f32 %v1778_v38, %v753_v13  ;;  %v1544_v16 = vpop.f32.mrb[14].mxu0  ;;  %v1576_v17 = vpop.f32.mrb[14].mxu1 }
 0x108   : > { %v846_v18 = vmax.f32 %v634_v10, 0.0  ;;  %v878_v19 = vmax.f32 %v762_v11, 0.0  ;;  %v637_v20 = vadd.f32 %v1544_v16, %v1778_v38  ;;  %v765_v21 = vadd.f32 %v1576_v17, %v1778_v38  ;;  %v628_v22 = vpop.f32.mrb[15].mxu0  ;;  %v756_v23 = vpop.f32.mrb[15].mxu1 }
 0x109   : > { %v844_v24 = vmax.f32 %v626_v14, 0.0  ;;  %v876_v25 = vmax.f32 %v754_v15, 0.0  ;;  %v629_v26 = vadd.f32 %v1778_v38, %v628_v22  ;;  %v757_v27 = vadd.f32 %v1778_v38, %v756_v23 }
 0x10a   : > { %v1432_v28 = vpack.c.bf16 %v846_v18, %v846_v18  ;;  %v1464_v29 = vpack.c.bf16 %v878_v19, %v878_v19  ;;  %v847_v30 = vmax.f32 %v637_v20, 0.0  ;;  %v879_v31 = vmax.f32 %v765_v21, 0.0 }
 0x10b   : > { %v1430_v32 = vpack.c.bf16 %v844_v24, %v844_v24  ;;  %v1462_v33 = vpack.c.bf16 %v876_v25, %v876_v25  ;;  %v845_v34 = vmax.f32 %v629_v26, 0.0  ;;  %v877_v35 = vmax.f32 %v757_v27, 0.0 }
 0x10c   : > { %1167 = vst.msk [vmem:[%s1791_s6 + $0x38] sm:$0xf] %vm1152_vm2, %v1432_v28  ;;  %1199 = vst.msk [vmem:[%s1791_s6 + $0xb8] sm:$0xf] %vm1152_vm2, %v1464_v29  ;;  %v1433_v36 = vpack.c.bf16 %v847_v30, %v847_v30  ;;  %v1465_v37 = vpack.c.bf16 %v879_v31, %v879_v31 }
 0x10d   : > { %1165 = vst.msk [vmem:[%s1791_s6 + $0x30] sm:$0xf] %vm1152_vm2, %v1430_v32  ;;  %1197 = vst.msk [vmem:[%s1791_s6 + $0xb0] sm:$0xf] %vm1152_vm2, %v1462_v33  ;;  %v1431_v39 = vpack.c.bf16 %v845_v34, %v845_v34  ;;  %v1463_v40 = vpack.c.bf16 %v877_v35, %v877_v35  ;;  %v1547_v41 = vpop.f32.mrb[16].mxu0  ;;  %v1579_v42 = vpop.f32.mrb[16].mxu1 }
 0x10e   : > { %1168 = vst.msk [vmem:[%s1791_s6 + $0x3c] sm:$0xf] %vm1152_vm2, %v1433_v36  ;;  %1200 = vst.msk [vmem:[%s1791_s6 + $0xbc] sm:$0xf] %vm1152_vm2, %v1465_v37  ;;  %v650_v43 = vadd.f32 %v1547_v41, %v1778_v38  ;;  %v778_v44 = vadd.f32 %v1579_v42, %v1778_v38  ;;  %v641_v45 = vpop.f32.mrb[17].mxu0  ;;  %v769_v46 = vpop.f32.mrb[17].mxu1 }
 0x10f   : > { %1166 = vst.msk [vmem:[%s1791_s6 + $0x34] sm:$0xf] %vm1152_vm2, %v1431_v39  ;;  %1198 = vst.msk [vmem:[%s1791_s6 + $0xb4] sm:$0xf] %vm1152_vm2, %v1463_v40  ;;  %v642_v47 = vadd.f32 %v1778_v38, %v641_v45  ;;  %v770_v48 = vadd.f32 %v1778_v38, %v769_v46  ;;  %v1548_v49 = vpop.f32.mrb[18].mxu0  ;;  %v1580_v50 = vpop.f32.mrb[18].mxu1 }
 0x110   : > { %v850_v51 = vmax.f32 %v650_v43, 0.0  ;;  %v882_v52 = vmax.f32 %v778_v44, 0.0  ;;  %v653_v53 = vadd.f32 %v1548_v49, %v1778_v38  ;;  %v781_v54 = vadd.f32 %v1580_v50, %v1778_v38  ;;  %v644_v55 = vpop.f32.mrb[19].mxu0  ;;  %v772_v56 = vpop.f32.mrb[19].mxu1 }
 0x111   : > { %v848_v57 = vmax.f32 %v642_v47, 0.0  ;;  %v880_v58 = vmax.f32 %v770_v48, 0.0  ;;  %v645_v59 = vadd.f32 %v1778_v38, %v644_v55  ;;  %v773_v60 = vadd.f32 %v1778_v38, %v772_v56 }
 0x112   : > { %v1436_v61 = vpack.c.bf16 %v850_v51, %v850_v51  ;;  %v1468_v62 = vpack.c.bf16 %v882_v52, %v882_v52  ;;  %v851_v63 = vmax.f32 %v653_v53, 0.0  ;;  %v883_v0 = vmax.f32 %v781_v54, 0.0 }
 0x113   : > { %v1434_v1 = vpack.c.bf16 %v848_v57, %v848_v57  ;;  %v1466_v2 = vpack.c.bf16 %v880_v58, %v880_v58  ;;  %v849_v3 = vmax.f32 %v645_v59, 0.0  ;;  %v881_v4 = vmax.f32 %v773_v60, 0.0 }
 0x114   : > { %1171 = vst.msk [vmem:[%s1791_s6 + $0x48] sm:$0xf] %vm1152_vm2, %v1436_v61  ;;  %1203 = vst.msk [vmem:[%s1791_s6 + $0xc8] sm:$0xf] %vm1152_vm2, %v1468_v62  ;;  %v1437_v5 = vpack.c.bf16 %v851_v63, %v851_v63  ;;  %v1469_v6 = vpack.c.bf16 %v883_v0, %v883_v0 }
 0x115   : > { %1169 = vst.msk [vmem:[%s1791_s6 + $0x40] sm:$0xf] %vm1152_vm2, %v1434_v1  ;;  %1201 = vst.msk [vmem:[%s1791_s6 + $0xc0] sm:$0xf] %vm1152_vm2, %v1466_v2  ;;  %v1435_v7 = vpack.c.bf16 %v849_v3, %v849_v3  ;;  %v1467_v8 = vpack.c.bf16 %v881_v4, %v881_v4  ;;  %v1551_v9 = vpop.f32.mrb[20].mxu0  ;;  %v1583_v10 = vpop.f32.mrb[20].mxu1 }
 0x116   : > { %1172 = vst.msk [vmem:[%s1791_s6 + $0x4c] sm:$0xf] %vm1152_vm2, %v1437_v5  ;;  %1204 = vst.msk [vmem:[%s1791_s6 + $0xcc] sm:$0xf] %vm1152_vm2, %v1469_v6  ;;  %v666_v11 = vadd.f32 %v1551_v9, %v1778_v38  ;;  %v794_v12 = vadd.f32 %v1583_v10, %v1778_v38  ;;  %v657_v13 = vpop.f32.mrb[21].mxu0  ;;  %v785_v14 = vpop.f32.mrb[21].mxu1 }
 0x117   : > { %1170 = vst.msk [vmem:[%s1791_s6 + $0x44] sm:$0xf] %vm1152_vm2, %v1435_v7  ;;  %1202 = vst.msk [vmem:[%s1791_s6 + $0xc4] sm:$0xf] %vm1152_vm2, %v1467_v8  ;;  %v658_v15 = vadd.f32 %v1778_v38, %v657_v13  ;;  %v786_v16 = vadd.f32 %v1778_v38, %v785_v14  ;;  %v1552_v17 = vpop.f32.mrb[22].mxu0  ;;  %v1584_v18 = vpop.f32.mrb[22].mxu1 }
 0x118   : > { %v854_v19 = vmax.f32 %v666_v11, 0.0  ;;  %v886_v20 = vmax.f32 %v794_v12, 0.0  ;;  %v669_v21 = vadd.f32 %v1552_v17, %v1778_v38  ;;  %v797_v22 = vadd.f32 %v1584_v18, %v1778_v38  ;;  %v660_v23 = vpop.f32.mrb[23].mxu0  ;;  %v788_v24 = vpop.f32.mrb[23].mxu1 }
 0x119   : > { %v852_v25 = vmax.f32 %v658_v15, 0.0  ;;  %v884_v26 = vmax.f32 %v786_v16, 0.0  ;;  %v661_v27 = vadd.f32 %v1778_v38, %v660_v23  ;;  %v789_v28 = vadd.f32 %v1778_v38, %v788_v24 }
 0x11a   : > { %v1440_v29 = vpack.c.bf16 %v854_v19, %v854_v19  ;;  %v1472_v30 = vpack.c.bf16 %v886_v20, %v886_v20  ;;  %v855_v31 = vmax.f32 %v669_v21, 0.0  ;;  %v887_v32 = vmax.f32 %v797_v22, 0.0 }
 0x11b   : > { %v1438_v33 = vpack.c.bf16 %v852_v25, %v852_v25  ;;  %v1470_v34 = vpack.c.bf16 %v884_v26, %v884_v26  ;;  %v853_v35 = vmax.f32 %v661_v27, 0.0  ;;  %v885_v36 = vmax.f32 %v789_v28, 0.0 }
 0x11c   : > { %1175 = vst.msk [vmem:[%s1791_s6 + $0x58] sm:$0xf] %vm1152_vm2, %v1440_v29  ;;  %1207 = vst.msk [vmem:[%s1791_s6 + $0xd8] sm:$0xf] %vm1152_vm2, %v1472_v30  ;;  %v1441_v37 = vpack.c.bf16 %v855_v31, %v855_v31  ;;  %v1473_v39 = vpack.c.bf16 %v887_v32, %v887_v32 }
 0x11d   : > { %1173 = vst.msk [vmem:[%s1791_s6 + $0x50] sm:$0xf] %vm1152_vm2, %v1438_v33  ;;  %1205 = vst.msk [vmem:[%s1791_s6 + $0xd0] sm:$0xf] %vm1152_vm2, %v1470_v34  ;;  %v1439_v40 = vpack.c.bf16 %v853_v35, %v853_v35  ;;  %v1471_v41 = vpack.c.bf16 %v885_v36, %v885_v36  ;;  %v1555_v42 = vpop.f32.mrb[24].mxu0  ;;  %v1587_v43 = vpop.f32.mrb[24].mxu1 }
 0x11e   : > { %1176 = vst.msk [vmem:[%s1791_s6 + $0x5c] sm:$0xf] %vm1152_vm2, %v1441_v37  ;;  %1208 = vst.msk [vmem:[%s1791_s6 + $0xdc] sm:$0xf] %vm1152_vm2, %v1473_v39  ;;  %v682_v44 = vadd.f32 %v1555_v42, %v1778_v38  ;;  %v810_v45 = vadd.f32 %v1587_v43, %v1778_v38  ;;  %v673_v46 = vpop.f32.mrb[25].mxu0  ;;  %v801_v47 = vpop.f32.mrb[25].mxu1 }
 0x11f   : > { %1174 = vst.msk [vmem:[%s1791_s6 + $0x54] sm:$0xf] %vm1152_vm2, %v1439_v40  ;;  %1206 = vst.msk [vmem:[%s1791_s6 + $0xd4] sm:$0xf] %vm1152_vm2, %v1471_v41  ;;  %v674_v48 = vadd.f32 %v1778_v38, %v673_v46  ;;  %v802_v49 = vadd.f32 %v1778_v38, %v801_v47  ;;  %v1556_v50 = vpop.f32.mrb[26].mxu0  ;;  %v1588_v51 = vpop.f32.mrb[26].mxu1 }
 0x120   : > { %v858_v52 = vmax.f32 %v682_v44, 0.0  ;;  %v890_v53 = vmax.f32 %v810_v45, 0.0  ;;  %v685_v54 = vadd.f32 %v1556_v50, %v1778_v38  ;;  %v813_v55 = vadd.f32 %v1588_v51, %v1778_v38  ;;  %v676_v56 = vpop.f32.mrb[27].mxu0  ;;  %v804_v57 = vpop.f32.mrb[27].mxu1 }
 0x121   : > { %v856_v58 = vmax.f32 %v674_v48, 0.0  ;;  %v888_v59 = vmax.f32 %v802_v49, 0.0  ;;  %v677_v60 = vadd.f32 %v1778_v38, %v676_v56  ;;  %v805_v61 = vadd.f32 %v1778_v38, %v804_v57 }
 0x122   : > { %v1444_v62 = vpack.c.bf16 %v858_v52, %v858_v52  ;;  %v1476_v63 = vpack.c.bf16 %v890_v53, %v890_v53  ;;  %v859_v0 = vmax.f32 %v685_v54, 0.0  ;;  %v891_v1 = vmax.f32 %v813_v55, 0.0 }
 0x123   : > { %v1442_v2 = vpack.c.bf16 %v856_v58, %v856_v58  ;;  %v1474_v3 = vpack.c.bf16 %v888_v59, %v888_v59  ;;  %v857_v4 = vmax.f32 %v677_v60, 0.0  ;;  %v889_v5 = vmax.f32 %v805_v61, 0.0 }
 0x124   : > { %1179 = vst.msk [vmem:[%s1791_s6 + $0x68] sm:$0xf] %vm1152_vm2, %v1444_v62  ;;  %1211 = vst.msk [vmem:[%s1791_s6 + $0xe8] sm:$0xf] %vm1152_vm2, %v1476_v63  ;;  %v1445_v6 = vpack.c.bf16 %v859_v0, %v859_v0  ;;  %v1477_v7 = vpack.c.bf16 %v891_v1, %v891_v1 }
 0x125   : > { %1177 = vst.msk [vmem:[%s1791_s6 + $0x60] sm:$0xf] %vm1152_vm2, %v1442_v2  ;;  %1209 = vst.msk [vmem:[%s1791_s6 + $0xe0] sm:$0xf] %vm1152_vm2, %v1474_v3  ;;  %v1443_v8 = vpack.c.bf16 %v857_v4, %v857_v4  ;;  %v1475_v9 = vpack.c.bf16 %v889_v5, %v889_v5  ;;  %v1559_v10 = vpop.f32.mrb[28].mxu0  ;;  %v1591_v11 = vpop.f32.mrb[28].mxu1 }
 0x126   : > { %1180 = vst.msk [vmem:[%s1791_s6 + $0x6c] sm:$0xf] %vm1152_vm2, %v1445_v6  ;;  %1212 = vst.msk [vmem:[%s1791_s6 + $0xec] sm:$0xf] %vm1152_vm2, %v1477_v7  ;;  %v698_v12 = vadd.f32 %v1559_v10, %v1778_v38  ;;  %v826_v13 = vadd.f32 %v1591_v11, %v1778_v38  ;;  %v689_v14 = vpop.f32.mrb[29].mxu0  ;;  %v817_v15 = vpop.f32.mrb[29].mxu1 }
 0x127   : > { %1178 = vst.msk [vmem:[%s1791_s6 + $0x64] sm:$0xf] %vm1152_vm2, %v1443_v8  ;;  %1210 = vst.msk [vmem:[%s1791_s6 + $0xe4] sm:$0xf] %vm1152_vm2, %v1475_v9  ;;  %v690_v16 = vadd.f32 %v1778_v38, %v689_v14  ;;  %v818_v17 = vadd.f32 %v1778_v38, %v817_v15  ;;  %v1560_v18 = vpop.f32.mrb[30].mxu0  ;;  %v1592_v19 = vpop.f32.mrb[30].mxu1 }
 0x128   : > { %v862_v20 = vmax.f32 %v698_v12, 0.0  ;;  %v894_v21 = vmax.f32 %v826_v13, 0.0  ;;  %v701_v22 = vadd.f32 %v1560_v18, %v1778_v38  ;;  %v829_v23 = vadd.f32 %v1592_v19, %v1778_v38  ;;  %v692_v24 = vpop.f32.mrb[31].mxu0  ;;  %v820_v25 = vpop.f32.mrb[31].mxu1 }
 0x129   : > { %v860_v26 = vmax.f32 %v690_v16, 0.0  ;;  %v892_v27 = vmax.f32 %v818_v17, 0.0  ;;  %v693_v28 = vadd.f32 %v1778_v38, %v692_v24  ;;  %v821_v29 = vadd.f32 %v1778_v38, %v820_v25 }
 0x12a   : > { %v1448_v30 = vpack.c.bf16 %v862_v20, %v862_v20  ;;  %v1480_v31 = vpack.c.bf16 %v894_v21, %v894_v21  ;;  %v863_v32 = vmax.f32 %v701_v22, 0.0  ;;  %v895_v33 = vmax.f32 %v829_v23, 0.0 }
 0x12b   : > { %v1446_v34 = vpack.c.bf16 %v860_v26, %v860_v26  ;;  %v1478_v35 = vpack.c.bf16 %v892_v27, %v892_v27  ;;  %v861_v36 = vmax.f32 %v693_v28, 0.0  ;;  %v893_v37 = vmax.f32 %v821_v29, 0.0 }
 0x12c   : > { %1183 = vst.msk [vmem:[%s1791_s6 + $0x78] sm:$0xf] %vm1152_vm2, %v1448_v30  ;;  %1215 = vst.msk [vmem:[%s1791_s6 + $0xf8] sm:$0xf] %vm1152_vm2, %v1480_v31  ;;  %v1449_v39 = vpack.c.bf16 %v863_v32, %v863_v32  ;;  %v1481_v40 = vpack.c.bf16 %v895_v33, %v895_v33 }
 0x12d   : > { %1181 = vst.msk [vmem:[%s1791_s6 + $0x70] sm:$0xf] %vm1152_vm2, %v1446_v34  ;;  %1213 = vst.msk [vmem:[%s1791_s6 + $0xf0] sm:$0xf] %vm1152_vm2, %v1478_v35  ;;  %v1447_v38 = vpack.c.bf16 %v861_v36, %v861_v36  ;;  %v1479_v41 = vpack.c.bf16 %v893_v37, %v893_v37 }
 0x12e   : > { %1184 = vst.msk [vmem:[%s1791_s6 + $0x7c] sm:$0xf] %vm1152_vm2, %v1449_v39  ;;  %1216 = vst.msk [vmem:[%s1791_s6 + $0xfc] sm:$0xf] %vm1152_vm2, %v1481_v40 }
 0x12f   : > { %1182 = vst.msk [vmem:[%s1791_s6 + $0x74] sm:$0xf] %vm1152_vm2, %v1447_v38  ;;  %1214 = vst.msk [vmem:[%s1791_s6 + $0xf4] sm:$0xf] %vm1152_vm2, %v1479_v41 }
 0x130 PF: > { %s13_s12 = sadd.s32 1, %s1656_s12  }
 0x131   : > { %p10_p4 = scmp.ge.s32.totalorder %s13_s12, 6  }
 0x133   :  { %12 = sbr.rel (!%p10_p4) target bundleno = 1 (0x1), region = 62 }

// kernel: vgg16_relu7.22
= control target key start
LH: loop header
LB: loop body
LE: loop exit
PB: predicated region body
PF: predicated region fallthrough
CT: control target
= control target key end

     0   :  { %s590_s22 = smov 120   ;;  %vm520_vm0 = vcmask 60416   ;;  %s1561_s0 = inlined_call_operand.vmem [shape: bf16[32,2,16,16], index: 0, kind: input, shape index: {}]   ;;  %s1562_s1 = inlined_call_operand.vmem [shape: bf16[32,16,8], index: 1, kind: output, shape index: {}]  }
   0x1   :  { %v12_v0 = vld [vmem:[%s1561_s0 + $0x10] sm:$0xf]  ;;  %v14_v1 = vld [vmem:[%s1561_s0 + $0x18] sm:$0xf]  ;;  %v8_v2 = vld [vmem:[%s1561_s0] sm:$0xf] }
   0x2   :  { %v610_v3 = vmax.bf16 %v14_v1, %v12_v0  ;;  %v10_v4 = vld [vmem:[%s1561_s0 + $0x8] sm:$0xf]  ;;  %v13_v5 = vld [vmem:[%s1561_s0 + $0x14] sm:$0xf]  ;;  %v15_v6 = vld [vmem:[%s1561_s0 + $0x1c] sm:$0xf] }
   0x3   :  { %v621_v7 = vmax.bf16 %v10_v4, %v8_v2  ;;  %v9_v8 = vld [vmem:[%s1561_s0 + $0x4] sm:$0xf]  ;;  %v11_v9 = vld [vmem:[%s1561_s0 + $0xc] sm:$0xf]  ;;  %v631_v10 = vmax.bf16 %v15_v6, %v13_v5  ;;  %v16_v14 = vld [vmem:[%s1561_s0 + $0x20] sm:$0xf] }
   0x4   :  { %268 = vrot.lane.b32.xlu1 %v610_v3, %s590_s22  ;;  %v635_v11 = vmax.bf16 %v11_v9, %v9_v8  ;;  %v17_v12 = vld [vmem:[%s1561_s0 + $0x24] sm:$0xf]  ;;  %v19_v13 = vld [vmem:[%s1561_s0 + $0x2c] sm:$0xf]  ;;  %v18_v15 = vld [vmem:[%s1561_s0 + $0x28] sm:$0xf] }
   0x5   :  { %264 = vrot.lane.b32.xlu0 %v621_v7, %s590_s22  ;;  %v651_v16 = vmax.bf16 %v19_v13, %v17_v12  ;;  %v655_v17 = vmax.bf16 %v18_v15, %v16_v14  ;;  %v21_v18 = vld [vmem:[%s1561_s0 + $0x34] sm:$0xf]  ;;  %v23_v19 = vld [vmem:[%s1561_s0 + $0x3c] sm:$0xf]  ;;  %v20_v20 = vld [vmem:[%s1561_s0 + $0x30] sm:$0xf] }
   0x6   :  { %v22_v21 = vld [vmem:[%s1561_s0 + $0x38] sm:$0xf]  ;;  %v671_v22 = vmax.bf16 %v23_v19, %v21_v18  ;;  %v25_v24 = vld [vmem:[%s1561_s0 + $0x44] sm:$0xf]  ;;  %v27_v25 = vld [vmem:[%s1561_s0 + $0x4c] sm:$0xf] }
   0x7   :  { %v675_v23 = vmax.bf16 %v22_v21, %v20_v20  ;;  %v24_v26 = vld [vmem:[%s1561_s0 + $0x40] sm:$0xf]  ;;  %v26_v27 = vld [vmem:[%s1561_s0 + $0x48] sm:$0xf]  ;;  %v691_v28 = vmax.bf16 %v27_v25, %v25_v24  ;;  %v29_v30 = vld [vmem:[%s1561_s0 + $0x54] sm:$0xf] }
   0x8   :  { %270 = vrot.lane.b32.xlu1 %v631_v10, %s590_s22  ;;  %v695_v29 = vmax.bf16 %v26_v27, %v24_v26  ;;  %v31_v31 = vld [vmem:[%s1561_s0 + $0x5c] sm:$0xf]  ;;  %v28_v32 = vld [vmem:[%s1561_s0 + $0x50] sm:$0xf]  ;;  %v30_v33 = vld [vmem:[%s1561_s0 + $0x58] sm:$0xf] }
   0x9   :  { %266 = vrot.lane.b32.xlu0 %v635_v11, %s590_s22  ;;  %v711_v34 = vmax.bf16 %v31_v31, %v29_v30  ;;  %v715_v35 = vmax.bf16 %v30_v33, %v28_v32  ;;  %v33_v36 = vld [vmem:[%s1561_s0 + $0x64] sm:$0xf]  ;;  %v35_v37 = vld [vmem:[%s1561_s0 + $0x6c] sm:$0xf]  ;;  %v32_v38 = vld [vmem:[%s1561_s0 + $0x60] sm:$0xf] }
   0xa   :  { %v34_v39 = vld [vmem:[%s1561_s0 + $0x68] sm:$0xf]  ;;  %v731_v40 = vmax.bf16 %v35_v37, %v33_v36  ;;  %v37_v42 = vld [vmem:[%s1561_s0 + $0x74] sm:$0xf]  ;;  %v39_v43 = vld [vmem:[%s1561_s0 + $0x7c] sm:$0xf] }
   0xb   :  { %v735_v41 = vmax.bf16 %v34_v39, %v32_v38  ;;  %v36_v44 = vld [vmem:[%s1561_s0 + $0x70] sm:$0xf]  ;;  %v38_v45 = vld [vmem:[%s1561_s0 + $0x78] sm:$0xf]  ;;  %v751_v46 = vmax.bf16 %v39_v43, %v37_v42  ;;  %v41_v48 = vld [vmem:[%s1561_s0 + $0x84] sm:$0xf] }
   0xc   :  { %274 = vrot.lane.b32.xlu1 %v651_v16, %s590_s22  ;;  %v755_v47 = vmax.bf16 %v38_v45, %v36_v44  ;;  %v43_v49 = vld [vmem:[%s1561_s0 + $0x8c] sm:$0xf]  ;;  %v40_v50 = vld [vmem:[%s1561_s0 + $0x80] sm:$0xf]  ;;  %v42_v51 = vld [vmem:[%s1561_s0 + $0x88] sm:$0xf] }
   0xd   :  { %272 = vrot.lane.b32.xlu0 %v655_v17, %s590_s22  ;;  %v771_v52 = vmax.bf16 %v43_v49, %v41_v48  ;;  %v775_v53 = vmax.bf16 %v42_v51, %v40_v50  ;;  %v45_v54 = vld [vmem:[%s1561_s0 + $0x94] sm:$0xf]  ;;  %v47_v55 = vld [vmem:[%s1561_s0 + $0x9c] sm:$0xf]  ;;  %v44_v56 = vld [vmem:[%s1561_s0 + $0x90] sm:$0xf] }
   0xe   :  { %v46_v57 = vld [vmem:[%s1561_s0 + $0x98] sm:$0xf]  ;;  %v791_v58 = vmax.bf16 %v47_v55, %v45_v54  ;;  %v49_v60 = vld [vmem:[%s1561_s0 + $0xa4] sm:$0xf]  ;;  %v51_v61 = vld [vmem:[%s1561_s0 + $0xac] sm:$0xf] }
   0xf   :  { %v795_v59 = vmax.bf16 %v46_v57, %v44_v56  ;;  %v48_v62 = vld [vmem:[%s1561_s0 + $0xa0] sm:$0xf]  ;;  %v50_v63 = vld [vmem:[%s1561_s0 + $0xa8] sm:$0xf]  ;;  %v811_v0 = vmax.bf16 %v51_v61, %v49_v60  ;;  %v53_v2 = vld [vmem:[%s1561_s0 + $0xb4] sm:$0xf] }
  0x10   :  { %278 = vrot.lane.b32.xlu1 %v671_v22, %s590_s22  ;;  %v815_v1 = vmax.bf16 %v50_v63, %v48_v62  ;;  %v55_v4 = vld [vmem:[%s1561_s0 + $0xbc] sm:$0xf]  ;;  %v52_v5 = vld [vmem:[%s1561_s0 + $0xb0] sm:$0xf]  ;;  %v54_v6 = vld [vmem:[%s1561_s0 + $0xb8] sm:$0xf] }
  0x11   :  { %276 = vrot.lane.b32.xlu0 %v675_v23, %s590_s22  ;;  %v831_v8 = vmax.bf16 %v55_v4, %v53_v2  ;;  %v835_v9 = vmax.bf16 %v54_v6, %v52_v5  ;;  %v57_v12 = vld [vmem:[%s1561_s0 + $0xc4] sm:$0xf]  ;;  %v59_v13 = vld [vmem:[%s1561_s0 + $0xcc] sm:$0xf]  ;;  %v56_v14 = vld [vmem:[%s1561_s0 + $0xc0] sm:$0xf] }
  0x12   :  { %v58_v15 = vld [vmem:[%s1561_s0 + $0xc8] sm:$0xf]  ;;  %v851_v18 = vmax.bf16 %v59_v13, %v57_v12  ;;  %v61_v20 = vld [vmem:[%s1561_s0 + $0xd4] sm:$0xf]  ;;  %v63_v21 = vld [vmem:[%s1561_s0 + $0xdc] sm:$0xf] }
  0x13   :  { %v855_v19 = vmax.bf16 %v58_v15, %v56_v14  ;;  %v60_v24 = vld [vmem:[%s1561_s0 + $0xd0] sm:$0xf]  ;;  %v62_v25 = vld [vmem:[%s1561_s0 + $0xd8] sm:$0xf]  ;;  %v871_v26 = vmax.bf16 %v63_v21, %v61_v20  ;;  %v65_v30 = vld [vmem:[%s1561_s0 + $0xe4] sm:$0xf] }
  0x14   :  { %282 = vrot.lane.b32.xlu1 %v691_v28, %s590_s22  ;;  %v875_v27 = vmax.bf16 %v62_v25, %v60_v24  ;;  %v67_v31 = vld [vmem:[%s1561_s0 + $0xec] sm:$0xf]  ;;  %v64_v32 = vld [vmem:[%s1561_s0 + $0xe0] sm:$0xf]  ;;  %v66_v33 = vld [vmem:[%s1561_s0 + $0xe8] sm:$0xf] }
  0x15   :  { %280 = vrot.lane.b32.xlu0 %v695_v29, %s590_s22  ;;  %v891_v36 = vmax.bf16 %v67_v31, %v65_v30  ;;  %v895_v37 = vmax.bf16 %v66_v33, %v64_v32  ;;  %v69_v38 = vld [vmem:[%s1561_s0 + $0xf4] sm:$0xf]  ;;  %v71_v39 = vld [vmem:[%s1561_s0 + $0xfc] sm:$0xf]  ;;  %v68_v42 = vld [vmem:[%s1561_s0 + $0xf0] sm:$0xf] }
  0x16   :  { %v70_v43 = vld [vmem:[%s1561_s0 + $0xf8] sm:$0xf]  ;;  %v911_v44 = vmax.bf16 %v71_v39, %v69_v38  ;;  %v73_v48 = vld [vmem:[%s1561_s0 + $0x104] sm:$0xf]  ;;  %v75_v49 = vld [vmem:[%s1561_s0 + $0x10c] sm:$0xf] }
  0x17   :  { %v915_v45 = vmax.bf16 %v70_v43, %v68_v42  ;;  %v72_v50 = vld [vmem:[%s1561_s0 + $0x100] sm:$0xf]  ;;  %v74_v51 = vld [vmem:[%s1561_s0 + $0x108] sm:$0xf]  ;;  %v931_v54 = vmax.bf16 %v75_v49, %v73_v48  ;;  %v77_v56 = vld [vmem:[%s1561_s0 + $0x114] sm:$0xf] }
  0x18   :  { %286 = vrot.lane.b32.xlu1 %v711_v34, %s590_s22  ;;  %v935_v55 = vmax.bf16 %v74_v51, %v72_v50  ;;  %v79_v57 = vld [vmem:[%s1561_s0 + $0x11c] sm:$0xf]  ;;  %v76_v60 = vld [vmem:[%s1561_s0 + $0x110] sm:$0xf]  ;;  %v78_v61 = vld [vmem:[%s1561_s0 + $0x118] sm:$0xf] }
  0x19   :  { %284 = vrot.lane.b32.xlu0 %v715_v35, %s590_s22  ;;  %v951_v62 = vmax.bf16 %v79_v57, %v77_v56  ;;  %v955_v63 = vmax.bf16 %v78_v61, %v76_v60  ;;  %v81_v2 = vld [vmem:[%s1561_s0 + $0x124] sm:$0xf]  ;;  %v83_v4 = vld [vmem:[%s1561_s0 + $0x12c] sm:$0xf]  ;;  %v80_v5 = vld [vmem:[%s1561_s0 + $0x120] sm:$0xf] }
  0x1a   :  { %v82_v6 = vld [vmem:[%s1561_s0 + $0x128] sm:$0xf]  ;;  %v971_v12 = vmax.bf16 %v83_v4, %v81_v2  ;;  %v85_v14 = vld [vmem:[%s1561_s0 + $0x134] sm:$0xf]  ;;  %v87_v15 = vld [vmem:[%s1561_s0 + $0x13c] sm:$0xf] }
  0x1b   :  { %v975_v13 = vmax.bf16 %v82_v6, %v80_v5  ;;  %v84_v20 = vld [vmem:[%s1561_s0 + $0x130] sm:$0xf]  ;;  %v86_v21 = vld [vmem:[%s1561_s0 + $0x138] sm:$0xf]  ;;  %v991_v24 = vmax.bf16 %v87_v15, %v85_v14  ;;  %v89_v30 = vld [vmem:[%s1561_s0 + $0x144] sm:$0xf] }
  0x1c   :  { %290 = vrot.lane.b32.xlu1 %v731_v40, %s590_s22  ;;  %v995_v25 = vmax.bf16 %v86_v21, %v84_v20  ;;  %v91_v31 = vld [vmem:[%s1561_s0 + $0x14c] sm:$0xf]  ;;  %v88_v32 = vld [vmem:[%s1561_s0 + $0x140] sm:$0xf]  ;;  %v90_v33 = vld [vmem:[%s1561_s0 + $0x148] sm:$0xf] }
  0x1d   :  { %288 = vrot.lane.b32.xlu0 %v735_v41, %s590_s22  ;;  %v1011_v38 = vmax.bf16 %v91_v31, %v89_v30  ;;  %v1015_v39 = vmax.bf16 %v90_v33, %v88_v32  ;;  %v93_v42 = vld [vmem:[%s1561_s0 + $0x154] sm:$0xf]  ;;  %v95_v43 = vld [vmem:[%s1561_s0 + $0x15c] sm:$0xf]  ;;  %v92_v48 = vld [vmem:[%s1561_s0 + $0x150] sm:$0xf] }
  0x1e   :  { %v94_v49 = vld [vmem:[%s1561_s0 + $0x158] sm:$0xf]  ;;  %v1031_v50 = vmax.bf16 %v95_v43, %v93_v42  ;;  %v97_v56 = vld [vmem:[%s1561_s0 + $0x164] sm:$0xf]  ;;  %v99_v57 = vld [vmem:[%s1561_s0 + $0x16c] sm:$0xf] }
  0x1f   :  { %v1035_v51 = vmax.bf16 %v94_v49, %v92_v48  ;;  %v96_v60 = vld [vmem:[%s1561_s0 + $0x160] sm:$0xf]  ;;  %v98_v61 = vld [vmem:[%s1561_s0 + $0x168] sm:$0xf]  ;;  %v1051_v2 = vmax.bf16 %v99_v57, %v97_v56  ;;  %v101_v5 = vld [vmem:[%s1561_s0 + $0x174] sm:$0xf] }
  0x20   :  { %294 = vrot.lane.b32.xlu1 %v751_v46, %s590_s22  ;;  %v1055_v4 = vmax.bf16 %v98_v61, %v96_v60  ;;  %v103_v6 = vld [vmem:[%s1561_s0 + $0x17c] sm:$0xf]  ;;  %v100_v14 = vld [vmem:[%s1561_s0 + $0x170] sm:$0xf]  ;;  %v102_v15 = vld [vmem:[%s1561_s0 + $0x178] sm:$0xf] }
  0x21   :  { %292 = vrot.lane.b32.xlu0 %v755_v47, %s590_s22  ;;  %v1071_v20 = vmax.bf16 %v103_v6, %v101_v5  ;;  %v1075_v21 = vmax.bf16 %v102_v15, %v100_v14  ;;  %v105_v30 = vld [vmem:[%s1561_s0 + $0x184] sm:$0xf]  ;;  %v107_v31 = vld [vmem:[%s1561_s0 + $0x18c] sm:$0xf]  ;;  %v104_v32 = vld [vmem:[%s1561_s0 + $0x180] sm:$0xf] }
  0x22   :  { %v106_v33 = vld [vmem:[%s1561_s0 + $0x188] sm:$0xf]  ;;  %v1091_v42 = vmax.bf16 %v107_v31, %v105_v30  ;;  %v109_v48 = vld [vmem:[%s1561_s0 + $0x194] sm:$0xf]  ;;  %v111_v49 = vld [vmem:[%s1561_s0 + $0x19c] sm:$0xf] }
  0x23   :  { %v1095_v43 = vmax.bf16 %v106_v33, %v104_v32  ;;  %v108_v56 = vld [vmem:[%s1561_s0 + $0x190] sm:$0xf]  ;;  %v110_v57 = vld [vmem:[%s1561_s0 + $0x198] sm:$0xf]  ;;  %v1111_v60 = vmax.bf16 %v111_v49, %v109_v48  ;;  %v113_v5 = vld [vmem:[%s1561_s0 + $0x1a4] sm:$0xf] }
  0x24   :  { %298 = vrot.lane.b32.xlu1 %v771_v52, %s590_s22  ;;  %v1115_v61 = vmax.bf16 %v110_v57, %v108_v56  ;;  %v115_v6 = vld [vmem:[%s1561_s0 + $0x1ac] sm:$0xf]  ;;  %v112_v14 = vld [vmem:[%s1561_s0 + $0x1a0] sm:$0xf]  ;;  %v114_v15 = vld [vmem:[%s1561_s0 + $0x1a8] sm:$0xf] }
  0x25   :  { %296 = vrot.lane.b32.xlu0 %v775_v53, %s590_s22  ;;  %v1131_v30 = vmax.bf16 %v115_v6, %v113_v5  ;;  %v1135_v31 = vmax.bf16 %v114_v15, %v112_v14  ;;  %v117_v32 = vld [vmem:[%s1561_s0 + $0x1b4] sm:$0xf]  ;;  %v119_v33 = vld [vmem:[%s1561_s0 + $0x1bc] sm:$0xf]  ;;  %v116_v48 = vld [vmem:[%s1561_s0 + $0x1b0] sm:$0xf] }
  0x26   :  { %v118_v49 = vld [vmem:[%s1561_s0 + $0x1b8] sm:$0xf]  ;;  %v1151_v56 = vmax.bf16 %v119_v33, %v117_v32  ;;  %v121_v5 = vld [vmem:[%s1561_s0 + $0x1c4] sm:$0xf]  ;;  %v123_v6 = vld [vmem:[%s1561_s0 + $0x1cc] sm:$0xf] }
  0x27   :  { %1569 = vst [vmem:[#allocation2_spill] sm:$0xff] %v1131_v30  ;;  %1570 = vst [vmem:[#allocation3_spill] sm:$0xff] %v1135_v31  ;;  %v1155_v57 = vmax.bf16 %v118_v49, %v116_v48  ;;  %v120_v14 = vld [vmem:[%s1561_s0 + $0x1c0] sm:$0xf]  ;;  %v122_v15 = vld [vmem:[%s1561_s0 + $0x1c8] sm:$0xf]  ;;  %v1171_v32 = vmax.bf16 %v123_v6, %v121_v5 }
  0x28   :  { %302 = vrot.lane.b32.xlu1 %v791_v58, %s590_s22  ;;  %1571 = vst [vmem:[#allocation4_spill] sm:$0xff] %v1151_v56  ;;  %v1175_v33 = vmax.bf16 %v122_v15, %v120_v14  ;;  %v125_v48 = vld [vmem:[%s1561_s0 + $0x1d4] sm:$0xf]  ;;  %v127_v49 = vld [vmem:[%s1561_s0 + $0x1dc] sm:$0xf] }
  0x29   :  { %300 = vrot.lane.b32.xlu0 %v795_v59, %s590_s22  ;;  %1572 = vst [vmem:[#allocation5_spill] sm:$0xff] %v1155_v57  ;;  %1573 = vst [vmem:[#allocation6_spill] sm:$0xff] %v1171_v32  ;;  %v126_v5 = vld [vmem:[%s1561_s0 + $0x1d8] sm:$0xf]  ;;  %v1191_v6 = vmax.bf16 %v127_v49, %v125_v48  ;;  %v129_v15 = vld [vmem:[%s1561_s0 + $0x1e4] sm:$0xf] }
  0x2a   :  { %1574 = vst [vmem:[#allocation7_spill] sm:$0xff] %v1175_v33  ;;  %v128_v48 = vld [vmem:[%s1561_s0 + $0x1e0] sm:$0xf]  ;;  %v130_v49 = vld [vmem:[%s1561_s0 + $0x1e8] sm:$0xf] }
  0x2c   :  { %306 = vrot.lane.b32.xlu1 %v811_v0, %s590_s22 }
  0x2d   :  { %304 = vrot.lane.b32.xlu0 %v815_v1, %s590_s22 }
  0x30   :  { %310 = vrot.lane.b32.xlu1 %v831_v8, %s590_s22 }
  0x31   :  { %308 = vrot.lane.b32.xlu0 %v835_v9, %s590_s22 }
  0x34   :  { %314 = vrot.lane.b32.xlu1 %v851_v18, %s590_s22 }
  0x35   :  { %312 = vrot.lane.b32.xlu0 %v855_v19, %s590_s22 }
  0x38   :  { %318 = vrot.lane.b32.xlu1 %v871_v26, %s590_s22 }
  0x39   :  { %316 = vrot.lane.b32.xlu0 %v875_v27, %s590_s22 }
  0x3c   :  { %322 = vrot.lane.b32.xlu1 %v891_v36, %s590_s22 }
  0x3d   :  { %320 = vrot.lane.b32.xlu0 %v895_v37, %s590_s22 }
  0x40   :  { %326 = vrot.lane.b32.xlu1 %v911_v44, %s590_s22 }
  0x41   :  { %324 = vrot.lane.b32.xlu0 %v915_v45, %s590_s22 }
  0x44   :  { %330 = vrot.lane.b32.xlu1 %v931_v54, %s590_s22 }
  0x45   :  { %328 = vrot.lane.b32.xlu0 %v935_v55, %s590_s22 }
  0x48   :  { %334 = vrot.lane.b32.xlu1 %v951_v62, %s590_s22 }
  0x49   :  { %332 = vrot.lane.b32.xlu0 %v955_v63, %s590_s22 }
  0x4c   :  { %338 = vrot.lane.b32.xlu1 %v971_v12, %s590_s22 }
  0x4d   :  { %336 = vrot.lane.b32.xlu0 %v975_v13, %s590_s22 }
  0x50   :  { %342 = vrot.lane.b32.xlu1 %v991_v24, %s590_s22 }
  0x51   :  { %340 = vrot.lane.b32.xlu0 %v995_v25, %s590_s22 }
  0x54   :  { %346 = vrot.lane.b32.xlu1 %v1011_v38, %s590_s22 }
  0x55   :  { %344 = vrot.lane.b32.xlu0 %v1015_v39, %s590_s22 }
  0x58   :  { %350 = vrot.lane.b32.xlu1 %v1031_v50, %s590_s22 }
  0x59   :  { %348 = vrot.lane.b32.xlu0 %v1035_v51, %s590_s22 }
  0x5c   :  { %354 = vrot.lane.b32.xlu1 %v1051_v2, %s590_s22 }
  0x5d   :  { %352 = vrot.lane.b32.xlu0 %v1055_v4, %s590_s22 }
  0x60   :  { %358 = vrot.lane.b32.xlu1 %v1071_v20, %s590_s22 }
  0x61   :  { %356 = vrot.lane.b32.xlu0 %v1075_v21, %s590_s22 }
  0x64   :  { %362 = vrot.lane.b32.xlu1 %v1091_v42, %s590_s22 }
  0x65   :  { %360 = vrot.lane.b32.xlu0 %v1095_v43, %s590_s22 }
  0x68   :  { %366 = vrot.lane.b32.xlu1 %v1111_v60, %s590_s22 }
  0x69   :  { %364 = vrot.lane.b32.xlu0 %v1115_v61, %s590_s22 }
  0x6c   :  { %370 = vrot.lane.b32.xlu1 %v1131_v30, %s590_s22  ;;  %v1221_v30 = vmax.bf16 %v130_v49, %v128_v48 }
  0x6d   :  { %368 = vrot.lane.b32.xlu0 %v1135_v31, %s590_s22  ;;  %v124_v31 = vld [vmem:[%s1561_s0 + $0x1d0] sm:$0xf] }
  0x6e   :  { %v1195_v14 = vmax.bf16 %v126_v5, %v124_v31 }
  0x70   :  { %374 = vrot.lane.b32.xlu1 %v1151_v56, %s590_s22 }
  0x71   :  { %372 = vrot.lane.b32.xlu0 %v1155_v57, %s590_s22  ;;  %v131_v57 = vld [vmem:[%s1561_s0 + $0x1ec] sm:$0xf] }
  0x74   :  { %378 = vrot.lane.b32.xlu1 %v1171_v32, %s590_s22  ;;  %v1213_v32 = vmax.bf16 %v131_v57, %v129_v15  ;;  %v132_v57 = vld [vmem:[%s1561_s0 + $0x1f0] sm:$0xf]  ;;  %v134_v15 = vld [vmem:[%s1561_s0 + $0x1f8] sm:$0xf] }
  0x75   :  { %376 = vrot.lane.b32.xlu0 %v1175_v33, %s590_s22 }
  0x76   :  { %v269_v56 = vpop.permute.xlu1 %268 }
  0x77   :  { %v458_v31 = vmax.bf16 %v269_v56, %v610_v3  ;;  %v265_v5 = vpop.permute.xlu0 %264  ;;  %v133_v3 = vld [vmem:[%s1561_s0 + $0x1f4] sm:$0xf] }
  0x78   :  { %v456_v33 = vmax.bf16 %v265_v5, %v621_v7  ;;  %382 = vrot.lane.b32.xlu1 %v1191_v6, %s590_s22  ;;  %v135_v7 = vld [vmem:[%s1561_s0 + $0x1fc] sm:$0xf] }
  0x79   :  { %523 = vst.msk [vmem:[%s1562_s1 + $0x8] sm:$0xf] %vm520_vm0, %v458_v31  ;;  %380 = vrot.lane.b32.xlu0 %v1195_v14, %s590_s22  ;;  %v1243_v5 = vmax.bf16 %v135_v7, %v133_v3 }
  0x7a   :  { %521 = vst.msk [vmem:[%s1562_s1] sm:$0xf] %vm520_vm0, %v456_v33  ;;  %v271_v56 = vpop.permute.xlu1 %270  ;;  %v1251_v33 = vmax.bf16 %v134_v15, %v132_v57 }
  0x7b   :  { %v459_v48 = vmax.bf16 %v271_v56, %v631_v10  ;;  %v267_v49 = vpop.permute.xlu0 %266 }
  0x7c   :  { %v457_v31 = vmax.bf16 %v267_v49, %v635_v11  ;;  %386 = vrot.lane.b32.xlu1 %v1213_v32, %s590_s22 }
  0x7d   :  { %524 = vst.msk [vmem:[%s1562_s1 + $0xc] sm:$0xf] %vm520_vm0, %v459_v48  ;;  %384 = vrot.lane.b32.xlu0 %v1221_v30, %s590_s22 }
  0x7e   :  { %522 = vst.msk [vmem:[%s1562_s1 + $0x4] sm:$0xf] %vm520_vm0, %v457_v31  ;;  %v275_v10 = vpop.permute.xlu1 %274 }
  0x7f   :  { %v461_v11 = vmax.bf16 %v275_v10, %v651_v16  ;;  %v273_v3 = vpop.permute.xlu0 %272 }
  0x80   :  { %v460_v7 = vmax.bf16 %v273_v3, %v655_v17  ;;  %390 = vrot.lane.b32.xlu1 %v1243_v5, %s590_s22 }
  0x81   :  { %526 = vst.msk [vmem:[%s1562_s1 + $0x14] sm:$0xf] %vm520_vm0, %v461_v11  ;;  %388 = vrot.lane.b32.xlu0 %v1251_v33, %s590_s22 }
  0x82   :  { %525 = vst.msk [vmem:[%s1562_s1 + $0x10] sm:$0xf] %vm520_vm0, %v460_v7  ;;  %v279_v16 = vpop.permute.xlu1 %278 }
  0x83   :  { %v463_v56 = vmax.bf16 %v279_v16, %v671_v22  ;;  %v277_v17 = vpop.permute.xlu0 %276 }
  0x84   :  { %v462_v57 = vmax.bf16 %v277_v17, %v675_v23 }
  0x85   :  { %528 = vst.msk [vmem:[%s1562_s1 + $0x1c] sm:$0xf] %vm520_vm0, %v463_v56 }
  0x86   :  { %527 = vst.msk [vmem:[%s1562_s1 + $0x18] sm:$0xf] %vm520_vm0, %v462_v57  ;;  %v283_v15 = vpop.permute.xlu1 %282 }
  0x87   :  { %v465_v48 = vmax.bf16 %v283_v15, %v691_v28  ;;  %v281_v49 = vpop.permute.xlu0 %280 }
  0x88   :  { %v464_v31 = vmax.bf16 %v281_v49, %v695_v29 }
  0x89   :  { %530 = vst.msk [vmem:[%s1562_s1 + $0x24] sm:$0xf] %vm520_vm0, %v465_v48 }
  0x8a   :  { %529 = vst.msk [vmem:[%s1562_s1 + $0x20] sm:$0xf] %vm520_vm0, %v464_v31  ;;  %v287_v22 = vpop.permute.xlu1 %286 }
  0x8b   :  { %v467_v23 = vmax.bf16 %v287_v22, %v711_v34  ;;  %v285_v10 = vpop.permute.xlu0 %284 }
  0x8c   :  { %v466_v11 = vmax.bf16 %v285_v10, %v715_v35 }
  0x8d   :  { %532 = vst.msk [vmem:[%s1562_s1 + $0x2c] sm:$0xf] %vm520_vm0, %v467_v23 }
  0x8e   :  { %531 = vst.msk [vmem:[%s1562_s1 + $0x28] sm:$0xf] %vm520_vm0, %v466_v11  ;;  %v291_v28 = vpop.permute.xlu1 %290 }
  0x8f   :  { %v469_v29 = vmax.bf16 %v291_v28, %v731_v40  ;;  %v289_v3 = vpop.permute.xlu0 %288 }
  0x90   :  { %v468_v7 = vmax.bf16 %v289_v3, %v735_v41 }
  0x91   :  { %534 = vst.msk [vmem:[%s1562_s1 + $0x34] sm:$0xf] %vm520_vm0, %v469_v29 }
  0x92   :  { %533 = vst.msk [vmem:[%s1562_s1 + $0x30] sm:$0xf] %vm520_vm0, %v468_v7  ;;  %v295_v34 = vpop.permute.xlu1 %294 }
  0x93   :  { %v471_v35 = vmax.bf16 %v295_v34, %v751_v46  ;;  %v293_v16 = vpop.permute.xlu0 %292 }
  0x94   :  { %v470_v56 = vmax.bf16 %v293_v16, %v755_v47 }
  0x95   :  { %536 = vst.msk [vmem:[%s1562_s1 + $0x3c] sm:$0xf] %vm520_vm0, %v471_v35 }
  0x96   :  { %535 = vst.msk [vmem:[%s1562_s1 + $0x38] sm:$0xf] %vm520_vm0, %v470_v56  ;;  %v299_v40 = vpop.permute.xlu1 %298 }
  0x97   :  { %v473_v41 = vmax.bf16 %v299_v40, %v771_v52  ;;  %v297_v17 = vpop.permute.xlu0 %296 }
  0x98   :  { %v472_v57 = vmax.bf16 %v297_v17, %v775_v53 }
  0x99   :  { %538 = vst.msk [vmem:[%s1562_s1 + $0x44] sm:$0xf] %vm520_vm0, %v473_v41 }
  0x9a   :  { %537 = vst.msk [vmem:[%s1562_s1 + $0x40] sm:$0xf] %vm520_vm0, %v472_v57  ;;  %v303_v46 = vpop.permute.xlu1 %302 }
  0x9b   :  { %v475_v47 = vmax.bf16 %v303_v46, %v791_v58  ;;  %v301_v15 = vpop.permute.xlu0 %300 }
  0x9c   :  { %v474_v48 = vmax.bf16 %v301_v15, %v795_v59 }
  0x9d   :  { %540 = vst.msk [vmem:[%s1562_s1 + $0x4c] sm:$0xf] %vm520_vm0, %v475_v47 }
  0x9e   :  { %539 = vst.msk [vmem:[%s1562_s1 + $0x48] sm:$0xf] %vm520_vm0, %v474_v48  ;;  %v307_v52 = vpop.permute.xlu1 %306 }
  0x9f   :  { %v477_v53 = vmax.bf16 %v307_v52, %v811_v0  ;;  %v305_v49 = vpop.permute.xlu0 %304 }
  0xa0   :  { %v476_v31 = vmax.bf16 %v305_v49, %v815_v1 }
  0xa1   :  { %542 = vst.msk [vmem:[%s1562_s1 + $0x54] sm:$0xf] %vm520_vm0, %v477_v53 }
  0xa2   :  { %541 = vst.msk [vmem:[%s1562_s1 + $0x50] sm:$0xf] %vm520_vm0, %v476_v31  ;;  %v311_v58 = vpop.permute.xlu1 %310 }
  0xa3   :  { %v479_v59 = vmax.bf16 %v311_v58, %v831_v8  ;;  %v309_v22 = vpop.permute.xlu0 %308 }
  0xa4   :  { %v478_v23 = vmax.bf16 %v309_v22, %v835_v9 }
  0xa5   :  { %544 = vst.msk [vmem:[%s1562_s1 + $0x5c] sm:$0xf] %vm520_vm0, %v479_v59 }
  0xa6   :  { %543 = vst.msk [vmem:[%s1562_s1 + $0x58] sm:$0xf] %vm520_vm0, %v478_v23  ;;  %v315_v0 = vpop.permute.xlu1 %314 }
  0xa7   :  { %v481_v1 = vmax.bf16 %v315_v0, %v851_v18  ;;  %v313_v10 = vpop.permute.xlu0 %312 }
  0xa8   :  { %v480_v11 = vmax.bf16 %v313_v10, %v855_v19 }
  0xa9   :  { %546 = vst.msk [vmem:[%s1562_s1 + $0x64] sm:$0xf] %vm520_vm0, %v481_v1 }
  0xaa   :  { %545 = vst.msk [vmem:[%s1562_s1 + $0x60] sm:$0xf] %vm520_vm0, %v480_v11  ;;  %v319_v8 = vpop.permute.xlu1 %318 }
  0xab   :  { %v483_v9 = vmax.bf16 %v319_v8, %v871_v26  ;;  %v317_v28 = vpop.permute.xlu0 %316  ;;  %v1576_v8 = vld [vmem:[#allocation3_spill] sm:$0xff] }
  0xac   :  { %v482_v29 = vmax.bf16 %v317_v28, %v875_v27 }
  0xad   :  { %548 = vst.msk [vmem:[%s1562_s1 + $0x6c] sm:$0xf] %vm520_vm0, %v483_v9 }
  0xae   :  { %547 = vst.msk [vmem:[%s1562_s1 + $0x68] sm:$0xf] %vm520_vm0, %v482_v29  ;;  %v323_v18 = vpop.permute.xlu1 %322 }
  0xaf   :  { %v485_v19 = vmax.bf16 %v323_v18, %v891_v36  ;;  %v321_v3 = vpop.permute.xlu0 %320  ;;  %v1578_v18 = vld [vmem:[#allocation5_spill] sm:$0xff] }
  0xb0   :  { %v484_v7 = vmax.bf16 %v321_v3, %v895_v37 }
  0xb1   :  { %550 = vst.msk [vmem:[%s1562_s1 + $0x74] sm:$0xf] %vm520_vm0, %v485_v19 }
  0xb2   :  { %549 = vst.msk [vmem:[%s1562_s1 + $0x70] sm:$0xf] %vm520_vm0, %v484_v7  ;;  %v327_v26 = vpop.permute.xlu1 %326  ;;  %v1579_v7 = vld [vmem:[#allocation6_spill] sm:$0xff] }
  0xb3   :  { %v487_v27 = vmax.bf16 %v327_v26, %v911_v44  ;;  %v325_v34 = vpop.permute.xlu0 %324 }
  0xb4   :  { %v486_v35 = vmax.bf16 %v325_v34, %v915_v45  ;;  %v1580_v34 = vld [vmem:[#allocation7_spill] sm:$0xff] }
  0xb5   :  { %552 = vst.msk [vmem:[%s1562_s1 + $0x7c] sm:$0xf] %vm520_vm0, %v487_v27 }
  0xb6   :  { %551 = vst.msk [vmem:[%s1562_s1 + $0x78] sm:$0xf] %vm520_vm0, %v486_v35  ;;  %v331_v36 = vpop.permute.xlu1 %330 }
  0xb7   :  { %v489_v37 = vmax.bf16 %v331_v36, %v931_v54  ;;  %v329_v16 = vpop.permute.xlu0 %328 }
  0xb8   :  { %v488_v56 = vmax.bf16 %v329_v16, %v935_v55 }
  0xb9   :  { %554 = vst.msk [vmem:[%s1562_s1 + $0x84] sm:$0xf] %vm520_vm0, %v489_v37 }
  0xba   :  { %553 = vst.msk [vmem:[%s1562_s1 + $0x80] sm:$0xf] %vm520_vm0, %v488_v56  ;;  %v335_v44 = vpop.permute.xlu1 %334 }
  0xbb   :  { %v491_v45 = vmax.bf16 %v335_v44, %v951_v62  ;;  %v333_v40 = vpop.permute.xlu0 %332 }
  0xbc   :  { %v490_v41 = vmax.bf16 %v333_v40, %v955_v63 }
  0xbd   :  { %556 = vst.msk [vmem:[%s1562_s1 + $0x8c] sm:$0xf] %vm520_vm0, %v491_v45 }
  0xbe   :  { %555 = vst.msk [vmem:[%s1562_s1 + $0x88] sm:$0xf] %vm520_vm0, %v490_v41  ;;  %v339_v54 = vpop.permute.xlu1 %338 }
  0xbf   :  { %v493_v55 = vmax.bf16 %v339_v54, %v971_v12  ;;  %v337_v17 = vpop.permute.xlu0 %336 }
  0xc0   :  { %v492_v57 = vmax.bf16 %v337_v17, %v975_v13 }
  0xc1   :  { %558 = vst.msk [vmem:[%s1562_s1 + $0x94] sm:$0xf] %vm520_vm0, %v493_v55 }
  0xc2   :  { %557 = vst.msk [vmem:[%s1562_s1 + $0x90] sm:$0xf] %vm520_vm0, %v492_v57  ;;  %v343_v62 = vpop.permute.xlu1 %342 }
  0xc3   :  { %v495_v63 = vmax.bf16 %v343_v62, %v991_v24  ;;  %v341_v46 = vpop.permute.xlu0 %340 }
  0xc4   :  { %v494_v47 = vmax.bf16 %v341_v46, %v995_v25 }
  0xc5   :  { %560 = vst.msk [vmem:[%s1562_s1 + $0x9c] sm:$0xf] %vm520_vm0, %v495_v63 }
  0xc6   :  { %559 = vst.msk [vmem:[%s1562_s1 + $0x98] sm:$0xf] %vm520_vm0, %v494_v47  ;;  %v347_v12 = vpop.permute.xlu1 %346 }
  0xc7   :  { %v497_v13 = vmax.bf16 %v347_v12, %v1011_v38  ;;  %v345_v15 = vpop.permute.xlu0 %344 }
  0xc8   :  { %v496_v48 = vmax.bf16 %v345_v15, %v1015_v39 }
  0xc9   :  { %562 = vst.msk [vmem:[%s1562_s1 + $0xa4] sm:$0xf] %vm520_vm0, %v497_v13 }
  0xca   :  { %561 = vst.msk [vmem:[%s1562_s1 + $0xa0] sm:$0xf] %vm520_vm0, %v496_v48  ;;  %v351_v24 = vpop.permute.xlu1 %350 }
  0xcb   :  { %v499_v25 = vmax.bf16 %v351_v24, %v1031_v50  ;;  %v349_v52 = vpop.permute.xlu0 %348 }
  0xcc   :  { %v498_v53 = vmax.bf16 %v349_v52, %v1035_v51 }
  0xcd   :  { %564 = vst.msk [vmem:[%s1562_s1 + $0xac] sm:$0xf] %vm520_vm0, %v499_v25 }
  0xce   :  { %563 = vst.msk [vmem:[%s1562_s1 + $0xa8] sm:$0xf] %vm520_vm0, %v498_v53  ;;  %v355_v38 = vpop.permute.xlu1 %354 }
  0xcf   :  { %v501_v39 = vmax.bf16 %v355_v38, %v1051_v2  ;;  %v353_v49 = vpop.permute.xlu0 %352 }
  0xd0   :  { %v500_v31 = vmax.bf16 %v353_v49, %v1055_v4 }
  0xd1   :  { %566 = vst.msk [vmem:[%s1562_s1 + $0xb4] sm:$0xf] %vm520_vm0, %v501_v39 }
  0xd2   :  { %565 = vst.msk [vmem:[%s1562_s1 + $0xb0] sm:$0xf] %vm520_vm0, %v500_v31  ;;  %v359_v50 = vpop.permute.xlu1 %358 }
  0xd3   :  { %v503_v51 = vmax.bf16 %v359_v50, %v1071_v20  ;;  %v357_v58 = vpop.permute.xlu0 %356 }
  0xd4   :  { %v502_v59 = vmax.bf16 %v357_v58, %v1075_v21 }
  0xd5   :  { %568 = vst.msk [vmem:[%s1562_s1 + $0xbc] sm:$0xf] %vm520_vm0, %v503_v51 }
  0xd6   :  { %567 = vst.msk [vmem:[%s1562_s1 + $0xb8] sm:$0xf] %vm520_vm0, %v502_v59  ;;  %v363_v2 = vpop.permute.xlu1 %362 }
  0xd7   :  { %v505_v4 = vmax.bf16 %v363_v2, %v1091_v42  ;;  %v361_v22 = vpop.permute.xlu0 %360 }
  0xd8   :  { %v504_v23 = vmax.bf16 %v361_v22, %v1095_v43  ;;  %v1575_v43 = vld [vmem:[#allocation2_spill] sm:$0xff] }
  0xd9   :  { %570 = vst.msk [vmem:[%s1562_s1 + $0xc4] sm:$0xf] %vm520_vm0, %v505_v4 }
  0xda   :  { %569 = vst.msk [vmem:[%s1562_s1 + $0xc0] sm:$0xf] %vm520_vm0, %v504_v23  ;;  %v367_v20 = vpop.permute.xlu1 %366 }
  0xdb   :  { %v507_v21 = vmax.bf16 %v367_v20, %v1111_v60  ;;  %v365_v0 = vpop.permute.xlu0 %364 }
  0xdc   :  { %v506_v1 = vmax.bf16 %v365_v0, %v1115_v61  ;;  %v1577_v61 = vld [vmem:[#allocation4_spill] sm:$0xff] }
  0xdd   :  { %572 = vst.msk [vmem:[%s1562_s1 + $0xcc] sm:$0xf] %vm520_vm0, %v507_v21 }
  0xde   :  { %571 = vst.msk [vmem:[%s1562_s1 + $0xc8] sm:$0xf] %vm520_vm0, %v506_v1  ;;  %v371_v42 = vpop.permute.xlu1 %370 }
  0xdf   :  { %v509_v10 = vmax.bf16 %v371_v42, %v1575_v43  ;;  %v369_v11 = vpop.permute.xlu0 %368 }
  0xe0   :  { %v508_v9 = vmax.bf16 %v369_v11, %v1576_v8 }
  0xe1   :  { %574 = vst.msk [vmem:[%s1562_s1 + $0xd4] sm:$0xf] %vm520_vm0, %v509_v10 }
  0xe2   :  { %573 = vst.msk [vmem:[%s1562_s1 + $0xd0] sm:$0xf] %vm520_vm0, %v508_v9  ;;  %v375_v60 = vpop.permute.xlu1 %374 }
  0xe3   :  { %v511_v28 = vmax.bf16 %v375_v60, %v1577_v61  ;;  %v373_v29 = vpop.permute.xlu0 %372 }
  0xe4   :  { %v510_v19 = vmax.bf16 %v373_v29, %v1578_v18 }
  0xe5   :  { %576 = vst.msk [vmem:[%s1562_s1 + $0xdc] sm:$0xf] %vm520_vm0, %v511_v28 }
  0xe6   :  { %575 = vst.msk [vmem:[%s1562_s1 + $0xd8] sm:$0xf] %vm520_vm0, %v510_v19  ;;  %v379_v3 = vpop.permute.xlu1 %378 }
  0xe7   :  { %v513_v26 = vmax.bf16 %v379_v3, %v1579_v7  ;;  %v377_v27 = vpop.permute.xlu0 %376 }
  0xe8   :  { %v512_v35 = vmax.bf16 %v377_v27, %v1580_v34 }
  0xe9   :  { %578 = vst.msk [vmem:[%s1562_s1 + $0xe4] sm:$0xf] %vm520_vm0, %v513_v26 }
  0xea   :  { %577 = vst.msk [vmem:[%s1562_s1 + $0xe0] sm:$0xf] %vm520_vm0, %v512_v35  ;;  %v383_v36 = vpop.permute.xlu1 %382 }
  0xeb   :  { %v515_v37 = vmax.bf16 %v383_v36, %v1191_v6  ;;  %v381_v16 = vpop.permute.xlu0 %380 }
  0xec   :  { %v514_v56 = vmax.bf16 %v381_v16, %v1195_v14 }
  0xed   :  { %580 = vst.msk [vmem:[%s1562_s1 + $0xec] sm:$0xf] %vm520_vm0, %v515_v37 }
  0xee   :  { %579 = vst.msk [vmem:[%s1562_s1 + $0xe8] sm:$0xf] %vm520_vm0, %v514_v56  ;;  %v387_v44 = vpop.permute.xlu1 %386 }
  0xef   :  { %v517_v45 = vmax.bf16 %v387_v44, %v1213_v32  ;;  %v385_v40 = vpop.permute.xlu0 %384 }
  0xf0   :  { %v516_v41 = vmax.bf16 %v385_v40, %v1221_v30 }
  0xf1   :  { %582 = vst.msk [vmem:[%s1562_s1 + $0xf4] sm:$0xf] %vm520_vm0, %v517_v45 }
  0xf2   :  { %581 = vst.msk [vmem:[%s1562_s1 + $0xf0] sm:$0xf] %vm520_vm0, %v516_v41  ;;  %v391_v6 = vpop.permute.xlu1 %390 }
  0xf3   :  { %v519_v14 = vmax.bf16 %v391_v6, %v1243_v5  ;;  %v389_v54 = vpop.permute.xlu0 %388 }
  0xf4   :  { %v518_v55 = vmax.bf16 %v389_v54, %v1251_v33 }
  0xf5   :  { %584 = vst.msk [vmem:[%s1562_s1 + $0xfc] sm:$0xf] %vm520_vm0, %v519_v14 }
  0xf6   :  { %583 = vst.msk [vmem:[%s1562_s1 + $0xf8] sm:$0xf] %vm520_vm0, %v518_v55 }

// kernel: vgg16_relu7.23
= control target key start
LH: loop header
LB: loop body
LE: loop exit
PB: predicated region body
PF: predicated region fallthrough
CT: control target
= control target key end

     0   :  { %vm282_vm0 = vcmask 588800   ;;  %vm379_vm1 = vcmask 1043456   ;;  %vm992_vm2 = vcmask 125952   ;;  %s1907_s1 = inlined_call_operand.vmem [shape: bf16[72,16], index: 1, kind: input, shape index: {}]   ;;  %s1908_s0 = inlined_call_operand.vmem [shape: bf16[512,72], index: 0, kind: input, shape index: {}]   ;;  %s1909_s2 = inlined_call_operand.vmem [shape: f32[1,16], index: 2, kind: input, shape index: {}]   ;;  %s1910_s3 = inlined_call_operand.vmem [shape: bf16[512,16], index: 3, kind: output, shape index: {}]  }
   0x1   :  { %v1382_v0 = vld [vmem:[%s1907_s1] sm:$0xff]   ;;  %v1383_v1 = vld [vmem:[%s1907_s1 + $0x8] sm:$0xff]   ;;  %v1384_v2 = vld [vmem:[%s1907_s1 + $0x10] sm:$0xff]  }
   0x2   :  { %1296 = vmatprep.subr.bf16.mxu0 %v1382_v0  ;;  %1370 = vmatprep.subr.bf16.mxu1 %v1382_v0  ;;  %v1387_v3 = vld [vmem:[%s1908_s0] sm:$0xff]   ;;  %v1385_v5 = vld [vmem:[%s1907_s1 + $0x18] sm:$0xff]   ;;  %v1389_v8 = vld [vmem:[%s1908_s0 + $0x8] sm:$0xff]  }
   0x3   :  { %1297 = vmatpush3.bf16.msra.mxu0 %v1382_v0  ;;  %1375 = vmatpush3.bf16.msra.mxu1 %v1382_v0  ;;  %v1388_v4 = vld [vmem:[%s1908_s0 + $0x80] sm:$0xff]   ;;  %v1390_v9 = vld [vmem:[%s1908_s0 + $0x88] sm:$0xff]   ;;  %v1391_v10 = vld [vmem:[%s1908_s0 + $0x10] sm:$0xff]  }
   0x4   :  { %1298 = vmatprep.subr.bf16.mxu0 %v1383_v1  ;;  %1371 = vmatprep.subr.bf16.mxu1 %v1383_v1  ;;  %v1386_v6 = vld [vmem:[%s1907_s1 + $0x20] ss:$0 sps:$4 sm:$0xff]   ;;  %v1392_v11 = vld [vmem:[%s1908_s0 + $0x90] sm:$0xff]   ;;  %v1393_v12 = vld [vmem:[%s1908_s0 + $0x18] sm:$0xff]  }
   0x5   :  { %1306 = vmatprep.mubr.msk.bf16.mxu0 %vm282_vm0, %v1387_v3  ;;  %1338 = vmatprep.mubr.msk.bf16.mxu1 %vm282_vm0, %v1388_v4  ;;  %v381_v7 = vsel %vm379_vm1, %v1386_v6, 0  ;;  %v1394_v13 = vld [vmem:[%s1908_s0 + $0x98] sm:$0xff]   ;;  %v1395_v14 = vld [vmem:[%s1908_s0 + $0x20] sm:$0xff]   ;;  %v1397_v16 = vld [vmem:[%s1908_s0 + $0x28] sm:$0xff]  }
   0x6   :  { %v1396_v15 = vld [vmem:[%s1908_s0 + $0xa0] sm:$0xff]   ;;  %v1398_v17 = vld [vmem:[%s1908_s0 + $0xa8] sm:$0xff]   ;;  %v1399_v18 = vld [vmem:[%s1908_s0 + $0x30] sm:$0xff]  }
   0x7   :  { %1299 = vmatpush3.bf16.msra.mxu0 %v1383_v1  ;;  %1376 = vmatpush3.bf16.msra.mxu1 %v1383_v1  ;;  %v1400_v19 = vld [vmem:[%s1908_s0 + $0xb0] sm:$0xff]   ;;  %v1401_v20 = vld [vmem:[%s1908_s0 + $0x38] sm:$0xff]   ;;  %v1403_v22 = vld [vmem:[%s1908_s0 + $0x40] sm:$0xff]  }
   0x8   :  { %1300 = vmatprep.subr.bf16.mxu0 %v1384_v2  ;;  %1372 = vmatprep.subr.bf16.mxu1 %v1384_v2  ;;  %v1402_v21 = vld [vmem:[%s1908_s0 + $0xb8] sm:$0xff]   ;;  %v1404_v23 = vld [vmem:[%s1908_s0 + $0xc0] sm:$0xff]   ;;  %v1405_v24 = vld [vmem:[%s1908_s0 + $0x48] sm:$0xff]  }
   0x9   :  { %v1406_v25 = vld [vmem:[%s1908_s0 + $0xc8] sm:$0xff]   ;;  %v1407_v26 = vld [vmem:[%s1908_s0 + $0x50] sm:$0xff]   ;;  %v1409_v28 = vld [vmem:[%s1908_s0 + $0x58] sm:$0xff]  }
   0xa   :  { %v1408_v27 = vld [vmem:[%s1908_s0 + $0xd0] sm:$0xff]   ;;  %v1410_v29 = vld [vmem:[%s1908_s0 + $0xd8] sm:$0xff]   ;;  %v1411_v30 = vld [vmem:[%s1908_s0 + $0x60] sm:$0xff]  }
   0xb   :  { %1301 = vmatpush3.bf16.msra.mxu0 %v1384_v2  ;;  %1377 = vmatpush3.bf16.msra.mxu1 %v1384_v2  ;;  %v1412_v31 = vld [vmem:[%s1908_s0 + $0xe0] sm:$0xff]   ;;  %v1413_v32 = vld [vmem:[%s1908_s0 + $0x68] sm:$0xff]   ;;  %v1415_v34 = vld [vmem:[%s1908_s0 + $0x70] sm:$0xff]  }
   0xc   :  { %1302 = vmatprep.subr.bf16.mxu0 %v1385_v5  ;;  %1373 = vmatprep.subr.bf16.mxu1 %v1385_v5  ;;  %v1414_v33 = vld [vmem:[%s1908_s0 + $0xe8] sm:$0xff]   ;;  %v1416_v35 = vld [vmem:[%s1908_s0 + $0xf0] sm:$0xff]   ;;  %v1417_v36 = vld [vmem:[%s1908_s0 + $0x78] sm:$0xff]  }
   0xd   :  { %v1418_v37 = vld [vmem:[%s1908_s0 + $0xf8] sm:$0xff]   ;;  %v1585_v38 = vld [vmem:[%s1909_s2] ss:$0 sm:$0xff] }
   0xf   :  { %1303 = vmatpush3.bf16.msra.mxu0 %v1385_v5  ;;  %1378 = vmatpush3.bf16.msra.mxu1 %v1385_v5 }
  0x10   :  { %1380 = vmatprep.subr.msk.bf16.mxu0 %vm379_vm1, %v1386_v6  ;;  %1381 = vmatprep.subr.msk.bf16.mxu1 %vm379_vm1, %v1386_v6 }
  0x13   :  { %1305 = vmatpush3.bf16.msra.mxu0 %v381_v7  ;;  %1379 = vmatpush3.bf16.msra.mxu1 %v381_v7 }
  0x16   :  { %1307 = vmatmul.mubr.msk.bf16.vlgmr.msra.gmra.mrb[0].mxu0 %vm282_vm0, %v1389_v8  ;;  %1339 = vmatmul.mubr.msk.bf16.vlgmr.msra.gmra.mrb[0].mxu1 %vm282_vm0, %v1390_v9 }
  0x17   :  { %1310 = vmatprep.mubr.msk.bf16.mxu0 %vm282_vm0, %v1391_v10  ;;  %1342 = vmatprep.mubr.msk.bf16.mxu1 %vm282_vm0, %v1392_v11 }
  0x1e   :  { %1311 = vmatmul.mubr.msk.bf16.gmra.mrb[4].mxu0 %vm282_vm0, %v1393_v12  ;;  %1343 = vmatmul.mubr.msk.bf16.gmra.mrb[4].mxu1 %vm282_vm0, %v1394_v13 }
  0x1f   :  { %1314 = vmatprep.mubr.msk.bf16.mxu0 %vm282_vm0, %v1395_v14  ;;  %1346 = vmatprep.mubr.msk.bf16.mxu1 %vm282_vm0, %v1396_v15 }
  0x26   :  { %1315 = vmatmul.mubr.msk.bf16.gmra.mrb[8].mxu0 %vm282_vm0, %v1397_v16  ;;  %1347 = vmatmul.mubr.msk.bf16.gmra.mrb[8].mxu1 %vm282_vm0, %v1398_v17 }
  0x27   :  { %1318 = vmatprep.mubr.msk.bf16.mxu0 %vm282_vm0, %v1399_v18  ;;  %1350 = vmatprep.mubr.msk.bf16.mxu1 %vm282_vm0, %v1400_v19 }
  0x2e   :  { %1319 = vmatmul.mubr.msk.bf16.gmra.mrb[12].mxu0 %vm282_vm0, %v1401_v20  ;;  %1351 = vmatmul.mubr.msk.bf16.gmra.mrb[12].mxu1 %vm282_vm0, %v1402_v21 }
  0x2f   :  { %1322 = vmatprep.mubr.msk.bf16.mxu0 %vm282_vm0, %v1403_v22  ;;  %1354 = vmatprep.mubr.msk.bf16.mxu1 %vm282_vm0, %v1404_v23 }
  0x36   :  { %1323 = vmatmul.mubr.msk.bf16.gmra.mrb[16].mxu0 %vm282_vm0, %v1405_v24  ;;  %1355 = vmatmul.mubr.msk.bf16.gmra.mrb[16].mxu1 %vm282_vm0, %v1406_v25 }
  0x37   :  { %1326 = vmatprep.mubr.msk.bf16.mxu0 %vm282_vm0, %v1407_v26  ;;  %1358 = vmatprep.mubr.msk.bf16.mxu1 %vm282_vm0, %v1408_v27 }
  0x3e   :  { %1327 = vmatmul.mubr.msk.bf16.gmra.mrb[20].mxu0 %vm282_vm0, %v1409_v28  ;;  %1359 = vmatmul.mubr.msk.bf16.gmra.mrb[20].mxu1 %vm282_vm0, %v1410_v29 }
  0x3f   :  { %1330 = vmatprep.mubr.msk.bf16.mxu0 %vm282_vm0, %v1411_v30  ;;  %1362 = vmatprep.mubr.msk.bf16.mxu1 %vm282_vm0, %v1412_v31 }
  0x46   :  { %1331 = vmatmul.mubr.msk.bf16.gmra.mrb[24].mxu0 %vm282_vm0, %v1413_v32  ;;  %1363 = vmatmul.mubr.msk.bf16.gmra.mrb[24].mxu1 %vm282_vm0, %v1414_v33 }
  0x47   :  { %1334 = vmatprep.mubr.msk.bf16.mxu0 %vm282_vm0, %v1415_v34  ;;  %1366 = vmatprep.mubr.msk.bf16.mxu1 %vm282_vm0, %v1416_v35 }
  0x4e   :  { %1335 = vmatmul.mubr.msk.bf16.gmra.mrb[28].mxu0 %vm282_vm0, %v1417_v36  ;;  %1367 = vmatmul.mubr.msk.bf16.gmra.mrb[28].mxu1 %vm282_vm0, %v1418_v37 }
  0xe9   :  { %v1308_v39 = vpop.f32.mrb[0].mxu0  ;;  %v1340_v40 = vpop.f32.mrb[0].mxu1 }
  0xea   :  { %v426_v41 = vadd.f32 %v1308_v39, %v1585_v38  ;;  %v554_v42 = vadd.f32 %v1340_v40, %v1585_v38  ;;  %v417_v43 = vpop.f32.mrb[1].mxu0  ;;  %v545_v44 = vpop.f32.mrb[1].mxu1 }
  0xeb   :  { %v418_v45 = vadd.f32 %v1585_v38, %v417_v43  ;;  %v546_v46 = vadd.f32 %v1585_v38, %v545_v44  ;;  %v1309_v47 = vpop.f32.mrb[2].mxu0  ;;  %v1341_v48 = vpop.f32.mrb[2].mxu1 }
  0xec   :  { %v674_v49 = vmax.f32 %v426_v41, 0.0  ;;  %v706_v50 = vmax.f32 %v554_v42, 0.0  ;;  %v429_v51 = vadd.f32 %v1309_v47, %v1585_v38  ;;  %v557_v52 = vadd.f32 %v1341_v48, %v1585_v38  ;;  %v420_v53 = vpop.f32.mrb[3].mxu0  ;;  %v548_v54 = vpop.f32.mrb[3].mxu1 }
  0xed   :  { %v672_v55 = vmax.f32 %v418_v45, 0.0  ;;  %v704_v56 = vmax.f32 %v546_v46, 0.0  ;;  %v421_v57 = vadd.f32 %v1585_v38, %v420_v53  ;;  %v549_v58 = vadd.f32 %v1585_v38, %v548_v54 }
  0xee   :  { %v1197_v59 = vpack.c.bf16 %v674_v49, %v674_v49  ;;  %v1229_v60 = vpack.c.bf16 %v706_v50, %v706_v50  ;;  %v675_v61 = vmax.f32 %v429_v51, 0.0  ;;  %v707_v62 = vmax.f32 %v557_v52, 0.0 }
  0xef   :  { %v1195_v63 = vpack.c.bf16 %v672_v55, %v672_v55  ;;  %v1227_v0 = vpack.c.bf16 %v704_v56, %v704_v56  ;;  %v673_v1 = vmax.f32 %v421_v57, 0.0  ;;  %v705_v2 = vmax.f32 %v549_v58, 0.0 }
  0xf0   :  { %995 = vst.msk [vmem:[%s1910_s3 + $0x8] sm:$0xf] %vm992_vm2, %v1197_v59  ;;  %1027 = vst.msk [vmem:[%s1910_s3 + $0x88] sm:$0xf] %vm992_vm2, %v1229_v60  ;;  %v1198_v3 = vpack.c.bf16 %v675_v61, %v675_v61  ;;  %v1230_v4 = vpack.c.bf16 %v707_v62, %v707_v62 }
  0xf1   :  { %993 = vst.msk [vmem:[%s1910_s3] sm:$0xf] %vm992_vm2, %v1195_v63  ;;  %1025 = vst.msk [vmem:[%s1910_s3 + $0x80] sm:$0xf] %vm992_vm2, %v1227_v0  ;;  %v1196_v5 = vpack.c.bf16 %v673_v1, %v673_v1  ;;  %v1228_v6 = vpack.c.bf16 %v705_v2, %v705_v2  ;;  %v1312_v7 = vpop.f32.mrb[4].mxu0  ;;  %v1344_v8 = vpop.f32.mrb[4].mxu1 }
  0xf2   :  { %996 = vst.msk [vmem:[%s1910_s3 + $0xc] sm:$0xf] %vm992_vm2, %v1198_v3  ;;  %1028 = vst.msk [vmem:[%s1910_s3 + $0x8c] sm:$0xf] %vm992_vm2, %v1230_v4  ;;  %v442_v9 = vadd.f32 %v1312_v7, %v1585_v38  ;;  %v570_v10 = vadd.f32 %v1344_v8, %v1585_v38  ;;  %v433_v11 = vpop.f32.mrb[5].mxu0  ;;  %v561_v12 = vpop.f32.mrb[5].mxu1 }
  0xf3   :  { %994 = vst.msk [vmem:[%s1910_s3 + $0x4] sm:$0xf] %vm992_vm2, %v1196_v5  ;;  %1026 = vst.msk [vmem:[%s1910_s3 + $0x84] sm:$0xf] %vm992_vm2, %v1228_v6  ;;  %v434_v13 = vadd.f32 %v1585_v38, %v433_v11  ;;  %v562_v14 = vadd.f32 %v1585_v38, %v561_v12  ;;  %v1313_v15 = vpop.f32.mrb[6].mxu0  ;;  %v1345_v16 = vpop.f32.mrb[6].mxu1 }
  0xf4   :  { %v678_v17 = vmax.f32 %v442_v9, 0.0  ;;  %v710_v18 = vmax.f32 %v570_v10, 0.0  ;;  %v445_v19 = vadd.f32 %v1313_v15, %v1585_v38  ;;  %v573_v20 = vadd.f32 %v1345_v16, %v1585_v38  ;;  %v436_v21 = vpop.f32.mrb[7].mxu0  ;;  %v564_v22 = vpop.f32.mrb[7].mxu1 }
  0xf5   :  { %v676_v23 = vmax.f32 %v434_v13, 0.0  ;;  %v708_v24 = vmax.f32 %v562_v14, 0.0  ;;  %v437_v25 = vadd.f32 %v1585_v38, %v436_v21  ;;  %v565_v26 = vadd.f32 %v1585_v38, %v564_v22 }
  0xf6   :  { %v1201_v27 = vpack.c.bf16 %v678_v17, %v678_v17  ;;  %v1233_v28 = vpack.c.bf16 %v710_v18, %v710_v18  ;;  %v679_v29 = vmax.f32 %v445_v19, 0.0  ;;  %v711_v30 = vmax.f32 %v573_v20, 0.0 }
  0xf7   :  { %v1199_v31 = vpack.c.bf16 %v676_v23, %v676_v23  ;;  %v1231_v32 = vpack.c.bf16 %v708_v24, %v708_v24  ;;  %v677_v33 = vmax.f32 %v437_v25, 0.0  ;;  %v709_v34 = vmax.f32 %v565_v26, 0.0 }
  0xf8   :  { %999 = vst.msk [vmem:[%s1910_s3 + $0x18] sm:$0xf] %vm992_vm2, %v1201_v27  ;;  %1031 = vst.msk [vmem:[%s1910_s3 + $0x98] sm:$0xf] %vm992_vm2, %v1233_v28  ;;  %v1202_v35 = vpack.c.bf16 %v679_v29, %v679_v29  ;;  %v1234_v36 = vpack.c.bf16 %v711_v30, %v711_v30 }
  0xf9   :  { %997 = vst.msk [vmem:[%s1910_s3 + $0x10] sm:$0xf] %vm992_vm2, %v1199_v31  ;;  %1029 = vst.msk [vmem:[%s1910_s3 + $0x90] sm:$0xf] %vm992_vm2, %v1231_v32  ;;  %v1200_v37 = vpack.c.bf16 %v677_v33, %v677_v33  ;;  %v1232_v39 = vpack.c.bf16 %v709_v34, %v709_v34  ;;  %v1316_v40 = vpop.f32.mrb[8].mxu0  ;;  %v1348_v41 = vpop.f32.mrb[8].mxu1 }
  0xfa   :  { %1000 = vst.msk [vmem:[%s1910_s3 + $0x1c] sm:$0xf] %vm992_vm2, %v1202_v35  ;;  %1032 = vst.msk [vmem:[%s1910_s3 + $0x9c] sm:$0xf] %vm992_vm2, %v1234_v36  ;;  %v458_v42 = vadd.f32 %v1316_v40, %v1585_v38  ;;  %v586_v43 = vadd.f32 %v1348_v41, %v1585_v38  ;;  %v449_v44 = vpop.f32.mrb[9].mxu0  ;;  %v577_v45 = vpop.f32.mrb[9].mxu1 }
  0xfb   :  { %998 = vst.msk [vmem:[%s1910_s3 + $0x14] sm:$0xf] %vm992_vm2, %v1200_v37  ;;  %1030 = vst.msk [vmem:[%s1910_s3 + $0x94] sm:$0xf] %vm992_vm2, %v1232_v39  ;;  %v450_v46 = vadd.f32 %v1585_v38, %v449_v44  ;;  %v578_v47 = vadd.f32 %v1585_v38, %v577_v45  ;;  %v1317_v48 = vpop.f32.mrb[10].mxu0  ;;  %v1349_v49 = vpop.f32.mrb[10].mxu1 }
  0xfc   :  { %v682_v50 = vmax.f32 %v458_v42, 0.0  ;;  %v714_v51 = vmax.f32 %v586_v43, 0.0  ;;  %v461_v52 = vadd.f32 %v1317_v48, %v1585_v38  ;;  %v589_v53 = vadd.f32 %v1349_v49, %v1585_v38  ;;  %v452_v54 = vpop.f32.mrb[11].mxu0  ;;  %v580_v55 = vpop.f32.mrb[11].mxu1 }
  0xfd   :  { %v680_v56 = vmax.f32 %v450_v46, 0.0  ;;  %v712_v57 = vmax.f32 %v578_v47, 0.0  ;;  %v453_v58 = vadd.f32 %v1585_v38, %v452_v54  ;;  %v581_v59 = vadd.f32 %v1585_v38, %v580_v55 }
  0xfe   :  { %v1205_v60 = vpack.c.bf16 %v682_v50, %v682_v50  ;;  %v1237_v61 = vpack.c.bf16 %v714_v51, %v714_v51  ;;  %v683_v62 = vmax.f32 %v461_v52, 0.0  ;;  %v715_v63 = vmax.f32 %v589_v53, 0.0 }
  0xff   :  { %v1203_v0 = vpack.c.bf16 %v680_v56, %v680_v56  ;;  %v1235_v1 = vpack.c.bf16 %v712_v57, %v712_v57  ;;  %v681_v2 = vmax.f32 %v453_v58, 0.0  ;;  %v713_v3 = vmax.f32 %v581_v59, 0.0 }
 0x100   :  { %1003 = vst.msk [vmem:[%s1910_s3 + $0x28] sm:$0xf] %vm992_vm2, %v1205_v60  ;;  %1035 = vst.msk [vmem:[%s1910_s3 + $0xa8] sm:$0xf] %vm992_vm2, %v1237_v61  ;;  %v1206_v4 = vpack.c.bf16 %v683_v62, %v683_v62  ;;  %v1238_v5 = vpack.c.bf16 %v715_v63, %v715_v63 }
 0x101   :  { %1001 = vst.msk [vmem:[%s1910_s3 + $0x20] sm:$0xf] %vm992_vm2, %v1203_v0  ;;  %1033 = vst.msk [vmem:[%s1910_s3 + $0xa0] sm:$0xf] %vm992_vm2, %v1235_v1  ;;  %v1204_v6 = vpack.c.bf16 %v681_v2, %v681_v2  ;;  %v1236_v7 = vpack.c.bf16 %v713_v3, %v713_v3  ;;  %v1320_v8 = vpop.f32.mrb[12].mxu0  ;;  %v1352_v9 = vpop.f32.mrb[12].mxu1 }
 0x102   :  { %1004 = vst.msk [vmem:[%s1910_s3 + $0x2c] sm:$0xf] %vm992_vm2, %v1206_v4  ;;  %1036 = vst.msk [vmem:[%s1910_s3 + $0xac] sm:$0xf] %vm992_vm2, %v1238_v5  ;;  %v474_v10 = vadd.f32 %v1320_v8, %v1585_v38  ;;  %v602_v11 = vadd.f32 %v1352_v9, %v1585_v38  ;;  %v465_v12 = vpop.f32.mrb[13].mxu0  ;;  %v593_v13 = vpop.f32.mrb[13].mxu1 }
 0x103   :  { %1002 = vst.msk [vmem:[%s1910_s3 + $0x24] sm:$0xf] %vm992_vm2, %v1204_v6  ;;  %1034 = vst.msk [vmem:[%s1910_s3 + $0xa4] sm:$0xf] %vm992_vm2, %v1236_v7  ;;  %v466_v14 = vadd.f32 %v1585_v38, %v465_v12  ;;  %v594_v15 = vadd.f32 %v1585_v38, %v593_v13  ;;  %v1321_v16 = vpop.f32.mrb[14].mxu0  ;;  %v1353_v17 = vpop.f32.mrb[14].mxu1 }
 0x104   :  { %v686_v18 = vmax.f32 %v474_v10, 0.0  ;;  %v718_v19 = vmax.f32 %v602_v11, 0.0  ;;  %v477_v20 = vadd.f32 %v1321_v16, %v1585_v38  ;;  %v605_v21 = vadd.f32 %v1353_v17, %v1585_v38  ;;  %v468_v22 = vpop.f32.mrb[15].mxu0  ;;  %v596_v23 = vpop.f32.mrb[15].mxu1 }
 0x105   :  { %v684_v24 = vmax.f32 %v466_v14, 0.0  ;;  %v716_v25 = vmax.f32 %v594_v15, 0.0  ;;  %v469_v26 = vadd.f32 %v1585_v38, %v468_v22  ;;  %v597_v27 = vadd.f32 %v1585_v38, %v596_v23 }
 0x106   :  { %v1209_v28 = vpack.c.bf16 %v686_v18, %v686_v18  ;;  %v1241_v29 = vpack.c.bf16 %v718_v19, %v718_v19  ;;  %v687_v30 = vmax.f32 %v477_v20, 0.0  ;;  %v719_v31 = vmax.f32 %v605_v21, 0.0 }
 0x107   :  { %v1207_v32 = vpack.c.bf16 %v684_v24, %v684_v24  ;;  %v1239_v33 = vpack.c.bf16 %v716_v25, %v716_v25  ;;  %v685_v34 = vmax.f32 %v469_v26, 0.0  ;;  %v717_v35 = vmax.f32 %v597_v27, 0.0 }
 0x108   :  { %1007 = vst.msk [vmem:[%s1910_s3 + $0x38] sm:$0xf] %vm992_vm2, %v1209_v28  ;;  %1039 = vst.msk [vmem:[%s1910_s3 + $0xb8] sm:$0xf] %vm992_vm2, %v1241_v29  ;;  %v1210_v36 = vpack.c.bf16 %v687_v30, %v687_v30  ;;  %v1242_v37 = vpack.c.bf16 %v719_v31, %v719_v31 }
 0x109   :  { %1005 = vst.msk [vmem:[%s1910_s3 + $0x30] sm:$0xf] %vm992_vm2, %v1207_v32  ;;  %1037 = vst.msk [vmem:[%s1910_s3 + $0xb0] sm:$0xf] %vm992_vm2, %v1239_v33  ;;  %v1208_v39 = vpack.c.bf16 %v685_v34, %v685_v34  ;;  %v1240_v40 = vpack.c.bf16 %v717_v35, %v717_v35  ;;  %v1324_v41 = vpop.f32.mrb[16].mxu0  ;;  %v1356_v42 = vpop.f32.mrb[16].mxu1 }
 0x10a   :  { %1008 = vst.msk [vmem:[%s1910_s3 + $0x3c] sm:$0xf] %vm992_vm2, %v1210_v36  ;;  %1040 = vst.msk [vmem:[%s1910_s3 + $0xbc] sm:$0xf] %vm992_vm2, %v1242_v37  ;;  %v490_v43 = vadd.f32 %v1324_v41, %v1585_v38  ;;  %v618_v44 = vadd.f32 %v1356_v42, %v1585_v38  ;;  %v481_v45 = vpop.f32.mrb[17].mxu0  ;;  %v609_v46 = vpop.f32.mrb[17].mxu1 }
 0x10b   :  { %1006 = vst.msk [vmem:[%s1910_s3 + $0x34] sm:$0xf] %vm992_vm2, %v1208_v39  ;;  %1038 = vst.msk [vmem:[%s1910_s3 + $0xb4] sm:$0xf] %vm992_vm2, %v1240_v40  ;;  %v482_v47 = vadd.f32 %v1585_v38, %v481_v45  ;;  %v610_v48 = vadd.f32 %v1585_v38, %v609_v46  ;;  %v1325_v49 = vpop.f32.mrb[18].mxu0  ;;  %v1357_v50 = vpop.f32.mrb[18].mxu1 }
 0x10c   :  { %v690_v51 = vmax.f32 %v490_v43, 0.0  ;;  %v722_v52 = vmax.f32 %v618_v44, 0.0  ;;  %v493_v53 = vadd.f32 %v1325_v49, %v1585_v38  ;;  %v621_v54 = vadd.f32 %v1357_v50, %v1585_v38  ;;  %v484_v55 = vpop.f32.mrb[19].mxu0  ;;  %v612_v56 = vpop.f32.mrb[19].mxu1 }
 0x10d   :  { %v688_v57 = vmax.f32 %v482_v47, 0.0  ;;  %v720_v58 = vmax.f32 %v610_v48, 0.0  ;;  %v485_v59 = vadd.f32 %v1585_v38, %v484_v55  ;;  %v613_v60 = vadd.f32 %v1585_v38, %v612_v56 }
 0x10e   :  { %v1213_v61 = vpack.c.bf16 %v690_v51, %v690_v51  ;;  %v1245_v62 = vpack.c.bf16 %v722_v52, %v722_v52  ;;  %v691_v63 = vmax.f32 %v493_v53, 0.0  ;;  %v723_v0 = vmax.f32 %v621_v54, 0.0 }
 0x10f   :  { %v1211_v1 = vpack.c.bf16 %v688_v57, %v688_v57  ;;  %v1243_v2 = vpack.c.bf16 %v720_v58, %v720_v58  ;;  %v689_v3 = vmax.f32 %v485_v59, 0.0  ;;  %v721_v4 = vmax.f32 %v613_v60, 0.0 }
 0x110   :  { %1011 = vst.msk [vmem:[%s1910_s3 + $0x48] sm:$0xf] %vm992_vm2, %v1213_v61  ;;  %1043 = vst.msk [vmem:[%s1910_s3 + $0xc8] sm:$0xf] %vm992_vm2, %v1245_v62  ;;  %v1214_v5 = vpack.c.bf16 %v691_v63, %v691_v63  ;;  %v1246_v6 = vpack.c.bf16 %v723_v0, %v723_v0 }
 0x111   :  { %1009 = vst.msk [vmem:[%s1910_s3 + $0x40] sm:$0xf] %vm992_vm2, %v1211_v1  ;;  %1041 = vst.msk [vmem:[%s1910_s3 + $0xc0] sm:$0xf] %vm992_vm2, %v1243_v2  ;;  %v1212_v7 = vpack.c.bf16 %v689_v3, %v689_v3  ;;  %v1244_v8 = vpack.c.bf16 %v721_v4, %v721_v4  ;;  %v1328_v9 = vpop.f32.mrb[20].mxu0  ;;  %v1360_v10 = vpop.f32.mrb[20].mxu1 }
 0x112   :  { %1012 = vst.msk [vmem:[%s1910_s3 + $0x4c] sm:$0xf] %vm992_vm2, %v1214_v5  ;;  %1044 = vst.msk [vmem:[%s1910_s3 + $0xcc] sm:$0xf] %vm992_vm2, %v1246_v6  ;;  %v506_v11 = vadd.f32 %v1328_v9, %v1585_v38  ;;  %v634_v12 = vadd.f32 %v1360_v10, %v1585_v38  ;;  %v497_v13 = vpop.f32.mrb[21].mxu0  ;;  %v625_v14 = vpop.f32.mrb[21].mxu1 }
 0x113   :  { %1010 = vst.msk [vmem:[%s1910_s3 + $0x44] sm:$0xf] %vm992_vm2, %v1212_v7  ;;  %1042 = vst.msk [vmem:[%s1910_s3 + $0xc4] sm:$0xf] %vm992_vm2, %v1244_v8  ;;  %v498_v15 = vadd.f32 %v1585_v38, %v497_v13  ;;  %v626_v16 = vadd.f32 %v1585_v38, %v625_v14  ;;  %v1329_v17 = vpop.f32.mrb[22].mxu0  ;;  %v1361_v18 = vpop.f32.mrb[22].mxu1 }
 0x114   :  { %v694_v19 = vmax.f32 %v506_v11, 0.0  ;;  %v726_v20 = vmax.f32 %v634_v12, 0.0  ;;  %v509_v21 = vadd.f32 %v1329_v17, %v1585_v38  ;;  %v637_v22 = vadd.f32 %v1361_v18, %v1585_v38  ;;  %v500_v23 = vpop.f32.mrb[23].mxu0  ;;  %v628_v24 = vpop.f32.mrb[23].mxu1 }
 0x115   :  { %v692_v25 = vmax.f32 %v498_v15, 0.0  ;;  %v724_v26 = vmax.f32 %v626_v16, 0.0  ;;  %v501_v27 = vadd.f32 %v1585_v38, %v500_v23  ;;  %v629_v28 = vadd.f32 %v1585_v38, %v628_v24 }
 0x116   :  { %v1217_v29 = vpack.c.bf16 %v694_v19, %v694_v19  ;;  %v1249_v30 = vpack.c.bf16 %v726_v20, %v726_v20  ;;  %v695_v31 = vmax.f32 %v509_v21, 0.0  ;;  %v727_v32 = vmax.f32 %v637_v22, 0.0 }
 0x117   :  { %v1215_v33 = vpack.c.bf16 %v692_v25, %v692_v25  ;;  %v1247_v34 = vpack.c.bf16 %v724_v26, %v724_v26  ;;  %v693_v35 = vmax.f32 %v501_v27, 0.0  ;;  %v725_v36 = vmax.f32 %v629_v28, 0.0 }
 0x118   :  { %1015 = vst.msk [vmem:[%s1910_s3 + $0x58] sm:$0xf] %vm992_vm2, %v1217_v29  ;;  %1047 = vst.msk [vmem:[%s1910_s3 + $0xd8] sm:$0xf] %vm992_vm2, %v1249_v30  ;;  %v1218_v37 = vpack.c.bf16 %v695_v31, %v695_v31  ;;  %v1250_v39 = vpack.c.bf16 %v727_v32, %v727_v32 }
 0x119   :  { %1013 = vst.msk [vmem:[%s1910_s3 + $0x50] sm:$0xf] %vm992_vm2, %v1215_v33  ;;  %1045 = vst.msk [vmem:[%s1910_s3 + $0xd0] sm:$0xf] %vm992_vm2, %v1247_v34  ;;  %v1216_v40 = vpack.c.bf16 %v693_v35, %v693_v35  ;;  %v1248_v41 = vpack.c.bf16 %v725_v36, %v725_v36  ;;  %v1332_v42 = vpop.f32.mrb[24].mxu0  ;;  %v1364_v43 = vpop.f32.mrb[24].mxu1 }
 0x11a   :  { %1016 = vst.msk [vmem:[%s1910_s3 + $0x5c] sm:$0xf] %vm992_vm2, %v1218_v37  ;;  %1048 = vst.msk [vmem:[%s1910_s3 + $0xdc] sm:$0xf] %vm992_vm2, %v1250_v39  ;;  %v522_v44 = vadd.f32 %v1332_v42, %v1585_v38  ;;  %v650_v45 = vadd.f32 %v1364_v43, %v1585_v38  ;;  %v513_v46 = vpop.f32.mrb[25].mxu0  ;;  %v641_v47 = vpop.f32.mrb[25].mxu1 }
 0x11b   :  { %1014 = vst.msk [vmem:[%s1910_s3 + $0x54] sm:$0xf] %vm992_vm2, %v1216_v40  ;;  %1046 = vst.msk [vmem:[%s1910_s3 + $0xd4] sm:$0xf] %vm992_vm2, %v1248_v41  ;;  %v514_v48 = vadd.f32 %v1585_v38, %v513_v46  ;;  %v642_v49 = vadd.f32 %v1585_v38, %v641_v47  ;;  %v1333_v50 = vpop.f32.mrb[26].mxu0  ;;  %v1365_v51 = vpop.f32.mrb[26].mxu1 }
 0x11c   :  { %v698_v52 = vmax.f32 %v522_v44, 0.0  ;;  %v730_v53 = vmax.f32 %v650_v45, 0.0  ;;  %v525_v54 = vadd.f32 %v1333_v50, %v1585_v38  ;;  %v653_v55 = vadd.f32 %v1365_v51, %v1585_v38  ;;  %v516_v56 = vpop.f32.mrb[27].mxu0  ;;  %v644_v57 = vpop.f32.mrb[27].mxu1 }
 0x11d   :  { %v696_v58 = vmax.f32 %v514_v48, 0.0  ;;  %v728_v59 = vmax.f32 %v642_v49, 0.0  ;;  %v517_v60 = vadd.f32 %v1585_v38, %v516_v56  ;;  %v645_v61 = vadd.f32 %v1585_v38, %v644_v57 }
 0x11e   :  { %v1221_v62 = vpack.c.bf16 %v698_v52, %v698_v52  ;;  %v1253_v63 = vpack.c.bf16 %v730_v53, %v730_v53  ;;  %v699_v0 = vmax.f32 %v525_v54, 0.0  ;;  %v731_v1 = vmax.f32 %v653_v55, 0.0 }
 0x11f   :  { %v1219_v2 = vpack.c.bf16 %v696_v58, %v696_v58  ;;  %v1251_v3 = vpack.c.bf16 %v728_v59, %v728_v59  ;;  %v697_v4 = vmax.f32 %v517_v60, 0.0  ;;  %v729_v5 = vmax.f32 %v645_v61, 0.0 }
 0x120   :  { %1019 = vst.msk [vmem:[%s1910_s3 + $0x68] sm:$0xf] %vm992_vm2, %v1221_v62  ;;  %1051 = vst.msk [vmem:[%s1910_s3 + $0xe8] sm:$0xf] %vm992_vm2, %v1253_v63  ;;  %v1222_v6 = vpack.c.bf16 %v699_v0, %v699_v0  ;;  %v1254_v7 = vpack.c.bf16 %v731_v1, %v731_v1 }
 0x121   :  { %1017 = vst.msk [vmem:[%s1910_s3 + $0x60] sm:$0xf] %vm992_vm2, %v1219_v2  ;;  %1049 = vst.msk [vmem:[%s1910_s3 + $0xe0] sm:$0xf] %vm992_vm2, %v1251_v3  ;;  %v1220_v8 = vpack.c.bf16 %v697_v4, %v697_v4  ;;  %v1252_v9 = vpack.c.bf16 %v729_v5, %v729_v5  ;;  %v1336_v10 = vpop.f32.mrb[28].mxu0  ;;  %v1368_v11 = vpop.f32.mrb[28].mxu1 }
 0x122   :  { %1020 = vst.msk [vmem:[%s1910_s3 + $0x6c] sm:$0xf] %vm992_vm2, %v1222_v6  ;;  %1052 = vst.msk [vmem:[%s1910_s3 + $0xec] sm:$0xf] %vm992_vm2, %v1254_v7  ;;  %v538_v12 = vadd.f32 %v1336_v10, %v1585_v38  ;;  %v666_v13 = vadd.f32 %v1368_v11, %v1585_v38  ;;  %v529_v14 = vpop.f32.mrb[29].mxu0  ;;  %v657_v15 = vpop.f32.mrb[29].mxu1 }
 0x123   :  { %1018 = vst.msk [vmem:[%s1910_s3 + $0x64] sm:$0xf] %vm992_vm2, %v1220_v8  ;;  %1050 = vst.msk [vmem:[%s1910_s3 + $0xe4] sm:$0xf] %vm992_vm2, %v1252_v9  ;;  %v530_v16 = vadd.f32 %v1585_v38, %v529_v14  ;;  %v658_v17 = vadd.f32 %v1585_v38, %v657_v15  ;;  %v1337_v18 = vpop.f32.mrb[30].mxu0  ;;  %v1369_v19 = vpop.f32.mrb[30].mxu1 }
 0x124   :  { %v702_v20 = vmax.f32 %v538_v12, 0.0  ;;  %v734_v21 = vmax.f32 %v666_v13, 0.0  ;;  %v541_v22 = vadd.f32 %v1337_v18, %v1585_v38  ;;  %v669_v23 = vadd.f32 %v1369_v19, %v1585_v38  ;;  %v532_v24 = vpop.f32.mrb[31].mxu0  ;;  %v660_v25 = vpop.f32.mrb[31].mxu1 }
 0x125   :  { %v700_v26 = vmax.f32 %v530_v16, 0.0  ;;  %v732_v27 = vmax.f32 %v658_v17, 0.0  ;;  %v533_v28 = vadd.f32 %v1585_v38, %v532_v24  ;;  %v661_v29 = vadd.f32 %v1585_v38, %v660_v25 }
 0x126   :  { %v1225_v30 = vpack.c.bf16 %v702_v20, %v702_v20  ;;  %v1257_v31 = vpack.c.bf16 %v734_v21, %v734_v21  ;;  %v703_v32 = vmax.f32 %v541_v22, 0.0  ;;  %v735_v33 = vmax.f32 %v669_v23, 0.0 }
 0x127   :  { %v1223_v34 = vpack.c.bf16 %v700_v26, %v700_v26  ;;  %v1255_v35 = vpack.c.bf16 %v732_v27, %v732_v27  ;;  %v701_v36 = vmax.f32 %v533_v28, 0.0  ;;  %v733_v37 = vmax.f32 %v661_v29, 0.0 }
 0x128   :  { %1023 = vst.msk [vmem:[%s1910_s3 + $0x78] sm:$0xf] %vm992_vm2, %v1225_v30  ;;  %1055 = vst.msk [vmem:[%s1910_s3 + $0xf8] sm:$0xf] %vm992_vm2, %v1257_v31  ;;  %v1226_v39 = vpack.c.bf16 %v703_v32, %v703_v32  ;;  %v1258_v38 = vpack.c.bf16 %v735_v33, %v735_v33 }
 0x129   :  { %1021 = vst.msk [vmem:[%s1910_s3 + $0x70] sm:$0xf] %vm992_vm2, %v1223_v34  ;;  %1053 = vst.msk [vmem:[%s1910_s3 + $0xf0] sm:$0xf] %vm992_vm2, %v1255_v35  ;;  %v1224_v40 = vpack.c.bf16 %v701_v36, %v701_v36  ;;  %v1256_v41 = vpack.c.bf16 %v733_v37, %v733_v37 }
 0x12a   :  { %1024 = vst.msk [vmem:[%s1910_s3 + $0x7c] sm:$0xf] %vm992_vm2, %v1226_v39  ;;  %1056 = vst.msk [vmem:[%s1910_s3 + $0xfc] sm:$0xf] %vm992_vm2, %v1258_v38 }
 0x12b   :  { %1022 = vst.msk [vmem:[%s1910_s3 + $0x74] sm:$0xf] %vm992_vm2, %v1224_v40  ;;  %1054 = vst.msk [vmem:[%s1910_s3 + $0xf4] sm:$0xf] %vm992_vm2, %v1256_v41 }

// kernel: vgg16_relu7.24
= control target key start
LH: loop header
LB: loop body
LE: loop exit
PB: predicated region body
PF: predicated region fallthrough
CT: control target
= control target key end

     0   :  { %v1579_v0 = vmov 0   ;;  %vm446_vm0 = vcmask 130048   ;;  %vm1152_vm1 = vcmask 125952   ;;  %s2176_s1 = inlined_call_operand.vmem [shape: bf16[144,16], index: 1, kind: input, shape index: {}]   ;;  %s2177_s0 = inlined_call_operand.vmem [shape: bf16[512,144], index: 0, kind: input, shape index: {}]   ;;  %s2178_s2 = inlined_call_operand.vmem [shape: f32[1,16], index: 2, kind: input, shape index: {}]   ;;  %s2179_s3 = inlined_call_operand.vmem [shape: bf16[512,16], index: 3, kind: output, shape index: {}]  }
   0x1   :  { %543 = vmatprep.subr.bf16.mxu0 %v1579_v0  ;;  %1455 = vmatprep.subr.bf16.mxu1 %v1579_v0  ;;  %v1474_v1 = vld [vmem:[%s2176_s1] sm:$0xff]   ;;  %v1475_v2 = vld [vmem:[%s2176_s1 + $0x8] sm:$0xff]   ;;  %v1476_v3 = vld [vmem:[%s2176_s1 + $0x10] sm:$0xff]  }
   0x2   :  { %544 = vmatpush1.bf16.msra.mxu0 %v1474_v1  ;;  %1464 = vmatpush1.bf16.msra.mxu1 %v1474_v1  ;;  %v1477_v4 = vld [vmem:[%s2176_s1 + $0x18] sm:$0xff]   ;;  %v1485_v5 = vld [vmem:[%s2177_s0 + $0x4] ss:$8 sps:$4 sm:$0xff]   ;;  %v1480_v9 = vld [vmem:[%s2176_s1 + $0x30] sm:$0xff]  }
   0x3   :  { %545 = vmatprep.subr.bf16.mxu0 %v1579_v0  ;;  %1456 = vmatprep.subr.bf16.mxu1 %v1579_v0  ;;  %v1488_v6 = vld [vmem:[%s2177_s0 + $0x104] ss:$8 sps:$4 sm:$0xff]   ;;  %v1481_v10 = vld [vmem:[%s2176_s1 + $0x38] sm:$0xff]   ;;  %v1483_v12 = vld [vmem:[%s2177_s0] ss:$8 sps:$4 sm:$0xff]  }
   0x4   :  { %1295 = vmatprep.mubr.msk.bf16.mxu0 %vm446_vm0, %v1485_v5  ;;  %1311 = vmatprep.mubr.msk.bf16.mxu1 %vm446_vm0, %v1488_v6  ;;  %v1478_v7 = vld [vmem:[%s2176_s1 + $0x20] sm:$0xff]   ;;  %v1479_v8 = vld [vmem:[%s2176_s1 + $0x28] sm:$0xff]   ;;  %v1489_v14 = vld [vmem:[%s2177_s0 + $0x14] ss:$8 sps:$4 sm:$0xff]  }
   0x5   :  { %v1482_v11 = vld [vmem:[%s2176_s1 + $0x40] sm:$0xff]   ;;  %v1491_v15 = vld [vmem:[%s2177_s0 + $0x114] ss:$8 sps:$4 sm:$0xff]   ;;  %v1493_v16 = vld [vmem:[%s2177_s0 + $0x10] ss:$8 sps:$4 sm:$0xff]  }
   0x6   :  { %546 = vmatpush1.bf16.msra.mxu0 %v1475_v2  ;;  %1465 = vmatpush1.bf16.msra.mxu1 %v1475_v2  ;;  %v1486_v13 = vld [vmem:[%s2177_s0 + $0x100] ss:$8 sps:$4 sm:$0xff]   ;;  %v1494_v17 = vld [vmem:[%s2177_s0 + $0x110] ss:$8 sps:$4 sm:$0xff]   ;;  %v1495_v18 = vld [vmem:[%s2177_s0 + $0x24] ss:$8 sps:$4 sm:$0xff]  }
   0x7   :  { %547 = vmatprep.subr.bf16.mxu0 %v1579_v0  ;;  %1457 = vmatprep.subr.bf16.mxu1 %v1579_v0  ;;  %v1497_v19 = vld [vmem:[%s2177_s0 + $0x124] ss:$8 sps:$4 sm:$0xff]   ;;  %v1499_v20 = vld [vmem:[%s2177_s0 + $0x20] ss:$8 sps:$4 sm:$0xff]   ;;  %v1501_v22 = vld [vmem:[%s2177_s0 + $0x34] ss:$8 sps:$4 sm:$0xff]  }
   0x8   :  { %v1500_v21 = vld [vmem:[%s2177_s0 + $0x120] ss:$8 sps:$4 sm:$0xff]   ;;  %v1503_v23 = vld [vmem:[%s2177_s0 + $0x134] ss:$8 sps:$4 sm:$0xff]   ;;  %v1505_v24 = vld [vmem:[%s2177_s0 + $0x30] ss:$8 sps:$4 sm:$0xff]  }
   0x9   :  { %v1506_v25 = vld [vmem:[%s2177_s0 + $0x130] ss:$8 sps:$4 sm:$0xff]   ;;  %v1507_v26 = vld [vmem:[%s2177_s0 + $0x44] ss:$8 sps:$4 sm:$0xff]   ;;  %v1511_v28 = vld [vmem:[%s2177_s0 + $0x40] ss:$8 sps:$4 sm:$0xff]  }
   0xa   :  { %548 = vmatpush1.bf16.msra.mxu0 %v1476_v3  ;;  %1466 = vmatpush1.bf16.msra.mxu1 %v1476_v3  ;;  %v1509_v27 = vld [vmem:[%s2177_s0 + $0x144] ss:$8 sps:$4 sm:$0xff]   ;;  %v1512_v29 = vld [vmem:[%s2177_s0 + $0x140] ss:$8 sps:$4 sm:$0xff]   ;;  %v1513_v30 = vld [vmem:[%s2177_s0 + $0x54] ss:$8 sps:$4 sm:$0xff]  }
   0xb   :  { %549 = vmatprep.subr.bf16.mxu0 %v1579_v0  ;;  %1458 = vmatprep.subr.bf16.mxu1 %v1579_v0  ;;  %v1515_v31 = vld [vmem:[%s2177_s0 + $0x154] ss:$8 sps:$4 sm:$0xff]   ;;  %v1517_v32 = vld [vmem:[%s2177_s0 + $0x50] ss:$8 sps:$4 sm:$0xff]   ;;  %v1519_v34 = vld [vmem:[%s2177_s0 + $0x64] ss:$8 sps:$4 sm:$0xff]  }
   0xc   :  { %v1518_v33 = vld [vmem:[%s2177_s0 + $0x150] ss:$8 sps:$4 sm:$0xff]   ;;  %v1521_v35 = vld [vmem:[%s2177_s0 + $0x164] ss:$8 sps:$4 sm:$0xff]   ;;  %v1523_v36 = vld [vmem:[%s2177_s0 + $0x60] ss:$8 sps:$4 sm:$0xff]  }
   0xd   :  { %v1524_v37 = vld [vmem:[%s2177_s0 + $0x160] ss:$8 sps:$4 sm:$0xff]   ;;  %v1525_v38 = vld [vmem:[%s2177_s0 + $0x74] ss:$8 sps:$4 sm:$0xff]   ;;  %v1529_v40 = vld [vmem:[%s2177_s0 + $0x70] ss:$8 sps:$4 sm:$0xff]  }
   0xe   :  { %550 = vmatpush1.bf16.msra.mxu0 %v1477_v4  ;;  %1467 = vmatpush1.bf16.msra.mxu1 %v1477_v4  ;;  %v1527_v39 = vld [vmem:[%s2177_s0 + $0x174] ss:$8 sps:$4 sm:$0xff]   ;;  %v1530_v41 = vld [vmem:[%s2177_s0 + $0x170] ss:$8 sps:$4 sm:$0xff]   ;;  %v1531_v42 = vld [vmem:[%s2177_s0 + $0x84] ss:$8 sps:$4 sm:$0xff]  }
   0xf   :  { %551 = vmatprep.subr.bf16.mxu0 %v1579_v0  ;;  %1459 = vmatprep.subr.bf16.mxu1 %v1579_v0  ;;  %v1533_v43 = vld [vmem:[%s2177_s0 + $0x184] ss:$8 sps:$4 sm:$0xff]   ;;  %v1535_v44 = vld [vmem:[%s2177_s0 + $0x80] ss:$8 sps:$4 sm:$0xff]   ;;  %v1537_v46 = vld [vmem:[%s2177_s0 + $0x94] ss:$8 sps:$4 sm:$0xff]  }
  0x10   :  { %v1536_v45 = vld [vmem:[%s2177_s0 + $0x180] ss:$8 sps:$4 sm:$0xff]   ;;  %v1539_v47 = vld [vmem:[%s2177_s0 + $0x194] ss:$8 sps:$4 sm:$0xff]   ;;  %v1541_v48 = vld [vmem:[%s2177_s0 + $0x90] ss:$8 sps:$4 sm:$0xff]  }
  0x11   :  { %v1542_v49 = vld [vmem:[%s2177_s0 + $0x190] ss:$8 sps:$4 sm:$0xff]   ;;  %v1543_v50 = vld [vmem:[%s2177_s0 + $0xa4] ss:$8 sps:$4 sm:$0xff]   ;;  %v1547_v52 = vld [vmem:[%s2177_s0 + $0xa0] ss:$8 sps:$4 sm:$0xff]  }
  0x12   :  { %552 = vmatpush1.bf16.msra.mxu0 %v1478_v7  ;;  %1468 = vmatpush1.bf16.msra.mxu1 %v1478_v7  ;;  %v1545_v51 = vld [vmem:[%s2177_s0 + $0x1a4] ss:$8 sps:$4 sm:$0xff]   ;;  %v1548_v53 = vld [vmem:[%s2177_s0 + $0x1a0] ss:$8 sps:$4 sm:$0xff]   ;;  %v1549_v54 = vld [vmem:[%s2177_s0 + $0xb4] ss:$8 sps:$4 sm:$0xff]  }
  0x13   :  { %553 = vmatprep.subr.bf16.mxu0 %v1579_v0  ;;  %1460 = vmatprep.subr.bf16.mxu1 %v1579_v0  ;;  %v1551_v55 = vld [vmem:[%s2177_s0 + $0x1b4] ss:$8 sps:$4 sm:$0xff]   ;;  %v1553_v56 = vld [vmem:[%s2177_s0 + $0xb0] ss:$8 sps:$4 sm:$0xff]   ;;  %v1555_v58 = vld [vmem:[%s2177_s0 + $0xc4] ss:$8 sps:$4 sm:$0xff]  }
  0x14   :  { %v1554_v57 = vld [vmem:[%s2177_s0 + $0x1b0] ss:$8 sps:$4 sm:$0xff]   ;;  %v1557_v59 = vld [vmem:[%s2177_s0 + $0x1c4] ss:$8 sps:$4 sm:$0xff]   ;;  %v1559_v60 = vld [vmem:[%s2177_s0 + $0xc0] ss:$8 sps:$4 sm:$0xff]  }
  0x15   :  { %v1560_v61 = vld [vmem:[%s2177_s0 + $0x1c0] ss:$8 sps:$4 sm:$0xff]   ;;  %v1561_v62 = vld [vmem:[%s2177_s0 + $0xd4] ss:$8 sps:$4 sm:$0xff]   ;;  %v1566_v1 = vld [vmem:[%s2177_s0 + $0x1d0] ss:$8 sps:$4 sm:$0xff]  }
  0x16   :  { %554 = vmatpush1.bf16.msra.mxu0 %v1479_v8  ;;  %1469 = vmatpush1.bf16.msra.mxu1 %v1479_v8  ;;  %v1563_v63 = vld [vmem:[%s2177_s0 + $0x1d4] ss:$8 sps:$4 sm:$0xff]   ;;  %v1567_v2 = vld [vmem:[%s2177_s0 + $0xe4] ss:$8 sps:$4 sm:$0xff]   ;;  %v1571_v4 = vld [vmem:[%s2177_s0 + $0xe0] ss:$8 sps:$4 sm:$0xff]  }
  0x17   :  { %555 = vmatprep.subr.bf16.mxu0 %v1579_v0  ;;  %1461 = vmatprep.subr.bf16.mxu1 %v1579_v0  ;;  %v1569_v3 = vld [vmem:[%s2177_s0 + $0x1e4] ss:$8 sps:$4 sm:$0xff]   ;;  %v1572_v5 = vld [vmem:[%s2177_s0 + $0x1e0] ss:$8 sps:$4 sm:$0xff]   ;;  %v1573_v6 = vld [vmem:[%s2177_s0 + $0xf4] ss:$8 sps:$4 sm:$0xff]  }
  0x18   :  { %v1575_v7 = vld [vmem:[%s2177_s0 + $0x1f4] ss:$8 sps:$4 sm:$0xff]   ;;  %v1577_v8 = vld [vmem:[%s2177_s0 + $0xf0] ss:$8 sps:$4 sm:$0xff]  }
  0x1a   :  { %556 = vmatpush1.bf16.msra.mxu0 %v1480_v9  ;;  %1470 = vmatpush1.bf16.msra.mxu1 %v1480_v9  ;;  %v1578_v9 = vld [vmem:[%s2177_s0 + $0x1f0] ss:$8 sps:$4 sm:$0xff]  }
  0x1b   :  { %557 = vmatprep.subr.bf16.mxu0 %v1579_v0  ;;  %1462 = vmatprep.subr.bf16.mxu1 %v1579_v0 }
  0x1e   :  { %558 = vmatpush1.bf16.msra.mxu0 %v1481_v10  ;;  %1471 = vmatpush1.bf16.msra.mxu1 %v1481_v10  ;;  %v1854_v10 = vld [vmem:[%s2178_s2] ss:$0 sm:$0xff] }
  0x1f   :  { %559 = vmatprep.subr.bf16.mxu0 %v1579_v0  ;;  %1463 = vmatprep.subr.bf16.mxu1 %v1579_v0  ;;  %v1565_v0 = vld [vmem:[%s2177_s0 + $0xd0] ss:$8 sps:$4 sm:$0xff]  }
  0x22   :  { %560 = vmatpush1.bf16.msra.mxu0 %v1482_v11  ;;  %1472 = vmatpush1.bf16.msra.mxu1 %v1482_v11 }
  0x25   :  { %576 = vmatmul.mubr.bf16.vlgmr.msra.gmra.mrb[0].mxu0 %v1483_v12  ;;  %704 = vmatmul.mubr.bf16.vlgmr.msra.gmra.mrb[0].mxu1 %v1486_v13 }
  0x26   :  { %1296 = vmatprep.mubr.msk.bf16.mxu0 %vm446_vm0, %v1489_v14  ;;  %1312 = vmatprep.mubr.msk.bf16.mxu1 %vm446_vm0, %v1491_v15 }
  0x2d   :  { %584 = vmatmul.mubr.bf16.gmra.mrb[4].mxu0 %v1493_v16  ;;  %712 = vmatmul.mubr.bf16.gmra.mrb[4].mxu1 %v1494_v17 }
  0x2e   :  { %1297 = vmatprep.mubr.msk.bf16.mxu0 %vm446_vm0, %v1495_v18  ;;  %1313 = vmatprep.mubr.msk.bf16.mxu1 %vm446_vm0, %v1497_v19 }
  0x35   :  { %592 = vmatmul.mubr.bf16.gmra.mrb[8].mxu0 %v1499_v20  ;;  %720 = vmatmul.mubr.bf16.gmra.mrb[8].mxu1 %v1500_v21 }
  0x36   :  { %1298 = vmatprep.mubr.msk.bf16.mxu0 %vm446_vm0, %v1501_v22  ;;  %1314 = vmatprep.mubr.msk.bf16.mxu1 %vm446_vm0, %v1503_v23 }
  0x3d   :  { %600 = vmatmul.mubr.bf16.gmra.mrb[12].mxu0 %v1505_v24  ;;  %728 = vmatmul.mubr.bf16.gmra.mrb[12].mxu1 %v1506_v25 }
  0x3e   :  { %1299 = vmatprep.mubr.msk.bf16.mxu0 %vm446_vm0, %v1507_v26  ;;  %1315 = vmatprep.mubr.msk.bf16.mxu1 %vm446_vm0, %v1509_v27 }
  0x45   :  { %608 = vmatmul.mubr.bf16.gmra.mrb[16].mxu0 %v1511_v28  ;;  %736 = vmatmul.mubr.bf16.gmra.mrb[16].mxu1 %v1512_v29 }
  0x46   :  { %1300 = vmatprep.mubr.msk.bf16.mxu0 %vm446_vm0, %v1513_v30  ;;  %1316 = vmatprep.mubr.msk.bf16.mxu1 %vm446_vm0, %v1515_v31 }
  0x4d   :  { %616 = vmatmul.mubr.bf16.gmra.mrb[20].mxu0 %v1517_v32  ;;  %744 = vmatmul.mubr.bf16.gmra.mrb[20].mxu1 %v1518_v33 }
  0x4e   :  { %1301 = vmatprep.mubr.msk.bf16.mxu0 %vm446_vm0, %v1519_v34  ;;  %1317 = vmatprep.mubr.msk.bf16.mxu1 %vm446_vm0, %v1521_v35 }
  0x55   :  { %624 = vmatmul.mubr.bf16.gmra.mrb[24].mxu0 %v1523_v36  ;;  %752 = vmatmul.mubr.bf16.gmra.mrb[24].mxu1 %v1524_v37 }
  0x56   :  { %1302 = vmatprep.mubr.msk.bf16.mxu0 %vm446_vm0, %v1525_v38  ;;  %1318 = vmatprep.mubr.msk.bf16.mxu1 %vm446_vm0, %v1527_v39 }
  0x5d   :  { %632 = vmatmul.mubr.bf16.gmra.mrb[28].mxu0 %v1529_v40  ;;  %760 = vmatmul.mubr.bf16.gmra.mrb[28].mxu1 %v1530_v41 }
  0x5e   :  { %1303 = vmatprep.mubr.msk.bf16.mxu0 %vm446_vm0, %v1531_v42  ;;  %1319 = vmatprep.mubr.msk.bf16.mxu1 %vm446_vm0, %v1533_v43 }
  0x65   :  { %640 = vmatmul.mubr.bf16.gmra.mrb[32].mxu0 %v1535_v44  ;;  %768 = vmatmul.mubr.bf16.gmra.mrb[32].mxu1 %v1536_v45 }
  0x66   :  { %1304 = vmatprep.mubr.msk.bf16.mxu0 %vm446_vm0, %v1537_v46  ;;  %1320 = vmatprep.mubr.msk.bf16.mxu1 %vm446_vm0, %v1539_v47 }
  0x6d   :  { %648 = vmatmul.mubr.bf16.gmra.mrb[36].mxu0 %v1541_v48  ;;  %776 = vmatmul.mubr.bf16.gmra.mrb[36].mxu1 %v1542_v49 }
  0x6e   :  { %1305 = vmatprep.mubr.msk.bf16.mxu0 %vm446_vm0, %v1543_v50  ;;  %1321 = vmatprep.mubr.msk.bf16.mxu1 %vm446_vm0, %v1545_v51 }
  0x75   :  { %656 = vmatmul.mubr.bf16.gmra.mrb[40].mxu0 %v1547_v52  ;;  %784 = vmatmul.mubr.bf16.gmra.mrb[40].mxu1 %v1548_v53 }
  0x76   :  { %1306 = vmatprep.mubr.msk.bf16.mxu0 %vm446_vm0, %v1549_v54  ;;  %1322 = vmatprep.mubr.msk.bf16.mxu1 %vm446_vm0, %v1551_v55 }
  0x7d   :  { %664 = vmatmul.mubr.bf16.gmra.mrb[44].mxu0 %v1553_v56  ;;  %792 = vmatmul.mubr.bf16.gmra.mrb[44].mxu1 %v1554_v57 }
  0x7e   :  { %1307 = vmatprep.mubr.msk.bf16.mxu0 %vm446_vm0, %v1555_v58  ;;  %1323 = vmatprep.mubr.msk.bf16.mxu1 %vm446_vm0, %v1557_v59 }
  0x85   :  { %672 = vmatmul.mubr.bf16.gmra.mrb[48].mxu0 %v1559_v60  ;;  %800 = vmatmul.mubr.bf16.gmra.mrb[48].mxu1 %v1560_v61 }
  0x86   :  { %1308 = vmatprep.mubr.msk.bf16.mxu0 %vm446_vm0, %v1561_v62  ;;  %1324 = vmatprep.mubr.msk.bf16.mxu1 %vm446_vm0, %v1563_v63 }
  0x8d   :  { %680 = vmatmul.mubr.bf16.gmra.mrb[52].mxu0 %v1565_v0  ;;  %808 = vmatmul.mubr.bf16.gmra.mrb[52].mxu1 %v1566_v1 }
  0x8e   :  { %1309 = vmatprep.mubr.msk.bf16.mxu0 %vm446_vm0, %v1567_v2  ;;  %1325 = vmatprep.mubr.msk.bf16.mxu1 %vm446_vm0, %v1569_v3 }
  0x95   :  { %688 = vmatmul.mubr.bf16.gmra.mrb[56].mxu0 %v1571_v4  ;;  %816 = vmatmul.mubr.bf16.gmra.mrb[56].mxu1 %v1572_v5 }
  0x96   :  { %1310 = vmatprep.mubr.msk.bf16.mxu0 %vm446_vm0, %v1573_v6  ;;  %1326 = vmatprep.mubr.msk.bf16.mxu1 %vm446_vm0, %v1575_v7 }
  0x9d   :  { %696 = vmatmul.mubr.bf16.gmra.mrb[60].mxu0 %v1577_v8  ;;  %824 = vmatmul.mubr.bf16.gmra.mrb[60].mxu1 %v1578_v9 }
  0xf8   :  { %v577_v11 = vpop.f32.mrb[0].mxu0  ;;  %v705_v12 = vpop.f32.mrb[0].mxu1 }
  0xf9   :  { %v578_v13 = vadd.f32 %v1854_v10, %v577_v11  ;;  %v706_v14 = vadd.f32 %v1854_v10, %v705_v12  ;;  %v579_v15 = vpop.f32.mrb[1].mxu0  ;;  %v707_v16 = vpop.f32.mrb[1].mxu1 }
  0xfa   :  { %v580_v17 = vpop.f32.mrb[2].mxu0  ;;  %v708_v18 = vpop.f32.mrb[2].mxu1 }
  0xfb   :  { %v832_v19 = vmax.f32 %v578_v13, 0.0  ;;  %v864_v20 = vmax.f32 %v706_v14, 0.0  ;;  %v581_v21 = vadd.f32 %v1854_v10, %v580_v17  ;;  %v709_v22 = vadd.f32 %v1854_v10, %v708_v18  ;;  %v582_v23 = vpop.f32.mrb[3].mxu0  ;;  %v710_v24 = vpop.f32.mrb[3].mxu1 }
  0xfd   :  { %v1391_v25 = vpack.c.bf16 %v832_v19, %v832_v19  ;;  %v1423_v26 = vpack.c.bf16 %v864_v20, %v864_v20  ;;  %v833_v27 = vmax.f32 %v581_v21, 0.0  ;;  %v865_v28 = vmax.f32 %v709_v22, 0.0 }
  0xff   :  { %1153 = vst.msk [vmem:[%s2179_s3] sm:$0xf] %vm1152_vm1, %v1391_v25  ;;  %1185 = vst.msk [vmem:[%s2179_s3 + $0x80] sm:$0xf] %vm1152_vm1, %v1423_v26  ;;  %v1392_v29 = vpack.c.bf16 %v833_v27, %v833_v27  ;;  %v1424_v30 = vpack.c.bf16 %v865_v28, %v865_v28 }
 0x100   :  { %v585_v31 = vpop.f32.mrb[4].mxu0  ;;  %v713_v32 = vpop.f32.mrb[4].mxu1 }
 0x101   :  { %1154 = vst.msk [vmem:[%s2179_s3 + $0x4] sm:$0xf] %vm1152_vm1, %v1392_v29  ;;  %1186 = vst.msk [vmem:[%s2179_s3 + $0x84] sm:$0xf] %vm1152_vm1, %v1424_v30  ;;  %v586_v33 = vadd.f32 %v1854_v10, %v585_v31  ;;  %v714_v34 = vadd.f32 %v1854_v10, %v713_v32  ;;  %v587_v35 = vpop.f32.mrb[5].mxu0  ;;  %v715_v36 = vpop.f32.mrb[5].mxu1 }
 0x102   :  { %v588_v37 = vpop.f32.mrb[6].mxu0  ;;  %v716_v38 = vpop.f32.mrb[6].mxu1 }
 0x103   :  { %v834_v39 = vmax.f32 %v586_v33, 0.0  ;;  %v866_v40 = vmax.f32 %v714_v34, 0.0  ;;  %v589_v41 = vadd.f32 %v1854_v10, %v588_v37  ;;  %v717_v42 = vadd.f32 %v1854_v10, %v716_v38  ;;  %v590_v43 = vpop.f32.mrb[7].mxu0  ;;  %v718_v44 = vpop.f32.mrb[7].mxu1 }
 0x105   :  { %v1393_v45 = vpack.c.bf16 %v834_v39, %v834_v39  ;;  %v1425_v46 = vpack.c.bf16 %v866_v40, %v866_v40  ;;  %v835_v47 = vmax.f32 %v589_v41, 0.0  ;;  %v867_v48 = vmax.f32 %v717_v42, 0.0 }
 0x107   :  { %1155 = vst.msk [vmem:[%s2179_s3 + $0x8] sm:$0xf] %vm1152_vm1, %v1393_v45  ;;  %1187 = vst.msk [vmem:[%s2179_s3 + $0x88] sm:$0xf] %vm1152_vm1, %v1425_v46  ;;  %v1394_v49 = vpack.c.bf16 %v835_v47, %v835_v47  ;;  %v1426_v50 = vpack.c.bf16 %v867_v48, %v867_v48 }
 0x108   :  { %v593_v51 = vpop.f32.mrb[8].mxu0  ;;  %v721_v52 = vpop.f32.mrb[8].mxu1 }
 0x109   :  { %1156 = vst.msk [vmem:[%s2179_s3 + $0xc] sm:$0xf] %vm1152_vm1, %v1394_v49  ;;  %1188 = vst.msk [vmem:[%s2179_s3 + $0x8c] sm:$0xf] %vm1152_vm1, %v1426_v50  ;;  %v594_v53 = vadd.f32 %v1854_v10, %v593_v51  ;;  %v722_v54 = vadd.f32 %v1854_v10, %v721_v52  ;;  %v595_v55 = vpop.f32.mrb[9].mxu0  ;;  %v723_v56 = vpop.f32.mrb[9].mxu1 }
 0x10a   :  { %v596_v57 = vpop.f32.mrb[10].mxu0  ;;  %v724_v58 = vpop.f32.mrb[10].mxu1 }
 0x10b   :  { %v836_v59 = vmax.f32 %v594_v53, 0.0  ;;  %v868_v60 = vmax.f32 %v722_v54, 0.0  ;;  %v597_v61 = vadd.f32 %v1854_v10, %v596_v57  ;;  %v725_v62 = vadd.f32 %v1854_v10, %v724_v58  ;;  %v598_v63 = vpop.f32.mrb[11].mxu0  ;;  %v726_v0 = vpop.f32.mrb[11].mxu1 }
 0x10d   :  { %v1395_v1 = vpack.c.bf16 %v836_v59, %v836_v59  ;;  %v1427_v2 = vpack.c.bf16 %v868_v60, %v868_v60  ;;  %v837_v3 = vmax.f32 %v597_v61, 0.0  ;;  %v869_v4 = vmax.f32 %v725_v62, 0.0 }
 0x10f   :  { %1157 = vst.msk [vmem:[%s2179_s3 + $0x10] sm:$0xf] %vm1152_vm1, %v1395_v1  ;;  %1189 = vst.msk [vmem:[%s2179_s3 + $0x90] sm:$0xf] %vm1152_vm1, %v1427_v2  ;;  %v1396_v5 = vpack.c.bf16 %v837_v3, %v837_v3  ;;  %v1428_v6 = vpack.c.bf16 %v869_v4, %v869_v4 }
 0x110   :  { %v601_v7 = vpop.f32.mrb[12].mxu0  ;;  %v729_v8 = vpop.f32.mrb[12].mxu1 }
 0x111   :  { %1158 = vst.msk [vmem:[%s2179_s3 + $0x14] sm:$0xf] %vm1152_vm1, %v1396_v5  ;;  %1190 = vst.msk [vmem:[%s2179_s3 + $0x94] sm:$0xf] %vm1152_vm1, %v1428_v6  ;;  %v602_v9 = vadd.f32 %v1854_v10, %v601_v7  ;;  %v730_v11 = vadd.f32 %v1854_v10, %v729_v8  ;;  %v603_v12 = vpop.f32.mrb[13].mxu0  ;;  %v731_v13 = vpop.f32.mrb[13].mxu1 }
 0x112   :  { %v604_v14 = vpop.f32.mrb[14].mxu0  ;;  %v732_v15 = vpop.f32.mrb[14].mxu1 }
 0x113   :  { %v838_v16 = vmax.f32 %v602_v9, 0.0  ;;  %v870_v17 = vmax.f32 %v730_v11, 0.0  ;;  %v605_v18 = vadd.f32 %v1854_v10, %v604_v14  ;;  %v733_v19 = vadd.f32 %v1854_v10, %v732_v15  ;;  %v606_v20 = vpop.f32.mrb[15].mxu0  ;;  %v734_v21 = vpop.f32.mrb[15].mxu1 }
 0x115   :  { %v1397_v22 = vpack.c.bf16 %v838_v16, %v838_v16  ;;  %v1429_v23 = vpack.c.bf16 %v870_v17, %v870_v17  ;;  %v839_v24 = vmax.f32 %v605_v18, 0.0  ;;  %v871_v25 = vmax.f32 %v733_v19, 0.0 }
 0x117   :  { %1159 = vst.msk [vmem:[%s2179_s3 + $0x18] sm:$0xf] %vm1152_vm1, %v1397_v22  ;;  %1191 = vst.msk [vmem:[%s2179_s3 + $0x98] sm:$0xf] %vm1152_vm1, %v1429_v23  ;;  %v1398_v26 = vpack.c.bf16 %v839_v24, %v839_v24  ;;  %v1430_v27 = vpack.c.bf16 %v871_v25, %v871_v25 }
 0x118   :  { %v609_v28 = vpop.f32.mrb[16].mxu0  ;;  %v737_v29 = vpop.f32.mrb[16].mxu1 }
 0x119   :  { %1160 = vst.msk [vmem:[%s2179_s3 + $0x1c] sm:$0xf] %vm1152_vm1, %v1398_v26  ;;  %1192 = vst.msk [vmem:[%s2179_s3 + $0x9c] sm:$0xf] %vm1152_vm1, %v1430_v27  ;;  %v610_v30 = vadd.f32 %v1854_v10, %v609_v28  ;;  %v738_v31 = vadd.f32 %v1854_v10, %v737_v29  ;;  %v611_v32 = vpop.f32.mrb[17].mxu0  ;;  %v739_v33 = vpop.f32.mrb[17].mxu1 }
 0x11a   :  { %v612_v34 = vpop.f32.mrb[18].mxu0  ;;  %v740_v35 = vpop.f32.mrb[18].mxu1 }
 0x11b   :  { %v840_v36 = vmax.f32 %v610_v30, 0.0  ;;  %v872_v37 = vmax.f32 %v738_v31, 0.0  ;;  %v613_v38 = vadd.f32 %v1854_v10, %v612_v34  ;;  %v741_v39 = vadd.f32 %v1854_v10, %v740_v35  ;;  %v614_v40 = vpop.f32.mrb[19].mxu0  ;;  %v742_v41 = vpop.f32.mrb[19].mxu1 }
 0x11d   :  { %v1399_v42 = vpack.c.bf16 %v840_v36, %v840_v36  ;;  %v1431_v43 = vpack.c.bf16 %v872_v37, %v872_v37  ;;  %v841_v44 = vmax.f32 %v613_v38, 0.0  ;;  %v873_v45 = vmax.f32 %v741_v39, 0.0 }
 0x11f   :  { %1161 = vst.msk [vmem:[%s2179_s3 + $0x20] sm:$0xf] %vm1152_vm1, %v1399_v42  ;;  %1193 = vst.msk [vmem:[%s2179_s3 + $0xa0] sm:$0xf] %vm1152_vm1, %v1431_v43  ;;  %v1400_v46 = vpack.c.bf16 %v841_v44, %v841_v44  ;;  %v1432_v47 = vpack.c.bf16 %v873_v45, %v873_v45 }
 0x120   :  { %v617_v48 = vpop.f32.mrb[20].mxu0  ;;  %v745_v49 = vpop.f32.mrb[20].mxu1 }
 0x121   :  { %1162 = vst.msk [vmem:[%s2179_s3 + $0x24] sm:$0xf] %vm1152_vm1, %v1400_v46  ;;  %1194 = vst.msk [vmem:[%s2179_s3 + $0xa4] sm:$0xf] %vm1152_vm1, %v1432_v47  ;;  %v618_v50 = vadd.f32 %v1854_v10, %v617_v48  ;;  %v746_v51 = vadd.f32 %v1854_v10, %v745_v49  ;;  %v619_v52 = vpop.f32.mrb[21].mxu0  ;;  %v747_v53 = vpop.f32.mrb[21].mxu1 }
 0x122   :  { %v620_v54 = vpop.f32.mrb[22].mxu0  ;;  %v748_v55 = vpop.f32.mrb[22].mxu1 }
 0x123   :  { %v842_v56 = vmax.f32 %v618_v50, 0.0  ;;  %v874_v57 = vmax.f32 %v746_v51, 0.0  ;;  %v621_v58 = vadd.f32 %v1854_v10, %v620_v54  ;;  %v749_v59 = vadd.f32 %v1854_v10, %v748_v55  ;;  %v622_v60 = vpop.f32.mrb[23].mxu0  ;;  %v750_v61 = vpop.f32.mrb[23].mxu1 }
 0x125   :  { %v1401_v62 = vpack.c.bf16 %v842_v56, %v842_v56  ;;  %v1433_v63 = vpack.c.bf16 %v874_v57, %v874_v57  ;;  %v843_v0 = vmax.f32 %v621_v58, 0.0  ;;  %v875_v1 = vmax.f32 %v749_v59, 0.0 }
 0x127   :  { %1163 = vst.msk [vmem:[%s2179_s3 + $0x28] sm:$0xf] %vm1152_vm1, %v1401_v62  ;;  %1195 = vst.msk [vmem:[%s2179_s3 + $0xa8] sm:$0xf] %vm1152_vm1, %v1433_v63  ;;  %v1402_v2 = vpack.c.bf16 %v843_v0, %v843_v0  ;;  %v1434_v3 = vpack.c.bf16 %v875_v1, %v875_v1 }
 0x128   :  { %v625_v4 = vpop.f32.mrb[24].mxu0  ;;  %v753_v5 = vpop.f32.mrb[24].mxu1 }
 0x129   :  { %1164 = vst.msk [vmem:[%s2179_s3 + $0x2c] sm:$0xf] %vm1152_vm1, %v1402_v2  ;;  %1196 = vst.msk [vmem:[%s2179_s3 + $0xac] sm:$0xf] %vm1152_vm1, %v1434_v3  ;;  %v626_v6 = vadd.f32 %v1854_v10, %v625_v4  ;;  %v754_v7 = vadd.f32 %v1854_v10, %v753_v5  ;;  %v627_v8 = vpop.f32.mrb[25].mxu0  ;;  %v755_v9 = vpop.f32.mrb[25].mxu1 }
 0x12a   :  { %v628_v11 = vpop.f32.mrb[26].mxu0  ;;  %v756_v12 = vpop.f32.mrb[26].mxu1 }
 0x12b   :  { %v844_v13 = vmax.f32 %v626_v6, 0.0  ;;  %v876_v14 = vmax.f32 %v754_v7, 0.0  ;;  %v629_v15 = vadd.f32 %v1854_v10, %v628_v11  ;;  %v757_v16 = vadd.f32 %v1854_v10, %v756_v12  ;;  %v630_v17 = vpop.f32.mrb[27].mxu0  ;;  %v758_v18 = vpop.f32.mrb[27].mxu1 }
 0x12d   :  { %v1403_v19 = vpack.c.bf16 %v844_v13, %v844_v13  ;;  %v1435_v20 = vpack.c.bf16 %v876_v14, %v876_v14  ;;  %v845_v21 = vmax.f32 %v629_v15, 0.0  ;;  %v877_v22 = vmax.f32 %v757_v16, 0.0 }
 0x12f   :  { %1165 = vst.msk [vmem:[%s2179_s3 + $0x30] sm:$0xf] %vm1152_vm1, %v1403_v19  ;;  %1197 = vst.msk [vmem:[%s2179_s3 + $0xb0] sm:$0xf] %vm1152_vm1, %v1435_v20  ;;  %v1404_v23 = vpack.c.bf16 %v845_v21, %v845_v21  ;;  %v1436_v24 = vpack.c.bf16 %v877_v22, %v877_v22 }
 0x130   :  { %v633_v25 = vpop.f32.mrb[28].mxu0  ;;  %v761_v26 = vpop.f32.mrb[28].mxu1 }
 0x131   :  { %1166 = vst.msk [vmem:[%s2179_s3 + $0x34] sm:$0xf] %vm1152_vm1, %v1404_v23  ;;  %1198 = vst.msk [vmem:[%s2179_s3 + $0xb4] sm:$0xf] %vm1152_vm1, %v1436_v24  ;;  %v634_v27 = vadd.f32 %v1854_v10, %v633_v25  ;;  %v762_v28 = vadd.f32 %v1854_v10, %v761_v26  ;;  %v635_v29 = vpop.f32.mrb[29].mxu0  ;;  %v763_v30 = vpop.f32.mrb[29].mxu1 }
 0x132   :  { %v636_v31 = vpop.f32.mrb[30].mxu0  ;;  %v764_v32 = vpop.f32.mrb[30].mxu1 }
 0x133   :  { %v846_v33 = vmax.f32 %v634_v27, 0.0  ;;  %v878_v34 = vmax.f32 %v762_v28, 0.0  ;;  %v637_v35 = vadd.f32 %v1854_v10, %v636_v31  ;;  %v765_v36 = vadd.f32 %v1854_v10, %v764_v32  ;;  %v638_v37 = vpop.f32.mrb[31].mxu0  ;;  %v766_v38 = vpop.f32.mrb[31].mxu1 }
 0x135   :  { %v1405_v39 = vpack.c.bf16 %v846_v33, %v846_v33  ;;  %v1437_v40 = vpack.c.bf16 %v878_v34, %v878_v34  ;;  %v847_v41 = vmax.f32 %v637_v35, 0.0  ;;  %v879_v42 = vmax.f32 %v765_v36, 0.0 }
 0x137   :  { %1167 = vst.msk [vmem:[%s2179_s3 + $0x38] sm:$0xf] %vm1152_vm1, %v1405_v39  ;;  %1199 = vst.msk [vmem:[%s2179_s3 + $0xb8] sm:$0xf] %vm1152_vm1, %v1437_v40  ;;  %v1406_v43 = vpack.c.bf16 %v847_v41, %v847_v41  ;;  %v1438_v44 = vpack.c.bf16 %v879_v42, %v879_v42 }
 0x138   :  { %v641_v45 = vpop.f32.mrb[32].mxu0  ;;  %v769_v46 = vpop.f32.mrb[32].mxu1 }
 0x139   :  { %1168 = vst.msk [vmem:[%s2179_s3 + $0x3c] sm:$0xf] %vm1152_vm1, %v1406_v43  ;;  %1200 = vst.msk [vmem:[%s2179_s3 + $0xbc] sm:$0xf] %vm1152_vm1, %v1438_v44  ;;  %v642_v47 = vadd.f32 %v1854_v10, %v641_v45  ;;  %v770_v48 = vadd.f32 %v1854_v10, %v769_v46  ;;  %v643_v49 = vpop.f32.mrb[33].mxu0  ;;  %v771_v50 = vpop.f32.mrb[33].mxu1 }
 0x13a   :  { %v644_v51 = vpop.f32.mrb[34].mxu0  ;;  %v772_v52 = vpop.f32.mrb[34].mxu1 }
 0x13b   :  { %v848_v53 = vmax.f32 %v642_v47, 0.0  ;;  %v880_v54 = vmax.f32 %v770_v48, 0.0  ;;  %v645_v55 = vadd.f32 %v1854_v10, %v644_v51  ;;  %v773_v56 = vadd.f32 %v1854_v10, %v772_v52  ;;  %v646_v57 = vpop.f32.mrb[35].mxu0  ;;  %v774_v58 = vpop.f32.mrb[35].mxu1 }
 0x13d   :  { %v1407_v59 = vpack.c.bf16 %v848_v53, %v848_v53  ;;  %v1439_v60 = vpack.c.bf16 %v880_v54, %v880_v54  ;;  %v849_v61 = vmax.f32 %v645_v55, 0.0  ;;  %v881_v62 = vmax.f32 %v773_v56, 0.0 }
 0x13f   :  { %1169 = vst.msk [vmem:[%s2179_s3 + $0x40] sm:$0xf] %vm1152_vm1, %v1407_v59  ;;  %1201 = vst.msk [vmem:[%s2179_s3 + $0xc0] sm:$0xf] %vm1152_vm1, %v1439_v60  ;;  %v1408_v63 = vpack.c.bf16 %v849_v61, %v849_v61  ;;  %v1440_v0 = vpack.c.bf16 %v881_v62, %v881_v62 }
 0x140   :  { %v649_v1 = vpop.f32.mrb[36].mxu0  ;;  %v777_v2 = vpop.f32.mrb[36].mxu1 }
 0x141   :  { %1170 = vst.msk [vmem:[%s2179_s3 + $0x44] sm:$0xf] %vm1152_vm1, %v1408_v63  ;;  %1202 = vst.msk [vmem:[%s2179_s3 + $0xc4] sm:$0xf] %vm1152_vm1, %v1440_v0  ;;  %v650_v3 = vadd.f32 %v1854_v10, %v649_v1  ;;  %v778_v4 = vadd.f32 %v1854_v10, %v777_v2  ;;  %v651_v5 = vpop.f32.mrb[37].mxu0  ;;  %v779_v6 = vpop.f32.mrb[37].mxu1 }
 0x142   :  { %v652_v7 = vpop.f32.mrb[38].mxu0  ;;  %v780_v8 = vpop.f32.mrb[38].mxu1 }
 0x143   :  { %v850_v9 = vmax.f32 %v650_v3, 0.0  ;;  %v882_v11 = vmax.f32 %v778_v4, 0.0  ;;  %v653_v12 = vadd.f32 %v1854_v10, %v652_v7  ;;  %v781_v13 = vadd.f32 %v1854_v10, %v780_v8  ;;  %v654_v14 = vpop.f32.mrb[39].mxu0  ;;  %v782_v15 = vpop.f32.mrb[39].mxu1 }
 0x145   :  { %v1409_v16 = vpack.c.bf16 %v850_v9, %v850_v9  ;;  %v1441_v17 = vpack.c.bf16 %v882_v11, %v882_v11  ;;  %v851_v18 = vmax.f32 %v653_v12, 0.0  ;;  %v883_v19 = vmax.f32 %v781_v13, 0.0 }
 0x147   :  { %1171 = vst.msk [vmem:[%s2179_s3 + $0x48] sm:$0xf] %vm1152_vm1, %v1409_v16  ;;  %1203 = vst.msk [vmem:[%s2179_s3 + $0xc8] sm:$0xf] %vm1152_vm1, %v1441_v17  ;;  %v1410_v20 = vpack.c.bf16 %v851_v18, %v851_v18  ;;  %v1442_v21 = vpack.c.bf16 %v883_v19, %v883_v19 }
 0x148   :  { %v657_v22 = vpop.f32.mrb[40].mxu0  ;;  %v785_v23 = vpop.f32.mrb[40].mxu1 }
 0x149   :  { %1172 = vst.msk [vmem:[%s2179_s3 + $0x4c] sm:$0xf] %vm1152_vm1, %v1410_v20  ;;  %1204 = vst.msk [vmem:[%s2179_s3 + $0xcc] sm:$0xf] %vm1152_vm1, %v1442_v21  ;;  %v658_v24 = vadd.f32 %v1854_v10, %v657_v22  ;;  %v786_v25 = vadd.f32 %v1854_v10, %v785_v23  ;;  %v659_v26 = vpop.f32.mrb[41].mxu0  ;;  %v787_v27 = vpop.f32.mrb[41].mxu1 }
 0x14a   :  { %v660_v28 = vpop.f32.mrb[42].mxu0  ;;  %v788_v29 = vpop.f32.mrb[42].mxu1 }
 0x14b   :  { %v852_v30 = vmax.f32 %v658_v24, 0.0  ;;  %v884_v31 = vmax.f32 %v786_v25, 0.0  ;;  %v661_v32 = vadd.f32 %v1854_v10, %v660_v28  ;;  %v789_v33 = vadd.f32 %v1854_v10, %v788_v29  ;;  %v662_v34 = vpop.f32.mrb[43].mxu0  ;;  %v790_v35 = vpop.f32.mrb[43].mxu1 }
 0x14d   :  { %v1411_v36 = vpack.c.bf16 %v852_v30, %v852_v30  ;;  %v1443_v37 = vpack.c.bf16 %v884_v31, %v884_v31  ;;  %v853_v38 = vmax.f32 %v661_v32, 0.0  ;;  %v885_v39 = vmax.f32 %v789_v33, 0.0 }
 0x14f   :  { %1173 = vst.msk [vmem:[%s2179_s3 + $0x50] sm:$0xf] %vm1152_vm1, %v1411_v36  ;;  %1205 = vst.msk [vmem:[%s2179_s3 + $0xd0] sm:$0xf] %vm1152_vm1, %v1443_v37  ;;  %v1412_v40 = vpack.c.bf16 %v853_v38, %v853_v38  ;;  %v1444_v41 = vpack.c.bf16 %v885_v39, %v885_v39 }
 0x150   :  { %v665_v42 = vpop.f32.mrb[44].mxu0  ;;  %v793_v43 = vpop.f32.mrb[44].mxu1 }
 0x151   :  { %1174 = vst.msk [vmem:[%s2179_s3 + $0x54] sm:$0xf] %vm1152_vm1, %v1412_v40  ;;  %1206 = vst.msk [vmem:[%s2179_s3 + $0xd4] sm:$0xf] %vm1152_vm1, %v1444_v41  ;;  %v666_v44 = vadd.f32 %v1854_v10, %v665_v42  ;;  %v794_v45 = vadd.f32 %v1854_v10, %v793_v43  ;;  %v667_v46 = vpop.f32.mrb[45].mxu0  ;;  %v795_v47 = vpop.f32.mrb[45].mxu1 }
 0x152   :  { %v668_v48 = vpop.f32.mrb[46].mxu0  ;;  %v796_v49 = vpop.f32.mrb[46].mxu1 }
 0x153   :  { %v854_v50 = vmax.f32 %v666_v44, 0.0  ;;  %v886_v51 = vmax.f32 %v794_v45, 0.0  ;;  %v669_v52 = vadd.f32 %v1854_v10, %v668_v48  ;;  %v797_v53 = vadd.f32 %v1854_v10, %v796_v49  ;;  %v670_v54 = vpop.f32.mrb[47].mxu0  ;;  %v798_v55 = vpop.f32.mrb[47].mxu1 }
 0x155   :  { %v1413_v56 = vpack.c.bf16 %v854_v50, %v854_v50  ;;  %v1445_v57 = vpack.c.bf16 %v886_v51, %v886_v51  ;;  %v855_v58 = vmax.f32 %v669_v52, 0.0  ;;  %v887_v59 = vmax.f32 %v797_v53, 0.0 }
 0x157   :  { %1175 = vst.msk [vmem:[%s2179_s3 + $0x58] sm:$0xf] %vm1152_vm1, %v1413_v56  ;;  %1207 = vst.msk [vmem:[%s2179_s3 + $0xd8] sm:$0xf] %vm1152_vm1, %v1445_v57  ;;  %v1414_v60 = vpack.c.bf16 %v855_v58, %v855_v58  ;;  %v1446_v61 = vpack.c.bf16 %v887_v59, %v887_v59 }
 0x158   :  { %v673_v62 = vpop.f32.mrb[48].mxu0  ;;  %v801_v63 = vpop.f32.mrb[48].mxu1 }
 0x159   :  { %1176 = vst.msk [vmem:[%s2179_s3 + $0x5c] sm:$0xf] %vm1152_vm1, %v1414_v60  ;;  %1208 = vst.msk [vmem:[%s2179_s3 + $0xdc] sm:$0xf] %vm1152_vm1, %v1446_v61  ;;  %v674_v0 = vadd.f32 %v1854_v10, %v673_v62  ;;  %v802_v1 = vadd.f32 %v1854_v10, %v801_v63  ;;  %v675_v2 = vpop.f32.mrb[49].mxu0  ;;  %v803_v3 = vpop.f32.mrb[49].mxu1 }
 0x15a   :  { %v676_v4 = vpop.f32.mrb[50].mxu0  ;;  %v804_v5 = vpop.f32.mrb[50].mxu1 }
 0x15b   :  { %v856_v6 = vmax.f32 %v674_v0, 0.0  ;;  %v888_v7 = vmax.f32 %v802_v1, 0.0  ;;  %v677_v8 = vadd.f32 %v1854_v10, %v676_v4  ;;  %v805_v9 = vadd.f32 %v1854_v10, %v804_v5  ;;  %v678_v11 = vpop.f32.mrb[51].mxu0  ;;  %v806_v12 = vpop.f32.mrb[51].mxu1 }
 0x15d   :  { %v1415_v13 = vpack.c.bf16 %v856_v6, %v856_v6  ;;  %v1447_v14 = vpack.c.bf16 %v888_v7, %v888_v7  ;;  %v857_v15 = vmax.f32 %v677_v8, 0.0  ;;  %v889_v16 = vmax.f32 %v805_v9, 0.0 }
 0x15f   :  { %1177 = vst.msk [vmem:[%s2179_s3 + $0x60] sm:$0xf] %vm1152_vm1, %v1415_v13  ;;  %1209 = vst.msk [vmem:[%s2179_s3 + $0xe0] sm:$0xf] %vm1152_vm1, %v1447_v14  ;;  %v1416_v17 = vpack.c.bf16 %v857_v15, %v857_v15  ;;  %v1448_v18 = vpack.c.bf16 %v889_v16, %v889_v16 }
 0x160   :  { %v681_v19 = vpop.f32.mrb[52].mxu0  ;;  %v809_v20 = vpop.f32.mrb[52].mxu1 }
 0x161   :  { %1178 = vst.msk [vmem:[%s2179_s3 + $0x64] sm:$0xf] %vm1152_vm1, %v1416_v17  ;;  %1210 = vst.msk [vmem:[%s2179_s3 + $0xe4] sm:$0xf] %vm1152_vm1, %v1448_v18  ;;  %v682_v21 = vadd.f32 %v1854_v10, %v681_v19  ;;  %v810_v22 = vadd.f32 %v1854_v10, %v809_v20  ;;  %v683_v23 = vpop.f32.mrb[53].mxu0  ;;  %v811_v24 = vpop.f32.mrb[53].mxu1 }
 0x162   :  { %v684_v25 = vpop.f32.mrb[54].mxu0  ;;  %v812_v26 = vpop.f32.mrb[54].mxu1 }
 0x163   :  { %v858_v27 = vmax.f32 %v682_v21, 0.0  ;;  %v890_v28 = vmax.f32 %v810_v22, 0.0  ;;  %v685_v29 = vadd.f32 %v1854_v10, %v684_v25  ;;  %v813_v30 = vadd.f32 %v1854_v10, %v812_v26  ;;  %v686_v31 = vpop.f32.mrb[55].mxu0  ;;  %v814_v32 = vpop.f32.mrb[55].mxu1 }
 0x165   :  { %v1417_v33 = vpack.c.bf16 %v858_v27, %v858_v27  ;;  %v1449_v34 = vpack.c.bf16 %v890_v28, %v890_v28  ;;  %v859_v35 = vmax.f32 %v685_v29, 0.0  ;;  %v891_v36 = vmax.f32 %v813_v30, 0.0 }
 0x167   :  { %1179 = vst.msk [vmem:[%s2179_s3 + $0x68] sm:$0xf] %vm1152_vm1, %v1417_v33  ;;  %1211 = vst.msk [vmem:[%s2179_s3 + $0xe8] sm:$0xf] %vm1152_vm1, %v1449_v34  ;;  %v1418_v37 = vpack.c.bf16 %v859_v35, %v859_v35  ;;  %v1450_v38 = vpack.c.bf16 %v891_v36, %v891_v36 }
 0x168   :  { %v689_v39 = vpop.f32.mrb[56].mxu0  ;;  %v817_v40 = vpop.f32.mrb[56].mxu1 }
 0x169   :  { %1180 = vst.msk [vmem:[%s2179_s3 + $0x6c] sm:$0xf] %vm1152_vm1, %v1418_v37  ;;  %1212 = vst.msk [vmem:[%s2179_s3 + $0xec] sm:$0xf] %vm1152_vm1, %v1450_v38  ;;  %v690_v41 = vadd.f32 %v1854_v10, %v689_v39  ;;  %v818_v42 = vadd.f32 %v1854_v10, %v817_v40  ;;  %v691_v43 = vpop.f32.mrb[57].mxu0  ;;  %v819_v44 = vpop.f32.mrb[57].mxu1 }
 0x16a   :  { %v692_v45 = vpop.f32.mrb[58].mxu0  ;;  %v820_v46 = vpop.f32.mrb[58].mxu1 }
 0x16b   :  { %v860_v47 = vmax.f32 %v690_v41, 0.0  ;;  %v892_v48 = vmax.f32 %v818_v42, 0.0  ;;  %v693_v49 = vadd.f32 %v1854_v10, %v692_v45  ;;  %v821_v50 = vadd.f32 %v1854_v10, %v820_v46  ;;  %v694_v51 = vpop.f32.mrb[59].mxu0  ;;  %v822_v52 = vpop.f32.mrb[59].mxu1 }
 0x16d   :  { %v1419_v53 = vpack.c.bf16 %v860_v47, %v860_v47  ;;  %v1451_v54 = vpack.c.bf16 %v892_v48, %v892_v48  ;;  %v861_v55 = vmax.f32 %v693_v49, 0.0  ;;  %v893_v56 = vmax.f32 %v821_v50, 0.0 }
 0x16f   :  { %1181 = vst.msk [vmem:[%s2179_s3 + $0x70] sm:$0xf] %vm1152_vm1, %v1419_v53  ;;  %1213 = vst.msk [vmem:[%s2179_s3 + $0xf0] sm:$0xf] %vm1152_vm1, %v1451_v54  ;;  %v1420_v57 = vpack.c.bf16 %v861_v55, %v861_v55  ;;  %v1452_v58 = vpack.c.bf16 %v893_v56, %v893_v56 }
 0x170   :  { %v697_v59 = vpop.f32.mrb[60].mxu0  ;;  %v825_v60 = vpop.f32.mrb[60].mxu1 }
 0x171   :  { %1182 = vst.msk [vmem:[%s2179_s3 + $0x74] sm:$0xf] %vm1152_vm1, %v1420_v57  ;;  %1214 = vst.msk [vmem:[%s2179_s3 + $0xf4] sm:$0xf] %vm1152_vm1, %v1452_v58  ;;  %v698_v61 = vadd.f32 %v1854_v10, %v697_v59  ;;  %v826_v62 = vadd.f32 %v1854_v10, %v825_v60  ;;  %v699_v63 = vpop.f32.mrb[61].mxu0  ;;  %v827_v0 = vpop.f32.mrb[61].mxu1 }
 0x172   :  { %v700_v1 = vpop.f32.mrb[62].mxu0  ;;  %v828_v2 = vpop.f32.mrb[62].mxu1 }
 0x173   :  { %v862_v3 = vmax.f32 %v698_v61, 0.0  ;;  %v894_v4 = vmax.f32 %v826_v62, 0.0  ;;  %v701_v5 = vadd.f32 %v1854_v10, %v700_v1  ;;  %v829_v6 = vadd.f32 %v1854_v10, %v828_v2  ;;  %v702_v7 = vpop.f32.mrb[63].mxu0  ;;  %v830_v8 = vpop.f32.mrb[63].mxu1 }
 0x175   :  { %v1421_v9 = vpack.c.bf16 %v862_v3, %v862_v3  ;;  %v1453_v11 = vpack.c.bf16 %v894_v4, %v894_v4  ;;  %v863_v12 = vmax.f32 %v701_v5, 0.0  ;;  %v895_v13 = vmax.f32 %v829_v6, 0.0 }
 0x177   :  { %1183 = vst.msk [vmem:[%s2179_s3 + $0x78] sm:$0xf] %vm1152_vm1, %v1421_v9  ;;  %1215 = vst.msk [vmem:[%s2179_s3 + $0xf8] sm:$0xf] %vm1152_vm1, %v1453_v11  ;;  %v1422_v14 = vpack.c.bf16 %v863_v12, %v863_v12  ;;  %v1454_v15 = vpack.c.bf16 %v895_v13, %v895_v13 }
 0x179   :  { %1184 = vst.msk [vmem:[%s2179_s3 + $0x7c] sm:$0xf] %vm1152_vm1, %v1422_v14  ;;  %1216 = vst.msk [vmem:[%s2179_s3 + $0xfc] sm:$0xf] %vm1152_vm1, %v1454_v15 }

// kernel: vgg16_relu7.25
= control target key start
LH: loop header
LB: loop body
LE: loop exit
PB: predicated region body
PF: predicated region fallthrough
CT: control target
= control target key end

     0   :  { %s158_s22 = smov 112   ;;  %vm136_vm0 = vcmask 125952   ;;  %s369_s0 = inlined_call_operand.vmem [shape: bf16[16,2,8,32], index: 0, kind: input, shape index: {}]   ;;  %s370_s1 = inlined_call_operand.vmem [shape: bf16[16,8,16], index: 1, kind: output, shape index: {}]  }
   0x1   :  { %v12_v0 = vld [vmem:[%s369_s0 + $0x10] sm:$0xf]  ;;  %v13_v1 = vld [vmem:[%s369_s0 + $0x14] sm:$0xf]  ;;  %v8_v2 = vld [vmem:[%s369_s0] sm:$0xf] }
   0x2   :  { %v178_v3 = vmax.bf16 %v13_v1, %v12_v0  ;;  %v9_v4 = vld [vmem:[%s369_s0 + $0x4] sm:$0xf]  ;;  %v14_v5 = vld [vmem:[%s369_s0 + $0x18] sm:$0xf]  ;;  %v15_v6 = vld [vmem:[%s369_s0 + $0x1c] sm:$0xf] }
   0x3   :  { %v189_v7 = vmax.bf16 %v9_v4, %v8_v2  ;;  %v10_v8 = vld [vmem:[%s369_s0 + $0x8] sm:$0xf]  ;;  %v11_v9 = vld [vmem:[%s369_s0 + $0xc] sm:$0xf]  ;;  %v199_v10 = vmax.bf16 %v15_v6, %v14_v5  ;;  %v16_v14 = vld [vmem:[%s369_s0 + $0x20] sm:$0xf] }
   0x4   :  { %76 = vrot.lane.b32.xlu1 %v178_v3, %s158_s22  ;;  %v203_v11 = vmax.bf16 %v11_v9, %v10_v8  ;;  %v18_v12 = vld [vmem:[%s369_s0 + $0x28] sm:$0xf]  ;;  %v19_v13 = vld [vmem:[%s369_s0 + $0x2c] sm:$0xf]  ;;  %v17_v15 = vld [vmem:[%s369_s0 + $0x24] sm:$0xf] }
   0x5   :  { %72 = vrot.lane.b32.xlu0 %v189_v7, %s158_s22  ;;  %v219_v16 = vmax.bf16 %v19_v13, %v18_v12  ;;  %v223_v17 = vmax.bf16 %v17_v15, %v16_v14  ;;  %v22_v18 = vld [vmem:[%s369_s0 + $0x38] sm:$0xf]  ;;  %v23_v19 = vld [vmem:[%s369_s0 + $0x3c] sm:$0xf]  ;;  %v20_v20 = vld [vmem:[%s369_s0 + $0x30] sm:$0xf] }
   0x6   :  { %v21_v21 = vld [vmem:[%s369_s0 + $0x34] sm:$0xf]  ;;  %v47_v22 = vmax.bf16 %v23_v19, %v22_v18  ;;  %v26_v24 = vld [vmem:[%s369_s0 + $0x48] sm:$0xf]  ;;  %v27_v25 = vld [vmem:[%s369_s0 + $0x4c] sm:$0xf] }
   0x7   :  { %v46_v23 = vmax.bf16 %v21_v21, %v20_v20  ;;  %v24_v26 = vld [vmem:[%s369_s0 + $0x40] sm:$0xf]  ;;  %v25_v27 = vld [vmem:[%s369_s0 + $0x44] sm:$0xf]  ;;  %v49_v28 = vmax.bf16 %v27_v25, %v26_v24  ;;  %v30_v30 = vld [vmem:[%s369_s0 + $0x58] sm:$0xf] }
   0x8   :  { %78 = vrot.lane.b32.xlu1 %v199_v10, %s158_s22  ;;  %v48_v29 = vmax.bf16 %v25_v27, %v24_v26  ;;  %v31_v31 = vld [vmem:[%s369_s0 + $0x5c] sm:$0xf]  ;;  %v28_v32 = vld [vmem:[%s369_s0 + $0x50] sm:$0xf]  ;;  %v29_v33 = vld [vmem:[%s369_s0 + $0x54] sm:$0xf] }
   0x9   :  { %74 = vrot.lane.b32.xlu0 %v203_v11, %s158_s22  ;;  %v51_v34 = vmax.bf16 %v31_v31, %v30_v30  ;;  %v50_v35 = vmax.bf16 %v29_v33, %v28_v32  ;;  %v34_v36 = vld [vmem:[%s369_s0 + $0x68] sm:$0xf]  ;;  %v35_v37 = vld [vmem:[%s369_s0 + $0x6c] sm:$0xf]  ;;  %v32_v38 = vld [vmem:[%s369_s0 + $0x60] sm:$0xf] }
   0xa   :  { %v33_v39 = vld [vmem:[%s369_s0 + $0x64] sm:$0xf]  ;;  %v53_v40 = vmax.bf16 %v35_v37, %v34_v36  ;;  %v38_v42 = vld [vmem:[%s369_s0 + $0x78] sm:$0xf]  ;;  %v39_v43 = vld [vmem:[%s369_s0 + $0x7c] sm:$0xf] }
   0xb   :  { %v52_v41 = vmax.bf16 %v33_v39, %v32_v38  ;;  %v36_v44 = vld [vmem:[%s369_s0 + $0x70] sm:$0xf]  ;;  %v37_v45 = vld [vmem:[%s369_s0 + $0x74] sm:$0xf]  ;;  %v55_v46 = vmax.bf16 %v39_v43, %v38_v42 }
   0xc   :  { %82 = vrot.lane.b32.xlu1 %v219_v16, %s158_s22  ;;  %v54_v47 = vmax.bf16 %v37_v45, %v36_v44 }
   0xd   :  { %80 = vrot.lane.b32.xlu0 %v223_v17, %s158_s22 }
  0x10   :  { %86 = vrot.lane.b32.xlu1 %v47_v22, %s158_s22 }
  0x11   :  { %84 = vrot.lane.b32.xlu0 %v46_v23, %s158_s22 }
  0x14   :  { %90 = vrot.lane.b32.xlu1 %v49_v28, %s158_s22 }
  0x15   :  { %88 = vrot.lane.b32.xlu0 %v48_v29, %s158_s22 }
  0x18   :  { %94 = vrot.lane.b32.xlu1 %v51_v34, %s158_s22 }
  0x19   :  { %92 = vrot.lane.b32.xlu0 %v50_v35, %s158_s22 }
  0x1c   :  { %98 = vrot.lane.b32.xlu1 %v53_v40, %s158_s22 }
  0x1d   :  { %96 = vrot.lane.b32.xlu0 %v52_v41, %s158_s22 }
  0x20   :  { %102 = vrot.lane.b32.xlu1 %v55_v46, %s158_s22 }
  0x21   :  { %100 = vrot.lane.b32.xlu0 %v54_v47, %s158_s22 }
  0x76   :  { %v77_v48 = vpop.permute.xlu1 %76 }
  0x77   :  { %v122_v49 = vmax.bf16 %v77_v48, %v178_v3  ;;  %v73_v50 = vpop.permute.xlu0 %72 }
  0x78   :  { %v120_v51 = vmax.bf16 %v73_v50, %v189_v7 }
  0x79   :  { %139 = vst.msk [vmem:[%s370_s1 + $0x8] sm:$0xf] %vm136_vm0, %v122_v49 }
  0x7a   :  { %137 = vst.msk [vmem:[%s370_s1] sm:$0xf] %vm136_vm0, %v120_v51  ;;  %v79_v52 = vpop.permute.xlu1 %78 }
  0x7b   :  { %v123_v53 = vmax.bf16 %v79_v52, %v199_v10  ;;  %v75_v54 = vpop.permute.xlu0 %74 }
  0x7c   :  { %v121_v55 = vmax.bf16 %v75_v54, %v203_v11 }
  0x7d   :  { %140 = vst.msk [vmem:[%s370_s1 + $0xc] sm:$0xf] %vm136_vm0, %v123_v53 }
  0x7e   :  { %138 = vst.msk [vmem:[%s370_s1 + $0x4] sm:$0xf] %vm136_vm0, %v121_v55  ;;  %v83_v56 = vpop.permute.xlu1 %82 }
  0x7f   :  { %v125_v57 = vmax.bf16 %v83_v56, %v219_v16  ;;  %v81_v58 = vpop.permute.xlu0 %80 }
  0x80   :  { %v124_v59 = vmax.bf16 %v81_v58, %v223_v17 }
  0x81   :  { %142 = vst.msk [vmem:[%s370_s1 + $0x14] sm:$0xf] %vm136_vm0, %v125_v57 }
  0x82   :  { %141 = vst.msk [vmem:[%s370_s1 + $0x10] sm:$0xf] %vm136_vm0, %v124_v59  ;;  %v87_v60 = vpop.permute.xlu1 %86 }
  0x83   :  { %v127_v61 = vmax.bf16 %v87_v60, %v47_v22  ;;  %v85_v62 = vpop.permute.xlu0 %84 }
  0x84   :  { %v126_v63 = vmax.bf16 %v85_v62, %v46_v23 }
  0x85   :  { %144 = vst.msk [vmem:[%s370_s1 + $0x1c] sm:$0xf] %vm136_vm0, %v127_v61 }
  0x86   :  { %143 = vst.msk [vmem:[%s370_s1 + $0x18] sm:$0xf] %vm136_vm0, %v126_v63  ;;  %v91_v0 = vpop.permute.xlu1 %90 }
  0x87   :  { %v129_v1 = vmax.bf16 %v91_v0, %v49_v28  ;;  %v89_v2 = vpop.permute.xlu0 %88 }
  0x88   :  { %v128_v3 = vmax.bf16 %v89_v2, %v48_v29 }
  0x89   :  { %146 = vst.msk [vmem:[%s370_s1 + $0x24] sm:$0xf] %vm136_vm0, %v129_v1 }
  0x8a   :  { %145 = vst.msk [vmem:[%s370_s1 + $0x20] sm:$0xf] %vm136_vm0, %v128_v3  ;;  %v95_v4 = vpop.permute.xlu1 %94 }
  0x8b   :  { %v131_v5 = vmax.bf16 %v95_v4, %v51_v34  ;;  %v93_v6 = vpop.permute.xlu0 %92 }
  0x8c   :  { %v130_v7 = vmax.bf16 %v93_v6, %v50_v35 }
  0x8d   :  { %148 = vst.msk [vmem:[%s370_s1 + $0x2c] sm:$0xf] %vm136_vm0, %v131_v5 }
  0x8e   :  { %147 = vst.msk [vmem:[%s370_s1 + $0x28] sm:$0xf] %vm136_vm0, %v130_v7  ;;  %v99_v8 = vpop.permute.xlu1 %98 }
  0x8f   :  { %v133_v9 = vmax.bf16 %v99_v8, %v53_v40  ;;  %v97_v10 = vpop.permute.xlu0 %96 }
  0x90   :  { %v132_v11 = vmax.bf16 %v97_v10, %v52_v41 }
  0x91   :  { %150 = vst.msk [vmem:[%s370_s1 + $0x34] sm:$0xf] %vm136_vm0, %v133_v9 }
  0x92   :  { %149 = vst.msk [vmem:[%s370_s1 + $0x30] sm:$0xf] %vm136_vm0, %v132_v11  ;;  %v103_v12 = vpop.permute.xlu1 %102 }
  0x93   :  { %v135_v13 = vmax.bf16 %v103_v12, %v55_v46  ;;  %v101_v14 = vpop.permute.xlu0 %100 }
  0x94   :  { %v134_v15 = vmax.bf16 %v101_v14, %v54_v47 }
  0x95   :  { %152 = vst.msk [vmem:[%s370_s1 + $0x3c] sm:$0xf] %vm136_vm0, %v135_v13 }
  0x96   :  { %151 = vst.msk [vmem:[%s370_s1 + $0x38] sm:$0xf] %vm136_vm0, %v134_v15 }

// kernel: vgg16_relu7.26
= control target key start
LH: loop header
LB: loop body
LE: loop exit
PB: predicated region body
PF: predicated region fallthrough
CT: control target
= control target key end

     0   :  { %v523_v0 = vmov 0   ;;  %vm182_vm0 = vcmask 130048   ;;  %vm384_vm1 = vcmask 257024   ;;  %s712_s1 = inlined_call_operand.vmem [shape: bf16[144,32], index: 1, kind: input, shape index: {}]   ;;  %s713_s0 = inlined_call_operand.vmem [shape: bf16[128,144], index: 0, kind: input, shape index: {}]   ;;  %s714_s2 = inlined_call_operand.vmem [shape: f32[1,32], index: 2, kind: input, shape index: {}]   ;;  %s715_s3 = inlined_call_operand.vmem [shape: bf16[128,32], index: 3, kind: output, shape index: {}]  }
   0x1   :  { %207 = vmatprep.subr.bf16.mxu0 %v523_v0  ;;  %471 = vmatprep.subr.bf16.mxu1 %v523_v0  ;;  %v490_v1 = vld [vmem:[%s712_s1] sm:$0xff]   ;;  %v491_v2 = vld [vmem:[%s712_s1 + $0x8] sm:$0xff]   ;;  %v492_v3 = vld [vmem:[%s712_s1 + $0x10] sm:$0xff]  }
   0x2   :  { %208 = vmatpush1.bf16.msra.mxu0 %v490_v1  ;;  %480 = vmatpush1.bf16.msra.mxu1 %v490_v1  ;;  %v493_v4 = vld [vmem:[%s712_s1 + $0x18] sm:$0xff]   ;;  %v501_v5 = vld [vmem:[%s713_s0 + $0x4] ss:$8 sps:$4 sm:$0xff]   ;;  %v496_v9 = vld [vmem:[%s712_s1 + $0x30] sm:$0xff]  }
   0x3   :  { %209 = vmatprep.subr.bf16.mxu0 %v523_v0  ;;  %472 = vmatprep.subr.bf16.mxu1 %v523_v0  ;;  %v504_v6 = vld [vmem:[%s713_s0 + $0x44] ss:$8 sps:$4 sm:$0xff]   ;;  %v497_v10 = vld [vmem:[%s712_s1 + $0x38] sm:$0xff]   ;;  %v499_v12 = vld [vmem:[%s713_s0] ss:$8 sps:$4 sm:$0xff]  }
   0x4   :  { %431 = vmatprep.mubr.msk.bf16.mxu0 %vm182_vm0, %v501_v5  ;;  %435 = vmatprep.mubr.msk.bf16.mxu1 %vm182_vm0, %v504_v6  ;;  %v494_v7 = vld [vmem:[%s712_s1 + $0x20] sm:$0xff]   ;;  %v495_v8 = vld [vmem:[%s712_s1 + $0x28] sm:$0xff]   ;;  %v505_v14 = vld [vmem:[%s713_s0 + $0x14] ss:$8 sps:$4 sm:$0xff]  }
   0x5   :  { %v498_v11 = vld [vmem:[%s712_s1 + $0x40] sm:$0xff]   ;;  %v507_v15 = vld [vmem:[%s713_s0 + $0x54] ss:$8 sps:$4 sm:$0xff]   ;;  %v509_v16 = vld [vmem:[%s713_s0 + $0x10] ss:$8 sps:$4 sm:$0xff]  }
   0x6   :  { %210 = vmatpush1.bf16.msra.mxu0 %v491_v2  ;;  %481 = vmatpush1.bf16.msra.mxu1 %v491_v2  ;;  %v502_v13 = vld [vmem:[%s713_s0 + $0x40] ss:$8 sps:$4 sm:$0xff]   ;;  %v510_v17 = vld [vmem:[%s713_s0 + $0x50] ss:$8 sps:$4 sm:$0xff]   ;;  %v511_v18 = vld [vmem:[%s713_s0 + $0x24] ss:$8 sps:$4 sm:$0xff]  }
   0x7   :  { %211 = vmatprep.subr.bf16.mxu0 %v523_v0  ;;  %473 = vmatprep.subr.bf16.mxu1 %v523_v0  ;;  %v513_v19 = vld [vmem:[%s713_s0 + $0x64] ss:$8 sps:$4 sm:$0xff]   ;;  %v515_v20 = vld [vmem:[%s713_s0 + $0x20] ss:$8 sps:$4 sm:$0xff]   ;;  %v517_v22 = vld [vmem:[%s713_s0 + $0x34] ss:$8 sps:$4 sm:$0xff]  }
   0x8   :  { %v516_v21 = vld [vmem:[%s713_s0 + $0x60] ss:$8 sps:$4 sm:$0xff]   ;;  %v519_v23 = vld [vmem:[%s713_s0 + $0x74] ss:$8 sps:$4 sm:$0xff]   ;;  %v521_v24 = vld [vmem:[%s713_s0 + $0x30] ss:$8 sps:$4 sm:$0xff]  }
   0x9   :  { %v522_v25 = vld [vmem:[%s713_s0 + $0x70] ss:$8 sps:$4 sm:$0xff]   ;;  %v630_v26 = vld [vmem:[%s714_s2] ss:$0 sm:$0xff] }
   0xa   :  { %212 = vmatpush1.bf16.msra.mxu0 %v492_v3  ;;  %482 = vmatpush1.bf16.msra.mxu1 %v492_v3 }
   0xb   :  { %213 = vmatprep.subr.bf16.mxu0 %v523_v0  ;;  %474 = vmatprep.subr.bf16.mxu1 %v523_v0 }
   0xe   :  { %214 = vmatpush1.bf16.msra.mxu0 %v493_v4  ;;  %483 = vmatpush1.bf16.msra.mxu1 %v493_v4 }
   0xf   :  { %215 = vmatprep.subr.bf16.mxu0 %v523_v0  ;;  %475 = vmatprep.subr.bf16.mxu1 %v523_v0 }
  0x12   :  { %216 = vmatpush1.bf16.msra.mxu0 %v494_v7  ;;  %484 = vmatpush1.bf16.msra.mxu1 %v494_v7 }
  0x13   :  { %217 = vmatprep.subr.bf16.mxu0 %v523_v0  ;;  %476 = vmatprep.subr.bf16.mxu1 %v523_v0 }
  0x16   :  { %218 = vmatpush1.bf16.msra.mxu0 %v495_v8  ;;  %485 = vmatpush1.bf16.msra.mxu1 %v495_v8 }
  0x17   :  { %219 = vmatprep.subr.bf16.mxu0 %v523_v0  ;;  %477 = vmatprep.subr.bf16.mxu1 %v523_v0 }
  0x1a   :  { %220 = vmatpush1.bf16.msra.mxu0 %v496_v9  ;;  %486 = vmatpush1.bf16.msra.mxu1 %v496_v9 }
  0x1b   :  { %221 = vmatprep.subr.bf16.mxu0 %v523_v0  ;;  %478 = vmatprep.subr.bf16.mxu1 %v523_v0 }
  0x1e   :  { %222 = vmatpush1.bf16.msra.mxu0 %v497_v10  ;;  %487 = vmatpush1.bf16.msra.mxu1 %v497_v10 }
  0x1f   :  { %223 = vmatprep.subr.bf16.mxu0 %v523_v0  ;;  %479 = vmatprep.subr.bf16.mxu1 %v523_v0 }
  0x22   :  { %224 = vmatpush1.bf16.msra.mxu0 %v498_v11  ;;  %488 = vmatpush1.bf16.msra.mxu1 %v498_v11 }
  0x25   :  { %240 = vmatmul.mubr.bf16.vlgmr.msra.gmra.mrb[0].mxu0 %v499_v12  ;;  %272 = vmatmul.mubr.bf16.vlgmr.msra.gmra.mrb[0].mxu1 %v502_v13 }
  0x26   :  { %432 = vmatprep.mubr.msk.bf16.mxu0 %vm182_vm0, %v505_v14  ;;  %436 = vmatprep.mubr.msk.bf16.mxu1 %vm182_vm0, %v507_v15 }
  0x2d   :  { %248 = vmatmul.mubr.bf16.gmra.mrb[4].mxu0 %v509_v16  ;;  %280 = vmatmul.mubr.bf16.gmra.mrb[4].mxu1 %v510_v17 }
  0x2e   :  { %433 = vmatprep.mubr.msk.bf16.mxu0 %vm182_vm0, %v511_v18  ;;  %437 = vmatprep.mubr.msk.bf16.mxu1 %vm182_vm0, %v513_v19 }
  0x35   :  { %256 = vmatmul.mubr.bf16.gmra.mrb[8].mxu0 %v515_v20  ;;  %288 = vmatmul.mubr.bf16.gmra.mrb[8].mxu1 %v516_v21 }
  0x36   :  { %434 = vmatprep.mubr.msk.bf16.mxu0 %vm182_vm0, %v517_v22  ;;  %438 = vmatprep.mubr.msk.bf16.mxu1 %vm182_vm0, %v519_v23 }
  0x3d   :  { %264 = vmatmul.mubr.bf16.gmra.mrb[12].mxu0 %v521_v24  ;;  %296 = vmatmul.mubr.bf16.gmra.mrb[12].mxu1 %v522_v25 }
  0xf8   :  { %v241_v27 = vpop.f32.mrb[0].mxu0  ;;  %v273_v28 = vpop.f32.mrb[0].mxu1 }
  0xf9   :  { %v242_v29 = vadd.f32 %v630_v26, %v241_v27  ;;  %v274_v30 = vadd.f32 %v630_v26, %v273_v28  ;;  %v243_v31 = vpop.f32.mrb[1].mxu0  ;;  %v275_v32 = vpop.f32.mrb[1].mxu1 }
  0xfa   :  { %v244_v33 = vpop.f32.mrb[2].mxu0  ;;  %v276_v34 = vpop.f32.mrb[2].mxu1 }
  0xfb   :  { %v304_v35 = vmax.f32 %v242_v29, 0.0  ;;  %v312_v36 = vmax.f32 %v274_v30, 0.0  ;;  %v245_v37 = vadd.f32 %v630_v26, %v244_v33  ;;  %v277_v38 = vadd.f32 %v630_v26, %v276_v34  ;;  %v246_v39 = vpop.f32.mrb[3].mxu0  ;;  %v278_v40 = vpop.f32.mrb[3].mxu1 }
  0xfd   :  { %v455_v41 = vpack.c.bf16 %v304_v35, %v304_v35  ;;  %v463_v42 = vpack.c.bf16 %v312_v36, %v312_v36  ;;  %v305_v43 = vmax.f32 %v245_v37, 0.0  ;;  %v313_v44 = vmax.f32 %v277_v38, 0.0 }
  0xff   :  { %385 = vst.msk [vmem:[%s715_s3] sm:$0xf] %vm384_vm1, %v455_v41  ;;  %393 = vst.msk [vmem:[%s715_s3 + $0x20] sm:$0xf] %vm384_vm1, %v463_v42  ;;  %v456_v45 = vpack.c.bf16 %v305_v43, %v305_v43  ;;  %v464_v46 = vpack.c.bf16 %v313_v44, %v313_v44 }
 0x100   :  { %v249_v47 = vpop.f32.mrb[4].mxu0  ;;  %v281_v48 = vpop.f32.mrb[4].mxu1 }
 0x101   :  { %386 = vst.msk [vmem:[%s715_s3 + $0x4] sm:$0xf] %vm384_vm1, %v456_v45  ;;  %394 = vst.msk [vmem:[%s715_s3 + $0x24] sm:$0xf] %vm384_vm1, %v464_v46  ;;  %v250_v49 = vadd.f32 %v630_v26, %v249_v47  ;;  %v282_v50 = vadd.f32 %v630_v26, %v281_v48  ;;  %v251_v51 = vpop.f32.mrb[5].mxu0  ;;  %v283_v52 = vpop.f32.mrb[5].mxu1 }
 0x102   :  { %v252_v53 = vpop.f32.mrb[6].mxu0  ;;  %v284_v54 = vpop.f32.mrb[6].mxu1 }
 0x103   :  { %v306_v55 = vmax.f32 %v250_v49, 0.0  ;;  %v314_v56 = vmax.f32 %v282_v50, 0.0  ;;  %v253_v57 = vadd.f32 %v630_v26, %v252_v53  ;;  %v285_v58 = vadd.f32 %v630_v26, %v284_v54  ;;  %v254_v59 = vpop.f32.mrb[7].mxu0  ;;  %v286_v60 = vpop.f32.mrb[7].mxu1 }
 0x105   :  { %v457_v61 = vpack.c.bf16 %v306_v55, %v306_v55  ;;  %v465_v62 = vpack.c.bf16 %v314_v56, %v314_v56  ;;  %v307_v63 = vmax.f32 %v253_v57, 0.0  ;;  %v315_v0 = vmax.f32 %v285_v58, 0.0 }
 0x107   :  { %387 = vst.msk [vmem:[%s715_s3 + $0x8] sm:$0xf] %vm384_vm1, %v457_v61  ;;  %395 = vst.msk [vmem:[%s715_s3 + $0x28] sm:$0xf] %vm384_vm1, %v465_v62  ;;  %v458_v1 = vpack.c.bf16 %v307_v63, %v307_v63  ;;  %v466_v2 = vpack.c.bf16 %v315_v0, %v315_v0 }
 0x108   :  { %v257_v3 = vpop.f32.mrb[8].mxu0  ;;  %v289_v4 = vpop.f32.mrb[8].mxu1 }
 0x109   :  { %388 = vst.msk [vmem:[%s715_s3 + $0xc] sm:$0xf] %vm384_vm1, %v458_v1  ;;  %396 = vst.msk [vmem:[%s715_s3 + $0x2c] sm:$0xf] %vm384_vm1, %v466_v2  ;;  %v258_v5 = vadd.f32 %v630_v26, %v257_v3  ;;  %v290_v6 = vadd.f32 %v630_v26, %v289_v4  ;;  %v259_v7 = vpop.f32.mrb[9].mxu0  ;;  %v291_v8 = vpop.f32.mrb[9].mxu1 }
 0x10a   :  { %v260_v9 = vpop.f32.mrb[10].mxu0  ;;  %v292_v10 = vpop.f32.mrb[10].mxu1 }
 0x10b   :  { %v308_v11 = vmax.f32 %v258_v5, 0.0  ;;  %v316_v12 = vmax.f32 %v290_v6, 0.0  ;;  %v261_v13 = vadd.f32 %v630_v26, %v260_v9  ;;  %v293_v14 = vadd.f32 %v630_v26, %v292_v10  ;;  %v262_v15 = vpop.f32.mrb[11].mxu0  ;;  %v294_v16 = vpop.f32.mrb[11].mxu1 }
 0x10d   :  { %v459_v17 = vpack.c.bf16 %v308_v11, %v308_v11  ;;  %v467_v18 = vpack.c.bf16 %v316_v12, %v316_v12  ;;  %v309_v19 = vmax.f32 %v261_v13, 0.0  ;;  %v317_v20 = vmax.f32 %v293_v14, 0.0 }
 0x10f   :  { %389 = vst.msk [vmem:[%s715_s3 + $0x10] sm:$0xf] %vm384_vm1, %v459_v17  ;;  %397 = vst.msk [vmem:[%s715_s3 + $0x30] sm:$0xf] %vm384_vm1, %v467_v18  ;;  %v460_v21 = vpack.c.bf16 %v309_v19, %v309_v19  ;;  %v468_v22 = vpack.c.bf16 %v317_v20, %v317_v20 }
 0x110   :  { %v265_v23 = vpop.f32.mrb[12].mxu0  ;;  %v297_v24 = vpop.f32.mrb[12].mxu1 }
 0x111   :  { %390 = vst.msk [vmem:[%s715_s3 + $0x14] sm:$0xf] %vm384_vm1, %v460_v21  ;;  %398 = vst.msk [vmem:[%s715_s3 + $0x34] sm:$0xf] %vm384_vm1, %v468_v22  ;;  %v266_v25 = vadd.f32 %v630_v26, %v265_v23  ;;  %v298_v27 = vadd.f32 %v630_v26, %v297_v24  ;;  %v267_v28 = vpop.f32.mrb[13].mxu0  ;;  %v299_v29 = vpop.f32.mrb[13].mxu1 }
 0x112   :  { %v268_v30 = vpop.f32.mrb[14].mxu0  ;;  %v300_v31 = vpop.f32.mrb[14].mxu1 }
 0x113   :  { %v310_v32 = vmax.f32 %v266_v25, 0.0  ;;  %v318_v33 = vmax.f32 %v298_v27, 0.0  ;;  %v269_v34 = vadd.f32 %v630_v26, %v268_v30  ;;  %v301_v35 = vadd.f32 %v630_v26, %v300_v31  ;;  %v270_v36 = vpop.f32.mrb[15].mxu0  ;;  %v302_v37 = vpop.f32.mrb[15].mxu1 }
 0x115   :  { %v461_v38 = vpack.c.bf16 %v310_v32, %v310_v32  ;;  %v469_v39 = vpack.c.bf16 %v318_v33, %v318_v33  ;;  %v311_v40 = vmax.f32 %v269_v34, 0.0  ;;  %v319_v41 = vmax.f32 %v301_v35, 0.0 }
 0x117   :  { %391 = vst.msk [vmem:[%s715_s3 + $0x18] sm:$0xf] %vm384_vm1, %v461_v38  ;;  %399 = vst.msk [vmem:[%s715_s3 + $0x38] sm:$0xf] %vm384_vm1, %v469_v39  ;;  %v462_v42 = vpack.c.bf16 %v311_v40, %v311_v40  ;;  %v470_v43 = vpack.c.bf16 %v319_v41, %v319_v41 }
 0x119   :  { %392 = vst.msk [vmem:[%s715_s3 + $0x1c] sm:$0xf] %vm384_vm1, %v462_v42  ;;  %400 = vst.msk [vmem:[%s715_s3 + $0x3c] sm:$0xf] %vm384_vm1, %v470_v43 }

// kernel: vgg16_relu7.27
= control target key start
LH: loop header
LB: loop body
LE: loop exit
PB: predicated region body
PF: predicated region fallthrough
CT: control target
= control target key end

     0   :  { %vm318_vm0 = vcmask 261120   ;;  %vm617_vm1 = vcmask 257024   ;;  %s1132_s1 = inlined_call_operand.vmem [shape: bf16[288,32], index: 1, kind: input, shape index: {}]   ;;  %s1133_s0 = inlined_call_operand.vmem [shape: bf16[128,288], index: 0, kind: input, shape index: {}]   ;;  %s1134_s2 = inlined_call_operand.vmem [shape: f32[1,32], index: 2, kind: input, shape index: {}]   ;;  %s1135_s3 = inlined_call_operand.vmem [shape: bf16[128,32], index: 3, kind: output, shape index: {}]  }
   0x1   :  { %v831_v0 = vld [vmem:[%s1132_s1 + $0x40] sm:$0xff]   ;;  %v833_v2 = vld [vmem:[%s1132_s1 + $0x48] sm:$0xff]   ;;  %v835_v4 = vld [vmem:[%s1132_s1 + $0x50] sm:$0xff]  }
   0x2   :  { %v832_v1 = vld [vmem:[%s1132_s1] sm:$0xff]   ;;  %721 = vmatprep.subr.bf16.mxu0 %v831_v0  ;;  %815 = vmatprep.subr.bf16.mxu1 %v831_v0  ;;  %v834_v3 = vld [vmem:[%s1132_s1 + $0x8] sm:$0xff]   ;;  %v836_v5 = vld [vmem:[%s1132_s1 + $0x10] sm:$0xff]  }
   0x3   :  { %722 = vmatpush3.bf16.msra.mxu0 %v832_v1  ;;  %823 = vmatpush3.bf16.msra.mxu1 %v832_v1  ;;  %v837_v6 = vld [vmem:[%s1132_s1 + $0x58] sm:$0xff]   ;;  %v839_v8 = vld [vmem:[%s1132_s1 + $0x60] sm:$0xff]   ;;  %v841_v10 = vld [vmem:[%s1132_s1 + $0x68] sm:$0xff]  }
   0x4   :  { %723 = vmatprep.subr.bf16.mxu0 %v833_v2  ;;  %816 = vmatprep.subr.bf16.mxu1 %v833_v2  ;;  %v838_v7 = vld [vmem:[%s1132_s1 + $0x18] sm:$0xff]   ;;  %v840_v9 = vld [vmem:[%s1132_s1 + $0x20] sm:$0xff]   ;;  %v842_v13 = vld [vmem:[%s1132_s1 + $0x28] sm:$0xff]  }
   0x5   :  { %v849_v11 = vld [vmem:[%s1133_s0 + $0x4] ss:$12 sps:$4 sm:$0xff]   ;;  %v852_v12 = vld [vmem:[%s1133_s0 + $0x94] ss:$12 sps:$4 sm:$0xff]   ;;  %v845_v16 = vld [vmem:[%s1132_s1 + $0x78] sm:$0xff]  }
   0x6   :  { %v843_v14 = vld [vmem:[%s1132_s1 + $0x70] sm:$0xff]   ;;  %375 = vmatprep.mubr.bf16.mxu0 %v849_v11  ;;  %423 = vmatprep.mubr.bf16.mxu1 %v852_v12  ;;  %v846_v17 = vld [vmem:[%s1132_s1 + $0x38] sm:$0xff]   ;;  %v847_v18 = vld [vmem:[%s1133_s0] ss:$12 sps:$4 sm:$0xff]  }
   0x7   :  { %724 = vmatpush3.bf16.msra.mxu0 %v834_v3  ;;  %824 = vmatpush3.bf16.msra.mxu1 %v834_v3  ;;  %v844_v15 = vld [vmem:[%s1132_s1 + $0x30] sm:$0xff]   ;;  %v853_v19 = vld [vmem:[%s1132_s1 + $0x80] sm:$0xff]   ;;  %v854_v21 = vld [vmem:[%s1133_s0 + $0x1c] ss:$12 sps:$4 sm:$0xff]  }
   0x8   :  { %725 = vmatprep.subr.bf16.mxu0 %v835_v4  ;;  %817 = vmatprep.subr.bf16.mxu1 %v835_v4  ;;  %v850_v20 = vld [vmem:[%s1133_s0 + $0x90] ss:$12 sps:$4 sm:$0xff]   ;;  %v856_v22 = vld [vmem:[%s1133_s0 + $0xac] ss:$12 sps:$4 sm:$0xff]   ;;  %v859_v25 = vld [vmem:[%s1133_s0 + $0xa8] ss:$12 sps:$4 sm:$0xff]  }
   0x9   :  { %v860_v23 = vld [vmem:[%s1132_s1 + $0x88] sm:$0xff]   ;;  %v858_v24 = vld [vmem:[%s1133_s0 + $0x18] ss:$12 sps:$4 sm:$0xff]   ;;  %v861_v26 = vld [vmem:[%s1133_s0 + $0x34] ss:$12 sps:$4 sm:$0xff]  }
   0xa   :  { %v863_v27 = vld [vmem:[%s1133_s0 + $0x8] ss:$12 sps:$4 sm:$0xff]   ;;  %v864_v28 = vld [vmem:[%s1133_s0 + $0x30] ss:$12 sps:$4 sm:$0xff]   ;;  %v865_v29 = vld [vmem:[%s1133_s0 + $0x20] ss:$12 sps:$4 sm:$0xff]  }
   0xb   :  { %726 = vmatpush3.bf16.msra.mxu0 %v836_v5  ;;  %825 = vmatpush3.bf16.msra.mxu1 %v836_v5  ;;  %v866_v30 = vld [vmem:[%s1133_s0 + $0x4c] ss:$12 sps:$4 sm:$0xff]   ;;  %v869_v32 = vld [vmem:[%s1133_s0 + $0x48] ss:$12 sps:$4 sm:$0xff]   ;;  %v870_v33 = vld [vmem:[%s1133_s0 + $0x50] ss:$12 sps:$4 sm:$0xff]  }
   0xc   :  { %727 = vmatprep.subr.bf16.mxu0 %v837_v6  ;;  %818 = vmatprep.subr.bf16.mxu1 %v837_v6  ;;  %v868_v31 = vld [vmem:[%s1133_s0 + $0x38] ss:$12 sps:$4 sm:$0xff]   ;;  %v873_v35 = vld [vmem:[%s1133_s0 + $0x68] ss:$12 sps:$4 sm:$0xff]   ;;  %v874_v36 = vld [vmem:[%s1133_s0 + $0x60] ss:$12 sps:$4 sm:$0xff]  }
   0xd   :  { %v871_v34 = vld [vmem:[%s1133_s0 + $0x64] ss:$12 sps:$4 sm:$0xff]   ;;  %v875_v37 = vld [vmem:[%s1133_s0 + $0x80] ss:$12 sps:$4 sm:$0xff]   ;;  %v876_v38 = vld [vmem:[%s1133_s0 + $0x7c] ss:$12 sps:$4 sm:$0xff]  }
   0xe   :  { %v878_v39 = vld [vmem:[%s1133_s0 + $0x98] ss:$12 sps:$4 sm:$0xff]   ;;  %v880_v41 = vld [vmem:[%s1133_s0 + $0xb0] ss:$12 sps:$4 sm:$0xff]   ;;  %v1046_v2 = vld [vmem:[%s1134_s2] ss:$0 sm:$0xff] }
   0xf   :  { %728 = vmatpush3.bf16.msra.mxu0 %v838_v7  ;;  %826 = vmatpush3.bf16.msra.mxu1 %v838_v7  ;;  %v879_v40 = vld [vmem:[%s1133_s0 + $0x78] ss:$12 sps:$4 sm:$0xff]  }
  0x10   :  { %729 = vmatprep.subr.bf16.mxu0 %v839_v8  ;;  %819 = vmatprep.subr.bf16.mxu1 %v839_v8 }
  0x13   :  { %730 = vmatpush3.bf16.msra.mxu0 %v840_v9  ;;  %827 = vmatpush3.bf16.msra.mxu1 %v840_v9 }
  0x14   :  { %731 = vmatprep.subr.bf16.mxu0 %v841_v10  ;;  %820 = vmatprep.subr.bf16.mxu1 %v841_v10 }
  0x17   :  { %732 = vmatpush3.bf16.msra.mxu0 %v842_v13  ;;  %828 = vmatpush3.bf16.msra.mxu1 %v842_v13 }
  0x18   :  { %733 = vmatprep.subr.bf16.mxu0 %v843_v14  ;;  %821 = vmatprep.subr.bf16.mxu1 %v843_v14 }
  0x1b   :  { %734 = vmatpush3.bf16.msra.mxu0 %v844_v15  ;;  %829 = vmatpush3.bf16.msra.mxu1 %v844_v15 }
  0x1c   :  { %735 = vmatprep.subr.bf16.mxu0 %v845_v16  ;;  %822 = vmatprep.subr.bf16.mxu1 %v845_v16 }
  0x1f   :  { %736 = vmatpush3.bf16.msra.mxu0 %v846_v17  ;;  %830 = vmatpush3.bf16.msra.mxu1 %v846_v17 }
  0x20   :  { %795 = vmatprep.subr.bf16.mxu1 %v853_v19 }
  0x22   :  { %376 = vmatmul.mubr.bf16.vlgmr.msra.gmra.mrb[0].mxu0 %v847_v18  ;;  %424 = vmatmul.mubr.bf16.vlgmr.msra.gmra.mrb[0].mxu1 %v850_v20 }
  0x23   :  { %796 = vmatpush3.bf16.msra.mxu1 %v853_v19  ;;  %383 = vmatprep.mubr.bf16.mxu0 %v854_v21 }
  0x24   :  { %431 = vmatprep.mubr.bf16.mxu1 %v856_v22  ;;  %797 = vmatprep.subr.bf16.mxu1 %v860_v23 }
  0x27   :  { %798 = vmatpush3.bf16.msra.mxu1 %v860_v23 }
  0x2a   :  { %384 = vmatmul.mubr.bf16.gmra.mrb[4].mxu0 %v858_v24  ;;  %432 = vmatmul.mubr.bf16.gmra.mrb[4].mxu1 %v859_v25 }
  0x2b   :  { %391 = vmatprep.mubr.bf16.mxu0 %v861_v26  ;;  %799 = vmatprep.mubr.msk.bf16.mxu1 %vm318_vm0, %v863_v27 }
  0x32   :  { %392 = vmatmul.mubr.bf16.gmra.mrb[8].mxu0 %v864_v28  ;;  %800 = vmatmul.mubr.msk.bf16.vlgmr.msra.gmra.mrb[8].mxu1 %vm318_vm0, %v865_v29 }
  0x33   :  { %399 = vmatprep.mubr.bf16.mxu0 %v866_v30  ;;  %803 = vmatprep.mubr.msk.bf16.mxu1 %vm318_vm0, %v868_v31 }
  0x3a   :  { %400 = vmatmul.mubr.bf16.gmra.mrb[12].mxu0 %v869_v32  ;;  %804 = vmatmul.mubr.msk.bf16.gmra.mrb[12].mxu1 %vm318_vm0, %v870_v33 }
  0x3b   :  { %407 = vmatprep.mubr.bf16.mxu0 %v871_v34  ;;  %807 = vmatprep.mubr.msk.bf16.mxu1 %vm318_vm0, %v873_v35 }
  0x42   :  { %408 = vmatmul.mubr.bf16.gmra.mrb[16].mxu0 %v874_v36  ;;  %808 = vmatmul.mubr.msk.bf16.gmra.mrb[16].mxu1 %vm318_vm0, %v875_v37 }
  0x43   :  { %415 = vmatprep.mubr.bf16.mxu0 %v876_v38  ;;  %811 = vmatprep.mubr.msk.bf16.mxu1 %vm318_vm0, %v878_v39 }
  0x4a   :  { %416 = vmatmul.mubr.bf16.gmra.mrb[20].mxu0 %v879_v40  ;;  %812 = vmatmul.mubr.msk.bf16.gmra.mrb[20].mxu1 %vm318_vm0, %v880_v41 }
  0xf5   :  { %v737_v42 = vpop.f32.mrb[0].mxu0  ;;  %v773_v43 = vpop.f32.mrb[0].mxu1 }
  0xf6   :  { %v738_v44 = vpop.f32.mrb[1].mxu0  ;;  %v774_v45 = vpop.f32.mrb[1].mxu1 }
  0xf7   :  { %v739_v46 = vadd.f32 %v738_v44, %v737_v42  ;;  %v740_v47 = vpop.f32.mrb[2].mxu0  ;;  %v1035_v48 = vadd.f32 %v774_v45, %v773_v43  ;;  %v776_v49 = vpop.f32.mrb[2].mxu1 }
  0xf8   :  { %v741_v50 = vpop.f32.mrb[3].mxu0  ;;  %v777_v51 = vpop.f32.mrb[3].mxu1 }
  0xf9   :  { %v742_v52 = vadd.f32 %v741_v50, %v740_v47  ;;  %v1037_v53 = vadd.f32 %v777_v51, %v776_v49  ;;  %v378_v6 = vadd.f32 %v739_v46, %v1046_v2 }
  0xfb   :  { %v381_v15 = vadd.f32 %v742_v52, %v1046_v2 }
  0xfd   :  { %v743_v54 = vpop.f32.mrb[4].mxu0  ;;  %v779_v55 = vpop.f32.mrb[4].mxu1 }
  0xfe   :  { %v744_v56 = vpop.f32.mrb[5].mxu0  ;;  %v780_v57 = vpop.f32.mrb[5].mxu1 }
  0xff   :  { %v745_v58 = vadd.f32 %v744_v56, %v743_v54  ;;  %v746_v59 = vpop.f32.mrb[6].mxu0  ;;  %v1039_v60 = vadd.f32 %v780_v57, %v779_v55  ;;  %v782_v61 = vpop.f32.mrb[6].mxu1 }
 0x100   :  { %v747_v62 = vpop.f32.mrb[7].mxu0  ;;  %v783_v63 = vpop.f32.mrb[7].mxu1 }
 0x101   :  { %v748_v0 = vadd.f32 %v747_v62, %v746_v59  ;;  %v1041_v1 = vadd.f32 %v783_v63, %v782_v61  ;;  %v386_v3 = vadd.f32 %v745_v58, %v1046_v2 }
 0x103   :  { %v389_v10 = vadd.f32 %v748_v0, %v1046_v2 }
 0x105   :  { %v749_v4 = vpop.f32.mrb[8].mxu0  ;;  %v801_v5 = vpop.f32.mrb[8].mxu1 }
 0x106   :  { %v483_v7 = vadd.f32 %v801_v5, %v386_v3  ;;  %v750_v8 = vpop.f32.mrb[9].mxu0  ;;  %v474_v9 = vpop.f32.mrb[9].mxu1 }
 0x107   :  { %v751_v11 = vadd.f32 %v750_v8, %v749_v4  ;;  %v475_v12 = vadd.f32 %v474_v9, %v378_v6  ;;  %v752_v13 = vpop.f32.mrb[10].mxu0  ;;  %v802_v14 = vpop.f32.mrb[10].mxu1  ;;  %v434_v9 = vadd.f32 %v1039_v60, %v1046_v2 }
 0x108   :  { %v539_v16 = vmax.f32 %v483_v7, 0.0  ;;  %v486_v17 = vadd.f32 %v802_v14, %v389_v10  ;;  %v753_v18 = vpop.f32.mrb[11].mxu0  ;;  %v477_v19 = vpop.f32.mrb[11].mxu1  ;;  %v426_v14 = vadd.f32 %v1035_v48, %v1046_v2 }
 0x109   :  { %v537_v20 = vmax.f32 %v475_v12, 0.0  ;;  %v754_v21 = vadd.f32 %v753_v18, %v752_v13  ;;  %v478_v22 = vadd.f32 %v477_v19, %v381_v15  ;;  %v394_v31 = vadd.f32 %v751_v11, %v1046_v2 }
 0x10a   :  { %v707_v23 = vpack.c.bf16 %v539_v16, %v539_v16  ;;  %v540_v24 = vmax.f32 %v486_v17, 0.0  ;;  %v437_v18 = vadd.f32 %v1041_v1, %v1046_v2 }
 0x10b   :  { %v705_v25 = vpack.c.bf16 %v537_v20, %v537_v20  ;;  %v538_v26 = vmax.f32 %v478_v22, 0.0  ;;  %v397_v38 = vadd.f32 %v754_v21, %v1046_v2 }
 0x10c   :  { %620 = vst.msk [vmem:[%s1135_s3 + $0x8] sm:$0xf] %vm617_vm1, %v707_v23  ;;  %v708_v27 = vpack.c.bf16 %v540_v24, %v540_v24 }
 0x10d   :  { %618 = vst.msk [vmem:[%s1135_s3] sm:$0xf] %vm617_vm1, %v705_v25  ;;  %v706_v28 = vpack.c.bf16 %v538_v26, %v538_v26  ;;  %v755_v29 = vpop.f32.mrb[12].mxu0  ;;  %v805_v30 = vpop.f32.mrb[12].mxu1 }
 0x10e   :  { %621 = vst.msk [vmem:[%s1135_s3 + $0xc] sm:$0xf] %vm617_vm1, %v708_v27  ;;  %v756_v32 = vpop.f32.mrb[13].mxu0  ;;  %v490_v33 = vpop.f32.mrb[13].mxu1  ;;  %v429_v27 = vadd.f32 %v1037_v53, %v1046_v2 }
 0x10f   :  { %619 = vst.msk [vmem:[%s1135_s3 + $0x4] sm:$0xf] %vm617_vm1, %v706_v28  ;;  %v757_v34 = vadd.f32 %v756_v32, %v755_v29  ;;  %v491_v35 = vadd.f32 %v490_v33, %v394_v31  ;;  %v758_v36 = vpop.f32.mrb[14].mxu0  ;;  %v806_v37 = vpop.f32.mrb[14].mxu1 }
 0x110   :  { %v759_v39 = vpop.f32.mrb[15].mxu0  ;;  %v493_v40 = vpop.f32.mrb[15].mxu1 }
 0x111   :  { %v402_v41 = vadd.f32 %v757_v34, %v1046_v2  ;;  %v541_v42 = vmax.f32 %v491_v35, 0.0  ;;  %v760_v43 = vadd.f32 %v759_v39, %v758_v36  ;;  %v494_v44 = vadd.f32 %v493_v40, %v397_v38 }
 0x113   :  { %v499_v45 = vadd.f32 %v805_v30, %v402_v41  ;;  %v709_v46 = vpack.c.bf16 %v541_v42, %v541_v42  ;;  %v405_v47 = vadd.f32 %v760_v43, %v1046_v2  ;;  %v542_v49 = vmax.f32 %v494_v44, 0.0 }
 0x115   :  { %v543_v50 = vmax.f32 %v499_v45, 0.0  ;;  %622 = vst.msk [vmem:[%s1135_s3 + $0x10] sm:$0xf] %vm617_vm1, %v709_v46  ;;  %v502_v51 = vadd.f32 %v806_v37, %v405_v47  ;;  %v710_v52 = vpack.c.bf16 %v542_v49, %v542_v49  ;;  %v761_v54 = vpop.f32.mrb[16].mxu0  ;;  %v809_v55 = vpop.f32.mrb[16].mxu1 }
 0x116   :  { %v762_v56 = vpop.f32.mrb[17].mxu0  ;;  %v506_v57 = vpop.f32.mrb[17].mxu1 }
 0x117   :  { %v711_v58 = vpack.c.bf16 %v543_v50, %v543_v50  ;;  %v544_v59 = vmax.f32 %v502_v51, 0.0  ;;  %623 = vst.msk [vmem:[%s1135_s3 + $0x14] sm:$0xf] %vm617_vm1, %v710_v52  ;;  %v763_v61 = vadd.f32 %v762_v56, %v761_v54  ;;  %v764_v62 = vpop.f32.mrb[18].mxu0  ;;  %v810_v63 = vpop.f32.mrb[18].mxu1 }
 0x118   :  { %v765_v0 = vpop.f32.mrb[19].mxu0  ;;  %v509_v3 = vpop.f32.mrb[19].mxu1 }
 0x119   :  { %624 = vst.msk [vmem:[%s1135_s3 + $0x18] sm:$0xf] %vm617_vm1, %v711_v58  ;;  %v712_v4 = vpack.c.bf16 %v544_v59, %v544_v59  ;;  %v410_v5 = vadd.f32 %v763_v61, %v1046_v2  ;;  %v766_v6 = vadd.f32 %v765_v0, %v764_v62 }
 0x11b   :  { %625 = vst.msk [vmem:[%s1135_s3 + $0x1c] sm:$0xf] %vm617_vm1, %v712_v4  ;;  %v507_v7 = vadd.f32 %v506_v57, %v410_v5  ;;  %v413_v8 = vadd.f32 %v766_v6, %v1046_v2 }
 0x11d   :  { %v545_v10 = vmax.f32 %v507_v7, 0.0  ;;  %v510_v11 = vadd.f32 %v509_v3, %v413_v8  ;;  %v767_v12 = vpop.f32.mrb[20].mxu0  ;;  %v813_v13 = vpop.f32.mrb[20].mxu1 }
 0x11e   :  { %v531_v15 = vadd.f32 %v813_v13, %v434_v9  ;;  %v768_v16 = vpop.f32.mrb[21].mxu0  ;;  %v522_v17 = vpop.f32.mrb[21].mxu1 }
 0x11f   :  { %v713_v19 = vpack.c.bf16 %v545_v10, %v545_v10  ;;  %v546_v20 = vmax.f32 %v510_v11, 0.0  ;;  %v769_v21 = vadd.f32 %v768_v16, %v767_v12  ;;  %v523_v22 = vadd.f32 %v522_v17, %v426_v14  ;;  %v770_v23 = vpop.f32.mrb[22].mxu0  ;;  %v814_v24 = vpop.f32.mrb[22].mxu1 }
 0x120   :  { %v551_v60 = vmax.f32 %v531_v15, 0.0  ;;  %v534_v25 = vadd.f32 %v814_v24, %v437_v18  ;;  %v771_v26 = vpop.f32.mrb[23].mxu0  ;;  %v525_v28 = vpop.f32.mrb[23].mxu1 }
 0x121   :  { %626 = vst.msk [vmem:[%s1135_s3 + $0x20] sm:$0xf] %vm617_vm1, %v713_v19  ;;  %v714_v48 = vpack.c.bf16 %v546_v20, %v546_v20  ;;  %v418_v1 = vadd.f32 %v769_v21, %v1046_v2  ;;  %v549_v29 = vmax.f32 %v523_v22, 0.0  ;;  %v772_v30 = vadd.f32 %v771_v26, %v770_v23 }
 0x122   :  { %v719_v31 = vpack.c.bf16 %v551_v60, %v551_v60  ;;  %v552_v32 = vmax.f32 %v534_v25, 0.0  ;;  %v526_v33 = vadd.f32 %v525_v28, %v429_v27 }
 0x123   :  { %627 = vst.msk [vmem:[%s1135_s3 + $0x24] sm:$0xf] %vm617_vm1, %v714_v48  ;;  %v515_v53 = vadd.f32 %v809_v55, %v418_v1  ;;  %v717_v34 = vpack.c.bf16 %v549_v29, %v549_v29  ;;  %v421_v35 = vadd.f32 %v772_v30, %v1046_v2 }
 0x124   :  { %632 = vst.msk [vmem:[%s1135_s3 + $0x38] sm:$0xf] %vm617_vm1, %v719_v31  ;;  %v720_v36 = vpack.c.bf16 %v552_v32, %v552_v32  ;;  %v550_v37 = vmax.f32 %v526_v33, 0.0 }
 0x125   :  { %v547_v38 = vmax.f32 %v515_v53, 0.0  ;;  %630 = vst.msk [vmem:[%s1135_s3 + $0x30] sm:$0xf] %vm617_vm1, %v717_v34  ;;  %v518_v39 = vadd.f32 %v810_v63, %v421_v35 }
 0x126   :  { %633 = vst.msk [vmem:[%s1135_s3 + $0x3c] sm:$0xf] %vm617_vm1, %v720_v36  ;;  %v718_v2 = vpack.c.bf16 %v550_v37, %v550_v37 }
 0x127   :  { %v715_v40 = vpack.c.bf16 %v547_v38, %v547_v38  ;;  %v548_v41 = vmax.f32 %v518_v39, 0.0 }
 0x128   :  { %631 = vst.msk [vmem:[%s1135_s3 + $0x34] sm:$0xf] %vm617_vm1, %v718_v2 }
 0x129   :  { %628 = vst.msk [vmem:[%s1135_s3 + $0x28] sm:$0xf] %vm617_vm1, %v715_v40  ;;  %v716_v42 = vpack.c.bf16 %v548_v41, %v548_v41 }
 0x12b   :  { %629 = vst.msk [vmem:[%s1135_s3 + $0x2c] sm:$0xf] %vm617_vm1, %v716_v42 }

// kernel: vgg16_relu7.29
= control target key start
LH: loop header
LB: loop body
LE: loop exit
PB: predicated region body
PF: predicated region fallthrough
CT: control target
= control target key end

     0   :  { %s86_s22 = smov 96   ;;  %vm72_vm0 = vcmask 254976   ;;  %s177_s0 = inlined_call_operand.vmem [shape: bf16[8,2,4,64], index: 0, kind: input, shape index: {}]   ;;  %s178_s1 = inlined_call_operand.vmem [shape: bf16[8,4,32], index: 1, kind: output, shape index: {}]  }
   0x1   :  { %v12_v0 = vld [vmem:[%s177_s0 + $0x8] sm:$0x3]  ;;  %v13_v1 = vld [vmem:[%s177_s0 + $0xa] sm:$0x3]  ;;  %v8_v2 = vld [vmem:[%s177_s0] sm:$0x3] }
   0x2   :  { %v26_v3 = vmax.bf16 %v13_v1, %v12_v0  ;;  %v9_v4 = vld [vmem:[%s177_s0 + $0x2] sm:$0x3]  ;;  %v14_v5 = vld [vmem:[%s177_s0 + $0xc] sm:$0x3]  ;;  %v15_v6 = vld [vmem:[%s177_s0 + $0xe] sm:$0x3] }
   0x3   :  { %v24_v7 = vmax.bf16 %v9_v4, %v8_v2  ;;  %v10_v8 = vld [vmem:[%s177_s0 + $0x4] sm:$0x3]  ;;  %v11_v9 = vld [vmem:[%s177_s0 + $0x6] sm:$0x3]  ;;  %v27_v10 = vmax.bf16 %v15_v6, %v14_v5  ;;  %v18_v12 = vld [vmem:[%s177_s0 + $0x14] sm:$0x3] }
   0x4   :  { %44 = vrot.lane.b32.xlu1 %v26_v3, %s86_s22  ;;  %v25_v11 = vmax.bf16 %v11_v9, %v10_v8  ;;  %v19_v13 = vld [vmem:[%s177_s0 + $0x16] sm:$0x3]  ;;  %v16_v14 = vld [vmem:[%s177_s0 + $0x10] sm:$0x3]  ;;  %v17_v15 = vld [vmem:[%s177_s0 + $0x12] sm:$0x3] }
   0x5   :  { %40 = vrot.lane.b32.xlu0 %v24_v7, %s86_s22  ;;  %v29_v16 = vmax.bf16 %v19_v13, %v18_v12  ;;  %v28_v17 = vmax.bf16 %v17_v15, %v16_v14  ;;  %v22_v18 = vld [vmem:[%s177_s0 + $0x1c] sm:$0x3]  ;;  %v23_v19 = vld [vmem:[%s177_s0 + $0x1e] sm:$0x3]  ;;  %v20_v20 = vld [vmem:[%s177_s0 + $0x18] sm:$0x3] }
   0x6   :  { %v21_v21 = vld [vmem:[%s177_s0 + $0x1a] sm:$0x3]  ;;  %v31_v22 = vmax.bf16 %v23_v19, %v22_v18 }
   0x7   :  { %v30_v23 = vmax.bf16 %v21_v21, %v20_v20 }
   0x8   :  { %46 = vrot.lane.b32.xlu1 %v27_v10, %s86_s22 }
   0x9   :  { %42 = vrot.lane.b32.xlu0 %v25_v11, %s86_s22 }
   0xc   :  { %50 = vrot.lane.b32.xlu1 %v29_v16, %s86_s22 }
   0xd   :  { %48 = vrot.lane.b32.xlu0 %v28_v17, %s86_s22 }
  0x10   :  { %54 = vrot.lane.b32.xlu1 %v31_v22, %s86_s22 }
  0x11   :  { %52 = vrot.lane.b32.xlu0 %v30_v23, %s86_s22 }
  0x76   :  { %v45_v24 = vpop.permute.xlu1 %44 }
  0x77   :  { %v66_v25 = vmax.bf16 %v45_v24, %v26_v3  ;;  %v41_v26 = vpop.permute.xlu0 %40 }
  0x78   :  { %v64_v27 = vmax.bf16 %v41_v26, %v24_v7 }
  0x79   :  { %75 = vst.msk [vmem:[%s178_s1 + $0x4] sm:$0x3] %vm72_vm0, %v66_v25 }
  0x7a   :  { %73 = vst.msk [vmem:[%s178_s1] sm:$0x3] %vm72_vm0, %v64_v27  ;;  %v47_v28 = vpop.permute.xlu1 %46 }
  0x7b   :  { %v67_v29 = vmax.bf16 %v47_v28, %v27_v10  ;;  %v43_v30 = vpop.permute.xlu0 %42 }
  0x7c   :  { %v65_v31 = vmax.bf16 %v43_v30, %v25_v11 }
  0x7d   :  { %76 = vst.msk [vmem:[%s178_s1 + $0x6] sm:$0x3] %vm72_vm0, %v67_v29 }
  0x7e   :  { %74 = vst.msk [vmem:[%s178_s1 + $0x2] sm:$0x3] %vm72_vm0, %v65_v31  ;;  %v51_v32 = vpop.permute.xlu1 %50 }
  0x7f   :  { %v69_v33 = vmax.bf16 %v51_v32, %v29_v16  ;;  %v49_v34 = vpop.permute.xlu0 %48 }
  0x80   :  { %v68_v35 = vmax.bf16 %v49_v34, %v28_v17 }
  0x81   :  { %78 = vst.msk [vmem:[%s178_s1 + $0xa] sm:$0x3] %vm72_vm0, %v69_v33 }
  0x82   :  { %77 = vst.msk [vmem:[%s178_s1 + $0x8] sm:$0x3] %vm72_vm0, %v68_v35  ;;  %v55_v36 = vpop.permute.xlu1 %54 }
  0x83   :  { %v71_v37 = vmax.bf16 %v55_v36, %v31_v22  ;;  %v53_v38 = vpop.permute.xlu0 %52 }
  0x84   :  { %v70_v39 = vmax.bf16 %v53_v38, %v30_v23 }
  0x85   :  { %80 = vst.msk [vmem:[%s178_s1 + $0xe] sm:$0x3] %vm72_vm0, %v71_v37 }
  0x86   :  { %79 = vst.msk [vmem:[%s178_s1 + $0xc] sm:$0x3] %vm72_vm0, %v70_v39 }

// kernel: vgg16_relu7.30
= control target key start
LH: loop header
LB: loop body
LE: loop exit
PB: predicated region body
PF: predicated region fallthrough
CT: control target
= control target key end

     0   :  { %vm204_vm0 = vcmask 261120   ;;  %vm329_vm1 = vcmask 519168   ;;  %s550_s1 = inlined_call_operand.vmem [shape: bf16[288,64], index: 1, kind: input, shape index: {}]   ;;  %s551_s0 = inlined_call_operand.vmem [shape: bf16[32,288], index: 0, kind: input, shape index: {}]   ;;  %s552_s2 = inlined_call_operand.vmem [shape: f32[1,64], index: 2, kind: input, shape index: {}]   ;;  %s553_s3 = inlined_call_operand.vmem [shape: bf16[32,64], index: 3, kind: output, shape index: {}]  }
   0x1   :  { %v413_v0 = vld [vmem:[%s550_s1 + $0x40] sm:$0xff]   ;;  %v415_v2 = vld [vmem:[%s550_s1 + $0x48] sm:$0xff]   ;;  %v417_v4 = vld [vmem:[%s550_s1 + $0x50] sm:$0xff]  }
   0x2   :  { %v414_v1 = vld [vmem:[%s550_s1] sm:$0xff]   ;;  %373 = vmatprep.subr.bf16.mxu0 %v413_v0  ;;  %v416_v3 = vld [vmem:[%s550_s1 + $0x8] sm:$0xff]   ;;  %v418_v5 = vld [vmem:[%s550_s1 + $0x10] sm:$0xff]  }
   0x3   :  { %374 = vmatpush3.bf16.msra.mxu0 %v414_v1  ;;  %v419_v6 = vld [vmem:[%s550_s1 + $0x58] sm:$0xff]   ;;  %v421_v8 = vld [vmem:[%s550_s1 + $0x60] sm:$0xff]   ;;  %v423_v11 = vld [vmem:[%s550_s1 + $0x68] sm:$0xff]  }
   0x4   :  { %375 = vmatprep.subr.bf16.mxu0 %v415_v2  ;;  %v420_v7 = vld [vmem:[%s550_s1 + $0x18] sm:$0xff]   ;;  %v422_v9 = vld [vmem:[%s550_s1 + $0x20] sm:$0xff]   ;;  %v424_v12 = vld [vmem:[%s550_s1 + $0x28] sm:$0xff]  }
   0x5   :  { %v428_v10 = vld [vmem:[%s550_s1 + $0x80] sm:$0xff]   ;;  %v425_v13 = vld [vmem:[%s550_s1 + $0x70] sm:$0xff]   ;;  %v433_v15 = vld [vmem:[%s550_s1 + $0x88] sm:$0xff]  }
   0x6   :  { %405 = vmatprep.subr.bf16.mxu1 %v428_v10  ;;  %v432_v14 = vld [vmem:[%s551_s0 + $0x4] ss:$12 sps:$4 sm:$0xff]   ;;  %v434_v16 = vld [vmem:[%s551_s0 + $0x8] ss:$12 sps:$4 sm:$0xff]   ;;  %v435_v17 = vld [vmem:[%s551_s0 + $0x20] ss:$12 sps:$4 sm:$0xff]  }
   0x7   :  { %376 = vmatpush3.bf16.msra.mxu0 %v416_v3  ;;  %406 = vmatpush3.bf16.msra.mxu1 %v428_v10  ;;  %v426_v18 = vld [vmem:[%s550_s1 + $0x30] sm:$0xff]   ;;  %v427_v19 = vld [vmem:[%s550_s1 + $0x78] sm:$0xff]   ;;  %v430_v21 = vld [vmem:[%s551_s0] ss:$12 sps:$4 sm:$0xff]  }
   0x8   :  { %377 = vmatprep.subr.bf16.mxu0 %v417_v4  ;;  %243 = vmatprep.mubr.bf16.mxu0 %v432_v14  ;;  %v429_v20 = vld [vmem:[%s550_s1 + $0x38] sm:$0xff]   ;;  %v338_v30 = vld [vmem:[%s552_s2] ss:$0 sm:$0xff] }
   0x9   :  { %407 = vmatprep.subr.bf16.mxu1 %v433_v15  ;;  %409 = vmatprep.mubr.msk.bf16.mxu1 %vm204_vm0, %v434_v16  ;;  %v436_v22 = vld [vmem:[%s551_s0 + $0x1c] ss:$12 sps:$4 sm:$0xff]   ;;  %v438_v23 = vld [vmem:[%s551_s0 + $0x18] ss:$12 sps:$4 sm:$0xff]  }
   0xb   :  { %378 = vmatpush3.bf16.msra.mxu0 %v418_v5  ;;  %408 = vmatpush3.bf16.msra.mxu1 %v433_v15 }
   0xc   :  { %379 = vmatprep.subr.bf16.mxu0 %v419_v6 }
   0xe   :  { %410 = vmatmul.mubr.msk.bf16.vlgmr.msra.gmra.mrb[0].mxu1 %vm204_vm0, %v435_v17 }
   0xf   :  { %380 = vmatpush3.bf16.msra.mxu0 %v420_v7 }
  0x10   :  { %381 = vmatprep.subr.bf16.mxu0 %v421_v8 }
  0x13   :  { %382 = vmatpush3.bf16.msra.mxu0 %v422_v9 }
  0x14   :  { %383 = vmatprep.subr.bf16.mxu0 %v423_v11 }
  0x17   :  { %384 = vmatpush3.bf16.msra.mxu0 %v424_v12 }
  0x18   :  { %385 = vmatprep.subr.bf16.mxu0 %v425_v13 }
  0x1b   :  { %386 = vmatpush3.bf16.msra.mxu0 %v426_v18 }
  0x1c   :  { %387 = vmatprep.subr.bf16.mxu0 %v427_v19 }
  0x1f   :  { %388 = vmatpush3.bf16.msra.mxu0 %v429_v20 }
  0x22   :  { %244 = vmatmul.mubr.bf16.vlgmr.msra.gmra.mrb[0].mxu0 %v430_v21 }
  0x23   :  { %251 = vmatprep.mubr.bf16.mxu0 %v436_v22 }
  0x2a   :  { %252 = vmatmul.mubr.bf16.gmra.mrb[4].mxu0 %v438_v23 }
  0xe1   :  { %v411_v24 = vpop.f32.mrb[0].mxu1 }
  0xe2   :  { %v294_v25 = vpop.f32.mrb[1].mxu1 }
  0xe3   :  { %v412_v26 = vpop.f32.mrb[2].mxu1 }
  0xe4   :  { %v297_v27 = vpop.f32.mrb[3].mxu1 }
  0xf5   :  { %v389_v28 = vpop.f32.mrb[0].mxu0 }
  0xf6   :  { %v390_v29 = vpop.f32.mrb[1].mxu0 }
  0xf7   :  { %v391_v31 = vadd.f32 %v390_v29, %v389_v28  ;;  %v392_v32 = vpop.f32.mrb[2].mxu0 }
  0xf8   :  { %v393_v33 = vpop.f32.mrb[3].mxu0 }
  0xf9   :  { %v394_v34 = vadd.f32 %v393_v33, %v392_v32  ;;  %v246_v35 = vadd.f32 %v391_v31, %v338_v30 }
  0xfb   :  { %v295_v36 = vadd.f32 %v294_v25, %v246_v35  ;;  %v249_v37 = vadd.f32 %v394_v34, %v338_v30 }
  0xfd   :  { %v309_v38 = vmax.f32 %v295_v36, 0.0  ;;  %v298_v39 = vadd.f32 %v297_v27, %v249_v37  ;;  %v395_v40 = vpop.f32.mrb[4].mxu0 }
  0xfe   :  { %v396_v41 = vpop.f32.mrb[5].mxu0 }
  0xff   :  { %v369_v42 = vpack.c.bf16 %v309_v38, %v309_v38  ;;  %v310_v43 = vmax.f32 %v298_v39, 0.0  ;;  %v397_v44 = vadd.f32 %v396_v41, %v395_v40  ;;  %v398_v45 = vpop.f32.mrb[6].mxu0 }
 0x100   :  { %v399_v46 = vpop.f32.mrb[7].mxu0 }
 0x101   :  { %330 = vst.msk [vmem:[%s553_s3] sm:$0xf] %vm329_vm1, %v369_v42  ;;  %v370_v47 = vpack.c.bf16 %v310_v43, %v310_v43  ;;  %v254_v48 = vadd.f32 %v397_v44, %v338_v30  ;;  %v400_v49 = vadd.f32 %v399_v46, %v398_v45 }
 0x103   :  { %331 = vst.msk [vmem:[%s553_s3 + $0x4] sm:$0xf] %vm329_vm1, %v370_v47  ;;  %v303_v50 = vadd.f32 %v411_v24, %v254_v48  ;;  %v257_v51 = vadd.f32 %v400_v49, %v338_v30 }
 0x105   :  { %v311_v52 = vmax.f32 %v303_v50, 0.0  ;;  %v306_v53 = vadd.f32 %v412_v26, %v257_v51 }
 0x107   :  { %v371_v54 = vpack.c.bf16 %v311_v52, %v311_v52  ;;  %v312_v55 = vmax.f32 %v306_v53, 0.0 }
 0x109   :  { %332 = vst.msk [vmem:[%s553_s3 + $0x8] sm:$0xf] %vm329_vm1, %v371_v54  ;;  %v372_v56 = vpack.c.bf16 %v312_v55, %v312_v55 }
 0x10b   :  { %333 = vst.msk [vmem:[%s553_s3 + $0xc] sm:$0xf] %vm329_vm1, %v372_v56 }

// kernel: vgg16_relu7.31
= control target key start
LH: loop header
LB: loop body
LE: loop exit
PB: predicated region body
PF: predicated region fallthrough
CT: control target
= control target key end

     0   :  { %vm372_vm0 = vcmask 523264   ;;  %vm546_vm1 = vcmask 519168   ;;  %s909_s1 = inlined_call_operand.vmem [shape: bf16[576,64], index: 1, kind: input, shape index: {}]   ;;  %s910_s0 = inlined_call_operand.vmem [shape: bf16[32,576], index: 0, kind: input, shape index: {}]   ;;  %s911_s2 = inlined_call_operand.vmem [shape: f32[1,64], index: 2, kind: input, shape index: {}]   ;;  %s912_s3 = inlined_call_operand.vmem [shape: bf16[32,64], index: 3, kind: output, shape index: {}]  }
   0x1   :  { %v686_v0 = vld [vmem:[%s909_s1 + $0x40] sm:$0xff]   ;;  %v690_v4 = vld [vmem:[%s909_s1 + $0x48] sm:$0xff]   ;;  %v694_v8 = vld [vmem:[%s909_s1 + $0x50] sm:$0xff]  }
   0x2   :  { %v687_v1 = vld [vmem:[%s909_s1] sm:$0xff]   ;;  %612 = vmatprep.subr.bf16.mxu0 %v686_v0  ;;  %v691_v5 = vld [vmem:[%s909_s1 + $0x8] sm:$0xff]   ;;  %v695_v9 = vld [vmem:[%s909_s1 + $0x10] sm:$0xff]  }
   0x3   :  { %v688_v2 = vld [vmem:[%s909_s1 + $0xc0] sm:$0xff]   ;;  %613 = vmatpush3.bf16.msra.mxu0 %v687_v1  ;;  %v692_v6 = vld [vmem:[%s909_s1 + $0xc8] sm:$0xff]   ;;  %v696_v10 = vld [vmem:[%s909_s1 + $0xd0] sm:$0xff]  }
   0x4   :  { %v689_v3 = vld [vmem:[%s909_s1 + $0x80] sm:$0xff]   ;;  %640 = vmatprep.subr.bf16.mxu1 %v688_v2  ;;  %614 = vmatprep.subr.bf16.mxu0 %v690_v4  ;;  %v693_v7 = vld [vmem:[%s909_s1 + $0x88] sm:$0xff]   ;;  %v697_v11 = vld [vmem:[%s909_s1 + $0x90] sm:$0xff]  }
   0x5   :  { %641 = vmatpush3.bf16.msra.mxu1 %v689_v3  ;;  %v698_v12 = vld [vmem:[%s909_s1 + $0x58] sm:$0xff]   ;;  %v702_v16 = vld [vmem:[%s909_s1 + $0x60] sm:$0xff]   ;;  %v706_v20 = vld [vmem:[%s909_s1 + $0x68] sm:$0xff]  }
   0x6   :  { %642 = vmatprep.subr.bf16.mxu1 %v692_v6  ;;  %v699_v13 = vld [vmem:[%s909_s1 + $0x18] sm:$0xff]   ;;  %v703_v17 = vld [vmem:[%s909_s1 + $0x20] sm:$0xff]   ;;  %v707_v21 = vld [vmem:[%s909_s1 + $0x28] sm:$0xff]  }
   0x7   :  { %615 = vmatpush3.bf16.msra.mxu0 %v691_v5  ;;  %v700_v14 = vld [vmem:[%s909_s1 + $0xd8] sm:$0xff]   ;;  %v704_v18 = vld [vmem:[%s909_s1 + $0xe0] sm:$0xff]   ;;  %v708_v22 = vld [vmem:[%s909_s1 + $0xe8] sm:$0xff]  }
   0x8   :  { %616 = vmatprep.subr.bf16.mxu0 %v694_v8  ;;  %v701_v15 = vld [vmem:[%s909_s1 + $0x98] sm:$0xff]   ;;  %v705_v19 = vld [vmem:[%s909_s1 + $0xa0] sm:$0xff]   ;;  %v709_v23 = vld [vmem:[%s909_s1 + $0xa8] sm:$0xff]  }
   0x9   :  { %643 = vmatpush3.bf16.msra.mxu1 %v693_v7  ;;  %v710_v24 = vld [vmem:[%s909_s1 + $0x70] sm:$0xff]   ;;  %v714_v28 = vld [vmem:[%s909_s1 + $0x78] sm:$0xff]   ;;  %v721_v34 = vld [vmem:[%s909_s1 + $0x100] sm:$0xff]  }
   0xa   :  { %644 = vmatprep.subr.bf16.mxu1 %v696_v10  ;;  %v711_v25 = vld [vmem:[%s909_s1 + $0x30] sm:$0xff]   ;;  %v715_v29 = vld [vmem:[%s909_s1 + $0x38] sm:$0xff]   ;;  %v724_v36 = vld [vmem:[%s910_s0 + $0xc] ss:$20 sps:$4 sm:$0xff]  }
   0xb   :  { %617 = vmatpush3.bf16.msra.mxu0 %v695_v9  ;;  %v712_v26 = vld [vmem:[%s909_s1 + $0xf0] sm:$0xff]   ;;  %v716_v30 = vld [vmem:[%s909_s1 + $0xf8] sm:$0xff]   ;;  %v725_v37 = vld [vmem:[%s909_s1 + $0x108] sm:$0xff]   ;;  %460 = vmatprep.mubr.bf16.mxu1 %v724_v36 }
   0xc   :  { %618 = vmatprep.subr.bf16.mxu0 %v698_v12  ;;  %v713_v27 = vld [vmem:[%s909_s1 + $0xb0] sm:$0xff]   ;;  %v719_v32 = vld [vmem:[%s910_s0 + $0x4] ss:$20 sps:$4 sm:$0xff]   ;;  %v722_v35 = vld [vmem:[%s910_s0 + $0x8] ss:$20 sps:$4 sm:$0xff]  }
   0xd   :  { %645 = vmatpush3.bf16.msra.mxu1 %v697_v11  ;;  %v717_v31 = vld [vmem:[%s910_s0] ss:$20 sps:$4 sm:$0xff]   ;;  %v720_v33 = vld [vmem:[%s909_s1 + $0xb8] sm:$0xff]   ;;  %411 = vmatprep.mubr.bf16.mxu0 %v719_v32  ;;  %v732_v42 = vld [vmem:[%s910_s0 + $0x30] ss:$20 sps:$4 sm:$0xff]  }
   0xe   :  { %646 = vmatprep.subr.bf16.mxu1 %v700_v14  ;;  %v726_v38 = vld [vmem:[%s910_s0 + $0x2c] ss:$20 sps:$4 sm:$0xff]   ;;  %v728_v39 = vld [vmem:[%s910_s0 + $0x28] ss:$20 sps:$4 sm:$0xff]   ;;  %v729_v40 = vld [vmem:[%s909_s1 + $0x110] sm:$0xff]  }
   0xf   :  { %619 = vmatpush3.bf16.msra.mxu0 %v699_v13  ;;  %v730_v41 = vld [vmem:[%s910_s0 + $0x34] ss:$20 sps:$4 sm:$0xff]   ;;  %v733_v43 = vld [vmem:[%s909_s1 + $0x118] sm:$0xff]   ;;  %v734_v44 = vld [vmem:[%s910_s0 + $0x10] ss:$20 sps:$4 sm:$0xff]  }
  0x10   :  { %620 = vmatprep.subr.bf16.mxu0 %v702_v16  ;;  %v735_v45 = vld [vmem:[%s910_s0 + $0x38] ss:$20 sps:$4 sm:$0xff]   ;;  %v555_v47 = vld [vmem:[%s911_s2] ss:$0 sm:$0xff] }
  0x11   :  { %647 = vmatpush3.bf16.msra.mxu1 %v701_v15 }
  0x12   :  { %648 = vmatprep.subr.bf16.mxu1 %v704_v18 }
  0x13   :  { %621 = vmatpush3.bf16.msra.mxu0 %v703_v17 }
  0x14   :  { %622 = vmatprep.subr.bf16.mxu0 %v706_v20 }
  0x15   :  { %649 = vmatpush3.bf16.msra.mxu1 %v705_v19 }
  0x16   :  { %650 = vmatprep.subr.bf16.mxu1 %v708_v22 }
  0x17   :  { %623 = vmatpush3.bf16.msra.mxu0 %v707_v21 }
  0x18   :  { %624 = vmatprep.subr.bf16.mxu0 %v710_v24 }
  0x19   :  { %651 = vmatpush3.bf16.msra.mxu1 %v709_v23 }
  0x1a   :  { %652 = vmatprep.subr.bf16.mxu1 %v712_v26 }
  0x1b   :  { %625 = vmatpush3.bf16.msra.mxu0 %v711_v25 }
  0x1c   :  { %626 = vmatprep.subr.bf16.mxu0 %v714_v28 }
  0x1d   :  { %653 = vmatpush3.bf16.msra.mxu1 %v713_v27 }
  0x1e   :  { %654 = vmatprep.subr.bf16.mxu1 %v716_v30 }
  0x1f   :  { %627 = vmatpush3.bf16.msra.mxu0 %v715_v29 }
  0x20   :  { %674 = vmatprep.subr.bf16.mxu0 %v721_v34 }
  0x21   :  { %655 = vmatpush3.bf16.msra.mxu1 %v720_v33 }
  0x22   :  { %412 = vmatmul.mubr.bf16.vlgmr.msra.gmra.mrb[0].mxu0 %v717_v31 }
  0x23   :  { %675 = vmatpush3.bf16.msra.mxu0 %v721_v34  ;;  %419 = vmatprep.mubr.bf16.mxu0 %v726_v38 }
  0x24   :  { %461 = vmatmul.mubr.bf16.vlgmr.msra.gmra.mrb[0].mxu1 %v722_v35  ;;  %676 = vmatprep.subr.bf16.mxu0 %v725_v37 }
  0x25   :  { %468 = vmatprep.mubr.bf16.mxu1 %v730_v41 }
  0x27   :  { %677 = vmatpush3.bf16.msra.mxu0 %v725_v37 }
  0x28   :  { %678 = vmatprep.subr.bf16.mxu0 %v729_v40 }
  0x2a   :  { %420 = vmatmul.mubr.bf16.gmra.mrb[4].mxu0 %v728_v39 }
  0x2b   :  { %682 = vmatprep.mubr.msk.bf16.mxu0 %vm372_vm0, %v734_v44  ;;  %679 = vmatpush3.bf16.msra.mxu0 %v729_v40 }
  0x2c   :  { %469 = vmatmul.mubr.bf16.gmra.mrb[4].mxu1 %v732_v42  ;;  %680 = vmatprep.subr.bf16.mxu0 %v733_v43 }
  0x2f   :  { %681 = vmatpush3.bf16.msra.mxu0 %v733_v43 }
  0x32   :  { %683 = vmatmul.mubr.msk.bf16.vlgmr.msra.gmra.mrb[8].mxu0 %vm372_vm0, %v735_v45 }
  0xf5   :  { %v628_v46 = vpop.f32.mrb[0].mxu0 }
  0xf6   :  { %v629_v48 = vpop.f32.mrb[1].mxu0 }
  0xf7   :  { %v630_v49 = vadd.f32 %v629_v48, %v628_v46  ;;  %v631_v50 = vpop.f32.mrb[2].mxu0  ;;  %v656_v51 = vpop.f32.mrb[0].mxu1 }
  0xf8   :  { %v632_v52 = vpop.f32.mrb[3].mxu0  ;;  %v657_v55 = vpop.f32.mrb[1].mxu1 }
  0xf9   :  { %v414_v53 = vadd.f32 %v630_v49, %v555_v47  ;;  %v633_v54 = vadd.f32 %v632_v52, %v631_v50  ;;  %v658_v56 = vadd.f32 %v657_v55, %v656_v51  ;;  %v659_v57 = vpop.f32.mrb[2].mxu1 }
  0xfa   :  { %v660_v59 = vpop.f32.mrb[3].mxu1 }
  0xfb   :  { %v417_v58 = vadd.f32 %v633_v54, %v555_v47  ;;  %v661_v60 = vadd.f32 %v660_v59, %v659_v57  ;;  %v463_v61 = vadd.f32 %v658_v56, %v414_v53 }
  0xfd   :  { %v634_v62 = vpop.f32.mrb[4].mxu0  ;;  %v466_v0 = vadd.f32 %v661_v60, %v417_v58 }
  0xfe   :  { %v635_v63 = vpop.f32.mrb[5].mxu0 }
  0xff   :  { %v636_v1 = vadd.f32 %v635_v63, %v634_v62  ;;  %v637_v2 = vpop.f32.mrb[6].mxu0  ;;  %v662_v3 = vpop.f32.mrb[4].mxu1 }
 0x100   :  { %v638_v4 = vpop.f32.mrb[7].mxu0  ;;  %v663_v7 = vpop.f32.mrb[5].mxu1 }
 0x101   :  { %v422_v5 = vadd.f32 %v636_v1, %v555_v47  ;;  %v639_v6 = vadd.f32 %v638_v4, %v637_v2  ;;  %v664_v8 = vadd.f32 %v663_v7, %v662_v3  ;;  %v665_v9 = vpop.f32.mrb[6].mxu1 }
 0x102   :  { %v666_v11 = vpop.f32.mrb[7].mxu1 }
 0x103   :  { %v425_v10 = vadd.f32 %v639_v6, %v555_v47  ;;  %v667_v12 = vadd.f32 %v666_v11, %v665_v9  ;;  %v471_v13 = vadd.f32 %v664_v8, %v422_v5 }
 0x105   :  { %v684_v14 = vpop.f32.mrb[8].mxu0  ;;  %v474_v15 = vadd.f32 %v667_v12, %v425_v10 }
 0x106   :  { %v520_v16 = vadd.f32 %v684_v14, %v471_v13  ;;  %v511_v17 = vpop.f32.mrb[9].mxu0 }
 0x107   :  { %v512_v18 = vadd.f32 %v511_v17, %v463_v61  ;;  %v685_v19 = vpop.f32.mrb[10].mxu0 }
 0x108   :  { %v528_v20 = vmax.f32 %v520_v16, 0.0  ;;  %v523_v21 = vadd.f32 %v685_v19, %v474_v15  ;;  %v514_v22 = vpop.f32.mrb[11].mxu0 }
 0x109   :  { %v526_v23 = vmax.f32 %v512_v18, 0.0  ;;  %v515_v24 = vadd.f32 %v514_v22, %v466_v0 }
 0x10a   :  { %v610_v25 = vpack.c.bf16 %v528_v20, %v528_v20  ;;  %v529_v26 = vmax.f32 %v523_v21, 0.0 }
 0x10b   :  { %v608_v27 = vpack.c.bf16 %v526_v23, %v526_v23  ;;  %v527_v28 = vmax.f32 %v515_v24, 0.0 }
 0x10c   :  { %549 = vst.msk [vmem:[%s912_s3 + $0x8] sm:$0xf] %vm546_vm1, %v610_v25  ;;  %v611_v29 = vpack.c.bf16 %v529_v26, %v529_v26 }
 0x10d   :  { %547 = vst.msk [vmem:[%s912_s3] sm:$0xf] %vm546_vm1, %v608_v27  ;;  %v609_v30 = vpack.c.bf16 %v527_v28, %v527_v28 }
 0x10e   :  { %550 = vst.msk [vmem:[%s912_s3 + $0xc] sm:$0xf] %vm546_vm1, %v611_v29 }
 0x10f   :  { %548 = vst.msk [vmem:[%s912_s3 + $0x4] sm:$0xf] %vm546_vm1, %v609_v30 }

// kernel: vgg16_relu7.33
= control target key start
LH: loop header
LB: loop body
LE: loop exit
PB: predicated region body
PF: predicated region fallthrough
CT: control target
= control target key end

     0   :  { %s50_s22 = smov 64   ;;  %vm40_vm0 = vcmask 516096   ;;  %s97_s0 = inlined_call_operand.vmem [shape: bf16[4,2,2,128], index: 0, kind: input, shape index: {}]   ;;  %s98_s1 = inlined_call_operand.vmem [shape: bf16[4,2,64], index: 1, kind: output, shape index: {}]  }
   0x1   :  { %v12_v0 = vld [vmem:[%s97_s0 + $0x4] sm:$0x1]  ;;  %v13_v1 = vld [vmem:[%s97_s0 + $0x5] sm:$0x1]  ;;  %v8_v2 = vld [vmem:[%s97_s0] sm:$0x1] }
   0x2   :  { %v18_v3 = vmax.bf16 %v13_v1, %v12_v0  ;;  %v9_v4 = vld [vmem:[%s97_s0 + $0x1] sm:$0x1]  ;;  %v14_v5 = vld [vmem:[%s97_s0 + $0x6] sm:$0x1]  ;;  %v15_v6 = vld [vmem:[%s97_s0 + $0x7] sm:$0x1] }
   0x3   :  { %v16_v7 = vmax.bf16 %v9_v4, %v8_v2  ;;  %v10_v8 = vld [vmem:[%s97_s0 + $0x2] sm:$0x1]  ;;  %v11_v9 = vld [vmem:[%s97_s0 + $0x3] sm:$0x1]  ;;  %v19_v10 = vmax.bf16 %v15_v6, %v14_v5 }
   0x4   :  { %28 = vrot.lane.b32.xlu1 %v18_v3, %s50_s22  ;;  %v17_v11 = vmax.bf16 %v11_v9, %v10_v8 }
   0x5   :  { %24 = vrot.lane.b32.xlu0 %v16_v7, %s50_s22 }
   0x8   :  { %30 = vrot.lane.b32.xlu1 %v19_v10, %s50_s22 }
   0x9   :  { %26 = vrot.lane.b32.xlu0 %v17_v11, %s50_s22 }
  0x76   :  { %v29_v12 = vpop.permute.xlu1 %28 }
  0x77   :  { %v38_v13 = vmax.bf16 %v29_v12, %v18_v3  ;;  %v25_v14 = vpop.permute.xlu0 %24 }
  0x78   :  { %v36_v15 = vmax.bf16 %v25_v14, %v16_v7 }
  0x79   :  { %43 = vst.msk [vmem:[%s98_s1 + $0x2] sm:$0x1] %vm40_vm0, %v38_v13 }
  0x7a   :  { %41 = vst.msk [vmem:[%s98_s1] sm:$0x1] %vm40_vm0, %v36_v15  ;;  %v31_v16 = vpop.permute.xlu1 %30 }
  0x7b   :  { %v39_v17 = vmax.bf16 %v31_v16, %v19_v10  ;;  %v27_v18 = vpop.permute.xlu0 %26 }
  0x7c   :  { %v37_v19 = vmax.bf16 %v27_v18, %v17_v11 }
  0x7d   :  { %44 = vst.msk [vmem:[%s98_s1 + $0x3] sm:$0x1] %vm40_vm0, %v39_v17 }
  0x7e   :  { %42 = vst.msk [vmem:[%s98_s1 + $0x1] sm:$0x1] %vm40_vm0, %v37_v19 }

// kernel: vgg16_relu7.37
= control target key start
LH: loop header
LB: loop body
LE: loop exit
PB: predicated region body
PF: predicated region fallthrough
CT: control target
= control target key end

     0   :  { %s38_s14 = smov 64   ;;  %vm24_vm0 = vcmask 516096   ;;  %vm25_vm1 = vsmask.f32 256  ;;  %s73_s0 = inlined_call_operand.vmem [shape: bf16[2,2,1,128], index: 0, kind: input, shape index: {}]   ;;  %s74_s1 = inlined_call_operand.vmem [shape: bf16[2,1,64], index: 1, kind: output, shape index: {}]  }
   0x1   :  { %v8_v0 = vld [vmem:[%s73_s0] sm:$0x1]  ;;  %v9_v1 = vld [vmem:[%s73_s0 + $0x1] sm:$0x1]  ;;  %v10_v2 = vld [vmem:[%s73_s0 + $0x2] sm:$0x1] }
   0x2   :  { %v12_v3 = vmax.bf16 %v9_v1, %v8_v0  ;;  %v11_v4 = vld [vmem:[%s73_s0 + $0x3] sm:$0x1]  ;;  %vm26_vm2 = vmand %vm24_vm0, %vm25_vm1  ;;  %v27_v6 = vld [vmem:[%s74_s1] sm:$0x1] }
   0x3   :  { %v13_v5 = vmax.bf16 %v11_v4, %v10_v2  ;;  %v30_v10 = vld [vmem:[%s74_s1 + $0x1] sm:$0x1] }
   0x4   :  { %16 = vrot.lane.b32.xlu0 %v12_v3, %s38_s14 }
   0x8   :  { %18 = vrot.lane.b32.xlu0 %v13_v5, %s38_s14 }
  0x76   :  { %v17_v7 = vpop.permute.xlu0 %16 }
  0x77   :  { %v22_v8 = vmax.bf16 %v17_v7, %v12_v3 }
  0x79   :  { %v28_v9 = vsel %vm26_vm2, %v22_v8, %v27_v6 }
  0x7a   :  { %29 = vst [vmem:[%s74_s1] sm:$0x1] %v28_v9  ;;  %v19_v11 = vpop.permute.xlu0 %18 }
  0x7b   :  { %v23_v12 = vmax.bf16 %v19_v11, %v13_v5 }
  0x7d   :  { %v31_v13 = vsel %vm26_vm2, %v23_v12, %v30_v10 }
  0x7e   :  { %32 = vst [vmem:[%s74_s1 + $0x1] sm:$0x1] %v31_v13 }

// kernel: vgg16_relu7.34
= control target key start
LH: loop header
LB: loop body
LE: loop exit
PB: predicated region body
PF: predicated region fallthrough
CT: control target
= control target key end

     0   :  { %v609_v35 = vmov 0.0   ;;  %vm610_vm0 = vmmov 0   ;;  %vm330_vm1 = vcmask 523264   ;;  %vm456_vm2 = vcmask 519168   ;;  %s754_s1 = inlined_call_operand.vmem [shape: bf16[576,64], index: 1, kind: input, shape index: {}]   ;;  %s755_s0 = inlined_call_operand.vmem [shape: bf16[8,576], index: 0, kind: input, shape index: {}]   ;;  %s756_s2 = inlined_call_operand.vmem [shape: f32[1,64], index: 2, kind: input, shape index: {}]   ;;  %s757_s3 = inlined_call_operand.vmem [shape: bf16[8,64], index: 3, kind: output, shape index: {}]  }
   0x1   :  { %v568_v0 = vld [vmem:[%s754_s1 + $0x40] sm:$0xff]   ;;  %v572_v4 = vld [vmem:[%s754_s1 + $0x48] sm:$0xff]   ;;  %v576_v8 = vld [vmem:[%s754_s1 + $0x50] sm:$0xff]  }
   0x2   :  { %v569_v1 = vld [vmem:[%s754_s1] sm:$0xff]   ;;  %505 = vmatprep.subr.bf16.mxu0 %v568_v0  ;;  %v573_v5 = vld [vmem:[%s754_s1 + $0x8] sm:$0xff]   ;;  %v577_v9 = vld [vmem:[%s754_s1 + $0x10] sm:$0xff]  }
   0x3   :  { %v570_v2 = vld [vmem:[%s754_s1 + $0xc0] sm:$0xff]   ;;  %506 = vmatpush3.bf16.msra.mxu0 %v569_v1  ;;  %v574_v6 = vld [vmem:[%s754_s1 + $0xc8] sm:$0xff]   ;;  %v578_v10 = vld [vmem:[%s754_s1 + $0xd0] sm:$0xff]  }
   0x4   :  { %v571_v3 = vld [vmem:[%s754_s1 + $0x80] sm:$0xff]   ;;  %527 = vmatprep.subr.bf16.mxu1 %v570_v2  ;;  %507 = vmatprep.subr.bf16.mxu0 %v572_v4  ;;  %v575_v7 = vld [vmem:[%s754_s1 + $0x88] sm:$0xff]   ;;  %v579_v11 = vld [vmem:[%s754_s1 + $0x90] sm:$0xff]  }
   0x5   :  { %528 = vmatpush3.bf16.msra.mxu1 %v571_v3  ;;  %v580_v12 = vld [vmem:[%s754_s1 + $0x58] sm:$0xff]   ;;  %v584_v16 = vld [vmem:[%s754_s1 + $0x60] sm:$0xff]   ;;  %v588_v20 = vld [vmem:[%s754_s1 + $0x68] sm:$0xff]  }
   0x6   :  { %529 = vmatprep.subr.bf16.mxu1 %v574_v6  ;;  %v581_v13 = vld [vmem:[%s754_s1 + $0x18] sm:$0xff]   ;;  %v585_v17 = vld [vmem:[%s754_s1 + $0x20] sm:$0xff]   ;;  %v589_v21 = vld [vmem:[%s754_s1 + $0x28] sm:$0xff]  }
   0x7   :  { %508 = vmatpush3.bf16.msra.mxu0 %v573_v5  ;;  %v582_v14 = vld [vmem:[%s754_s1 + $0xd8] sm:$0xff]   ;;  %v586_v18 = vld [vmem:[%s754_s1 + $0xe0] sm:$0xff]   ;;  %v590_v22 = vld [vmem:[%s754_s1 + $0xe8] sm:$0xff]  }
   0x8   :  { %509 = vmatprep.subr.bf16.mxu0 %v576_v8  ;;  %v583_v15 = vld [vmem:[%s754_s1 + $0x98] sm:$0xff]   ;;  %v587_v19 = vld [vmem:[%s754_s1 + $0xa0] sm:$0xff]   ;;  %v591_v23 = vld [vmem:[%s754_s1 + $0xa8] sm:$0xff]  }
   0x9   :  { %530 = vmatpush3.bf16.msra.mxu1 %v575_v7  ;;  %v592_v24 = vld [vmem:[%s754_s1 + $0x70] sm:$0xff]   ;;  %v596_v28 = vld [vmem:[%s754_s1 + $0x78] sm:$0xff]   ;;  %v15_v31 = vld [vmem:[%s755_s0] sm:$0xff] }
   0xa   :  { %531 = vmatprep.subr.bf16.mxu1 %v578_v10  ;;  %v593_v25 = vld [vmem:[%s754_s1 + $0x30] sm:$0xff]   ;;  %v597_v29 = vld [vmem:[%s754_s1 + $0x38] sm:$0xff]   ;;  %v463_v32 = vcombine.low %v15_v31, %v15_v31  ;;  %v464_v33 = vcombine.high %v15_v31, %v15_v31  ;;  %v16_v36 = vld [vmem:[%s755_s0 + $0x8] sm:$0xff] }
   0xb   :  { %510 = vmatpush3.bf16.msra.mxu0 %v577_v9  ;;  %v594_v26 = vld [vmem:[%s754_s1 + $0xf0] sm:$0xff]   ;;  %v598_v30 = vld [vmem:[%s754_s1 + $0xf8] sm:$0xff]   ;;  %v465_v37 = vcombine.low %v16_v36, %v16_v36  ;;  %v466_v38 = vcombine.high %v16_v36, %v16_v36  ;;  %v605_v39 = vld [vmem:[%s754_s1 + $0x100] sm:$0xff]  }
   0xc   :  { %511 = vmatprep.subr.bf16.mxu0 %v580_v12  ;;  %v595_v27 = vld [vmem:[%s754_s1 + $0xb0] sm:$0xff]   ;;  %v602_v34 = vld [vmem:[%s754_s1 + $0xb8] sm:$0xff]   ;;  %366 = vmatprep.mubr.bf16.mxu0 %v464_v33  ;;  %v606_v40 = vld [vmem:[%s754_s1 + $0x108] sm:$0xff]  }
   0xd   :  { %532 = vmatpush3.bf16.msra.mxu1 %v579_v11  ;;  %406 = vmatprep.mubr.bf16.mxu1 %v466_v38  ;;  %v607_v41 = vld [vmem:[%s754_s1 + $0x110] sm:$0xff]   ;;  %v608_v42 = vld [vmem:[%s754_s1 + $0x118] sm:$0xff]   ;;  %v462_v45 = vld [vmem:[%s756_s2] ss:$0 sm:$0xff] }
   0xe   :  { %533 = vmatprep.subr.bf16.mxu1 %v582_v14  ;;  %v601_v43 = vld [vmem:[%s755_s0 + $0x10] ss:$0 sps:$4 sm:$0xff]  }
   0xf   :  { %512 = vmatpush3.bf16.msra.mxu0 %v581_v13 }
  0x10   :  { %513 = vmatprep.subr.bf16.mxu0 %v584_v16 }
  0x11   :  { %534 = vmatpush3.bf16.msra.mxu1 %v583_v15 }
  0x12   :  { %535 = vmatprep.subr.bf16.mxu1 %v586_v18 }
  0x13   :  { %514 = vmatpush3.bf16.msra.mxu0 %v585_v17 }
  0x14   :  { %515 = vmatprep.subr.bf16.mxu0 %v588_v20 }
  0x15   :  { %536 = vmatpush3.bf16.msra.mxu1 %v587_v19 }
  0x16   :  { %537 = vmatprep.subr.bf16.mxu1 %v590_v22 }
  0x17   :  { %516 = vmatpush3.bf16.msra.mxu0 %v589_v21 }
  0x18   :  { %517 = vmatprep.subr.bf16.mxu0 %v592_v24 }
  0x19   :  { %538 = vmatpush3.bf16.msra.mxu1 %v591_v23 }
  0x1a   :  { %539 = vmatprep.subr.bf16.mxu1 %v594_v26 }
  0x1b   :  { %518 = vmatpush3.bf16.msra.mxu0 %v593_v25 }
  0x1c   :  { %519 = vmatprep.subr.bf16.mxu0 %v596_v28 }
  0x1d   :  { %540 = vmatpush3.bf16.msra.mxu1 %v595_v27 }
  0x1e   :  { %541 = vmatprep.subr.bf16.mxu1 %v598_v30 }
  0x1f   :  { %520 = vmatpush3.bf16.msra.mxu0 %v597_v29 }
  0x20   :  { %554 = vmatprep.subr.bf16.mxu0 %v609_v35 }
  0x21   :  { %542 = vmatpush3.bf16.msra.mxu1 %v602_v34 }
  0x22   :  { %367 = vmatmul.mubr.bf16.vlgmr.msra.gmra.mrb[0].mxu0 %v463_v32 }
  0x23   :  { %555 = vmatpush3.bf16.msra.mxu0 %v605_v39  ;;  %562 = vmatprep.mubr.msk.bf16.mxu0 %vm610_vm0, %v609_v35 }
  0x24   :  { %407 = vmatmul.mubr.bf16.vlgmr.msra.gmra.mrb[0].mxu1 %v465_v37  ;;  %556 = vmatprep.subr.bf16.mxu0 %v609_v35 }
  0x27   :  { %557 = vmatpush3.bf16.msra.mxu0 %v606_v40 }
  0x28   :  { %558 = vmatprep.subr.bf16.mxu0 %v609_v35 }
  0x2b   :  { %559 = vmatpush3.bf16.msra.mxu0 %v607_v41 }
  0x2c   :  { %560 = vmatprep.subr.bf16.mxu0 %v609_v35 }
  0x2f   :  { %561 = vmatpush3.bf16.msra.mxu0 %v608_v42 }
  0x32   :  { %563 = vmatmul.mubr.msk.bf16.vlgmr.msra.gmra.mrb[4].mxu0 %vm330_vm1, %v601_v43 }
  0xf5   :  { %v521_v44 = vpop.f32.mrb[0].mxu0 }
  0xf6   :  { %v522_v46 = vpop.f32.mrb[1].mxu0 }
  0xf7   :  { %v523_v47 = vadd.f32 %v522_v46, %v521_v44  ;;  %v524_v48 = vpop.f32.mrb[2].mxu0  ;;  %v543_v49 = vpop.f32.mrb[0].mxu1 }
  0xf8   :  { %v525_v50 = vpop.f32.mrb[3].mxu0  ;;  %v544_v51 = vpop.f32.mrb[1].mxu1 }
  0xf9   :  { %v369_v52 = vadd.f32 %v523_v47, %v462_v45  ;;  %v545_v53 = vadd.f32 %v544_v51, %v543_v49  ;;  %v546_v54 = vpop.f32.mrb[2].mxu1 }
  0xfa   :  { %v547_v55 = vpop.f32.mrb[3].mxu1 }
  0xfb   :  { %v409_v56 = vadd.f32 %v545_v53, %v369_v52 }
 0x105   :  { %v448_v57 = vpop.f32.mrb[4].mxu0 }
 0x106   :  { %v449_v58 = vadd.f32 %v448_v57, %v409_v56  ;;  %v564_v59 = vpop.f32.mrb[5].mxu0 }
 0x107   :  { %v451_v60 = vpop.f32.mrb[6].mxu0 }
 0x108   :  { %v454_v61 = vmax.f32 %v449_v58, 0.0  ;;  %v565_v62 = vpop.f32.mrb[7].mxu0 }
 0x10a   :  { %v455_v63 = vpack.c.bf16 %v454_v61, %v454_v61 }
 0x10c   :  { %457 = vst.msk [vmem:[%s757_s3] sm:$0xf] %vm456_vm2, %v455_v63 }

// kernel: vgg16_relu7.38
= control target key start
LH: loop header
LB: loop body
LE: loop exit
PB: predicated region body
PF: predicated region fallthrough
CT: control target
= control target key end

     0   :  { %vm79_vm0 = vcmask 523264   ;;  %v202_v0 = vmov 0.0   ;;  %vm203_vm1 = vmmov 0   ;;  %s266_s1 = inlined_call_operand.vmem [shape: bf16[128,64], index: 1, kind: input, shape index: {}]   ;;  %s267_s0 = inlined_call_operand.vmem [shape: bf16[2,64], index: 0, kind: input, shape index: {}]   ;;  %s268_s2 = inlined_call_operand.vmem [shape: f32[1,128], index: 2, kind: input, shape index: {}]   ;;  %s269_s3 = inlined_call_operand.vmem [shape: f32[2,128], index: 3, kind: output, shape index: {}]  }
   0x1   :  { %172 = vmatprep.subr.bf16.mxu0 %v202_v0  ;;  %v194_v1 = vld [vmem:[%s266_s1] sm:$0xff]   ;;  %188 = vmatprep.mubr.msk.bf16.mxu0 %vm203_vm1, %v202_v0  ;;  %v195_v3 = vld [vmem:[%s266_s1 + $0x8] sm:$0xff]   ;;  %v196_v5 = vld [vmem:[%s266_s1 + $0x10] sm:$0xff]  }
   0x2   :  { %v84_v2 = vsel %vm79_vm0, %v194_v1, 0  ;;  %v87_v4 = vsel %vm79_vm0, %v195_v3, 0  ;;  %v90_v6 = vsel %vm79_vm0, %v196_v5, 0  ;;  %v197_v7 = vld [vmem:[%s266_s1 + $0x18] sm:$0xff]   ;;  %v198_v9 = vld [vmem:[%s266_s1 + $0x20] sm:$0xff]   ;;  %v199_v11 = vld [vmem:[%s266_s1 + $0x28] sm:$0xff]  }
   0x3   :  { %173 = vmatpush3.bf16.xpose.msra.mxu0 %v84_v2  ;;  %v93_v8 = vsel %vm79_vm0, %v197_v7, 0  ;;  %v96_v10 = vsel %vm79_vm0, %v198_v9, 0  ;;  %v99_v12 = vsel %vm79_vm0, %v199_v11, 0  ;;  %v200_v13 = vld [vmem:[%s266_s1 + $0x30] sm:$0xff]   ;;  %v201_v15 = vld [vmem:[%s266_s1 + $0x38] sm:$0xff]  }
   0x4   :  { %174 = vmatprep.subr.bf16.mxu0 %v202_v0  ;;  %v102_v14 = vsel %vm79_vm0, %v200_v13, 0  ;;  %v105_v16 = vsel %vm79_vm0, %v201_v15, 0  ;;  %v15_v17 = vld [vmem:[%s267_s0] sm:$0x1] }
   0x5   :  { %v153_v18 = vld [vmem:[%s268_s2] ss:$0 sm:$0xff] }
   0xb   :  { %175 = vmatpush3.bf16.xpose.msra.mxu0 %v87_v4 }
   0xc   :  { %176 = vmatprep.subr.bf16.mxu0 %v202_v0 }
  0x13   :  { %177 = vmatpush3.bf16.xpose.msra.mxu0 %v90_v6 }
  0x14   :  { %178 = vmatprep.subr.bf16.mxu0 %v202_v0 }
  0x1b   :  { %179 = vmatpush3.bf16.xpose.msra.mxu0 %v93_v8 }
  0x1c   :  { %180 = vmatprep.subr.bf16.mxu0 %v202_v0 }
  0x23   :  { %181 = vmatpush3.bf16.xpose.msra.mxu0 %v96_v10 }
  0x24   :  { %182 = vmatprep.subr.bf16.mxu0 %v202_v0 }
  0x2b   :  { %183 = vmatpush3.bf16.xpose.msra.mxu0 %v99_v12 }
  0x2c   :  { %184 = vmatprep.subr.bf16.mxu0 %v202_v0 }
  0x33   :  { %185 = vmatpush3.bf16.xpose.msra.mxu0 %v102_v14 }
  0x34   :  { %186 = vmatprep.subr.bf16.mxu0 %v202_v0 }
  0x3b   :  { %187 = vmatpush3.bf16.xpose.msra.mxu0 %v105_v16 }
  0x42   :  { %189 = vmatmul.mubr.msk.bf16.vlgmr.msra.gmra.mrb[0].mxu0 %vm79_vm0, %v15_v17 }
 0x115   :  { %v141_v19 = vpop.f32.mrb[0].mxu0 }
 0x116   :  { %v142_v20 = vadd.f32 %v153_v18, %v141_v19  ;;  %v190_v21 = vpop.f32.mrb[1].mxu0 }
 0x117   :  { %v144_v22 = vpop.f32.mrb[2].mxu0 }
 0x118   :  { %v147_v23 = vmax.f32 %v142_v20, 0.0  ;;  %v191_v24 = vpop.f32.mrb[3].mxu0 }
 0x11a   :  { %148 = vst [vmem:[%s269_s3] sm:$0x3] %v147_v23 }

// kernel: vgg16_relu7.39
= control target key start
LH: loop header
LB: loop body
LE: loop exit
PB: predicated region body
PF: predicated region fallthrough
CT: control target
= control target key end

     0   :  { %v217_v1 = vmov 0.0   ;;  %vm218_vm0 = vmmov 0   ;;  %s282_s0 = inlined_call_operand.vmem [shape: bf16[2,128], index: 0, kind: input, shape index: {}]   ;;  %s283_s1 = inlined_call_operand.vmem [shape: bf16[128,128], index: 1, kind: input, shape index: {}]   ;;  %s284_s2 = inlined_call_operand.vmem [shape: f32[1,128], index: 2, kind: input, shape index: {}]   ;;  %s285_s3 = inlined_call_operand.hbm [shape: f32[2,128], index: 3, kind: output, shape index: {}]  }
   0x1   :  { %v185_v0 = vld [vmem:[%s283_s1] sm:$0xff]   ;;  %162 = vmatprep.subr.bf16.mxu0 %v217_v1  ;;  %178 = vmatprep.mubr.msk.bf16.mxu0 %vm218_vm0, %v217_v1  ;;  %v186_v2 = vld [vmem:[%s283_s1 + $0x8] sm:$0xff]  }
   0x2   :  { %163 = vmatpush3.bf16.xpose.msra.mxu0 %v185_v0 }
   0x3   :  { %164 = vmatprep.subr.bf16.mxu0 %v217_v1 }
   0x4   :  { %8 = vsyncpa [#allocation3], 0  ;;  %v187_v3 = vld [vmem:[%s283_s1 + $0x10] sm:$0xff]   ;;  %v188_v4 = vld [vmem:[%s283_s1 + $0x18] sm:$0xff]   ;;  %s219_s5 = smov [#allocation2]  }
   0x5   :  { %v189_v5 = vld [vmem:[%s283_s1 + $0x20] sm:$0xff]   ;;  %v190_v6 = vld [vmem:[%s283_s1 + $0x28] sm:$0xff]   ;;  %v191_v7 = vld [vmem:[%s283_s1 + $0x30] sm:$0xff]   ;;  %s136_s6 = sshll.u32 %s219_s5, 4  ;;  %s137_s6 = int_to_ptr.vmem [resolvable:$true] %s136_s6 }
   0x6   :  { %v192_v8 = vld [vmem:[%s283_s1 + $0x38] sm:$0xff]   ;;  %v16_v9 = vld [vmem:[%s282_s0] sm:$0x1]  ;;  %s193_s1 = scalar_lea.vmem %s137_s6, 32  ;;  %p198_p1 = scmp.lt.s32.totalorder %s137_s6, %s137_s6 }
   0x7   :  { %v144_v10 = vld [vmem:[%s284_s2] ss:$0 sm:$0xff]  ;;  %p194_p0 = scmp.ne.s32.totalorder %s137_s6, %s193_s1  ;;  %p199_p2 = scmp.lt.s32.totalorder %s193_s1, %s193_s1 }
   0x9   :  { %p200_p3 = por %p199_p2, %p198_p1 }
   0xa   :  { %165 = vmatpush3.bf16.xpose.msra.mxu0 %v186_v2 }
   0xb   :  { %166 = vmatprep.subr.bf16.mxu0 %v217_v1  ;;  %p201_p4 = pnand %p200_p3, %p194_p0 }
  0x12   :  { %167 = vmatpush3.bf16.xpose.msra.mxu0 %v187_v3 }
  0x13   :  { %168 = vmatprep.subr.bf16.mxu0 %v217_v1 }
  0x1a   :  { %169 = vmatpush3.bf16.xpose.msra.mxu0 %v188_v4 }
  0x1b   :  { %170 = vmatprep.subr.bf16.mxu0 %v217_v1 }
  0x22   :  { %171 = vmatpush3.bf16.xpose.msra.mxu0 %v189_v5 }
  0x23   :  { %172 = vmatprep.subr.bf16.mxu0 %v217_v1 }
  0x2a   :  { %173 = vmatpush3.bf16.xpose.msra.mxu0 %v190_v6 }
  0x2b   :  { %174 = vmatprep.subr.bf16.mxu0 %v217_v1 }
  0x32   :  { %175 = vmatpush3.bf16.xpose.msra.mxu0 %v191_v7 }
  0x33   :  { %176 = vmatprep.subr.bf16.mxu0 %v217_v1 }
  0x3a   :  { %177 = vmatpush3.bf16.xpose.msra.mxu0 %v192_v8 }
  0x41   :  { %179 = vmatmul.mubr.bf16.vlgmr.msra.gmra.mrb[0].mxu0 %v16_v9 }
 0x114   :  { %v122_v11 = vpop.f32.mrb[0].mxu0 }
 0x115   :  { %v123_v12 = vadd.f32 %v144_v10, %v122_v11  ;;  %v180_v13 = vpop.f32.mrb[1].mxu0 }
 0x116   :  { %v125_v14 = vpop.f32.mrb[2].mxu0 }
 0x117   :  { %v128_v15 = vmax.f32 %v123_v12, 0.0  ;;  %v181_v16 = vpop.f32.mrb[3].mxu0 }
 0x119   :  { %129 = vst [vmem:[#allocation2] sm:$0x3] %v128_v15 }
 0x11a   :  { %204 = shalt.err (!%p201_p4)
}
 0x11b   :  { %s205_s2 = scalar_lea.hbm %s285_s3, 32 }
 0x11c   :  { %p206_p5 = scmp.ne.s32.totalorder %s285_s3, %s205_s2  ;;  %p209_p6 = scmp.lt.u32.totalorder %s205_s2, %s285_s3 }
 0x11e   :  { %p211_p7 = pnand %p209_p6, %p206_p5 }
 0x120   :  { %214 = shalt.err (!%p211_p7)
}
 0x121   :  { %139 = dma.vmem_to_hbm [thread:$0]  %s137_s6, 32, %s285_s3, [#allocation3]  }
 0x122   :  { %215 = dma.done.wait [#allocation3], 32  }
 0x123   :  { %216 = vsyncadd [#allocation3], 4294967264 }
 0x124   :  { %143 = vsyncpa [#allocation3], 1 }

</bundles_post_ra>
